<compile_context>
chip_gen: v7x
topology: tpu7x:2x2x1
jax: 0.10.0
libtpu: 0.0.40
codegen_flags: <defaults>
</compile_context>

<pallas_src>
import functools

import jax
import jax.numpy as jnp
from jax.experimental import pallas as pl
from jax.experimental.pallas import tpu as pltpu


def _round_up(x, m):
    return (x + m - 1) // m * m


def _pick_batch(n, max_b=8):
    # largest B <= max_b dividing n that still leaves a grid of >= 2 steps
    # (keeps both v7x TensorCores busy); falls back to 1.
    best = 1
    for b in range(1, min(n, max_b) + 1):
        if n % b == 0 and n // b >= 2:
            best = b
    return best


# ---------------------------------------------------------------------------
# Fused Block kernel: conv1+BN1+ReLU -> conv2+BN2 -> (+shortcut) -> ReLU
# one grid step == B images; all intermediate activations stay in VMEM.
# ---------------------------------------------------------------------------
def _block_kernel(*refs, taps, sc_tap, identity_sc):
    if identity_sc:
        src_ref, w1_ref, b1_ref, w2_ref, b2_ref, o_ref, ypad_ref = refs
        wsc_ref = None
    else:
        src_ref, w1_ref, b1_ref, w2_ref, wsc_ref, b2_ref, o_ref, ypad_ref = refs

    B, Ho, Wo, Coutp = o_ref.shape
    Cin = src_ref.shape[-1]
    Cout = ypad_ref.shape[-1]
    M = B * Ho * Wo

    # ---- conv1: in-VMEM im2col (M, 9*Cin) -> ONE matmul -> BN1 bias -> ReLU ----
    a1 = jnp.concatenate(
        [src_ref[:, r0:r0 + Ho, c0:c0 + Wo, :].reshape(M, Cin) for r0, c0 in taps],
        axis=-1)
    y1 = jnp.dot(a1, w1_ref[...], preferred_element_type=jnp.float32)
    y1 = jnp.maximum(y1 + b1_ref[...], 0.0)

    # ---- stage y1 (bf16) in VMEM with a zero 1-pixel halo for conv2 ------------
    # border-only zeroing: the interior is fully overwritten every grid step.
    ypad_ref[:, 0:1, :, :] = jnp.zeros((B, 1, Wo + 2, Cout), ypad_ref.dtype)
    ypad_ref[:, Ho + 1:Ho + 2, :, :] = jnp.zeros((B, 1, Wo + 2, Cout), ypad_ref.dtype)
    ypad_ref[:, :, 0:1, :] = jnp.zeros((B, Ho + 2, 1, Cout), ypad_ref.dtype)
    ypad_ref[:, :, Wo + 1:Wo + 2, :] = jnp.zeros((B, Ho + 2, 1, Cout), ypad_ref.dtype)
    ypad_ref[:, 1:Ho + 1, 1:Wo + 1, :] = (
        y1[:, :Cout].reshape(B, Ho, Wo, Cout).astype(ypad_ref.dtype))

    # ---- conv2: in-VMEM im2col (M, 9*Cout) -> ONE matmul (BN2 scale folded) ----
    a2 = jnp.concatenate(
        [ypad_ref[:, kh:kh + Ho, kw:kw + Wo, :].reshape(M, Cout)
         for kh in range(3) for kw in range(3)],
        axis=-1)
    acc = jnp.dot(a2, w2_ref[...], preferred_element_type=jnp.float32)

    # ---- shortcut ---------------------------------------------------------------
    rs, cs = sc_tap
    xs = src_ref[:, rs:rs + Ho, cs:cs + Wo, :].reshape(M, Cin)
    if identity_sc:
        res = xs.astype(jnp.float32)                     # direct VPU add, no matmul
        if Coutp > Cin:
            res = jnp.concatenate(
                [res, jnp.zeros((M, Coutp - Cin), jnp.float32)], axis=-1)
        acc = acc + res
    else:
        acc = acc + jnp.dot(xs, wsc_ref[...], preferred_element_type=jnp.float32)

    # ---- (BN2 + BNsc) bias, post-ReLU, lane-dense bf16 store --------------------
    out = jnp.maximum(acc + b2_ref[...], 0.0)
    o_ref[...] = out.reshape(B, Ho, Wo, Coutp).astype(o_ref.dtype)


# ---------------------------------------------------------------------------
# Plain-JAX glue: BN folding, weight/activation prep, parameter init
# ---------------------------------------------------------------------------
def _bn_fold(gamma, beta, mean, var, eps=1e-5):
    scale = gamma / jnp.sqrt(var + eps)
    bias = beta - mean * scale
    return scale, bias


def block_forward(x_nchw, params, stride, *, out_format="nchw"):
    assert stride in (1, 2)
    N, Cin, H, W = x_nchw.shape
    w1 = params["w1"]
    Cout = w1.shape[0]
    Coutp = _round_up(Cout, 128)                 # lane-dense output channels
    cpad = Coutp - Cout
    s1, b1 = _bn_fold(*params["bn1"])
    s2, b2 = _bn_fold(*params["bn2"])
    identity_sc = (stride == 1 and Cin == Cout)

    # ---- activations: NHWC, spatial zero-pad, bf16 ---------------------------
    x = jnp.transpose(x_nchw, (0, 2, 3, 1))
    xp = jnp.pad(x, ((0, 0), (1, 1), (1, 1), (0, 0)))
    if stride == 1:
        Ho, Wo = H, W
        src = xp.astype(jnp.bfloat16)            # (N, H+2, W+2, Cin)
        taps = [(kh, kw) for kh in range(3) for kw in range(3)]
        sc_tap = (1, 1)                          # shortcut reads x itself
    else:
        assert H % 2 == 0 and W % 2 == 0
        Ho, Wo = H // 2, W // 2
        Hh, Wh = (H + 2) // 2, (W + 2) // 2
        # split the padded input into its 4 row/col parity planes, folded into the
        # row axis, so every stride-2 tap is a contiguous static slice in-kernel.
        src = xp.reshape(N, Hh, 2, Wh, 2, Cin).transpose(0, 2, 4, 1, 3, 5)
        src = src.reshape(N, 4 * Hh, Wh, Cin).astype(jnp.bfloat16)
        taps = [(((kh % 2) * 2 + (kw % 2)) * Hh + kh // 2, kw // 2)
                for kh in range(3) for kw in range(3)]
        sc_tap = (3 * Hh, 0)                     # shortcut reads x[:, ::2, ::2, :]

    # ---- weights: fold BN scales, im2col layout, pad only the output columns --
    W1 = jnp.transpose(w1, (2, 3, 1, 0)).reshape(9 * Cin, Cout) * s1[None, :]
    W1 = jnp.pad(W1, ((0, 0), (0, cpad))).astype(jnp.bfloat16)          # (9*Cin, Coutp)
    b1p = jnp.pad(b1, (0, cpad)).reshape(1, Coutp).astype(jnp.float32)

    W2 = (jnp.transpose(params["w2"], (2, 3, 1, 0)).reshape(9 * Cout, Cout)
          * s2[None, :])
    W2 = jnp.pad(W2, ((0, 0), (0, cpad))).astype(jnp.bfloat16)          # (9*Cout, Coutp)

    if identity_sc:
        Wsc = None
        bsc = jnp.zeros((Cout,), jnp.float32)
    else:
        ssc, bsc = _bn_fold(*params["bn_sc"])
        Wsc = params["w_sc"][:, :, 0, 0].T * ssc[None, :]
        Wsc = jnp.pad(Wsc, ((0, 0), (0, cpad))).astype(jnp.bfloat16)    # (Cin, Coutp)
    b2p = jnp.pad(b2 + bsc, (0, cpad)).reshape(1, Coutp).astype(jnp.float32)

    # ---- grid: B images per step, stacked along the matmul M dimension --------
    B = _pick_batch(N)
    kernel = functools.partial(_block_kernel, taps=tuple(taps), sc_tap=sc_tap,
                               identity_sc=identity_sc)

    in_specs = [pl.BlockSpec((B,) + src.shape[1:], lambda g: (g, 0, 0, 0)),
                pl.BlockSpec(W1.shape, lambda g: (0, 0)),
                pl.BlockSpec(b1p.shape, lambda g: (0, 0)),
                pl.BlockSpec(W2.shape, lambda g: (0, 0))]
    inputs = [src, W1, b1p, W2]
    if not identity_sc:
        in_specs.append(pl.BlockSpec(Wsc.shape, lambda g: (0, 0)))
        inputs.append(Wsc)
    in_specs.append(pl.BlockSpec(b2p.shape, lambda g: (0, 0)))
    inputs.append(b2p)

    out = pl.pallas_call(
        kernel,
        out_shape=jax.ShapeDtypeStruct((N, Ho, Wo, Coutp), jnp.bfloat16),
        grid_spec=pltpu.PrefetchScalarGridSpec(
            num_scalar_prefetch=0,
            grid=(N // B,),
            in_specs=in_specs,
            out_specs=pl.BlockSpec((B, Ho, Wo, Coutp), lambda g: (g, 0, 0, 0)),
            scratch_shapes=[
                pltpu.VMEM((B, Ho + 2, Wo + 2, Cout), jnp.bfloat16),  # conv2 halo
            ],
        ),
        compiler_params=pltpu.CompilerParams(dimension_semantics=("parallel",)),
    )(*inputs)

    if out_format == "nhwc_padded":
        return out                               # bf16, channels padded to Coutp
    # network-boundary conversion only (chained blocks should keep nhwc_padded)
    out = out[..., :Cout].astype(jnp.float32)
    return jnp.transpose(out, (0, 3, 1, 2))      # back to NCHW


def init_block_params(key, inp, outp, stride):
    ks = jax.random.split(key, 16)

    def conv_w(k, cout, cin, ksz):
        fan = cin * ksz * ksz
        return jax.random.normal(k, (cout, cin, ksz, ksz), jnp.float32) * (2.0 / fan) ** 0.5

    def bn_p(k, c):
        k1, k2, k3, k4 = jax.random.split(k, 4)
        gamma = 1.0 + 0.1 * jax.random.normal(k1, (c,), jnp.float32)
        beta = 0.1 * jax.random.normal(k2, (c,), jnp.float32)
        mean = 0.1 * jax.random.normal(k3, (c,), jnp.float32)
        var = 1.0 + 0.1 * jnp.abs(jax.random.normal(k4, (c,), jnp.float32))
        return (gamma, beta, mean, var)

    params = {
        "w1": conv_w(ks[0], outp, inp, 3),
        "bn1": bn_p(ks[1], outp),
        "w2": conv_w(ks[2], outp, outp, 3),
        "bn2": bn_p(ks[3], outp),
    }
    if not (stride == 1 and inp == outp):
        params["w_sc"] = conv_w(ks[4], outp, inp, 1)
        params["bn_sc"] = bn_p(ks[5], outp)
    return params


# ---------------------------------------------------------------------------
# Pure-JAX reference (f32, for verification)
# ---------------------------------------------------------------------------
def block_forward_ref(x, params, stride):
    def conv(x, w, s, pad):
        return jax.lax.conv_general_dilated(
            x, w, (s, s), [(pad, pad), (pad, pad)],
            dimension_numbers=("NCHW", "OIHW", "NCHW"),
            precision=jax.lax.Precision.HIGHEST)

    def bn(x, p):
        s, b = _bn_fold(*p)
        return x * s[None, :, None, None] + b[None, :, None, None]

    inp, outp = params["w1"].shape[1], params["w1"].shape[0]
    y = jnp.maximum(bn(conv(x, params["w1"], stride, 1), params["bn1"]), 0.0)
    y = bn(conv(y, params["w2"], 1, 1), params["bn2"])
    if stride == 1 and inp == outp:
        res = x
    else:
        res = bn(conv(x, params["w_sc"], stride, 0), params["bn_sc"])
    return jnp.maximum(y + res, 0.0)


if __name__ == "__main__":
    key = jax.random.PRNGKey(0)
    kx, kp1, kp2 = jax.random.split(key, 3)
    x = jax.random.normal(kx, (2, 4, 16, 16), jnp.float32)   # NCHW, like PyTorch

    # Tolerance is sized for bf16 MXU operands / bf16-resident activations / bf16
    # output (f32 accumulation) vs. the f32-HIGHEST reference.
    TOL = 5e-2

    # Case 1: identity residual (inp == outp, stride == 1)
    p1 = init_block_params(kp1, 4, 4, 1)
    out1 = jax.block_until_ready(block_forward(x, p1, 1))
    ref1 = block_forward_ref(x, p1, 1)
    assert out1.shape == (2, 4, 16, 16)
    assert jnp.allclose(out1, ref1, rtol=TOL, atol=TOL), float(jnp.max(jnp.abs(out1 - ref1)))

    # Case 2: downsampling block with conv1x1+BN shortcut (stride == 2, channel change)
    p2 = init_block_params(kp2, 4, 8, 2)
    out2 = jax.block_until_ready(block_forward(x, p2, 2))
    ref2 = block_forward_ref(x, p2, 2)
    assert out2.shape == (2, 8, 8, 8)
    assert jnp.allclose(out2, ref2, rtol=TOL, atol=TOL), float(jnp.max(jnp.abs(out2 - ref2)))

    print("KERNEL_OK")
</pallas_src>

<mosaic_0001>
module attributes {stable_mosaic.version = 11 : i64} {
  func.func @_block_kernel(%arg0: i32, %arg1: memref<1x18x18x4xbf16, #tpu.memory_space<vmem>>, %arg2: memref<36x128xbf16, #tpu.memory_space<vmem>>, %arg3: memref<1x128xf32, #tpu.memory_space<vmem>>, %arg4: memref<36x128xbf16, #tpu.memory_space<vmem>>, %arg5: memref<1x128xf32, #tpu.memory_space<vmem>>, %arg6: memref<1x16x16x128xbf16, #tpu.memory_space<vmem>>, %arg7: memref<1x18x18x4xbf16, #tpu.memory_space<vmem>>) attributes {dimension_semantics = [#tpu.dimension_semantics<parallel>], iteration_bounds = array<i64: 2>, scalar_prefetch = 0 : i64, scratch_operands = 1 : i64, tpu.core_type = #tpu.core_type<tc>, window_params = [{transform_indices = @transform_0, window_bounds = array<i64: 1, 18, 18, 4>}, {pipeline_mode = #tpu.pipeline_mode<synchronous>, transform_indices = @transform_1, window_bounds = array<i64: 36, 128>}, {pipeline_mode = #tpu.pipeline_mode<synchronous>, transform_indices = @transform_2, window_bounds = array<i64: 1, 128>}, {pipeline_mode = #tpu.pipeline_mode<synchronous>, transform_indices = @transform_3, window_bounds = array<i64: 36, 128>}, {pipeline_mode = #tpu.pipeline_mode<synchronous>, transform_indices = @transform_4, window_bounds = array<i64: 1, 128>}, {transform_indices = @transform_5, window_bounds = array<i64: 1, 16, 16, 128>}]} {
    %c0 = arith.constant 0 : index
    %c0_0 = arith.constant 0 : index
    %c0_1 = arith.constant 0 : index
    %c0_2 = arith.constant 0 : index
    %0 = vector.load %arg1[%c0, %c0_0, %c0_1, %c0_2] : memref<1x18x18x4xbf16, #tpu.memory_space<vmem>>, vector<1x16x16x4xbf16>
    %1 = vector.shape_cast %0 : vector<1x16x16x4xbf16> to vector<256x4xbf16>
    %c0_3 = arith.constant 0 : index
    %c0_4 = arith.constant 0 : index
    %c1 = arith.constant 1 : index
    %c0_5 = arith.constant 0 : index
    %2 = vector.load %arg1[%c0_3, %c0_4, %c1, %c0_5] : memref<1x18x18x4xbf16, #tpu.memory_space<vmem>>, vector<1x16x16x4xbf16>
    %3 = vector.shape_cast %2 : vector<1x16x16x4xbf16> to vector<256x4xbf16>
    %c0_6 = arith.constant 0 : index
    %c0_7 = arith.constant 0 : index
    %c2 = arith.constant 2 : index
    %c0_8 = arith.constant 0 : index
    %4 = vector.load %arg1[%c0_6, %c0_7, %c2, %c0_8] : memref<1x18x18x4xbf16, #tpu.memory_space<vmem>>, vector<1x16x16x4xbf16>
    %5 = vector.shape_cast %4 : vector<1x16x16x4xbf16> to vector<256x4xbf16>
    %c0_9 = arith.constant 0 : index
    %c1_10 = arith.constant 1 : index
    %c0_11 = arith.constant 0 : index
    %c0_12 = arith.constant 0 : index
    %6 = vector.load %arg1[%c0_9, %c1_10, %c0_11, %c0_12] : memref<1x18x18x4xbf16, #tpu.memory_space<vmem>>, vector<1x16x16x4xbf16>
    %7 = vector.shape_cast %6 : vector<1x16x16x4xbf16> to vector<256x4xbf16>
    %c0_13 = arith.constant 0 : index
    %c1_14 = arith.constant 1 : index
    %c1_15 = arith.constant 1 : index
    %c0_16 = arith.constant 0 : index
    %8 = vector.load %arg1[%c0_13, %c1_14, %c1_15, %c0_16] : memref<1x18x18x4xbf16, #tpu.memory_space<vmem>>, vector<1x16x16x4xbf16>
    %9 = vector.shape_cast %8 : vector<1x16x16x4xbf16> to vector<256x4xbf16>
    %c0_17 = arith.constant 0 : index
    %c1_18 = arith.constant 1 : index
    %c2_19 = arith.constant 2 : index
    %c0_20 = arith.constant 0 : index
    %10 = vector.load %arg1[%c0_17, %c1_18, %c2_19, %c0_20] : memref<1x18x18x4xbf16, #tpu.memory_space<vmem>>, vector<1x16x16x4xbf16>
    %11 = vector.shape_cast %10 : vector<1x16x16x4xbf16> to vector<256x4xbf16>
    %c0_21 = arith.constant 0 : index
    %c2_22 = arith.constant 2 : index
    %c0_23 = arith.constant 0 : index
    %c0_24 = arith.constant 0 : index
    %12 = vector.load %arg1[%c0_21, %c2_22, %c0_23, %c0_24] : memref<1x18x18x4xbf16, #tpu.memory_space<vmem>>, vector<1x16x16x4xbf16>
    %13 = vector.shape_cast %12 : vector<1x16x16x4xbf16> to vector<256x4xbf16>
    %c0_25 = arith.constant 0 : index
    %c2_26 = arith.constant 2 : index
    %c1_27 = arith.constant 1 : index
    %c0_28 = arith.constant 0 : index
    %14 = vector.load %arg1[%c0_25, %c2_26, %c1_27, %c0_28] : memref<1x18x18x4xbf16, #tpu.memory_space<vmem>>, vector<1x16x16x4xbf16>
    %15 = vector.shape_cast %14 : vector<1x16x16x4xbf16> to vector<256x4xbf16>
    %c0_29 = arith.constant 0 : index
    %c2_30 = arith.constant 2 : index
    %c2_31 = arith.constant 2 : index
    %c0_32 = arith.constant 0 : index
    %16 = vector.load %arg1[%c0_29, %c2_30, %c2_31, %c0_32] : memref<1x18x18x4xbf16, #tpu.memory_space<vmem>>, vector<1x16x16x4xbf16>
    %17 = vector.shape_cast %16 : vector<1x16x16x4xbf16> to vector<256x4xbf16>
    %18 = tpu.concatenate %1, %3, %5, %7, %9, %11, %13, %15, %17 in 1 : vector<256x4xbf16>, vector<256x4xbf16>, vector<256x4xbf16>, vector<256x4xbf16>, vector<256x4xbf16>, vector<256x4xbf16>, vector<256x4xbf16>, vector<256x4xbf16>, vector<256x4xbf16> -> vector<256x36xbf16>
    %c0_33 = arith.constant 0 : index
    %c0_34 = arith.constant 0 : index
    %19 = vector.load %arg2[%c0_33, %c0_34] : memref<36x128xbf16, #tpu.memory_space<vmem>>, vector<36x128xbf16>
    %cst = arith.constant dense<0.000000e+00> : vector<256x128xf32>
    %20 = tpu.matmul %18, %19, %cst {dimension_numbers = #tpu.dot_dimension_numbers<[1], [0], [0], [1], [0, 0, 1, 1], [], []>} : vector<256x36xbf16>, vector<36x128xbf16>, vector<256x128xf32> -> vector<256x128xf32>
    %c0_35 = arith.constant 0 : index
    %c0_36 = arith.constant 0 : index
    %21 = vector.load %arg3[%c0_35, %c0_36] : memref<1x128xf32, #tpu.memory_space<vmem>>, vector<1x128xf32>
    %22 = vector.broadcast %21 : vector<1x128xf32> to vector<256x128xf32>
    %23 = arith.addf %20, %22 : vector<256x128xf32>
    %cst_37 = arith.constant 0.000000e+00 : f32
    %24 = vector.broadcast %cst_37 : f32 to vector<256x128xf32>
    %25 = arith.maximumf %23, %24 : vector<256x128xf32>
    %cst_38 = arith.constant 0.000000e+00 : bf16
    %26 = vector.broadcast %cst_38 : bf16 to vector<1x1x18x4xbf16>
    %c0_39 = arith.constant 0 : index
    %c0_40 = arith.constant 0 : index
    %c0_41 = arith.constant 0 : index
    %c0_42 = arith.constant 0 : index
    %27 = vector.load %arg7[%c0_39, %c0_40, %c0_41, %c0_42] : memref<1x18x18x4xbf16, #tpu.memory_space<vmem>>, vector<1x1x18x4xbf16>
    tpu.vector_store %arg7[%c0_39, %c0_40, %c0_41, %c0_42], %26 {strides = array<i32>} : memref<1x18x18x4xbf16, #tpu.memory_space<vmem>>, vector<1x1x18x4xbf16>,
    %cst_43 = arith.constant 0.000000e+00 : bf16
    %28 = vector.broadcast %cst_43 : bf16 to vector<1x1x18x4xbf16>
    %c0_44 = arith.constant 0 : index
    %c17 = arith.constant 17 : index
    %c0_45 = arith.constant 0 : index
    %c0_46 = arith.constant 0 : index
    %29 = vector.load %arg7[%c0_44, %c17, %c0_45, %c0_46] : memref<1x18x18x4xbf16, #tpu.memory_space<vmem>>, vector<1x1x18x4xbf16>
    tpu.vector_store %arg7[%c0_44, %c17, %c0_45, %c0_46], %28 {strides = array<i32>} : memref<1x18x18x4xbf16, #tpu.memory_space<vmem>>, vector<1x1x18x4xbf16>,
    %cst_47 = arith.constant 0.000000e+00 : bf16
    %30 = vector.broadcast %cst_47 : bf16 to vector<1x18x1x4xbf16>
    %c0_48 = arith.constant 0 : index
    %c0_49 = arith.constant 0 : index
    %c0_50 = arith.constant 0 : index
    %c0_51 = arith.constant 0 : index
    %31 = vector.load %arg7[%c0_48, %c0_49, %c0_50, %c0_51] : memref<1x18x18x4xbf16, #tpu.memory_space<vmem>>, vector<1x18x1x4xbf16>
    tpu.vector_store %arg7[%c0_48, %c0_49, %c0_50, %c0_51], %30 {strides = array<i32>} : memref<1x18x18x4xbf16, #tpu.memory_space<vmem>>, vector<1x18x1x4xbf16>,
    %cst_52 = arith.constant 0.000000e+00 : bf16
    %32 = vector.broadcast %cst_52 : bf16 to vector<1x18x1x4xbf16>
    %c0_53 = arith.constant 0 : index
    %c0_54 = arith.constant 0 : index
    %c17_55 = arith.constant 17 : index
    %c0_56 = arith.constant 0 : index
    %33 = vector.load %arg7[%c0_53, %c0_54, %c17_55, %c0_56] : memref<1x18x18x4xbf16, #tpu.memory_space<vmem>>, vector<1x18x1x4xbf16>
    tpu.vector_store %arg7[%c0_53, %c0_54, %c17_55, %c0_56], %32 {strides = array<i32>} : memref<1x18x18x4xbf16, #tpu.memory_space<vmem>>, vector<1x18x1x4xbf16>,
    %34 = vector.extract_strided_slice %25 {offsets = [0, 0], sizes = [256, 4], strides = [1, 1]} : vector<256x128xf32> to vector<256x4xf32>
    %35 = vector.shape_cast %34 : vector<256x4xf32> to vector<1x16x16x4xf32>
    %36 = arith.truncf %35 : vector<1x16x16x4xf32> to vector<1x16x16x4xbf16>
    %c0_57 = arith.constant 0 : index
    %c1_58 = arith.constant 1 : index
    %c1_59 = arith.constant 1 : index
    %c0_60 = arith.constant 0 : index
    %37 = vector.load %arg7[%c0_57, %c1_58, %c1_59, %c0_60] : memref<1x18x18x4xbf16, #tpu.memory_space<vmem>>, vector<1x16x16x4xbf16>
    tpu.vector_store %arg7[%c0_57, %c1_58, %c1_59, %c0_60], %36 {strides = array<i32>} : memref<1x18x18x4xbf16, #tpu.memory_space<vmem>>, vector<1x16x16x4xbf16>,
    %c0_61 = arith.constant 0 : index
    %c0_62 = arith.constant 0 : index
    %c0_63 = arith.constant 0 : index
    %c0_64 = arith.constant 0 : index
    %38 = vector.load %arg7[%c0_61, %c0_62, %c0_63, %c0_64] : memref<1x18x18x4xbf16, #tpu.memory_space<vmem>>, vector<1x16x16x4xbf16>
    %39 = vector.shape_cast %38 : vector<1x16x16x4xbf16> to vector<256x4xbf16>
    %c0_65 = arith.constant 0 : index
    %c0_66 = arith.constant 0 : index
    %c1_67 = arith.constant 1 : index
    %c0_68 = arith.constant 0 : index
    %40 = vector.load %arg7[%c0_65, %c0_66, %c1_67, %c0_68] : memref<1x18x18x4xbf16, #tpu.memory_space<vmem>>, vector<1x16x16x4xbf16>
    %41 = vector.shape_cast %40 : vector<1x16x16x4xbf16> to vector<256x4xbf16>
    %c0_69 = arith.constant 0 : index
    %c0_70 = arith.constant 0 : index
    %c2_71 = arith.constant 2 : index
    %c0_72 = arith.constant 0 : index
    %42 = vector.load %arg7[%c0_69, %c0_70, %c2_71, %c0_72] : memref<1x18x18x4xbf16, #tpu.memory_space<vmem>>, vector<1x16x16x4xbf16>
    %43 = vector.shape_cast %42 : vector<1x16x16x4xbf16> to vector<256x4xbf16>
    %c0_73 = arith.constant 0 : index
    %c1_74 = arith.constant 1 : index
    %c0_75 = arith.constant 0 : index
    %c0_76 = arith.constant 0 : index
    %44 = vector.load %arg7[%c0_73, %c1_74, %c0_75, %c0_76] : memref<1x18x18x4xbf16, #tpu.memory_space<vmem>>, vector<1x16x16x4xbf16>
    %45 = vector.shape_cast %44 : vector<1x16x16x4xbf16> to vector<256x4xbf16>
    %c0_77 = arith.constant 0 : index
    %c1_78 = arith.constant 1 : index
    %c1_79 = arith.constant 1 : index
    %c0_80 = arith.constant 0 : index
    %46 = vector.load %arg7[%c0_77, %c1_78, %c1_79, %c0_80] : memref<1x18x18x4xbf16, #tpu.memory_space<vmem>>, vector<1x16x16x4xbf16>
    %47 = vector.shape_cast %46 : vector<1x16x16x4xbf16> to vector<256x4xbf16>
    %c0_81 = arith.constant 0 : index
    %c1_82 = arith.constant 1 : index
    %c2_83 = arith.constant 2 : index
    %c0_84 = arith.constant 0 : index
    %48 = vector.load %arg7[%c0_81, %c1_82, %c2_83, %c0_84] : memref<1x18x18x4xbf16, #tpu.memory_space<vmem>>, vector<1x16x16x4xbf16>
    %49 = vector.shape_cast %48 : vector<1x16x16x4xbf16> to vector<256x4xbf16>
    %c0_85 = arith.constant 0 : index
    %c2_86 = arith.constant 2 : index
    %c0_87 = arith.constant 0 : index
    %c0_88 = arith.constant 0 : index
    %50 = vector.load %arg7[%c0_85, %c2_86, %c0_87, %c0_88] : memref<1x18x18x4xbf16, #tpu.memory_space<vmem>>, vector<1x16x16x4xbf16>
    %51 = vector.shape_cast %50 : vector<1x16x16x4xbf16> to vector<256x4xbf16>
    %c0_89 = arith.constant 0 : index
    %c2_90 = arith.constant 2 : index
    %c1_91 = arith.constant 1 : index
    %c0_92 = arith.constant 0 : index
    %52 = vector.load %arg7[%c0_89, %c2_90, %c1_91, %c0_92] : memref<1x18x18x4xbf16, #tpu.memory_space<vmem>>, vector<1x16x16x4xbf16>
    %53 = vector.shape_cast %52 : vector<1x16x16x4xbf16> to vector<256x4xbf16>
    %c0_93 = arith.constant 0 : index
    %c2_94 = arith.constant 2 : index
    %c2_95 = arith.constant 2 : index
    %c0_96 = arith.constant 0 : index
    %54 = vector.load %arg7[%c0_93, %c2_94, %c2_95, %c0_96] : memref<1x18x18x4xbf16, #tpu.memory_space<vmem>>, vector<1x16x16x4xbf16>
    %55 = vector.shape_cast %54 : vector<1x16x16x4xbf16> to vector<256x4xbf16>
    %56 = tpu.concatenate %39, %41, %43, %45, %47, %49, %51, %53, %55 in 1 : vector<256x4xbf16>, vector<256x4xbf16>, vector<256x4xbf16>, vector<256x4xbf16>, vector<256x4xbf16>, vector<256x4xbf16>, vector<256x4xbf16>, vector<256x4xbf16>, vector<256x4xbf16> -> vector<256x36xbf16>
    %c0_97 = arith.constant 0 : index
    %c0_98 = arith.constant 0 : index
    %57 = vector.load %arg4[%c0_97, %c0_98] : memref<36x128xbf16, #tpu.memory_space<vmem>>, vector<36x128xbf16>
    %cst_99 = arith.constant dense<0.000000e+00> : vector<256x128xf32>
    %58 = tpu.matmul %56, %57, %cst_99 {dimension_numbers = #tpu.dot_dimension_numbers<[1], [0], [0], [1], [0, 0, 1, 1], [], []>} : vector<256x36xbf16>, vector<36x128xbf16>, vector<256x128xf32> -> vector<256x128xf32>
    %c0_100 = arith.constant 0 : index
    %c1_101 = arith.constant 1 : index
    %c1_102 = arith.constant 1 : index
    %c0_103 = arith.constant 0 : index
    %59 = vector.load %arg1[%c0_100, %c1_101, %c1_102, %c0_103] : memref<1x18x18x4xbf16, #tpu.memory_space<vmem>>, vector<1x16x16x4xbf16>
    %60 = vector.shape_cast %59 : vector<1x16x16x4xbf16> to vector<256x4xbf16>
    %61 = arith.extf %60 : vector<256x4xbf16> to vector<256x4xf32>
    %cst_104 = arith.constant 0.000000e+00 : f32
    %62 = vector.broadcast %cst_104 : f32 to vector<256x124xf32>
    %63 = tpu.concatenate %61, %62 in 1 : vector<256x4xf32>, vector<256x124xf32> -> vector<256x128xf32>
    %64 = arith.addf %58, %63 : vector<256x128xf32>
    %c0_105 = arith.constant 0 : index
    %c0_106 = arith.constant 0 : index
    %65 = vector.load %arg5[%c0_105, %c0_106] : memref<1x128xf32, #tpu.memory_space<vmem>>, vector<1x128xf32>
    %66 = vector.broadcast %65 : vector<1x128xf32> to vector<256x128xf32>
    %67 = arith.addf %64, %66 : vector<256x128xf32>
    %cst_107 = arith.constant 0.000000e+00 : f32
    %68 = vector.broadcast %cst_107 : f32 to vector<256x128xf32>
    %69 = arith.maximumf %67, %68 : vector<256x128xf32>
    %70 = vector.shape_cast %69 : vector<256x128xf32> to vector<1x16x16x128xf32>
    %71 = arith.truncf %70 : vector<1x16x16x128xf32> to vector<1x16x16x128xbf16>
    %c0_108 = arith.constant 0 : index
    %c0_109 = arith.constant 0 : index
    %c0_110 = arith.constant 0 : index
    %c0_111 = arith.constant 0 : index
    %72 = vector.load %arg6[%c0_108, %c0_109, %c0_110, %c0_111] : memref<1x16x16x128xbf16, #tpu.memory_space<vmem>>, vector<1x16x16x128xbf16>
    tpu.vector_store %arg6[%c0_108, %c0_109, %c0_110, %c0_111], %71 {strides = array<i32>} : memref<1x16x16x128xbf16, #tpu.memory_space<vmem>>, vector<1x16x16x128xbf16>,
    return
  }
  func.func @transform_0(%arg0: i32) -> (i32, i32, i32, i32) {
    %c0_i32 = arith.constant 0 : i32
    %c0_i32_0 = arith.constant 0 : i32
    %c0_i32_1 = arith.constant 0 : i32
    %c0_i32_2 = arith.constant 0 : i32
    return %arg0, %c0_i32, %c0_i32_0, %c0_i32_1 : i32, i32, i32, i32
  }
  func.func @transform_1(%arg0: i32) -> (i32, i32) {
    %c0_i32 = arith.constant 0 : i32
    %c0_i32_0 = arith.constant 0 : i32
    %c0_i32_1 = arith.constant 0 : i32
    return %c0_i32, %c0_i32_0 : i32, i32
  }
  func.func @transform_2(%arg0: i32) -> (i32, i32) {
    %c0_i32 = arith.constant 0 : i32
    %c0_i32_0 = arith.constant 0 : i32
    %c0_i32_1 = arith.constant 0 : i32
    return %c0_i32, %c0_i32_0 : i32, i32
  }
  func.func @transform_3(%arg0: i32) -> (i32, i32) {
    %c0_i32 = arith.constant 0 : i32
    %c0_i32_0 = arith.constant 0 : i32
    %c0_i32_1 = arith.constant 0 : i32
    return %c0_i32, %c0_i32_0 : i32, i32
  }
  func.func @transform_4(%arg0: i32) -> (i32, i32) {
    %c0_i32 = arith.constant 0 : i32
    %c0_i32_0 = arith.constant 0 : i32
    %c0_i32_1 = arith.constant 0 : i32
    return %c0_i32, %c0_i32_0 : i32, i32
  }
  func.func @transform_5(%arg0: i32) -> (i32, i32, i32, i32) {
    %c0_i32 = arith.constant 0 : i32
    %c0_i32_0 = arith.constant 0 : i32
    %c0_i32_1 = arith.constant 0 : i32
    %c0_i32_2 = arith.constant 0 : i32
    return %arg0, %c0_i32, %c0_i32_0, %c0_i32_1 : i32, i32, i32, i32
  }
}

</mosaic_0001>

<bundles_post_ra>
// kernel: tpu_custom_call.1
= control target key start
LH: loop header
LB: loop body
LE: loop exit
PB: predicated region body
PF: predicated region fallthrough
CT: control target
= control target key end

     0   :  { %10 = vsyncpa [#allocation4], 0  ;;  %s13028_s0 = inlined_call_operand.vmem [shape: bf16[2,18,18,4], index: 0, kind: input, shape index: {}]   ;;  %s13029_s1 = inlined_call_operand.vmem [shape: bf16[36,128], index: 1, kind: input, shape index: {}]   ;;  %s13030_s2 = inlined_call_operand.vmem [shape: f32[1,128], index: 2, kind: input, shape index: {}]   ;;  %s13031_s3 = inlined_call_operand.vmem [shape: bf16[36,128], index: 3, kind: input, shape index: {}]   ;;  %s13032_s4 = inlined_call_operand.vmem [shape: f32[1,128], index: 4, kind: input, shape index: {}]   ;;  %s13033_s5 = inlined_call_operand.hbm [shape: bf16[2,16,16,128], index: 5, kind: output, shape index: {}]  }
   0x1   :  { %12 = vsyncpa [#allocation4 + $0x1], 0  ;;  %s9118_s18 = smov 0   ;;  %s9120_s19 = smov 0  }
   0x2   :  { %s9122_s20 = smov 0   ;;  %s9124_s21 = smov 0  }
   0x3 LB: > { %s9139_s22 = sadd.s32 4294967295, %s9075_s21   ;;  %s7868_s23 = sadd.s32 4294967294, %s9075_s21   ;;  %s9075_s21 = sphi %s9124_s21, %s13153_s21   ;;  %s9071_s20 = sphi %s9122_s20, %s13152_s20   ;;  %s9067_s19 = sphi %s9120_s19, %s13151_s19   ;;  %s9063_s18 = sphi %s9118_s18, %s13150_s18  }
   0x4   : > { %s9143_s24 = sadd.s32 1, %s9075_s21   ;;  %s135_s25 = sadd.s32 1, %s9071_s20 }
   0x5   : > { %s132_s26 = ssub.s32 %s9075_s21, %s9143_s24  ;;  %p145_p0 = scmp.ne.s32.totalorder %s9071_s20, %s9067_s19 }
   0x6   : > { %p133_p1 = scmp.eq.s32.totalorder %s132_s26, 0  ;;  %p146_p2 = scmp.eq.s32.totalorder %s9139_s22, 1 }
   0x7   : > { %p151_p3 = scmp.ne.s32.totalorder %s9067_s19, %s9063_s18  ;;  %p152_p4 = scmp.eq.s32.totalorder %s7868_s23, 1 }
   0x8   : > { %s9154_s27 = scalar_select %p133_p1, %s9071_s20, %s135_s25  }
   0x9   : > { %p9156_p5 = por %p146_p2, %p145_p0  ;;  %p9160_p6 = por %p152_p4, %p151_p3 }
   0xa   : > { %p7871_p7 = scmp.ge.s32.totalorder %s9075_s21, 1  ;;  %p190_p8 = scmp.lt.s32.totalorder %s9075_s21, 3 }
   0xc   : > { %p191_p9 = pnand %p7871_p7, %p190_p8 }
   0xe   : > { %194 = sbr.rel (%p191_p9) target bundleno = 1195 (0x4ab), region = 40 }
  0x15   : > { %p218_p10 = scmp.lt.s32.totalorder %s9139_s22, 1  ;;  %vm723_vm0 = vcmask 1042432   ;;  %vm724_vm1 = vcmask 1046532   ;;  %s9077_s10 = smov 12   ;;  %vm272_vm3 = vsmask.f32 3328 }
  0x16   : > { %vm9195_vm2 = vmor %vm723_vm0, %vm724_vm1  ;;  %vm273_vm4 = vsmask.f32 7440  ;;  %s9078_s11 = smov 20   ;;  %s9079_s12 = smov 8   ;;  %vm2792_vm6 = vcmask 31744   ;;  %vm2841_vm7 = vcmask 64512  }
  0x17   : > { %s219_s30 = scalar_select %p218_p10, %s9139_s22, 1  ;;  %vm9239_vm5 = vmor %vm272_vm3, %vm273_vm4  ;;  %vm2874_vm8 = vcmask 97280   ;;  %vm2907_vm9 = vcmask 130048   ;;  %vm2940_vm10 = vcmask 162816   ;;  %vm13036_vm11 = vcmask 195584  }
  0x18   : > { %s9080_s13 = smov 4   ;;  %s9081_s14 = smov 16   ;;  %vm13037_vm12 = vcmask 228352   ;;  %vm13034_vm13 = vcmask 1041408   ;;  %vm3039_vm14 = vcmask 261120   ;;  %vm3099_vm15 = vcmask 293888  }
  0x19   : > { %s8819_s6 = smul.u32 216, %s219_s30  ;;  %s9082_s15 = smov 24   ;;  %vm3329_vm0 = vcmask 27648   ;;  %vm3332_vm1 = vcmask 24576   ;;  %vm13035_vm3 = vsmask.f32 256 }
  0x1a   : > { %s9083_s16 = smov 28   ;;  %s9084_s25 = smov 32   ;;  %vm3395_vm4 = vsmask.f32 7938 }
  0x1b   : > { %s9171_s9 = scalar_lea.vmem %s13028_s0, %s8819_s6  ;;  %s9086_s26 = smov [#allocation3]  }
  0x1c   : > { %v7892_v0 = vld [vmem:[%s9171_s9 + $0x18] sm:$0xf]  ;;  %v9175_v1 = vld [vmem:[%s9171_s9 + $0x1c] sm:$0xf]  ;;  %v7890_v2 = vld [vmem:[%s9171_s9 + $0xc] sm:$0xf] }
  0x1d   : > { %v921_v3 = vshll.u32 %v9175_v1, 16  ;;  %v925_v4 = vshrl.u32 %v9175_v1, 16  ;;  %v8099_v5 = vcombine.low %v7892_v0, %v9175_v1  ;;  %v912_v6 = vshrl.u32 %v7892_v0, 16  ;;  %v9182_v7 = vld [vmem:[%s9171_s9 + $0x10] sm:$0xf]  ;;  %s9017_s30 = sshll.u32 %s9086_s26, 4  ;;  %s9018_s30 = int_to_ptr.vmem [resolvable:$false] %s9017_s30 }
  0x1e   : > { %v915_v8 = vshll.u32 %v7892_v0, 16  ;;  %v897_v9 = vshll.u32 %v9182_v7, 16  ;;  %v901_v10 = vshrl.u32 %v9182_v7, 16  ;;  %v8098_v11 = vcombine.low %v7890_v2, %v9182_v7  ;;  %v9188_v12 = vld [vmem:[%s9171_s9 + $0x14] sm:$0x1]  ;;  %s9019_s6 = scalar_lea.vmem %s9018_s30, 4096 }
  0x1f   : > { %v9190_v13 = vrot.slane %v925_v4, 4  ;;  %2346 = vrot.lane.b32.xlu1 %v8099_v5, %s9077_s10  ;;  %v914_v14 = vrot.slane %v912_v6, 4  ;;  %v888_v15 = vshrl.u32 %v7890_v2, 16  ;;  %v891_v16 = vshll.u32 %v7890_v2, 16  ;;  %v7938_v18 = vld [vmem:[%s9171_s9 + $0xc] sm:$0xe] }
  0x20   : > { %v917_v19 = vrot.slane %v915_v8, 5  ;;  %v9200_v20 = vrot.slane %v901_v10, 4  ;;  %2344 = vrot.lane.b32.xlu0 %v8098_v11, %s9077_s10  ;;  %v7954_v21 = vrot.slane %v7938_v18, 9  ;;  %v1337_v22 = vrot.slane %v9182_v7, 5  ;;  %v225_v23 = vld [vmem:[%s9171_s9 + $0x4] sm:$0xf] }
  0x21   : > { %v890_v24 = vrot.slane %v888_v15, 4  ;;  %v893_v25 = vrot.slane %v891_v16, 5  ;;  %v1340_v26 = vrot.slane %v9188_v12, 5  ;;  %v256_v27 = vld [vmem:[%s9171_s9 + $0x8] sm:$0x1]  ;;  %v728_v28 = vrot.slane %v225_v23, 5 }
  0x22   : > { %v918_v29 = vor.u32 %v917_v19, %v914_v14  ;;  %v1338_v30 = vsel %vm9195_vm2, %v7954_v21, %v1337_v22  ;;  %v1339_v31 = vrot.slane %v1337_v22, 4  ;;  %v659_v32 = vld [vmem:[%s9171_s9] sm:$0xe]  ;;  %v731_v33 = vrot.slane %v256_v27, 5  ;;  %v227_v34 = vld [vmem:[%s9171_s9 + $0x10] sm:$0xf] }
  0x23   : > { %v894_v35 = vor.u32 %v893_v25, %v890_v24  ;;  %v7874_v36 = vrot.slane %v659_v32, 9  ;;  %v730_v37 = vrot.slane %v728_v28, 4  ;;  %v257_v38 = vld [vmem:[%s9171_s9 + $0x14] sm:$0x1]  ;;  %v660_v39 = vld [vmem:[%s9171_s9 + $0xc] sm:$0xe] }
  0x24   : > { %v9213_v40 = vrot.slane %v918_v29, 4  ;;  %v1341_v41 = vsel %vm9195_vm2, %v1339_v31, %v1340_v26  ;;  %v7875_v42 = vrot.slane %v660_v39, 9  ;;  %v735_v43 = vrot.slane %v227_v34, 5  ;;  %v224_v44 = vld [vmem:[%s9171_s9] sm:$0xf] }
  0x25   : > { %v9218_v45 = vrot.slane %v894_v35, 4  ;;  %v8130_v46 = vcombine.low %v1338_v30, %v1341_v41  ;;  %v729_v47 = vsel %vm9195_vm2, %v7874_v36, %v728_v28  ;;  %v732_v48 = vsel %vm9195_vm2, %v730_v37, %v731_v33  ;;  %v7939_v49 = vld [vmem:[%s9171_s9 + $0x18] sm:$0xe]  ;;  %v7923_v58 = vld [vmem:[%s9171_s9 + $0x20] sm:$0x1] }
  0x26   : > { %v8082_v50 = vcombine.low %v729_v47, %v732_v48  ;;  %v736_v51 = vsel %vm9195_vm2, %v7875_v42, %v735_v43  ;;  %v737_v52 = vrot.slane %v735_v43, 4  ;;  %v738_v53 = vrot.slane %v257_v38, 5  ;;  %v226_v63 = vld [vmem:[%s9171_s9 + $0xc] sm:$0xf]  ;;  %v7972_v42 = vld [vmem:[%s9171_s9 + $0x24] sm:$0xf] }
  0x27   : > { %2504 = vrot.lane.b32.xlu0 %v8130_v46, %s9078_s11  ;;  %v276_v54 = vshrl.u32 %v224_v44, 16  ;;  %v279_v55 = vshll.u32 %v224_v44, 16  ;;  %v285_v56 = vshll.u32 %v225_v23, 16  ;;  %v289_v57 = vshrl.u32 %v225_v23, 16 }
  0x28   : > { %2248 = vrot.lane.b32.xlu1 %v8082_v50, %s9079_s12  ;;  %v739_v59 = vsel %vm9195_vm2, %v737_v52, %v738_v53  ;;  %v295_v60 = vshll.u32 %v256_v27, 16  ;;  %v7955_v61 = vrot.slane %v7939_v49, 9  ;;  %v1344_v62 = vrot.slane %v9175_v1, 5 }
  0x29   : > { %v8083_v0 = vcombine.low %v736_v51, %v739_v59  ;;  %v278_v2 = vrot.slane %v276_v54, 4  ;;  %v281_v4 = vrot.slane %v279_v55, 5  ;;  %v287_v5 = vrot.slane %v285_v56, 5  ;;  %v7970_v51 = vld [vmem:[%s9171_s9 + $0x18] sm:$0xf] }
  0x2a   : > { %v291_v6 = vrot.slane %v289_v57, 4  ;;  %v297_v8 = vrot.slane %v295_v60, 5  ;;  %v1345_v10 = vsel %vm9195_vm2, %v7955_v61, %v1344_v62  ;;  %v1346_v11 = vrot.slane %v1344_v62, 4  ;;  %v9281_v62 = vld [vmem:[%s9171_s9 + $0x2c] sm:$0x1] }
  0x2b   : > { %v282_v14 = vor.u32 %v281_v4, %v278_v2  ;;  %v1347_v15 = vrot.slane %v7923_v58, 5  ;;  %v300_v16 = vshrl.u32 %v226_v63, 16  ;;  %v303_v18 = vshll.u32 %v226_v63, 16 }
  0x2c   : > { %2250 = vrot.lane.b32.xlu1 %v8083_v0, %s9079_s12  ;;  %v292_v21 = vor.u32 %v291_v6, %v287_v5  ;;  %v309_v22 = vshll.u32 %v227_v34, 16  ;;  %v313_v23 = vshrl.u32 %v227_v34, 16  ;;  %v319_v24 = vshll.u32 %v257_v38, 16 }
  0x2d   : > { %v283_v25 = vrot.slane %v282_v14, 4  ;;  %v1348_v26 = vsel %vm9195_vm2, %v1346_v11, %v1347_v15  ;;  %v302_v27 = vrot.slane %v300_v16, 4  ;;  %v305_v28 = vrot.slane %v303_v18, 5  ;;  %v228_v14 = vld [vmem:[%s9171_s9 + $0x18] sm:$0xf] }
  0x2e   : > { %v293_v29 = vrot.slane %v292_v21, 4  ;;  %v8131_v30 = vcombine.low %v1345_v10, %v1348_v26  ;;  %v311_v31 = vrot.slane %v309_v22, 5  ;;  %v315_v32 = vrot.slane %v313_v23, 4  ;;  %v9298_v26 = vld [vmem:[%s9171_s9 + $0x1c] sm:$0xf] }
  0x2f   : > { %v288_v33 = vsel %vm9239_vm5, %v283_v25, %v287_v5  ;;  %v306_v35 = vor.u32 %v305_v28, %v302_v27  ;;  %v321_v36 = vrot.slane %v319_v24, 5  ;;  %v923_v34 = vrot.slane %v921_v3, 5  ;;  %v9260_v3 = vld [vmem:[%s9171_s9 + $0x28] sm:$0xf]  ;;  %v9289_v5 = vld [vmem:[%s9171_s9 + $0x20] sm:$0x1] }
  0x30   : > { %v298_v37 = vsel %vm9239_vm5, %v293_v29, %v297_v8  ;;  %2506 = vrot.lane.b32.xlu1 %v8131_v30, %s9078_s11  ;;  %v316_v38 = vor.u32 %v315_v32, %v311_v31  ;;  %v931_v39 = vshll.u32 %v7923_v58, 16  ;;  %v899_v41 = vrot.slane %v897_v9, 5  ;;  %v9302_v30 = vld [vmem:[%s9171_s9 + $0x20] sm:$0x1] }
  0x31   : > { %v8066_v43 = vcombine.low %v288_v33, %v298_v37  ;;  %v307_v44 = vrot.slane %v306_v35, 4  ;;  %v924_v46 = vsel %vm9239_vm5, %v9213_v40, %v923_v34  ;;  %v928_v1 = vor.u32 %v9190_v13, %v923_v34  ;;  %v8018_v34 = vld [vmem:[%s9171_s9 + $0x18] sm:$0xe] }
  0x32   : > { %v317_v47 = vrot.slane %v316_v38, 4  ;;  %v933_v48 = vrot.slane %v931_v39, 5  ;;  %v900_v7 = vsel %vm9239_vm5, %v9218_v45, %v899_v41  ;;  %v904_v9 = vor.u32 %v9200_v20, %v899_v41  ;;  %v9275_v20 = vld [vmem:[%s9171_s9 + $0x1c] sm:$0xf] }
  0x33   : > { %2168 = vrot.lane.b32.xlu0 %v8066_v43, %s9080_s13  ;;  %v312_v49 = vsel %vm9239_vm5, %v307_v44, %v311_v31  ;;  %v929_v40 = vrot.slane %v928_v1, 4  ;;  %v907_v13 = vshll.u32 %v9188_v12, 16  ;;  %v1521_v50 = vshrl.u32 %v7972_v42, 16 }
  0x34   : > { %v322_v52 = vsel %vm9239_vm5, %v317_v47, %v321_v36  ;;  %v905_v53 = vrot.slane %v904_v9, 4  ;;  %v1524_v54 = vshll.u32 %v7972_v42, 16  ;;  %v1534_v45 = vshrl.u32 %v9260_v3, 16  ;;  %v230_v9 = vld [vmem:[%s9171_s9 + $0x24] sm:$0xf] }
  0x35   : > { %v8067_v55 = vcombine.low %v312_v49, %v322_v52  ;;  %v934_v56 = vsel %vm9239_vm5, %v929_v40, %v933_v48  ;;  %v909_v57 = vrot.slane %v907_v13, 5  ;;  %v1523_v58 = vrot.slane %v1521_v50, 4 }
  0x36   : > { %v8115_v12 = vcombine.low %v924_v46, %v934_v56  ;;  %v1526_v59 = vrot.slane %v1524_v54, 5  ;;  %v8147_v60 = vcombine.low %v7972_v42, %v9260_v3  ;;  %v1497_v61 = vshrl.u32 %v7970_v51, 16 }
  0x37   : > { %2170 = vrot.lane.b32.xlu0 %v8067_v55, %s9080_s13  ;;  %v910_v63 = vsel %vm9239_vm5, %v905_v53, %v909_v57  ;;  %v1500_v0 = vshll.u32 %v7970_v51, 16  ;;  %v1510_v2 = vshrl.u32 %v9275_v20, 16  ;;  %v8146_v4 = vcombine.low %v7970_v51, %v9275_v20  ;;  %v231_v51 = vld [vmem:[%s9171_s9 + $0x28] sm:$0xf] }
  0x38   : > { %2426 = vrot.lane.b32.xlu1 %v8115_v12, %s9081_s14  ;;  %v8114_v6 = vcombine.low %v900_v7, %v910_v63  ;;  %v1499_v8 = vrot.slane %v1497_v61, 4  ;;  %v1527_v10 = vor.u32 %v1526_v59, %v1523_v58  ;;  %v1530_v11 = vshll.u32 %v9260_v3, 16  ;;  %v259_v58 = vld [vmem:[%s9171_s9 + $0x2c] sm:$0x1] }
  0x39   : > { %v1502_v15 = vrot.slane %v1500_v0, 5  ;;  %v1536_v16 = vrot.slane %v1534_v45, 4  ;;  %v1540_v18 = vshll.u32 %v9281_v62, 16  ;;  %v1506_v21 = vshll.u32 %v9275_v20, 16  ;;  %v8019_v0 = vld [vmem:[%s9171_s9 + $0x24] sm:$0xe] }
  0x3a   : > { %v1528_v22 = vrot.slane %v1527_v10, 4  ;;  %v1532_v23 = vrot.slane %v1530_v11, 5  ;;  %v1512_v24 = vrot.slane %v1510_v2, 4  ;;  %v1516_v25 = vshll.u32 %v9289_v5, 16 }
  0x3b   : > { %2424 = vrot.lane.b32.xlu0 %v8114_v6, %s9081_s14  ;;  %v1542_v27 = vrot.slane %v1540_v18, 5  ;;  %v1503_v28 = vor.u32 %v1502_v15, %v1499_v8  ;;  %v1508_v29 = vrot.slane %v1506_v21, 5  ;;  %v324_v31 = vshrl.u32 %v228_v14, 16  ;;  %v8887_v15 = vld [vmem:[%s13029_s1] sm:$0xff]  }
  0x3c   : > { %2602 = vrot.lane.b32.xlu1 %v8147_v60, %s9082_s15  ;;  %v1533_v32 = vsel %vm9239_vm5, %v1528_v22, %v1532_v23  ;;  %v1537_v33 = vor.u32 %v1536_v16, %v1532_v23  ;;  %v1518_v35 = vrot.slane %v1516_v25, 5  ;;  %v327_v36 = vshll.u32 %v228_v14, 16  ;;  %v662_v14 = vld [vmem:[%s9171_s9 + $0x24] sm:$0xe]  ;;  %8741 = vmatprep.subr.bf16.mxu0 %v8887_v15 }
  0x3d   : > { %v1504_v37 = vrot.slane %v1503_v28, 4  ;;  %v1513_v38 = vor.u32 %v1512_v24, %v1508_v29  ;;  %v326_v39 = vrot.slane %v324_v31, 4  ;;  %v333_v41 = vshll.u32 %v9298_v26, 16  ;;  %v661_v28 = vld [vmem:[%s9171_s9 + $0x18] sm:$0xe]  ;;  %8742 = vmatpush3.bf16.msra.mxu0 %v8887_v15 }
  0x3e   : > { %v1538_v42 = vrot.slane %v1537_v33, 4  ;;  %v329_v43 = vrot.slane %v327_v36, 5  ;;  %v337_v44 = vshrl.u32 %v9298_v26, 16  ;;  %v343_v46 = vshll.u32 %v9302_v30, 16  ;;  %v7940_v15 = vld [vmem:[%s9171_s9 + $0x24] sm:$0xe] }
  0x3f   : > { %2600 = vrot.lane.b32.xlu0 %v8146_v4, %s9082_s15  ;;  %v1509_v1 = vsel %vm9239_vm5, %v1504_v37, %v1508_v29  ;;  %v1514_v47 = vrot.slane %v1513_v38, 4  ;;  %v335_v48 = vrot.slane %v333_v41, 5  ;;  %v8034_v7 = vrot.slane %v8018_v34, 9  ;;  %v9346_v37 = vld [vmem:[%s9171_s9 + $0x30] sm:$0xf]  ;;  %v8890_v38 = vld [vmem:[%s13029_s1 + $0x8] sm:$0xff]  }
  0x40   : > { %v1543_v49 = vsel %vm9239_vm5, %v1538_v42, %v1542_v27  ;;  %v330_v40 = vor.u32 %v329_v43, %v326_v39  ;;  %v339_v13 = vrot.slane %v337_v44, 4  ;;  %v345_v50 = vrot.slane %v343_v46, 5  ;;  %8743 = vmatprep.subr.bf16.mxu0 %v8890_v38 }
  0x41   : > { %v8163_v52 = vcombine.low %v1533_v32, %v1543_v49  ;;  %v1519_v53 = vsel %vm9239_vm5, %v1514_v47, %v1518_v35  ;;  %v1946_v54 = vrot.slane %v9275_v20, 5  ;;  %v1949_v45 = vrot.slane %v9289_v5, 5  ;;  %v7897_v47 = vld [vmem:[%s9171_s9 + $0x34] sm:$0xf]  ;;  %8744 = vmatpush3.bf16.msra.mxu0 %v8890_v38 }
  0x42   : > { %v8162_v55 = vcombine.low %v1509_v1, %v1519_v53  ;;  %v331_v56 = vrot.slane %v330_v40, 4  ;;  %v340_v57 = vor.u32 %v339_v13, %v335_v48  ;;  %v348_v12 = vshrl.u32 %v230_v9, 16  ;;  %v7894_v40 = vld [vmem:[%s9171_s9 + $0x24] sm:$0xf]  ;;  %v9367_v13 = vld [vmem:[%s9171_s9 + $0x28] sm:$0xf] }
  0x43   : > { %2682 = vrot.lane.b32.xlu1 %v8163_v52, %s9083_s16  ;;  %v1947_v59 = vsel %vm9195_vm2, %v8034_v7, %v1946_v54  ;;  %v1948_v60 = vrot.slane %v1946_v54, 4  ;;  %v351_v61 = vshll.u32 %v230_v9, 16  ;;  %v357_v63 = vshll.u32 %v231_v51, 16 }
  0x44   : > { %2680 = vrot.lane.b32.xlu0 %v8162_v55, %s9083_s16  ;;  %v336_v20 = vsel %vm9239_vm5, %v331_v56, %v335_v48  ;;  %v341_v2 = vrot.slane %v340_v57, 4  ;;  %v350_v4 = vrot.slane %v348_v12, 4  ;;  %v361_v5 = vshrl.u32 %v231_v51, 16  ;;  %v7925_v55 = vld [vmem:[%s9171_s9 + $0x38] sm:$0x1] }
  0x45   : > { %v1950_v6 = vsel %vm9195_vm2, %v1948_v60, %v1949_v45  ;;  %v353_v8 = vrot.slane %v351_v61, 5  ;;  %v359_v10 = vrot.slane %v357_v63, 5  ;;  %v367_v11 = vshll.u32 %v259_v58, 16 }
  0x46   : > { %v346_v16 = vsel %vm9239_vm5, %v341_v2, %v345_v50  ;;  %v8178_v18 = vcombine.low %v1947_v59, %v1950_v6  ;;  %v363_v21 = vrot.slane %v361_v5, 4  ;;  %v8035_v22 = vrot.slane %v8019_v0, 9  ;;  %v7924_v0 = vld [vmem:[%s9171_s9 + $0x2c] sm:$0x1] }
  0x47   : > { %v8068_v23 = vcombine.low %v336_v20, %v346_v16  ;;  %v354_v24 = vor.u32 %v353_v8, %v350_v4  ;;  %v369_v25 = vrot.slane %v367_v11, 5  ;;  %v1953_v27 = vrot.slane %v9260_v3, 5  ;;  %v7941_v20 = vld [vmem:[%s9171_s9 + $0x30] sm:$0xe] }
  0x48   : > { %2760 = vrot.lane.b32.xlu0 %v8178_v18, %s9084_s25  ;;  %v364_v29 = vor.u32 %v363_v21, %v359_v10  ;;  %v1956_v31 = vrot.slane %v9281_v62, 5  ;;  %v7877_v32 = vrot.slane %v662_v14, 9  ;;  %v749_v33 = vrot.slane %v231_v51, 5 }
  0x49   : > { %2172 = vrot.lane.b32.xlu1 %v8068_v23, %s9080_s13  ;;  %v355_v35 = vrot.slane %v354_v24, 4  ;;  %v1954_v36 = vsel %vm9195_vm2, %v8035_v22, %v1953_v27  ;;  %v1955_v34 = vrot.slane %v1953_v27, 4  ;;  %v752_v3 = vrot.slane %v259_v58, 5 }
  0x4a   : > { %v365_v62 = vrot.slane %v364_v29, 4  ;;  %v750_v39 = vsel %vm9195_vm2, %v7877_v32, %v749_v33  ;;  %v751_v41 = vrot.slane %v749_v33, 4  ;;  %v7876_v42 = vrot.slane %v661_v28, 9  ;;  %v9387_v33 = vld [vmem:[%s9171_s9 + $0x3c] sm:$0xf] }
  0x4b   : > { %v360_v43 = vsel %vm9239_vm5, %v355_v35, %v359_v10  ;;  %v1957_v44 = vsel %vm9195_vm2, %v1955_v34, %v1956_v31  ;;  %v742_v46 = vrot.slane %v9298_v26, 5  ;;  %v745_v1 = vrot.slane %v9302_v30, 5 }
  0x4c   : > { %v370_v48 = vsel %vm9239_vm5, %v365_v62, %v369_v25  ;;  %v8179_v7 = vcombine.low %v1954_v36, %v1957_v44  ;;  %v753_v9 = vsel %vm9195_vm2, %v751_v41, %v752_v3  ;;  %v960_v49 = vshrl.u32 %v9346_v37, 16 }
  0x4d   : > { %v8069_v50 = vcombine.low %v360_v43, %v370_v48  ;;  %v8085_v26 = vcombine.low %v750_v39, %v753_v9  ;;  %v743_v30 = vsel %vm9195_vm2, %v7876_v42, %v742_v46  ;;  %v744_v51 = vrot.slane %v742_v46, 4  ;;  %v9401_v43 = vld [vmem:[%s9171_s9 + $0x40] sm:$0xf]  ;;  %v7974_v9 = vld [vmem:[%s9171_s9 + $0x30] sm:$0xf] }
  0x4e   : > { %2762 = vrot.lane.b32.xlu0 %v8179_v7, %s9084_s25  ;;  %v962_v52 = vrot.slane %v960_v49, 4  ;;  %v963_v53 = vshll.u32 %v9346_v37, 16  ;;  %v973_v54 = vshrl.u32 %v7897_v47, 16  ;;  %v8101_v45 = vcombine.low %v9346_v37, %v7897_v47  ;;  %v9411_v49 = vld [vmem:[%s9171_s9 + $0x34] sm:$0xf] }
  0x4f   : > { %2174 = vrot.lane.b32.xlu1 %v8069_v50, %s9080_s13  ;;  %v746_v56 = vsel %vm9195_vm2, %v744_v51, %v745_v1  ;;  %v936_v57 = vshrl.u32 %v7894_v40, 16  ;;  %v939_v58 = vshll.u32 %v7894_v40, 16  ;;  %v949_v12 = vshrl.u32 %v9367_v13, 16 }
  0x50   : > { %v8084_v59 = vcombine.low %v743_v30, %v746_v56  ;;  %v965_v60 = vrot.slane %v963_v53, 5  ;;  %v8100_v61 = vcombine.low %v7894_v40, %v9367_v13  ;;  %v969_v63 = vshll.u32 %v7897_v47, 16 }
  0x51   : > { %v938_v2 = vrot.slane %v936_v57, 4  ;;  %v941_v4 = vrot.slane %v939_v58, 5  ;;  %v975_v5 = vrot.slane %v973_v54, 4  ;;  %v979_v6 = vshll.u32 %v7925_v55, 16  ;;  %v9422_v54 = vld [vmem:[%s9171_s9 + $0x44] sm:$0x1] }
  0x52   : > { %2252 = vrot.lane.b32.xlu0 %v8084_v59, %s9079_s12  ;;  %v966_v8 = vor.u32 %v965_v60, %v962_v52  ;;  %v971_v10 = vrot.slane %v969_v63, 5  ;;  %v945_v11 = vshll.u32 %v9367_v13, 16  ;;  %v951_v14 = vrot.slane %v949_v12, 4  ;;  %v9426_v58 = vld [vmem:[%s9171_s9 + $0x38] sm:$0x1] }
  0x53   : > { %2254 = vrot.lane.b32.xlu1 %v8085_v26, %s9079_s12  ;;  %v981_v16 = vrot.slane %v979_v6, 5  ;;  %v942_v18 = vor.u32 %v941_v4, %v938_v2  ;;  %v955_v21 = vshll.u32 %v7924_v0, 16  ;;  %v7957_v22 = vrot.slane %v7941_v20, 9  ;;  %v232_v63 = vld [vmem:[%s9171_s9 + $0x30] sm:$0xf] }
  0x54   : > { %v967_v23 = vrot.slane %v966_v8, 4  ;;  %v976_v24 = vor.u32 %v975_v5, %v971_v10  ;;  %v947_v25 = vrot.slane %v945_v11, 5  ;;  %v1358_v27 = vrot.slane %v7897_v47, 5  ;;  %v9437_v11 = vld [vmem:[%s9171_s9 + $0x34] sm:$0xf] }
  0x55   : > { %v943_v28 = vrot.slane %v942_v18, 4  ;;  %v957_v29 = vrot.slane %v955_v21, 5  ;;  %v1361_v31 = vrot.slane %v7925_v55, 5  ;;  %v7956_v32 = vrot.slane %v7940_v15, 9  ;;  %v9440_v18 = vld [vmem:[%s9171_s9 + $0x38] sm:$0x1] }
  0x56   : > { %2348 = vrot.lane.b32.xlu0 %v8100_v61, %s9077_s10  ;;  %v972_v35 = vsel %vm9239_vm5, %v967_v23, %v971_v10  ;;  %v977_v36 = vrot.slane %v976_v24, 4  ;;  %v952_v34 = vor.u32 %v951_v14, %v947_v25  ;;  %v1359_v3 = vsel %vm9195_vm2, %v7957_v22, %v1358_v27 }
  0x57   : > { %2350 = vrot.lane.b32.xlu1 %v8101_v45, %s9077_s10  ;;  %v948_v37 = vsel %vm9239_vm5, %v943_v28, %v947_v25  ;;  %v1360_v38 = vrot.slane %v1358_v27, 4  ;;  %v1351_v62 = vrot.slane %v9367_v13, 5  ;;  %v1354_v39 = vrot.slane %v7924_v0, 5  ;;  %v8020_v27 = vld [vmem:[%s9171_s9 + $0x30] sm:$0xe] }
  0x58   : > { %v982_v41 = vsel %vm9239_vm5, %v977_v36, %v981_v16  ;;  %v953_v42 = vrot.slane %v952_v34, 4  ;;  %v1569_v44 = vshrl.u32 %v9387_v33, 16  ;;  %v1572_v46 = vshll.u32 %v9387_v33, 16 }
  0x59   : > { %v8117_v1 = vcombine.low %v972_v35, %v982_v41  ;;  %v1362_v47 = vsel %vm9195_vm2, %v1360_v38, %v1361_v31  ;;  %v1352_v48 = vsel %vm9195_vm2, %v7956_v32, %v1351_v62  ;;  %v1353_v7 = vrot.slane %v1351_v62, 4 }
  0x5a   : > { %v958_v40 = vsel %vm9239_vm5, %v953_v42, %v957_v29  ;;  %v8133_v13 = vcombine.low %v1359_v3, %v1362_v47  ;;  %v1571_v50 = vrot.slane %v1569_v44, 4  ;;  %v1574_v26 = vrot.slane %v1572_v46, 5 }
  0x5b   : > { %2430 = vrot.lane.b32.xlu1 %v8117_v1, %s9081_s14  ;;  %v8116_v30 = vcombine.low %v948_v37, %v958_v40  ;;  %v1355_v51 = vsel %vm9195_vm2, %v1353_v7, %v1354_v39  ;;  %v1582_v52 = vshrl.u32 %v9401_v43, 16  ;;  %v8149_v53 = vcombine.low %v9387_v33, %v9401_v43  ;;  %v234_v39 = vld [vmem:[%s9171_s9 + $0x3c] sm:$0xf]  ;;  %v235_v1 = vld [vmem:[%s9171_s9 + $0x40] sm:$0xf] }
  0x5c   : > { %v8132_v45 = vcombine.low %v1352_v48, %v1355_v51  ;;  %v1545_v55 = vshrl.u32 %v7974_v9, 16  ;;  %v1548_v56 = vshll.u32 %v7974_v9, 16  ;;  %v1558_v57 = vshrl.u32 %v9411_v49, 16 }
  0x5d   : > { %2428 = vrot.lane.b32.xlu0 %v8116_v30, %s9081_s14  ;;  %v8148_v12 = vcombine.low %v7974_v9, %v9411_v49  ;;  %v1575_v59 = vor.u32 %v1574_v26, %v1571_v50  ;;  %v1578_v60 = vshll.u32 %v9401_v43, 16  ;;  %v1584_v61 = vrot.slane %v1582_v52, 4  ;;  %v261_v26 = vld [vmem:[%s9171_s9 + $0x44] sm:$0x1] }
  0x5e   : > { %v1547_v0 = vrot.slane %v1545_v55, 4  ;;  %v1550_v20 = vrot.slane %v1548_v56, 5  ;;  %v1588_v2 = vshll.u32 %v9422_v54, 16  ;;  %v1554_v4 = vshll.u32 %v9411_v49, 16  ;;  %v8021_v55 = vld [vmem:[%s9171_s9 + $0x3c] sm:$0xe] }
  0x5f   : > { %2510 = vrot.lane.b32.xlu1 %v8133_v13, %s9078_s11  ;;  %v1576_v5 = vrot.slane %v1575_v59, 4  ;;  %v1580_v6 = vrot.slane %v1578_v60, 5  ;;  %v1560_v8 = vrot.slane %v1558_v57, 4  ;;  %v1564_v10 = vshll.u32 %v9426_v58, 16 }
  0x60   : > { %v1590_v14 = vrot.slane %v1588_v2, 5  ;;  %v1551_v15 = vor.u32 %v1550_v20, %v1547_v0  ;;  %v1556_v16 = vrot.slane %v1554_v4, 5  ;;  %v372_v21 = vshrl.u32 %v232_v63, 16 }
  0x61   : > { %2508 = vrot.lane.b32.xlu0 %v8132_v45, %s9078_s11  ;;  %v1581_v22 = vsel %vm9239_vm5, %v1576_v5, %v1580_v6  ;;  %v1585_v23 = vor.u32 %v1584_v61, %v1580_v6  ;;  %v1566_v24 = vrot.slane %v1564_v10, 5  ;;  %v375_v25 = vshll.u32 %v232_v63, 16  ;;  %v664_v63 = vld [vmem:[%s9171_s9 + $0x3c] sm:$0xe] }
  0x62   : > { %v1552_v28 = vrot.slane %v1551_v15, 4  ;;  %v1561_v29 = vor.u32 %v1560_v8, %v1556_v16  ;;  %v374_v31 = vrot.slane %v372_v21, 4  ;;  %v381_v32 = vshll.u32 %v9437_v11, 16 }
  0x63   : > { %2606 = vrot.lane.b32.xlu1 %v8149_v53, %s9082_s15  ;;  %v1586_v33 = vrot.slane %v1585_v23, 4  ;;  %v377_v35 = vrot.slane %v375_v25, 5  ;;  %v385_v36 = vshrl.u32 %v9437_v11, 16  ;;  %v391_v34 = vshll.u32 %v9440_v18, 16 }
  0x64   : > { %v1557_v3 = vsel %vm9239_vm5, %v1552_v28, %v1556_v16  ;;  %v1562_v37 = vrot.slane %v1561_v29, 4  ;;  %v383_v38 = vrot.slane %v381_v32, 5  ;;  %v8036_v62 = vrot.slane %v8020_v27, 9 }
  0x65   : > { %2604 = vrot.lane.b32.xlu0 %v8148_v12, %s9082_s15  ;;  %v1591_v41 = vsel %vm9239_vm5, %v1586_v33, %v1590_v14  ;;  %v378_v42 = vor.u32 %v377_v35, %v374_v31  ;;  %v387_v44 = vrot.slane %v385_v36, 4  ;;  %v393_v46 = vrot.slane %v391_v34, 5  ;;  %v663_v14 = vld [vmem:[%s9171_s9 + $0x30] sm:$0xe]  ;;  %v7901_v34 = vld [vmem:[%s9171_s9 + $0x4c] sm:$0xf] }
  0x66   : > { %v8165_v47 = vcombine.low %v1581_v22, %v1591_v41  ;;  %v1567_v48 = vsel %vm9239_vm5, %v1562_v37, %v1566_v24  ;;  %v1960_v7 = vrot.slane %v9411_v49, 5  ;;  %v1963_v9 = vrot.slane %v9426_v58, 5  ;;  %v9500_v41 = vld [vmem:[%s9171_s9 + $0x40] sm:$0xf] }
  0x67   : > { %v8164_v40 = vcombine.low %v1557_v3, %v1567_v48  ;;  %v379_v13 = vrot.slane %v378_v42, 4  ;;  %v388_v50 = vor.u32 %v387_v44, %v383_v38  ;;  %v396_v30 = vshrl.u32 %v234_v39, 16 }
  0x68   : > { %2686 = vrot.lane.b32.xlu1 %v8165_v47, %s9083_s16  ;;  %v1961_v51 = vsel %vm9195_vm2, %v8036_v62, %v1960_v7  ;;  %v1962_v52 = vrot.slane %v1960_v7, 4  ;;  %v399_v53 = vshll.u32 %v234_v39, 16  ;;  %v405_v45 = vshll.u32 %v235_v1, 16  ;;  %v7898_v39 = vld [vmem:[%s9171_s9 + $0x3c] sm:$0xf] }
  0x69   : > { %2684 = vrot.lane.b32.xlu0 %v8164_v40, %s9083_s16  ;;  %v384_v49 = vsel %vm9239_vm5, %v379_v13, %v383_v38  ;;  %v389_v56 = vrot.slane %v388_v50, 4  ;;  %v398_v57 = vrot.slane %v396_v30, 4  ;;  %v409_v58 = vshrl.u32 %v235_v1, 16  ;;  %v7927_v7 = vld [vmem:[%s9171_s9 + $0x50] sm:$0x1] }
  0x6a   : > { %v1964_v12 = vsel %vm9195_vm2, %v1962_v52, %v1963_v9  ;;  %v401_v59 = vrot.slane %v399_v53, 5  ;;  %v407_v60 = vrot.slane %v405_v45, 5  ;;  %v415_v61 = vshll.u32 %v261_v26, 16  ;;  %v7926_v53 = vld [vmem:[%s9171_s9 + $0x44] sm:$0x1] }
  0x6b   : > { %v394_v0 = vsel %vm9239_vm5, %v389_v56, %v393_v46  ;;  %v8180_v20 = vcombine.low %v1961_v51, %v1964_v12  ;;  %v411_v2 = vrot.slane %v409_v58, 4  ;;  %v8037_v4 = vrot.slane %v8021_v55, 9  ;;  %v7943_v45 = vld [vmem:[%s9171_s9 + $0x48] sm:$0xe] }
  0x6c   : > { %v8070_v5 = vcombine.low %v384_v49, %v394_v0  ;;  %v402_v6 = vor.u32 %v401_v59, %v398_v57  ;;  %v417_v8 = vrot.slane %v415_v61, 5  ;;  %v1967_v10 = vrot.slane %v9401_v43, 5  ;;  %v9482_v43 = vld [vmem:[%s9171_s9 + $0x48] sm:$0xf]  ;;  %v7942_v61 = vld [vmem:[%s9171_s9 + $0x3c] sm:$0xe] }
  0x6d   : > { %2764 = vrot.lane.b32.xlu0 %v8180_v20, %s9084_s25  ;;  %v412_v15 = vor.u32 %v411_v2, %v407_v60  ;;  %v1970_v16 = vrot.slane %v9422_v54, 5  ;;  %v7879_v21 = vrot.slane %v664_v63, 9  ;;  %v763_v22 = vrot.slane %v235_v1, 5 }
  0x6e   : > { %2176 = vrot.lane.b32.xlu1 %v8070_v5, %s9080_s13  ;;  %v403_v23 = vrot.slane %v402_v6, 4  ;;  %v1968_v24 = vsel %vm9195_vm2, %v8037_v4, %v1967_v10  ;;  %v1969_v25 = vrot.slane %v1967_v10, 4  ;;  %v766_v27 = vrot.slane %v261_v26, 5 }
  0x6f   : > { %v413_v28 = vrot.slane %v412_v15, 4  ;;  %v764_v29 = vsel %vm9195_vm2, %v7879_v21, %v763_v22  ;;  %v765_v54 = vrot.slane %v763_v22, 4  ;;  %v7878_v31 = vrot.slane %v663_v14, 9  ;;  %v9520_v21 = vld [vmem:[%s9171_s9 + $0x54] sm:$0xf] }
  0x70   : > { %v408_v32 = vsel %vm9239_vm5, %v403_v23, %v407_v60  ;;  %v1971_v33 = vsel %vm9195_vm2, %v1969_v25, %v1970_v16  ;;  %v756_v35 = vrot.slane %v9437_v11, 5  ;;  %v759_v36 = vrot.slane %v9440_v18, 5 }
  0x71   : > { %v418_v3 = vsel %vm9239_vm5, %v413_v28, %v417_v8  ;;  %v8181_v37 = vcombine.low %v1968_v24, %v1971_v33  ;;  %v767_v38 = vsel %vm9195_vm2, %v765_v54, %v766_v27  ;;  %v1008_v62 = vshrl.u32 %v9482_v43, 16 }
  0x72   : > { %v8071_v42 = vcombine.low %v408_v32, %v418_v3  ;;  %v8087_v44 = vcombine.low %v764_v29, %v767_v38  ;;  %v757_v11 = vsel %vm9195_vm2, %v7878_v31, %v756_v35  ;;  %v758_v18 = vrot.slane %v756_v35, 4  ;;  %v9534_v32 = vld [vmem:[%s9171_s9 + $0x58] sm:$0xf]  ;;  %v7978_v38 = vld [vmem:[%s9171_s9 + $0x48] sm:$0xf] }
  0x73   : > { %2766 = vrot.lane.b32.xlu0 %v8181_v37, %s9084_s25  ;;  %v1010_v46 = vrot.slane %v1008_v62, 4  ;;  %v1011_v1 = vshll.u32 %v9482_v43, 16  ;;  %v1021_v47 = vshrl.u32 %v7901_v34, 16  ;;  %v8103_v48 = vcombine.low %v9482_v43, %v7901_v34  ;;  %v9544_v62 = vld [vmem:[%s9171_s9 + $0x4c] sm:$0xf] }
  0x74   : > { %2178 = vrot.lane.b32.xlu1 %v8071_v42, %s9080_s13  ;;  %v760_v9 = vsel %vm9195_vm2, %v758_v18, %v759_v36  ;;  %v984_v40 = vshrl.u32 %v7898_v39, 16  ;;  %v987_v13 = vshll.u32 %v7898_v39, 16  ;;  %v997_v50 = vshrl.u32 %v9500_v41, 16 }
  0x75   : > { %v8086_v26 = vcombine.low %v757_v11, %v760_v9  ;;  %v1013_v30 = vrot.slane %v1011_v1, 5  ;;  %v8102_v51 = vcombine.low %v7898_v39, %v9500_v41  ;;  %v1017_v52 = vshll.u32 %v7901_v34, 16 }
  0x76   : > { %v986_v55 = vrot.slane %v984_v40, 4  ;;  %v989_v49 = vrot.slane %v987_v13, 5  ;;  %v1023_v56 = vrot.slane %v1021_v47, 4  ;;  %v1027_v57 = vshll.u32 %v7927_v7, 16  ;;  %v9555_v47 = vld [vmem:[%s9171_s9 + $0x5c] sm:$0x1] }
  0x77   : > { %2256 = vrot.lane.b32.xlu0 %v8086_v26, %s9079_s12  ;;  %v1014_v58 = vor.u32 %v1013_v30, %v1010_v46  ;;  %v1019_v12 = vrot.slane %v1017_v52, 5  ;;  %v993_v59 = vshll.u32 %v9500_v41, 16  ;;  %v999_v60 = vrot.slane %v997_v50, 4  ;;  %v9559_v13 = vld [vmem:[%s9171_s9 + $0x50] sm:$0x1] }
  0x78   : > { %2258 = vrot.lane.b32.xlu1 %v8087_v44, %s9079_s12  ;;  %v1029_v63 = vrot.slane %v1027_v57, 5  ;;  %v990_v0 = vor.u32 %v989_v49, %v986_v55  ;;  %v1003_v20 = vshll.u32 %v7926_v53, 16  ;;  %v7959_v2 = vrot.slane %v7943_v45, 9  ;;  %v236_v52 = vld [vmem:[%s9171_s9 + $0x48] sm:$0xf] }
  0x79   : > { %v1015_v4 = vrot.slane %v1014_v58, 4  ;;  %v1024_v5 = vor.u32 %v1023_v56, %v1019_v12  ;;  %v995_v6 = vrot.slane %v993_v59, 5  ;;  %v1372_v8 = vrot.slane %v7901_v34, 5  ;;  %v9570_v59 = vld [vmem:[%s9171_s9 + $0x4c] sm:$0xf] }
  0x7a   : > { %v991_v10 = vrot.slane %v990_v0, 4  ;;  %v1005_v14 = vrot.slane %v1003_v20, 5  ;;  %v1375_v15 = vrot.slane %v7927_v7, 5  ;;  %v7958_v16 = vrot.slane %v7942_v61, 9  ;;  %v9573_v0 = vld [vmem:[%s9171_s9 + $0x50] sm:$0x1] }
  0x7b   : > { %2352 = vrot.lane.b32.xlu0 %v8102_v51, %s9077_s10  ;;  %v1020_v22 = vsel %vm9239_vm5, %v1015_v4, %v1019_v12  ;;  %v1025_v23 = vrot.slane %v1024_v5, 4  ;;  %v1000_v24 = vor.u32 %v999_v60, %v995_v6  ;;  %v1373_v25 = vsel %vm9195_vm2, %v7959_v2, %v1372_v8 }
  0x7c   : > { %2354 = vrot.lane.b32.xlu1 %v8103_v48, %s9077_s10  ;;  %v996_v27 = vsel %vm9239_vm5, %v991_v10, %v995_v6  ;;  %v1374_v43 = vrot.slane %v1372_v8, 4  ;;  %v1365_v28 = vrot.slane %v9500_v41, 5  ;;  %v1368_v29 = vrot.slane %v7926_v53, 5  ;;  %v8022_v8 = vld [vmem:[%s9171_s9 + $0x48] sm:$0xe] }
  0x7d   : > { %v1030_v54 = vsel %vm9239_vm5, %v1025_v23, %v1029_v63  ;;  %v1001_v31 = vrot.slane %v1000_v24, 4  ;;  %v1617_v33 = vshrl.u32 %v9520_v21, 16  ;;  %v1620_v35 = vshll.u32 %v9520_v21, 16 }
  0x7e   : > { %v8119_v36 = vcombine.low %v1020_v22, %v1030_v54  ;;  %v1376_v34 = vsel %vm9195_vm2, %v1374_v43, %v1375_v15  ;;  %v1366_v3 = vsel %vm9195_vm2, %v7958_v16, %v1365_v28  ;;  %v1367_v37 = vrot.slane %v1365_v28, 4 }
  0x7f   : > { %v1006_v39 = vsel %vm9239_vm5, %v1001_v31, %v1005_v14  ;;  %v8135_v41 = vcombine.low %v1373_v25, %v1376_v34  ;;  %v1619_v42 = vrot.slane %v1617_v33, 4  ;;  %v1622_v44 = vrot.slane %v1620_v35, 5 }
  0x80   : > { %2434 = vrot.lane.b32.xlu1 %v8119_v36, %s9081_s14  ;;  %v8118_v11 = vcombine.low %v996_v27, %v1006_v39  ;;  %v1369_v18 = vsel %vm9195_vm2, %v1367_v37, %v1368_v29  ;;  %v1630_v46 = vshrl.u32 %v9534_v32, 16  ;;  %v8151_v1 = vcombine.low %v9520_v21, %v9534_v32  ;;  %v238_v29 = vld [vmem:[%s9171_s9 + $0x54] sm:$0xf]  ;;  %v239_v36 = vld [vmem:[%s9171_s9 + $0x58] sm:$0xf] }
  0x81   : > { %v8134_v48 = vcombine.low %v1366_v3, %v1369_v18  ;;  %v1593_v7 = vshrl.u32 %v7978_v38, 16  ;;  %v1596_v9 = vshll.u32 %v7978_v38, 16  ;;  %v1606_v40 = vshrl.u32 %v9544_v62, 16 }
  0x82   : > { %2432 = vrot.lane.b32.xlu0 %v8118_v11, %s9081_s14  ;;  %v8150_v50 = vcombine.low %v7978_v38, %v9544_v62  ;;  %v1623_v26 = vor.u32 %v1622_v44, %v1619_v42  ;;  %v1626_v30 = vshll.u32 %v9534_v32, 16  ;;  %v1632_v51 = vrot.slane %v1630_v46, 4  ;;  %v263_v44 = vld [vmem:[%s9171_s9 + $0x5c] sm:$0x1] }
  0x83   : > { %v1595_v53 = vrot.slane %v1593_v7, 4  ;;  %v1598_v45 = vrot.slane %v1596_v9, 5  ;;  %v1636_v55 = vshll.u32 %v9555_v47, 16  ;;  %v1602_v49 = vshll.u32 %v9544_v62, 16  ;;  %v8023_v7 = vld [vmem:[%s9171_s9 + $0x54] sm:$0xe] }
  0x84   : > { %2514 = vrot.lane.b32.xlu1 %v8135_v41, %s9078_s11  ;;  %v1624_v56 = vrot.slane %v1623_v26, 4  ;;  %v1628_v57 = vrot.slane %v1626_v30, 5  ;;  %v1608_v58 = vrot.slane %v1606_v40, 4  ;;  %v1612_v12 = vshll.u32 %v9559_v13, 16 }
  0x85   : > { %v1638_v60 = vrot.slane %v1636_v55, 5  ;;  %v1599_v61 = vor.u32 %v1598_v45, %v1595_v53  ;;  %v1604_v63 = vrot.slane %v1602_v49, 5  ;;  %v420_v20 = vshrl.u32 %v236_v52, 16 }
  0x86   : > { %2512 = vrot.lane.b32.xlu0 %v8134_v48, %s9078_s11  ;;  %v1629_v2 = vsel %vm9239_vm5, %v1624_v56, %v1628_v57  ;;  %v1633_v4 = vor.u32 %v1632_v51, %v1628_v57  ;;  %v1614_v5 = vrot.slane %v1612_v12, 5  ;;  %v423_v6 = vshll.u32 %v236_v52, 16  ;;  %v666_v52 = vld [vmem:[%s9171_s9 + $0x54] sm:$0xe] }
  0x87   : > { %v1600_v10 = vrot.slane %v1599_v61, 4  ;;  %v1609_v14 = vor.u32 %v1608_v58, %v1604_v63  ;;  %v422_v15 = vrot.slane %v420_v20, 4  ;;  %v429_v16 = vshll.u32 %v9570_v59, 16 }
  0x88   : > { %2610 = vrot.lane.b32.xlu1 %v8151_v1, %s9082_s15  ;;  %v1634_v21 = vrot.slane %v1633_v4, 4  ;;  %v425_v22 = vrot.slane %v423_v6, 5  ;;  %v433_v23 = vshrl.u32 %v9570_v59, 16  ;;  %v439_v24 = vshll.u32 %v9573_v0, 16 }
  0x89   : > { %v1605_v25 = vsel %vm9239_vm5, %v1600_v10, %v1604_v63  ;;  %v1610_v27 = vrot.slane %v1609_v14, 4  ;;  %v431_v43 = vrot.slane %v429_v16, 5  ;;  %v8038_v28 = vrot.slane %v8022_v8, 9  ;;  %v9615_v10 = vld [vmem:[%s9171_s9 + $0x60] sm:$0xf] }
  0x8a   : > { %2608 = vrot.lane.b32.xlu0 %v8150_v50, %s9082_s15  ;;  %v1639_v54 = vsel %vm9239_vm5, %v1634_v21, %v1638_v60  ;;  %v426_v31 = vor.u32 %v425_v22, %v422_v15  ;;  %v435_v33 = vrot.slane %v433_v23, 4  ;;  %v441_v35 = vrot.slane %v439_v24, 5  ;;  %v665_v60 = vld [vmem:[%s9171_s9 + $0x48] sm:$0xe] }
  0x8b   : > { %v8167_v34 = vcombine.low %v1629_v2, %v1639_v54  ;;  %v1615_v3 = vsel %vm9239_vm5, %v1610_v27, %v1614_v5  ;;  %v1974_v37 = vrot.slane %v9544_v62, 5  ;;  %v1977_v38 = vrot.slane %v9559_v13, 5  ;;  %v7902_v54 = vld [vmem:[%s9171_s9 + $0x54] sm:$0xf] }
  0x8c   : > { %v8166_v39 = vcombine.low %v1605_v25, %v1615_v3  ;;  %v427_v41 = vrot.slane %v426_v31, 4  ;;  %v436_v42 = vor.u32 %v435_v33, %v431_v43  ;;  %v444_v11 = vshrl.u32 %v238_v29, 16  ;;  %v9628_v25 = vld [vmem:[%s9171_s9 + $0x64] sm:$0xf]  ;;  %v9637_v31 = vld [vmem:[%s9171_s9 + $0x58] sm:$0xf] }
  0x8d   : > { %2690 = vrot.lane.b32.xlu1 %v8167_v34, %s9083_s16  ;;  %v1975_v18 = vsel %vm9195_vm2, %v8038_v28, %v1974_v37  ;;  %v1976_v46 = vrot.slane %v1974_v37, 4  ;;  %v447_v1 = vshll.u32 %v238_v29, 16  ;;  %v453_v48 = vshll.u32 %v239_v36, 16 }
  0x8e   : > { %2688 = vrot.lane.b32.xlu0 %v8166_v39, %s9083_s16  ;;  %v432_v62 = vsel %vm9239_vm5, %v427_v41, %v431_v43  ;;  %v437_v9 = vrot.slane %v436_v42, 4  ;;  %v446_v40 = vrot.slane %v444_v11, 4  ;;  %v457_v13 = vshrl.u32 %v239_v36, 16 }
  0x8f   : > { %v1978_v50 = vsel %vm9195_vm2, %v1976_v46, %v1977_v38  ;;  %v449_v26 = vrot.slane %v447_v1, 5  ;;  %v455_v30 = vrot.slane %v453_v48, 5  ;;  %v463_v51 = vshll.u32 %v263_v44, 16  ;;  %v7929_v38 = vld [vmem:[%s9171_s9 + $0x68] sm:$0x1] }
  0x90   : > { %v442_v53 = vsel %vm9239_vm5, %v437_v9, %v441_v35  ;;  %v8182_v45 = vcombine.low %v1975_v18, %v1978_v50  ;;  %v459_v55 = vrot.slane %v457_v13, 4  ;;  %v8039_v49 = vrot.slane %v8023_v7, 9  ;;  %v7928_v7 = vld [vmem:[%s9171_s9 + $0x5c] sm:$0x1] }
  0x91   : > { %v8072_v56 = vcombine.low %v432_v62, %v442_v53  ;;  %v450_v57 = vor.u32 %v449_v26, %v446_v40  ;;  %v465_v58 = vrot.slane %v463_v51, 5  ;;  %v1981_v12 = vrot.slane %v9534_v32, 5  ;;  %v9619_v16 = vpop.permute.xlu1 %2346  ;;  %v7945_v62 = vld [vmem:[%s9171_s9 + $0x60] sm:$0xe] }
  0x92   : > { %2768 = vrot.lane.b32.xlu0 %v8182_v45, %s9084_s25  ;;  %v460_v61 = vor.u32 %v459_v55, %v455_v30  ;;  %v1984_v63 = vrot.slane %v9555_v47, 5  ;;  %v7881_v20 = vrot.slane %v666_v52, 9  ;;  %v777_v2 = vrot.slane %v239_v36, 5  ;;  %v9651_v11 = vpop.permute.xlu0 %2344  ;;  %v7944_v45 = vld [vmem:[%s9171_s9 + $0x54] sm:$0xe] }
  0x93   : > { %2180 = vrot.lane.b32.xlu1 %v8072_v56, %s9080_s13  ;;  %v451_v4 = vrot.slane %v450_v57, 4  ;;  %v1982_v5 = vsel %vm9195_vm2, %v8039_v49, %v1981_v12  ;;  %v1983_v6 = vrot.slane %v1981_v12, 4  ;;  %v780_v8 = vrot.slane %v263_v44, 5 }
  0x94   : > { %v461_v32 = vrot.slane %v460_v61, 4  ;;  %v778_v14 = vsel %vm9195_vm2, %v7881_v20, %v777_v2  ;;  %v779_v47 = vrot.slane %v777_v2, 4  ;;  %v7880_v15 = vrot.slane %v665_v60, 9 }
  0x95   : > { %v456_v21 = vsel %vm9239_vm5, %v451_v4, %v455_v30  ;;  %v1985_v22 = vsel %vm9195_vm2, %v1983_v6, %v1984_v63  ;;  %v770_v23 = vrot.slane %v9570_v59, 5  ;;  %v773_v24 = vrot.slane %v9573_v0, 5  ;;  %v9667_v6 = vld [vmem:[%s9171_s9 + $0x6c] sm:$0xf] }
  0x96   : > { %v466_v27 = vsel %vm9239_vm5, %v461_v32, %v465_v58  ;;  %v8183_v43 = vcombine.low %v1982_v5, %v1985_v22  ;;  %v781_v28 = vsel %vm9195_vm2, %v779_v47, %v780_v8  ;;  %v1056_v29 = vshrl.u32 %v9615_v10, 16 }
  0x97   : > { %v8073_v33 = vcombine.low %v456_v21, %v466_v27  ;;  %v8089_v35 = vcombine.low %v778_v14, %v781_v28  ;;  %v771_v59 = vsel %vm9195_vm2, %v7880_v15, %v770_v23  ;;  %v772_v0 = vrot.slane %v770_v23, 4  ;;  %v9683_v27 = vld [vmem:[%s9171_s9 + $0x70] sm:$0xf] }
  0x98   : > { %2770 = vrot.lane.b32.xlu0 %v8183_v43, %s9084_s25  ;;  %v1058_v36 = vrot.slane %v1056_v29, 4  ;;  %v1059_v34 = vshll.u32 %v9615_v10, 16  ;;  %v1069_v3 = vshrl.u32 %v9628_v25, 16  ;;  %v8105_v37 = vcombine.low %v9615_v10, %v9628_v25 }
  0x99   : > { %2182 = vrot.lane.b32.xlu1 %v8073_v33, %s9080_s13  ;;  %v774_v39 = vsel %vm9195_vm2, %v772_v0, %v773_v24  ;;  %v1032_v41 = vshrl.u32 %v7902_v54, 16  ;;  %v1035_v42 = vshll.u32 %v7902_v54, 16  ;;  %v1045_v44 = vshrl.u32 %v9637_v31, 16  ;;  %v9669_v8 = vpop.permute.xlu0 %2504 }
  0x9a   : > { %v8088_v18 = vcombine.low %v771_v59, %v774_v39  ;;  %v1061_v46 = vrot.slane %v1059_v34, 5  ;;  %v8104_v1 = vcombine.low %v7902_v54, %v9637_v31  ;;  %v1065_v48 = vshll.u32 %v9628_v25, 16  ;;  %v9657_v9 = vpop.permute.xlu1 %2248  ;;  %v9695_v59 = vld [vmem:[%s9171_s9 + $0x64] sm:$0xf] }
  0x9b   : > { %v1034_v40 = vrot.slane %v1032_v41, 4  ;;  %v1037_v13 = vrot.slane %v1035_v42, 5  ;;  %v1071_v50 = vrot.slane %v1069_v3, 4  ;;  %v1075_v26 = vshll.u32 %v7929_v38, 16 }
  0x9c   : > { %2260 = vrot.lane.b32.xlu0 %v8088_v18, %s9079_s12  ;;  %v1062_v30 = vor.u32 %v1061_v46, %v1058_v36  ;;  %v1067_v51 = vrot.slane %v1065_v48, 5  ;;  %v1041_v52 = vshll.u32 %v9637_v31, 16  ;;  %v1047_v53 = vrot.slane %v1045_v44, 4  ;;  %v9708_v44 = vld [vmem:[%s9171_s9 + $0x74] sm:$0x1] }
  0x9d   : > { %2262 = vrot.lane.b32.xlu1 %v8089_v35, %s9079_s12  ;;  %v1077_v55 = vrot.slane %v1075_v26, 5  ;;  %v1038_v49 = vor.u32 %v1037_v13, %v1034_v40  ;;  %v1051_v56 = vshll.u32 %v7928_v7, 16  ;;  %v7961_v57 = vrot.slane %v7945_v62, 9  ;;  %v9692_v35 = vld [vmem:[%s9171_s9 + $0x60] sm:$0xf] }
  0x9e   : > { %v1063_v58 = vrot.slane %v1062_v30, 4  ;;  %v1072_v12 = vor.u32 %v1071_v50, %v1067_v51  ;;  %v1043_v60 = vrot.slane %v1041_v52, 5  ;;  %v1386_v61 = vrot.slane %v9628_v25, 5  ;;  %v9664_v63 = vpop.permute.xlu1 %2250  ;;  %v9714_v62 = vld [vmem:[%s9171_s9 + $0x68] sm:$0x1] }
  0x9f   : > { %v1039_v20 = vrot.slane %v1038_v49, 4  ;;  %v1053_v2 = vrot.slane %v1051_v56, 5  ;;  %v1389_v4 = vrot.slane %v7929_v38, 5  ;;  %v7960_v5 = vrot.slane %v7944_v45, 9 }
  0xa0   : > { %2356 = vrot.lane.b32.xlu0 %v8104_v1, %s9077_s10  ;;  %v1068_v10 = vsel %vm9239_vm5, %v1063_v58, %v1067_v51  ;;  %v1073_v32 = vrot.slane %v1072_v12, 4  ;;  %v1048_v14 = vor.u32 %v1047_v53, %v1043_v60  ;;  %v1387_v47 = vsel %vm9195_vm2, %v7961_v57, %v1386_v61 }
  0xa1   : > { %2358 = vrot.lane.b32.xlu1 %v8105_v37, %s9077_s10  ;;  %v1044_v15 = vsel %vm9239_vm5, %v1039_v20, %v1043_v60  ;;  %v1388_v21 = vrot.slane %v1386_v61, 4  ;;  %v1379_v22 = vrot.slane %v9637_v31, 5  ;;  %v1382_v23 = vrot.slane %v7928_v7, 5  ;;  %v8959_v61 = vld [vmem:[%s9171_s9 + $0x4] sm:$0xf] }
  0xa2   : > { %v1078_v24 = vsel %vm9239_vm5, %v1073_v32, %v1077_v55  ;;  %v1049_v25 = vrot.slane %v1048_v14, 4  ;;  %v1665_v43 = vshrl.u32 %v9667_v6, 16  ;;  %v1668_v28 = vshll.u32 %v9667_v6, 16  ;;  %v9699_v37 = vpop.permute.xlu1 %2506  ;;  %v8960_v20 = vld [vmem:[%s9171_s9] sm:$0xf] }
  0xa3   : > { %v8121_v29 = vcombine.low %v1068_v10, %v1078_v24  ;;  %v1390_v54 = vsel %vm9195_vm2, %v1388_v21, %v1389_v4  ;;  %v1380_v33 = vsel %vm9195_vm2, %v7960_v5, %v1379_v22  ;;  %v1381_v31 = vrot.slane %v1379_v22, 4  ;;  %v240_v4 = vld [vmem:[%s9171_s9 + $0x60] sm:$0xf]  ;;  %v9735_v14 = vld [vmem:[%s9171_s9 + $0x64] sm:$0xf] }
  0xa4   : > { %v1054_v0 = vsel %vm9239_vm5, %v1049_v25, %v1053_v2  ;;  %v8137_v36 = vcombine.low %v1387_v47, %v1390_v54  ;;  %v1667_v34 = vrot.slane %v1665_v43, 4  ;;  %v1670_v3 = vrot.slane %v1668_v28, 5  ;;  %v9739_v22 = vld [vmem:[%s9171_s9 + $0x68] sm:$0x1] }
  0xa5   : > { %2438 = vrot.lane.b32.xlu1 %v8121_v29, %s9081_s14  ;;  %v8120_v38 = vcombine.low %v1044_v15, %v1054_v0  ;;  %v1383_v39 = vsel %vm9195_vm2, %v1381_v31, %v1382_v23  ;;  %v1678_v41 = vshrl.u32 %v9683_v27, 16  ;;  %v8153_v42 = vcombine.low %v9667_v6, %v9683_v27  ;;  %v2169_v18 = vpop.permute.xlu0 %2168 }
  0xa6   : > { %v8136_v46 = vcombine.low %v1380_v33, %v1383_v39  ;;  %v1641_v1 = vshrl.u32 %v9692_v35, 16  ;;  %v1644_v48 = vshll.u32 %v9692_v35, 16  ;;  %v1654_v7 = vshrl.u32 %v9695_v59, 16 }
  0xa7   : > { %2436 = vrot.lane.b32.xlu0 %v8120_v38, %s9081_s14  ;;  %v8152_v40 = vcombine.low %v9692_v35, %v9695_v59  ;;  %v1671_v13 = vor.u32 %v1670_v3, %v1667_v34  ;;  %v1674_v50 = vshll.u32 %v9683_v27, 16  ;;  %v1680_v26 = vrot.slane %v1678_v41, 4  ;;  %v8024_v35 = vld [vmem:[%s9171_s9 + $0x60] sm:$0xe] }
  0xa8   : > { %v1643_v30 = vrot.slane %v1641_v1, 4  ;;  %v1646_v51 = vrot.slane %v1644_v48, 5  ;;  %v1684_v52 = vshll.u32 %v9708_v44, 16  ;;  %v1650_v53 = vshll.u32 %v9695_v59, 16 }
  0xa9   : > { %2518 = vrot.lane.b32.xlu1 %v8137_v36, %s9078_s11  ;;  %v1672_v45 = vrot.slane %v1671_v13, 4  ;;  %v1676_v55 = vrot.slane %v1674_v50, 5  ;;  %v1656_v49 = vrot.slane %v1654_v7, 4  ;;  %v1660_v56 = vshll.u32 %v9714_v62, 16  ;;  %v9724_v57 = vpop.permute.xlu0 %2170 }
  0xaa   : > { %v1686_v58 = vrot.slane %v1684_v52, 5  ;;  %v1647_v12 = vor.u32 %v1646_v51, %v1643_v30  ;;  %v1652_v60 = vrot.slane %v1650_v53, 5  ;;  %v8050_v2 = vcombine.low %v8960_v20, %v8959_v61  ;;  %v9729_v5 = vpop.permute.xlu1 %2426  ;;  %v8961_v51 = vld [vmem:[%s9171_s9 + $0x10] sm:$0xf]  ;;  %v8962_v52 = vld [vmem:[%s9171_s9 + $0xc] sm:$0xf] }
  0xab   : > { %2516 = vrot.lane.b32.xlu0 %v8136_v46, %s9078_s11  ;;  %v1677_v6 = vsel %vm9239_vm5, %v1672_v45, %v1676_v55  ;;  %v1681_v10 = vor.u32 %v1680_v26, %v1676_v55  ;;  %v1662_v32 = vrot.slane %v1660_v56, 5  ;;  %v468_v25 = vshrl.u32 %v240_v4, 16  ;;  %v9763_v46 = vld [vmem:[%s9171_s9 + $0x70] sm:$0xf] }
  0xac   : > { %v1648_v47 = vrot.slane %v1647_v12, 4  ;;  %v1657_v15 = vor.u32 %v1656_v49, %v1652_v60  ;;  %v2795_v21 = vsel %vm2792_vm6, %v8050_v2, %v2169_v18  ;;  %v471_v43 = vshll.u32 %v240_v4, 16  ;;  %v242_v18 = vld [vmem:[%s9171_s9 + $0x6c] sm:$0xf] }
  0xad   : > { %2614 = vrot.lane.b32.xlu1 %v8153_v42, %s9082_s15  ;;  %v1682_v23 = vrot.slane %v1681_v10, 4  ;;  %v9744_v24 = vsel %vm2841_vm7, %v2795_v21, %v9657_v9  ;;  %v9746_v28 = vpop.permute.xlu0 %2424  ;;  %v477_v33 = vshll.u32 %v9735_v14, 16  ;;  %v481_v31 = vshrl.u32 %v9735_v14, 16 }
  0xae   : > { %v1653_v29 = vsel %vm9239_vm5, %v1648_v47, %v1652_v60  ;;  %v1658_v54 = vrot.slane %v1657_v15, 4  ;;  %v470_v0 = vrot.slane %v468_v25, 4  ;;  %v473_v36 = vrot.slane %v471_v43, 5  ;;  %v9757_v3 = vpop.permute.xlu1 %2602 }
  0xaf   : > { %2612 = vrot.lane.b32.xlu0 %v8152_v40, %s9082_s15  ;;  %v1687_v9 = vsel %vm9239_vm5, %v1682_v23, %v1686_v58  ;;  %v487_v34 = vshll.u32 %v9739_v22, 16  ;;  %v479_v41 = vrot.slane %v477_v33, 5  ;;  %v483_v42 = vrot.slane %v481_v31, 4 }
  0xb0   : > { %v8169_v38 = vcombine.low %v1677_v6, %v1687_v9  ;;  %v1663_v39 = vsel %vm9239_vm5, %v1658_v54, %v1662_v32  ;;  %v474_v48 = vor.u32 %v473_v36, %v470_v0  ;;  %v8040_v40 = vrot.slane %v8024_v35, 9  ;;  %v8025_v6 = vld [vmem:[%s9171_s9 + $0x6c] sm:$0xe] }
  0xb1   : > { %v8168_v1 = vcombine.low %v1653_v29, %v1663_v39  ;;  %v489_v7 = vrot.slane %v487_v34, 5  ;;  %v9765_v13 = vpop.permute.xlu0 %2600  ;;  %v484_v50 = vor.u32 %v483_v42, %v479_v41  ;;  %v1988_v26 = vrot.slane %v9695_v59, 5  ;;  %v668_v35 = vld [vmem:[%s9171_s9 + $0x6c] sm:$0xe] }
  0xb2   : > { %2694 = vrot.lane.b32.xlu1 %v8169_v38, %s9083_s16  ;;  %v1991_v30 = vrot.slane %v9714_v62, 5  ;;  %v8051_v53 = vcombine.low %v8962_v52, %v8961_v51  ;;  %v475_v45 = vrot.slane %v474_v48, 4  ;;  %v492_v55 = vshrl.u32 %v242_v18, 16  ;;  %v265_v62 = vld [vmem:[%s9171_s9 + $0x74] sm:$0x1] }
  0xb3   : > { %2692 = vrot.lane.b32.xlu0 %v8168_v1, %s9083_s16  ;;  %v495_v49 = vshll.u32 %v242_v18, 16  ;;  %v501_v56 = vshll.u32 %v9763_v46, 16  ;;  %v485_v58 = vrot.slane %v484_v50, 4  ;;  %v1989_v12 = vsel %vm9195_vm2, %v8040_v40, %v1988_v26 }
  0xb4   : > { %v1990_v60 = vrot.slane %v1988_v26, 4  ;;  %v2798_v59 = vsel %vm2792_vm6, %v8051_v53, %v9724_v57  ;;  %v480_v61 = vsel %vm9239_vm5, %v475_v45, %v479_v41  ;;  %v494_v2 = vrot.slane %v492_v55, 4  ;;  %v7908_v55 = vld [vmem:[%s9171_s9 + $0x78] sm:$0xf] }
  0xb5   : > { %v2845_v20 = vsel %vm2841_vm7, %v2798_v59, %v9664_v63  ;;  %v497_v4 = vrot.slane %v495_v49, 5  ;;  %v9784_v10 = vpop.permute.xlu1 %2682  ;;  %v490_v32 = vsel %vm9239_vm5, %v485_v58, %v489_v7  ;;  %v503_v57 = vrot.slane %v501_v56, 5  ;;  %v7906_v58 = vld [vmem:[%s9171_s9 + $0x6c] sm:$0xf] }
  0xb6   : > { %v1992_v47 = vsel %vm9195_vm2, %v1990_v60, %v1991_v30  ;;  %v505_v15 = vshrl.u32 %v9763_v46, 16  ;;  %v9791_v21 = vpop.permute.xlu0 %2680  ;;  %v8074_v23 = vcombine.low %v480_v61, %v490_v32  ;;  %v511_v43 = vshll.u32 %v265_v62, 16 }
  0xb7   : > { %v8184_v25 = vcombine.low %v1989_v12, %v1992_v47  ;;  %v498_v63 = vor.u32 %v497_v4, %v494_v2  ;;  %v8041_v54 = vrot.slane %v8025_v6, 9  ;;  %v1995_v33 = vrot.slane %v9683_v27, 5  ;;  %v667_v27 = vld [vmem:[%s9171_s9 + $0x60] sm:$0xe] }
  0xb8   : > { %v507_v29 = vrot.slane %v505_v15, 4  ;;  %v1998_v31 = vrot.slane %v9708_v44, 5  ;;  %2184 = vrot.lane.b32.xlu1 %v8074_v23, %s9080_s13  ;;  %v513_v0 = vrot.slane %v511_v43, 5  ;;  %v2878_v39 = vsel %vm2874_vm8, %v2845_v20, %v9619_v16  ;;  %v9856_v23 = vld [vmem:[%s9171_s9 + $0x80] sm:$0x1] }
  0xb9   : > { %2772 = vrot.lane.b32.xlu0 %v8184_v25, %s9084_s25  ;;  %v499_v9 = vrot.slane %v498_v63, 4  ;;  %v1996_v34 = vsel %vm9195_vm2, %v8041_v54, %v1995_v33  ;;  %v1997_v38 = vrot.slane %v1995_v33, 4  ;;  %v2911_v42 = vsel %vm2907_vm9, %v2878_v39, %v9729_v5  ;;  %v9861_v63 = vld [vmem:[%s9171_s9 + $0x74] sm:$0x1] }
  0xba   : > { %v508_v36 = vor.u32 %v507_v29, %v503_v57  ;;  %v9803_v41 = vpop.permute.xlu0 %2760  ;;  %v2876_v18 = vsel %vm2874_vm8, %v9744_v24, %v9651_v11  ;;  %v7883_v1 = vrot.slane %v668_v35, 9  ;;  %v791_v50 = vrot.slane %v9763_v46, 5 }
  0xbb   : > { %v504_v44 = vsel %vm9239_vm5, %v499_v9, %v503_v57  ;;  %v9812_v48 = vpop.permute.xlu1 %2172  ;;  %v1999_v16 = vsel %vm9195_vm2, %v1997_v38, %v1998_v31  ;;  %v2909_v40 = vsel %vm2907_vm9, %v2876_v18, %v9746_v28  ;;  %v794_v5 = vrot.slane %v265_v62, 5 }
  0xbc   : > { %v509_v7 = vrot.slane %v508_v36, 4  ;;  %v8185_v26 = vcombine.low %v1996_v34, %v1999_v16  ;;  %v7882_v30 = vrot.slane %v667_v27, 9  ;;  %v784_v11 = vrot.slane %v9735_v14, 5  ;;  %v9830_v14 = vld [vmem:[%s9171_s9 + $0x7c] sm:$0xf] }
  0xbd   : > { %v792_v51 = vsel %vm9195_vm2, %v7883_v1, %v791_v50  ;;  %v793_v52 = vrot.slane %v791_v50, 4  ;;  %v787_v53 = vrot.slane %v9739_v22, 5  ;;  %v2944_v56 = vsel %vm2940_vm10, %v2911_v42, %v9699_v37  ;;  %v9838_v22 = vld [vmem:[%s9171_s9 + $0x70] sm:$0xf]  ;;  %v8963_v50 = vld [vmem:[%s9171_s9 + $0x18] sm:$0xf] }
  0xbe   : > { %v514_v24 = vsel %vm9239_vm5, %v509_v7, %v513_v0  ;;  %2774 = vrot.lane.b32.xlu0 %v8185_v26, %s9084_s25  ;;  %v785_v46 = vsel %vm9195_vm2, %v7882_v30, %v784_v11  ;;  %v786_v45 = vrot.slane %v784_v11, 4  ;;  %v2977_v62 = vsel %vm13036_vm11, %v2944_v56, %v9757_v3  ;;  %v8892_v34 = vld [vmem:[%s13029_s1 + $0x10] ss:$0 sps:$4 sm:$0x33]   ;;  %v8964_v26 = vld [vmem:[%s9171_s9 + $0x1c] sm:$0xf] }
  0xbf   : > { %v8075_v28 = vcombine.low %v504_v44, %v514_v24  ;;  %v795_v49 = vsel %vm9195_vm2, %v793_v52, %v794_v5  ;;  %v2942_v61 = vsel %vm2940_vm10, %v2909_v40, %v9669_v8  ;;  %v1104_v2 = vshrl.u32 %v7908_v55, 16  ;;  %v7947_v44 = vld [vmem:[%s9171_s9 + $0x78] sm:$0xe]  ;;  %v7946_v30 = vld [vmem:[%s9171_s9 + $0x6c] sm:$0xe]  ;;  %8817 = vmatprep.subr.msk.bf16.mxu0 %vm13034_vm13, %v8892_v34 }
  0xc0   : > { %v9840_v12 = vpop.permute.xlu0 %2762  ;;  %v8091_v60 = vcombine.low %v792_v51, %v795_v49  ;;  %v788_v59 = vsel %vm9195_vm2, %v786_v45, %v787_v53  ;;  %v1107_v4 = vshll.u32 %v7908_v55, 16  ;;  %v1117_v6 = vshrl.u32 %v9830_v14, 16 }
  0xc1   : > { %2186 = vrot.lane.b32.xlu1 %v8075_v28, %s9080_s13  ;;  %v9849_v37 = vpop.permute.xlu1 %2174  ;;  %v8090_v20 = vcombine.low %v785_v46, %v788_v59  ;;  %v2975_v32 = vsel %vm13036_vm11, %v2942_v61, %v9765_v13  ;;  %v1080_v47 = vshrl.u32 %v7906_v58, 16  ;;  %v1083_v57 = vshll.u32 %v7906_v58, 16 }
  0xc2   : > { %v1093_v15 = vshrl.u32 %v9838_v22, 16  ;;  %v1106_v8 = vrot.slane %v1104_v2, 4  ;;  %v1109_v3 = vrot.slane %v1107_v4, 5  ;;  %v8106_v25 = vcombine.low %v7906_v58, %v9838_v22 }
  0xc3   : > { %2264 = vrot.lane.b32.xlu0 %v8090_v20, %s9079_s12  ;;  %v8107_v13 = vcombine.low %v7908_v55, %v9830_v14  ;;  %v1082_v29 = vrot.slane %v1080_v47, 4  ;;  %v1085_v54 = vrot.slane %v1083_v57, 5  ;;  %v9869_v33 = vsel %vm13037_vm12, %v2977_v62, %v9784_v10 }
  0xc4   : > { %v9863_v43 = vpop.permute.xlu0 %2252  ;;  %v1110_v35 = vor.u32 %v1109_v3, %v1106_v8  ;;  %v1113_v9 = vshll.u32 %v9830_v14, 16  ;;  %v1119_v0 = vrot.slane %v1117_v6, 4  ;;  %v1123_v36 = vshll.u32 %v9856_v23, 16  ;;  %v9912_v6 = vld [vmem:[%s9171_s9 + $0x84] sm:$0xf] }
  0xc5   : > { %2266 = vrot.lane.b32.xlu1 %v8091_v60, %s9079_s12  ;;  %v9871_v31 = vpop.permute.xlu1 %2254  ;;  %v1086_v38 = vor.u32 %v1085_v54, %v1082_v29  ;;  %v1089_v39 = vshll.u32 %v9838_v22, 16  ;;  %v1095_v10 = vrot.slane %v1093_v15, 4  ;;  %v1099_v27 = vshll.u32 %v9861_v63, 16  ;;  %v9919_v15 = vld [vmem:[%s9171_s9 + $0x88] sm:$0xf] }
  0xc6   : > { %v3008_v42 = vsel %vm13037_vm12, %v2975_v32, %v9791_v21  ;;  %v1111_v18 = vrot.slane %v1110_v35, 4  ;;  %v1115_v1 = vrot.slane %v1113_v9, 5  ;;  %v1125_v7 = vrot.slane %v1123_v36, 5  ;;  %v8965_v54 = vld [vmem:[%s9171_s9 + $0x24] sm:$0xf] }
  0xc7   : > { %2360 = vrot.lane.b32.xlu0 %v8106_v25, %s9077_s10  ;;  %v1087_v16 = vrot.slane %v1086_v38, 4  ;;  %v1091_v40 = vrot.slane %v1089_v39, 5  ;;  %v8052_v5 = vcombine.low %v8963_v50, %v8964_v26  ;;  %v1101_v52 = vrot.slane %v1099_v27, 5  ;;  %v8966_v35 = vld [vmem:[%s9171_s9 + $0x28] sm:$0xf] }
  0xc8   : > { %v9890_v24 = vpop.permute.xlu0 %2348  ;;  %v1116_v51 = vsel %vm9239_vm5, %v1111_v18, %v1115_v1  ;;  %v1120_v21 = vor.u32 %v1119_v0, %v1115_v1  ;;  %v7963_v53 = vrot.slane %v7947_v44, 9  ;;  %v1400_v45 = vrot.slane %v9830_v14, 5  ;;  %v9958_v50 = vld [vmem:[%s9171_s9 + $0x80] sm:$0x1] }
  0xc9   : > { %2362 = vrot.lane.b32.xlu1 %v8107_v13, %s9077_s10  ;;  %v9888_v11 = vpop.permute.xlu1 %2350  ;;  %v1092_v28 = vsel %vm9239_vm5, %v1087_v16, %v1091_v40  ;;  %v1096_v46 = vor.u32 %v1095_v10, %v1091_v40  ;;  %v1403_v55 = vrot.slane %v9856_v23, 5  ;;  %v7962_v56 = vrot.slane %v7946_v30, 9  ;;  %v7986_v23 = vld [vmem:[%s9171_s9 + $0x78] sm:$0xf]  ;;  %v9931_v13 = vld [vmem:[%s9171_s9 + $0x7c] sm:$0xf] }
  0xca   : > { %v1121_v49 = vrot.slane %v1120_v21, 4  ;;  %v1393_v58 = vrot.slane %v9838_v22, 5  ;;  %v1396_v60 = vrot.slane %v9861_v63, 5  ;;  %v1401_v62 = vsel %vm9195_vm2, %v7963_v53, %v1400_v45 }
  0xcb   : > { %v1097_v59 = vrot.slane %v1096_v46, 4  ;;  %v1402_v61 = vrot.slane %v1400_v45, 4  ;;  %v3041_v4 = vsel %vm3039_vm14, %v3008_v42, %v9803_v41  ;;  %v2801_v41 = vsel %vm2792_vm6, %v8052_v5, %v9812_v48  ;;  %v244_v46 = vld [vmem:[%s9171_s9 + $0x78] sm:$0xf] }
  0xcc   : > { %v1126_v14 = vsel %vm9239_vm5, %v1121_v49, %v1125_v7  ;;  %v1394_v2 = vsel %vm9195_vm2, %v7962_v56, %v1393_v58  ;;  %v1395_v22 = vrot.slane %v1393_v58, 4  ;;  %8747 = vmatprep.mubr.msk.bf16.mxu0 %vm3099_vm15, %v3041_v4  ;;  %v3134_v63 = vsel %vm13034_vm13, %v8892_v34, 0  ;;  %v9974_v56 = vld [vmem:[%s9171_s9 + $0x7c] sm:$0xf]  ;;  %vm10696_vm13 = vmand %vm3332_vm1, %vm13035_vm3 }
  0xcd   : > { %v9903_v20 = vpop.permute.xlu1 %2430  ;;  %v8123_v32 = vcombine.low %v1116_v51, %v1126_v14  ;;  %v1102_v47 = vsel %vm9239_vm5, %v1097_v59, %v1101_v52  ;;  %v1404_v57 = vsel %vm9195_vm2, %v1402_v61, %v1403_v55  ;;  %8746 = vmatpush3.bf16.msra.mxu0 %v3134_v63  ;;  %v8053_v9 = vcombine.low %v8965_v54, %v8966_v35  ;;  %vm10716_vm3 = vmand %vm3332_vm1, %vm3395_vm4 }
  0xce   : > { %v8122_v3 = vcombine.low %v1092_v28, %v1102_v47  ;;  %v1397_v25 = vsel %vm9195_vm2, %v1395_v22, %v1396_v60  ;;  %v8139_v29 = vcombine.low %v1401_v62, %v1404_v57  ;;  %v3043_v48 = vsel %vm3039_vm14, %v9869_v33, %v9840_v12  ;;  %v9949_v33 = vld [vmem:[%s9171_s9 + $0x8c] sm:$0x1]  ;;  %v9982_v22 = vld [vmem:[%s9171_s9 + $0x80] sm:$0x1] }
  0xcf   : > { %v9922_v8 = vpop.permute.xlu0 %2428  ;;  %2442 = vrot.lane.b32.xlu1 %v8123_v32, %s9081_s14  ;;  %v1713_v0 = vshrl.u32 %v9912_v6, 16  ;;  %v8138_v34 = vcombine.low %v1394_v2, %v1397_v25  ;;  %v1716_v38 = vshll.u32 %v9912_v6, 16  ;;  %v1726_v39 = vshrl.u32 %v9919_v15, 16 }
  0xd0   : > { %2440 = vrot.lane.b32.xlu0 %v8122_v3, %s9081_s14  ;;  %v1689_v10 = vshrl.u32 %v7986_v23, 16  ;;  %v2804_v27 = vsel %vm2792_vm6, %v8053_v9, %v9849_v37  ;;  %v1692_v42 = vshll.u32 %v7986_v23, 16  ;;  %v1702_v12 = vshrl.u32 %v9931_v13, 16  ;;  %8748 = vmatmul.mubr.msk.bf16.vlgmr.msra.gmra.mrb[0].mxu0 %vm3099_vm15, %v3043_v48 }
  0xd1   : > { %v9940_v36 = vpop.permute.xlu1 %2510  ;;  %v1715_v44 = vrot.slane %v1713_v0, 4  ;;  %v1718_v1 = vrot.slane %v1716_v38, 5  ;;  %v8155_v7 = vcombine.low %v9912_v6, %v9919_v15  ;;  %v8154_v40 = vcombine.low %v7986_v23, %v9931_v13  ;;  %v8026_v23 = vld [vmem:[%s9171_s9 + $0x78] sm:$0xe] }
  0xd2   : > { %v1691_v16 = vrot.slane %v1689_v10, 4  ;;  %v1694_v37 = vrot.slane %v1692_v42, 5  ;;  %v2849_v26 = vsel %vm2841_vm7, %v2804_v27, %v9871_v31  ;;  %v1722_v5 = vshll.u32 %v9919_v15, 16 }
  0xd3   : > { %v9951_v18 = vpop.permute.xlu0 %2508  ;;  %2522 = vrot.lane.b32.xlu1 %v8139_v29, %s9078_s11  ;;  %v1728_v30 = vrot.slane %v1726_v39, 4  ;;  %v1719_v21 = vor.u32 %v1718_v1, %v1715_v44  ;;  %v1732_v52 = vshll.u32 %v9949_v33, 16  ;;  %v1698_v53 = vshll.u32 %v9931_v13, 16  ;;  %v247_v1 = vld [vmem:[%s9171_s9 + $0x88] sm:$0xf] }
  0xd4   : > { %2520 = vrot.lane.b32.xlu0 %v8138_v34, %s9078_s11  ;;  %v1704_v28 = vrot.slane %v1702_v12, 4  ;;  %v2847_v45 = vsel %vm2841_vm7, %v2801_v41, %v9863_v43  ;;  %v1724_v55 = vrot.slane %v1722_v5, 5  ;;  %v1695_v31 = vor.u32 %v1694_v37, %v1691_v16  ;;  %v246_v12 = vld [vmem:[%s9171_s9 + $0x84] sm:$0xf] }
  0xd5   : > { %v9964_v51 = vpop.permute.xlu1 %2606  ;;  %v1708_v49 = vshll.u32 %v9958_v50, 16  ;;  %v1720_v60 = vrot.slane %v1719_v21, 4  ;;  %v1734_v59 = vrot.slane %v1732_v52, 5  ;;  %v1700_v62 = vrot.slane %v1698_v53, 5 }
  0xd6   : > { %v2882_v61 = vsel %vm2874_vm8, %v2849_v26, %v9888_v11  ;;  %v1729_v14 = vor.u32 %v1728_v30, %v1724_v55  ;;  %v1696_v2 = vrot.slane %v1695_v31, 4  ;;  %v516_v4 = vshrl.u32 %v244_v46, 16  ;;  %v10007_v26 = vld [vmem:[%s9171_s9 + $0x8c] sm:$0x1] }
  0xd7   : > { %v9976_v58 = vpop.permute.xlu0 %2604  ;;  %2618 = vrot.lane.b32.xlu1 %v8155_v7, %s9082_s15  ;;  %v1710_v43 = vrot.slane %v1708_v49, 5  ;;  %v1725_v6 = vsel %vm9239_vm5, %v1720_v60, %v1724_v55  ;;  %v1705_v32 = vor.u32 %v1704_v28, %v1700_v62  ;;  %v519_v47 = vshll.u32 %v244_v46, 16 }
  0xd8   : > { %2616 = vrot.lane.b32.xlu0 %v8154_v40, %s9082_s15  ;;  %v525_v57 = vshll.u32 %v9974_v56, 16  ;;  %v1730_v11 = vrot.slane %v1729_v14, 4  ;;  %v1701_v41 = vsel %vm9239_vm5, %v1696_v2, %v1700_v62  ;;  %v518_v25 = vrot.slane %v516_v4, 4  ;;  %v670_v14 = vld [vmem:[%s9171_s9 + $0x84] sm:$0xe] }
  0xd9   : > { %v529_v63 = vshrl.u32 %v9974_v56, 16  ;;  %v1706_v54 = vrot.slane %v1705_v32, 4  ;;  %v521_v35 = vrot.slane %v519_v47, 5  ;;  %v535_v48 = vshll.u32 %v9982_v22, 16 }
  0xda   : > { %v9989_v3 = vpop.permute.xlu1 %2686  ;;  %v527_v9 = vrot.slane %v525_v57, 5  ;;  %v1735_v0 = vsel %vm9239_vm5, %v1730_v11, %v1734_v59  ;;  %v8042_v38 = vrot.slane %v8026_v23, 9  ;;  %v2002_v39 = vrot.slane %v9931_v13, 5  ;;  %v669_v11 = vld [vmem:[%s9171_s9 + $0x78] sm:$0xe] }
  0xdb   : > { %v9994_v29 = vpop.permute.xlu0 %2684  ;;  %v531_v34 = vrot.slane %v529_v63, 4  ;;  %v8171_v10 = vcombine.low %v1725_v6, %v1735_v0  ;;  %v1711_v27 = vsel %vm9239_vm5, %v1706_v54, %v1710_v43  ;;  %v2880_v44 = vsel %vm2874_vm8, %v2847_v45, %v9890_v24 }
  0xdc   : > { %v522_v42 = vor.u32 %v521_v35, %v518_v25  ;;  %v8170_v7 = vcombine.low %v1701_v41, %v1711_v27  ;;  %v537_v40 = vrot.slane %v535_v48, 5  ;;  %v2004_v37 = vrot.slane %v2002_v39, 4 }
  0xdd   : > { %v532_v16 = vor.u32 %v531_v34, %v527_v9  ;;  %2698 = vrot.lane.b32.xlu1 %v8171_v10, %s9083_s16  ;;  %v2003_v30 = vsel %vm9195_vm2, %v8042_v38, %v2002_v39  ;;  %v2005_v24 = vrot.slane %v9958_v50, 5  ;;  %v2915_v21 = vsel %vm2907_vm9, %v2882_v61, %v9903_v20  ;;  %v8027_v20 = vld [vmem:[%s9171_s9 + $0x84] sm:$0xe] }
  0xde   : > { %v523_v13 = vrot.slane %v522_v42, 4  ;;  %2696 = vrot.lane.b32.xlu0 %v8170_v7, %s9083_s16  ;;  %v540_v28 = vshrl.u32 %v246_v12, 16  ;;  %v543_v46 = vshll.u32 %v246_v12, 16  ;;  %v549_v45 = vshll.u32 %v247_v1, 16  ;;  %v10053_v42 = vld [vmem:[%s9171_s9 + $0x90] sm:$0xf] }
  0xdf   : > { %v10009_v5 = vpop.permute.xlu0 %2764  ;;  %v533_v53 = vrot.slane %v532_v16, 4  ;;  %v2006_v31 = vsel %vm9195_vm2, %v2004_v37, %v2005_v24  ;;  %v553_v49 = vshrl.u32 %v247_v1, 16  ;;  %v559_v50 = vshll.u32 %v10007_v26, 16  ;;  %v7910_v37 = vld [vmem:[%s9171_s9 + $0x84] sm:$0xf] }
  0xe0   : > { %v10017_v52 = vpop.permute.xlu1 %2176  ;;  %v528_v55 = vsel %vm9239_vm5, %v523_v13, %v527_v9  ;;  %v8186_v59 = vcombine.low %v2003_v30, %v2006_v31  ;;  %v542_v62 = vrot.slane %v540_v28, 4  ;;  %v545_v61 = vrot.slane %v543_v46, 5 }
  0xe1   : > { %v538_v60 = vsel %vm9239_vm5, %v533_v53, %v537_v40  ;;  %v2913_v43 = vsel %vm2907_vm9, %v2880_v44, %v9922_v8  ;;  %v551_v4 = vrot.slane %v549_v45, 5  ;;  %v555_v6 = vrot.slane %v553_v49, 4  ;;  %v10062_v40 = vld [vmem:[%s9171_s9 + $0x94] sm:$0xf]  ;;  %v10078_v45 = vld [vmem:[%s9171_s9 + $0x88] sm:$0xf] }
  0xe2   : > { %v8076_v2 = vcombine.low %v528_v55, %v538_v60  ;;  %2776 = vrot.lane.b32.xlu0 %v8186_v59, %s9084_s25  ;;  %v546_v32 = vor.u32 %v545_v61, %v542_v62  ;;  %v8043_v47 = vrot.slane %v8027_v20, 9  ;;  %v2009_v57 = vrot.slane %v9919_v15, 5  ;;  %v10087_v59 = vld [vmem:[%s9171_s9 + $0x98] sm:$0x1] }
  0xe3   : > { %v2012_v23 = vrot.slane %v9949_v33, 5  ;;  %v556_v25 = vor.u32 %v555_v6, %v551_v4  ;;  %v561_v63 = vrot.slane %v559_v50, 5  ;;  %v2948_v8 = vsel %vm2940_vm10, %v2915_v21, %v9940_v36 }
  0xe4   : > { %2188 = vrot.lane.b32.xlu1 %v8076_v2, %s9080_s13  ;;  %v7885_v54 = vrot.slane %v670_v14, 9  ;;  %v547_v9 = vrot.slane %v546_v32, 4  ;;  %v2010_v15 = vsel %vm9195_vm2, %v8043_v47, %v2009_v57  ;;  %v2011_v48 = vrot.slane %v2009_v57, 4 }
  0xe5   : > { %v10035_v41 = vpop.permute.xlu0 %2766  ;;  %v805_v33 = vrot.slane %v247_v1, 5  ;;  %v557_v0 = vrot.slane %v556_v25, 4  ;;  %v808_v34 = vrot.slane %v10007_v26, 5  ;;  %v7884_v38 = vrot.slane %v669_v11, 9 }
  0xe6   : > { %v10040_v35 = vpop.permute.xlu1 %2178  ;;  %v798_v39 = vrot.slane %v9974_v56, 5  ;;  %v552_v36 = vsel %vm9239_vm5, %v547_v9, %v551_v4  ;;  %v2013_v10 = vsel %vm9195_vm2, %v2011_v48, %v2012_v23  ;;  %v2946_v56 = vsel %vm2940_vm10, %v2913_v43, %v9951_v18  ;;  %v10098_v4 = vld [vmem:[%s9171_s9 + $0x8c] sm:$0x1] }
  0xe7   : > { %v806_v27 = vsel %vm9195_vm2, %v7885_v54, %v805_v33  ;;  %v807_v44 = vrot.slane %v805_v33, 4  ;;  %v562_v1 = vsel %vm9239_vm5, %v557_v0, %v561_v63  ;;  %v8187_v7 = vcombine.low %v2010_v15, %v2013_v10 }
  0xe8   : > { %v800_v16 = vrot.slane %v798_v39, 4  ;;  %v8077_v13 = vcombine.low %v552_v36, %v562_v1  ;;  %v799_v24 = vsel %vm9195_vm2, %v7884_v38, %v798_v39  ;;  %v801_v21 = vrot.slane %v9982_v22, 5  ;;  %v7948_v39 = vld [vmem:[%s9171_s9 + $0x84] sm:$0xe] }
  0xe9   : > { %v10055_v12 = vpop.permute.xlu0 %2256  ;;  %v809_v30 = vsel %vm9195_vm2, %v807_v44, %v808_v34  ;;  %2778 = vrot.lane.b32.xlu0 %v8187_v7, %s9084_s25  ;;  %v2981_v18 = vsel %vm13036_vm11, %v2948_v8, %v9964_v51  ;;  %v1152_v28 = vshrl.u32 %v10053_v42, 16  ;;  %v1155_v46 = vshll.u32 %v10053_v42, 16  ;;  %v8967_v44 = vld [vmem:[%s9171_s9 + $0x30] sm:$0xf] }
  0xea   : > { %v10065_v26 = vpop.permute.xlu1 %2258  ;;  %v8093_v53 = vcombine.low %v806_v27, %v809_v30  ;;  %2190 = vrot.lane.b32.xlu1 %v8077_v13, %s9080_s13  ;;  %v802_v55 = vsel %vm9195_vm2, %v800_v16, %v801_v21  ;;  %v2979_v22 = vsel %vm13036_vm11, %v2946_v56, %v9976_v58  ;;  %v1165_v31 = vshrl.u32 %v10062_v40, 16 }
  0xeb   : > { %v1128_v49 = vshrl.u32 %v7910_v37, 16  ;;  %v8092_v50 = vcombine.low %v799_v24, %v802_v55  ;;  %v1154_v51 = vrot.slane %v1152_v28, 4  ;;  %v1157_v20 = vrot.slane %v1155_v46, 5 }
  0xec   : > { %v1131_v60 = vshll.u32 %v7910_v37, 16  ;;  %v8109_v14 = vcombine.low %v10053_v42, %v10062_v40  ;;  %v1141_v43 = vshrl.u32 %v10078_v45, 16  ;;  %v8108_v58 = vcombine.low %v7910_v37, %v10078_v45  ;;  %v8968_v42 = vld [vmem:[%s9171_s9 + $0x34] sm:$0xf] }
  0xed   : > { %v10091_v61 = vpop.permute.xlu0 %2352  ;;  %v1130_v2 = vrot.slane %v1128_v49, 4  ;;  %2268 = vrot.lane.b32.xlu0 %v8092_v50, %s9079_s12  ;;  %v3012_v32 = vsel %vm13037_vm12, %v2979_v22, %v9994_v29  ;;  %v1158_v47 = vor.u32 %v1157_v20, %v1154_v51  ;;  %v1161_v57 = vshll.u32 %v10062_v40, 16  ;;  %v7949_v29 = vld [vmem:[%s9171_s9 + $0x90] sm:$0xe]  ;;  %v8969_v22 = vld [vmem:[%s9171_s9 + $0x3c] sm:$0xf] }
  0xee   : > { %v10089_v62 = vpop.permute.xlu1 %2354  ;;  %v1133_v6 = vrot.slane %v1131_v60, 5  ;;  %2270 = vrot.lane.b32.xlu1 %v8093_v53, %s9079_s12  ;;  %v1167_v23 = vrot.slane %v1165_v31, 4  ;;  %v1171_v11 = vshll.u32 %v10087_v59, 16  ;;  %v1137_v25 = vshll.u32 %v10078_v45, 16  ;;  %v8970_v31 = vld [vmem:[%s9171_s9 + $0x40] sm:$0xf] }
  0xef   : > { %v1143_v63 = vrot.slane %v1141_v43, 4  ;;  %v1159_v8 = vrot.slane %v1158_v47, 4  ;;  %v1163_v54 = vrot.slane %v1161_v57, 5  ;;  %v1147_v15 = vshll.u32 %v10098_v4, 16  ;;  %v7992_v51 = vld [vmem:[%s9171_s9 + $0x9c] sm:$0xf] }
  0xf0   : > { %v1134_v9 = vor.u32 %v1133_v6, %v1130_v2  ;;  %v3014_v33 = vsel %vm13037_vm12, %v2981_v18, %v9989_v3  ;;  %v1173_v0 = vrot.slane %v1171_v11, 5  ;;  %v1139_v34 = vrot.slane %v1137_v25, 5  ;;  %v10143_v20 = vld [vmem:[%s9171_s9 + $0xa0] sm:$0xf]  ;;  %v7990_v43 = vld [vmem:[%s9171_s9 + $0x90] sm:$0xf] }
  0xf1   : > { %v3045_v38 = vsel %vm3039_vm14, %v3012_v32, %v10009_v5  ;;  %2364 = vrot.lane.b32.xlu0 %v8108_v58, %s9077_s10  ;;  %v1164_v36 = vsel %vm9239_vm5, %v1159_v8, %v1163_v54  ;;  %v1168_v10 = vor.u32 %v1167_v23, %v1163_v54  ;;  %v8054_v1 = vcombine.low %v8967_v44, %v8968_v42  ;;  %v10155_v58 = vld [vmem:[%s9171_s9 + $0x94] sm:$0xf] }
  0xf2   : > { %v10109_v48 = vpop.permute.xlu1 %2434  ;;  %v1135_v27 = vrot.slane %v1134_v9, 4  ;;  %8751 = vmatprep.mubr.msk.bf16.mxu0 %vm3099_vm15, %v3045_v38  ;;  %2366 = vrot.lane.b32.xlu1 %v8109_v14, %s9077_s10  ;;  %v1144_v3 = vor.u32 %v1143_v63, %v1139_v34  ;;  %v1149_v5 = vrot.slane %v1147_v15, 5  ;;  %v7965_v56 = vrot.slane %v7949_v29, 9  ;;  %v10171_v9 = vld [vmem:[%s9171_s9 + $0xa4] sm:$0x1] }
  0xf3   : > { %v1414_v16 = vrot.slane %v10062_v40, 5  ;;  %v1169_v37 = vrot.slane %v1168_v10, 4  ;;  %v1417_v30 = vrot.slane %v10087_v59, 5  ;;  %v7964_v24 = vrot.slane %v7948_v39, 9 }
  0xf4   : > { %v10122_v7 = vpop.permute.xlu0 %2432  ;;  %v1140_v13 = vsel %vm9239_vm5, %v1135_v27, %v1139_v34  ;;  %v1145_v53 = vrot.slane %v1144_v3, 4  ;;  %v1407_v40 = vrot.slane %v10078_v45, 5  ;;  %v1410_v55 = vrot.slane %v10098_v4, 5  ;;  %v10177_v34 = vld [vmem:[%s9171_s9 + $0x98] sm:$0x1] }
  0xf5   : > { %v1415_v18 = vsel %vm9195_vm2, %v7965_v56, %v1414_v16  ;;  %v1416_v28 = vrot.slane %v1414_v16, 4  ;;  %v1174_v46 = vsel %vm9239_vm5, %v1169_v37, %v1173_v0  ;;  %v8055_v49 = vcombine.low %v8969_v22, %v8970_v31  ;;  %v248_v37 = vld [vmem:[%s9171_s9 + $0x90] sm:$0xf]  ;;  %v10201_v31 = vld [vmem:[%s9171_s9 + $0x98] sm:$0x1] }
  0xf6   : > { %v10129_v21 = vpop.permute.xlu1 %2514  ;;  %v3047_v50 = vsel %vm3039_vm14, %v3014_v33, %v10035_v41  ;;  %v8125_v59 = vcombine.low %v1164_v36, %v1174_v46  ;;  %v1150_v45 = vsel %vm9239_vm5, %v1145_v53, %v1149_v5  ;;  %v2807_v14 = vsel %vm2792_vm6, %v8054_v1, %v10017_v52 }
  0xf7   : > { %v1418_v2 = vsel %vm9195_vm2, %v1416_v28, %v1417_v30  ;;  %8752 = vmatmul.mubr.msk.bf16.gmra.mrb[4].mxu0 %vm3099_vm15, %v3047_v50  ;;  %v8124_v41 = vcombine.low %v1140_v13, %v1150_v45  ;;  %v1408_v6 = vsel %vm9195_vm2, %v7964_v24, %v1407_v40  ;;  %v1409_v32 = vrot.slane %v1407_v40, 4  ;;  %v10196_v28 = vld [vmem:[%s9171_s9 + $0x94] sm:$0xf] }
  0xf8   : > { %v10145_v60 = vpop.permute.xlu0 %2512  ;;  %v8141_v4 = vcombine.low %v1415_v18, %v1418_v2  ;;  %2446 = vrot.lane.b32.xlu1 %v8125_v59, %s9081_s14  ;;  %v2810_v52 = vsel %vm2792_vm6, %v8055_v49, %v10040_v35  ;;  %v1761_v57 = vshrl.u32 %v7992_v51, 16  ;;  %v1764_v23 = vshll.u32 %v7992_v51, 16  ;;  %v8028_v2 = vld [vmem:[%s9171_s9 + $0x90] sm:$0xe] }
  0xf9   : > { %v1774_v11 = vshrl.u32 %v10143_v20, 16  ;;  %2444 = vrot.lane.b32.xlu0 %v8124_v41, %s9081_s14  ;;  %v1411_v25 = vsel %vm9195_vm2, %v1409_v32, %v1410_v55  ;;  %v1737_v63 = vshrl.u32 %v7990_v43, 16  ;;  %v1740_v8 = vshll.u32 %v7990_v43, 16 }
  0xfa   : > { %v10160_v47 = vpop.permute.xlu1 %2610  ;;  %v1750_v54 = vshrl.u32 %v10155_v58, 16  ;;  %v8140_v29 = vcombine.low %v1408_v6, %v1411_v25  ;;  %v1763_v33 = vrot.slane %v1761_v57, 4  ;;  %v1766_v35 = vrot.slane %v1764_v23, 5 }
  0xfb   : > { %v8157_v0 = vcombine.low %v7992_v51, %v10143_v20  ;;  %v1739_v38 = vrot.slane %v1737_v63, 4  ;;  %v1742_v39 = vrot.slane %v1740_v8, 5  ;;  %v8156_v36 = vcombine.low %v7990_v43, %v10155_v58 }
  0xfc   : > { %v10173_v15 = vpop.permute.xlu0 %2608  ;;  %v2853_v10 = vsel %vm2841_vm7, %v2810_v52, %v10065_v26  ;;  %2526 = vrot.lane.b32.xlu1 %v8141_v4, %s9078_s11  ;;  %v1767_v27 = vor.u32 %v1766_v35, %v1763_v33  ;;  %v1770_v44 = vshll.u32 %v10143_v20, 16  ;;  %v1776_v42 = vrot.slane %v1774_v11, 4 }
  0xfd   : > { %v1780_v1 = vshll.u32 %v10171_v9, 16  ;;  %2524 = vrot.lane.b32.xlu0 %v8140_v29, %s9078_s11  ;;  %v1743_v5 = vor.u32 %v1742_v39, %v1739_v38  ;;  %v1746_v56 = vshll.u32 %v10155_v58, 16  ;;  %v1752_v16 = vrot.slane %v1750_v54, 4  ;;  %v250_v38 = vld [vmem:[%s9171_s9 + $0x9c] sm:$0xf] }
  0xfe   : > { %v1756_v26 = vshll.u32 %v10177_v34, 16  ;;  %v2851_v30 = vsel %vm2841_vm7, %v2807_v14, %v10055_v12  ;;  %v1768_v24 = vrot.slane %v1767_v27, 4  ;;  %v1772_v53 = vrot.slane %v1770_v44, 5  ;;  %v251_v39 = vld [vmem:[%s9171_s9 + $0xa0] sm:$0xf] }
  0xff   : > { %v10185_v3 = vpop.permute.xlu1 %2690  ;;  %v1782_v18 = vrot.slane %v1780_v1, 5  ;;  %v1744_v40 = vrot.slane %v1743_v5, 4  ;;  %v1748_v46 = vrot.slane %v1746_v56, 5  ;;  %v2886_v22 = vsel %vm2874_vm8, %v2853_v10, %v10089_v62 }
 0x100   : > { %v10191_v13 = vpop.permute.xlu0 %2688  ;;  %v1758_v55 = vrot.slane %v1756_v26, 5  ;;  %2622 = vrot.lane.b32.xlu1 %v8157_v0, %s9082_s15  ;;  %v1777_v49 = vor.u32 %v1776_v42, %v1772_v53  ;;  %v2884_v12 = vsel %vm2874_vm8, %v2851_v30, %v10091_v61  ;;  %v564_v50 = vshrl.u32 %v248_v37, 16  ;;  %v10229_v42 = vld [vmem:[%s9171_s9 + $0xa4] sm:$0x1] }
 0x101   : > { %v567_v51 = vshll.u32 %v248_v37, 16  ;;  %2620 = vrot.lane.b32.xlu0 %v8156_v36, %s9082_s15  ;;  %v1773_v59 = vsel %vm9239_vm5, %v1768_v24, %v1772_v53  ;;  %v1753_v45 = vor.u32 %v1752_v16, %v1748_v46  ;;  %v573_v14 = vshll.u32 %v10196_v28, 16 }
 0x102   : > { %v577_v62 = vshrl.u32 %v10196_v28, 16  ;;  %v1778_v41 = vrot.slane %v1777_v49, 4  ;;  %v566_v4 = vrot.slane %v564_v50, 4  ;;  %v583_v61 = vshll.u32 %v10201_v31, 16 }
 0x103   : > { %v569_v6 = vrot.slane %v567_v51, 5  ;;  %v1749_v52 = vsel %vm9239_vm5, %v1744_v40, %v1748_v46  ;;  %v1754_v57 = vrot.slane %v1753_v45, 4  ;;  %v575_v23 = vrot.slane %v573_v14, 5  ;;  %v8029_v46 = vld [vmem:[%s9171_s9 + $0x9c] sm:$0xe] }
 0x104   : > { %v10212_v43 = vpop.permute.xlu0 %2768  ;;  %v579_v11 = vrot.slane %v577_v62, 4  ;;  %v1783_v25 = vsel %vm9239_vm5, %v1778_v41, %v1782_v18  ;;  %v585_v8 = vrot.slane %v583_v61, 5  ;;  %v8044_v54 = vrot.slane %v8028_v2, 9  ;;  %v672_v51 = vld [vmem:[%s9171_s9 + $0x9c] sm:$0xe] }
 0x105   : > { %v10215_v32 = vpop.permute.xlu1 %2180  ;;  %v570_v63 = vor.u32 %v569_v6, %v566_v4  ;;  %v8173_v29 = vcombine.low %v1773_v59, %v1783_v25  ;;  %v1759_v33 = vsel %vm9239_vm5, %v1754_v57, %v1758_v55  ;;  %v2016_v0 = vrot.slane %v10155_v58, 5 }
 0x106   : > { %v580_v35 = vor.u32 %v579_v11, %v575_v23  ;;  %v8172_v36 = vcombine.low %v1749_v52, %v1759_v33  ;;  %v815_v27 = vrot.slane %v10201_v31, 5  ;;  %v2019_v44 = vrot.slane %v10177_v34, 5  ;;  %v671_v52 = vld [vmem:[%s9171_s9 + $0x90] sm:$0xe] }
 0x107   : > { %v571_v10 = vrot.slane %v570_v63, 4  ;;  %2702 = vrot.lane.b32.xlu1 %v8173_v29, %s9083_s16  ;;  %v2017_v5 = vsel %vm9195_vm2, %v8044_v54, %v2016_v0  ;;  %v2018_v56 = vrot.slane %v2016_v0, 4  ;;  %v2919_v58 = vsel %vm2907_vm9, %v2886_v22, %v10109_v48 }
 0x108   : > { %v581_v1 = vrot.slane %v580_v35, 4  ;;  %2700 = vrot.lane.b32.xlu0 %v8172_v36, %s9083_s16  ;;  %v588_v26 = vshrl.u32 %v250_v38, 16  ;;  %v591_v37 = vshll.u32 %v250_v38, 16  ;;  %v597_v30 = vshll.u32 %v251_v39, 16  ;;  %v10270_v35 = vld [vmem:[%s9171_s9 + $0xa8] sm:$0xf] }
 0x109   : > { %v576_v34 = vsel %vm9239_vm5, %v571_v10, %v575_v23  ;;  %v2020_v18 = vsel %vm9195_vm2, %v2018_v56, %v2019_v44  ;;  %v601_v48 = vshrl.u32 %v251_v39, 16  ;;  %v607_v40 = vshll.u32 %v10229_v42, 16  ;;  %v10279_v36 = vld [vmem:[%s9171_s9 + $0xac] sm:$0xf] }
 0x10a   : > { %v10236_v16 = vpop.permute.xlu0 %2770  ;;  %v586_v53 = vsel %vm9239_vm5, %v581_v1, %v585_v8  ;;  %v8188_v22 = vcombine.low %v2017_v5, %v2020_v18  ;;  %v590_v49 = vrot.slane %v588_v26, 4  ;;  %v593_v50 = vrot.slane %v591_v37, 5  ;;  %v7914_v5 = vld [vmem:[%s9171_s9 + $0x9c] sm:$0xf]  ;;  %v10296_v37 = vld [vmem:[%s9171_s9 + $0xa0] sm:$0xf] }
 0x10b   : > { %v10241_v24 = vpop.permute.xlu1 %2182  ;;  %v8078_v55 = vcombine.low %v576_v34, %v586_v53  ;;  %v2917_v59 = vsel %vm2907_vm9, %v2884_v12, %v10122_v7  ;;  %v599_v45 = vrot.slane %v597_v30, 5  ;;  %v603_v14 = vrot.slane %v601_v48, 4 }
 0x10c   : > { %v609_v62 = vrot.slane %v607_v40, 5  ;;  %2780 = vrot.lane.b32.xlu0 %v8188_v22, %s9084_s25  ;;  %v594_v41 = vor.u32 %v593_v50, %v590_v49  ;;  %v8045_v4 = vrot.slane %v8029_v46, 9  ;;  %v2023_v6 = vrot.slane %v10143_v20, 5  ;;  %v10309_v22 = vld [vmem:[%s9171_s9 + $0xb0] sm:$0x1] }
 0x10d   : > { %2192 = vrot.lane.b32.xlu1 %v8078_v55, %s9080_s13  ;;  %v2026_v61 = vrot.slane %v10171_v9, 5  ;;  %v604_v7 = vor.u32 %v603_v14, %v599_v45  ;;  %v822_v12 = vrot.slane %v10229_v42, 5  ;;  %v2952_v23 = vsel %vm2940_vm10, %v2919_v58, %v10129_v21 }
 0x10e   : > { %v10252_v2 = vpop.permute.xlu0 %2260  ;;  %v7887_v11 = vrot.slane %v672_v51, 9  ;;  %v595_v25 = vrot.slane %v594_v41, 4  ;;  %v2024_v63 = vsel %vm9195_vm2, %v8045_v4, %v2023_v6  ;;  %v2025_v8 = vrot.slane %v2023_v6, 4  ;;  %v10317_v51 = vld [vmem:[%s9171_s9 + $0xa4] sm:$0x1] }
 0x10f   : > { %v10259_v57 = vpop.permute.xlu1 %2262  ;;  %v819_v20 = vrot.slane %v251_v39, 5  ;;  %v605_v54 = vrot.slane %v604_v7, 4  ;;  %v2950_v9 = vsel %vm2940_vm10, %v2917_v59, %v10145_v60  ;;  %v7886_v29 = vrot.slane %v671_v52, 9 }
 0x110   : > { %v812_v33 = vrot.slane %v10196_v28, 5  ;;  %v600_v21 = vsel %vm9239_vm5, %v595_v25, %v599_v45  ;;  %v2027_v0 = vsel %vm9195_vm2, %v2025_v8, %v2026_v61  ;;  %v2985_v34 = vsel %vm13036_vm11, %v2952_v23, %v10160_v47 }
 0x111   : > { %v820_v38 = vsel %vm9195_vm2, %v7887_v11, %v819_v20  ;;  %v821_v39 = vrot.slane %v819_v20, 4  ;;  %v610_v28 = vsel %vm9239_vm5, %v605_v54, %v609_v62  ;;  %v8189_v44 = vcombine.low %v2024_v63, %v2027_v0  ;;  %v7951_v11 = vld [vmem:[%s9171_s9 + $0xa8] sm:$0xe] }
 0x112   : > { %v10283_v60 = vpop.permute.xlu0 %2356  ;;  %v813_v42 = vsel %vm9195_vm2, %v7886_v29, %v812_v33  ;;  %v814_v1 = vrot.slane %v812_v33, 4  ;;  %v8079_v56 = vcombine.low %v600_v21, %v610_v28  ;;  %v1200_v26 = vshrl.u32 %v10270_v35, 16  ;;  %v8971_v33 = vld [vmem:[%s9171_s9 + $0x48] sm:$0xf] }
 0x113   : > { %v10281_v10 = vpop.permute.xlu1 %2358  ;;  %v823_v58 = vsel %vm9195_vm2, %v821_v39, %v822_v12  ;;  %2782 = vrot.lane.b32.xlu0 %v8189_v44, %s9084_s25  ;;  %v2983_v53 = vsel %vm13036_vm11, %v2950_v9, %v10173_v15  ;;  %v1203_v18 = vshll.u32 %v10270_v35, 16  ;;  %v1213_v48 = vshrl.u32 %v10279_v36, 16 }
 0x114   : > { %v816_v30 = vsel %vm9195_vm2, %v814_v1, %v815_v27  ;;  %2194 = vrot.lane.b32.xlu1 %v8079_v56, %s9080_s13  ;;  %v8095_v47 = vcombine.low %v820_v38, %v823_v58  ;;  %v1202_v46 = vrot.slane %v1200_v26, 4  ;;  %v1176_v55 = vshrl.u32 %v7914_v5, 16  ;;  %v7950_v38 = vld [vmem:[%s9171_s9 + $0x9c] sm:$0xe] }
 0x115   : > { %v8094_v40 = vcombine.low %v813_v42, %v816_v30  ;;  %v1205_v49 = vrot.slane %v1203_v18, 5  ;;  %v8111_v27 = vcombine.low %v10270_v35, %v10279_v36  ;;  %v1179_v50 = vshll.u32 %v7914_v5, 16  ;;  %v8972_v35 = vld [vmem:[%s9171_s9 + $0x4c] sm:$0xf] }
 0x116   : > { %v1189_v15 = vshrl.u32 %v10296_v37, 16  ;;  %v1178_v59 = vrot.slane %v1176_v55, 4  ;;  %v8110_v45 = vcombine.low %v7914_v5, %v10296_v37  ;;  %v3018_v14 = vsel %vm13037_vm12, %v2985_v34, %v10185_v3 }
 0x117   : > { %v10311_v31 = vpop.permute.xlu1 %2438  ;;  %v1209_v62 = vshll.u32 %v10279_v36, 16  ;;  %2272 = vrot.lane.b32.xlu0 %v8094_v40, %s9079_s12  ;;  %v1181_v4 = vrot.slane %v1179_v50, 5  ;;  %v1206_v6 = vor.u32 %v1205_v49, %v1202_v46  ;;  %v1215_v61 = vrot.slane %v1213_v48, 4  ;;  %v8973_v49 = vld [vmem:[%s9171_s9 + $0x54] sm:$0xf] }
 0x118   : > { %v1219_v52 = vshll.u32 %v10309_v22, 16  ;;  %2274 = vrot.lane.b32.xlu1 %v8095_v47, %s9079_s12  ;;  %v1185_v12 = vshll.u32 %v10296_v37, 16  ;;  %v1191_v3 = vrot.slane %v1189_v15, 4  ;;  %v1195_v23 = vshll.u32 %v10317_v51, 16  ;;  %v10369_v15 = vld [vmem:[%s9171_s9 + $0xb8] sm:$0xf] }
 0x119   : > { %v10323_v41 = vpop.permute.xlu0 %2436  ;;  %v1211_v7 = vrot.slane %v1209_v62, 5  ;;  %v3016_v63 = vsel %vm13037_vm12, %v2983_v53, %v10191_v13  ;;  %v1207_v8 = vrot.slane %v1206_v6, 4  ;;  %v1182_v54 = vor.u32 %v1181_v4, %v1178_v59  ;;  %v10354_v53 = vld [vmem:[%s9171_s9 + $0xb4] sm:$0xf]  ;;  %v7994_v4 = vld [vmem:[%s9171_s9 + $0xa8] sm:$0xf] }
 0x11a   : > { %v1221_v20 = vrot.slane %v1219_v52, 5  ;;  %v1187_v29 = vrot.slane %v1185_v12, 5  ;;  %v8056_v21 = vcombine.low %v8971_v33, %v8972_v35  ;;  %v3049_v0 = vsel %vm3039_vm14, %v3016_v63, %v10212_v43  ;;  %v10380_v6 = vld [vmem:[%s9171_s9 + $0xac] sm:$0xf]  ;;  %v10405_v35 = vld [vmem:[%s9171_s9 + $0xb0] sm:$0x1] }
 0x11b   : > { %v10331_v25 = vpop.permute.xlu1 %2518  ;;  %v1216_v9 = vor.u32 %v1215_v61, %v1211_v7  ;;  %2368 = vrot.lane.b32.xlu0 %v8110_v45, %s9077_s10  ;;  %v1212_v13 = vsel %vm9239_vm5, %v1207_v8, %v1211_v7  ;;  %v1183_v28 = vrot.slane %v1182_v54, 4  ;;  %v1197_v44 = vrot.slane %v1195_v23, 5  ;;  %8755 = vmatprep.mubr.msk.bf16.mxu0 %vm3099_vm15, %v3049_v0  ;;  %v10395_v54 = vld [vmem:[%s9171_s9 + $0xbc] sm:$0x1] }
 0x11c   : > { %v7967_v42 = vrot.slane %v7951_v11, 9  ;;  %2370 = vrot.lane.b32.xlu1 %v8111_v27, %s9077_s10  ;;  %v1192_v5 = vor.u32 %v1191_v3, %v1187_v29  ;;  %v1428_v43 = vrot.slane %v10279_v36, 5  ;;  %v1431_v56 = vrot.slane %v10309_v22, 5  ;;  %v8974_v27 = vld [vmem:[%s9171_s9 + $0x58] sm:$0xf] }
 0x11d   : > { %v10340_v39 = vpop.permute.xlu0 %2516  ;;  %v1217_v1 = vrot.slane %v1216_v9, 4  ;;  %v1188_v58 = vsel %vm9239_vm5, %v1183_v28, %v1187_v29  ;;  %v7966_v34 = vrot.slane %v7950_v38, 9  ;;  %v1421_v26 = vrot.slane %v10296_v37, 5 }
 0x11e   : > { %v1424_v30 = vrot.slane %v10317_v51, 5  ;;  %v1193_v48 = vrot.slane %v1192_v5, 4  ;;  %v1429_v36 = vsel %vm9195_vm2, %v7967_v42, %v1428_v43  ;;  %v1430_v47 = vrot.slane %v1428_v43, 4 }
 0x11f   : > { %v1222_v18 = vsel %vm9239_vm5, %v1217_v1, %v1221_v20  ;;  %v10360_v40 = vpop.permute.xlu1 %2614  ;;  %v1422_v37 = vsel %vm9195_vm2, %v7966_v34, %v1421_v26  ;;  %v1423_v22 = vrot.slane %v1421_v26, 4  ;;  %v8057_v50 = vcombine.low %v8973_v49, %v8974_v27  ;;  %v10421_v26 = vld [vmem:[%s9171_s9 + $0xac] sm:$0xf] }
 0x120   : > { %v8127_v55 = vcombine.low %v1212_v13, %v1222_v18  ;;  %v1198_v51 = vsel %vm9239_vm5, %v1193_v48, %v1197_v44  ;;  %v1432_v59 = vsel %vm9195_vm2, %v1430_v47, %v1431_v56  ;;  %v3051_v45 = vsel %vm3039_vm14, %v3018_v14, %v10236_v16 }
 0x121   : > { %v10362_v46 = vpop.permute.xlu0 %2612  ;;  %v1809_v62 = vshrl.u32 %v10354_v53, 16  ;;  %v8126_v61 = vcombine.low %v1188_v58, %v1198_v51  ;;  %v8143_v52 = vcombine.low %v1429_v36, %v1432_v59  ;;  %v1425_v7 = vsel %vm9195_vm2, %v1423_v22, %v1424_v30  ;;  %8756 = vmatmul.mubr.msk.bf16.gmra.mrb[8].mxu0 %vm3099_vm15, %v3051_v45 }
 0x122   : > { %2450 = vrot.lane.b32.xlu1 %v8127_v55, %s9081_s14  ;;  %v2816_v12 = vsel %vm2792_vm6, %v8057_v50, %v10241_v24  ;;  %v2813_v3 = vsel %vm2792_vm6, %v8056_v21, %v10215_v32  ;;  %v1812_v14 = vshll.u32 %v10354_v53, 16  ;;  %v1822_v23 = vshrl.u32 %v10369_v15, 16 }
 0x123   : > { %v1811_v16 = vrot.slane %v1809_v62, 4  ;;  %2448 = vrot.lane.b32.xlu0 %v8126_v61, %s9081_s14  ;;  %v8142_v11 = vcombine.low %v1422_v37, %v1425_v7  ;;  %v1785_v63 = vshrl.u32 %v7994_v4, 16  ;;  %v1788_v8 = vshll.u32 %v7994_v4, 16  ;;  %v10427_v37 = vld [vmem:[%s9171_s9 + $0xb0] sm:$0x1] }
 0x124   : > { %v1798_v20 = vshrl.u32 %v10380_v6, 16  ;;  %v1814_v32 = vrot.slane %v1812_v14, 5  ;;  %v8159_v9 = vcombine.low %v10354_v53, %v10369_v15  ;;  %v8158_v29 = vcombine.low %v7994_v4, %v10380_v6  ;;  %v10407_v21 = vpop.permute.xlu1 %2694 }
 0x125   : > { %v10397_v24 = vpop.permute.xlu0 %2692  ;;  %v2857_v33 = vsel %vm2841_vm7, %v2816_v12, %v10259_v57  ;;  %v1787_v0 = vrot.slane %v1785_v63, 4  ;;  %v1790_v38 = vrot.slane %v1788_v8, 5  ;;  %v1818_v13 = vshll.u32 %v10369_v15, 16  ;;  %v10414_v57 = vld [vmem:[%s9171_s9 + $0xa8] sm:$0xf] }
 0x126   : > { %2530 = vrot.lane.b32.xlu1 %v8143_v52, %s9078_s11  ;;  %v1824_v28 = vrot.slane %v1822_v23, 4  ;;  %v1815_v44 = vor.u32 %v1814_v32, %v1811_v16  ;;  %v1828_v42 = vshll.u32 %v10395_v54, 16  ;;  %v1794_v1 = vshll.u32 %v10380_v6, 16 }
 0x127   : > { %v1800_v5 = vrot.slane %v1798_v20, 4  ;;  %2528 = vrot.lane.b32.xlu0 %v8142_v11, %s9078_s11  ;;  %v2855_v43 = vsel %vm2841_vm7, %v2813_v3, %v10252_v2  ;;  %v1820_v56 = vrot.slane %v1818_v13, 5  ;;  %v1791_v58 = vor.u32 %v1790_v38, %v1787_v0 }
 0x128   : > { %v1804_v34 = vshll.u32 %v10405_v35, 16  ;;  %v1816_v30 = vrot.slane %v1815_v44, 4  ;;  %v1830_v53 = vrot.slane %v1828_v42, 5  ;;  %v1796_v18 = vrot.slane %v1794_v1, 5 }
 0x129   : > { %v2890_v48 = vsel %vm2874_vm8, %v2857_v33, %v10281_v10  ;;  %v1825_v36 = vor.u32 %v1824_v28, %v1820_v56  ;;  %v1792_v47 = vrot.slane %v1791_v58, 4  ;;  %v612_v2 = vshrl.u32 %v10414_v57, 16  ;;  %v8030_v10 = vld [vmem:[%s9171_s9 + $0xa8] sm:$0xe]  ;;  %v10458_v28 = vld [vmem:[%s9171_s9 + $0xbc] sm:$0x1] }
 0x12a   : > { %2626 = vrot.lane.b32.xlu1 %v8159_v9, %s9082_s15  ;;  %v1806_v55 = vrot.slane %v1804_v34, 5  ;;  %v1821_v49 = vsel %vm9239_vm5, %v1816_v30, %v1820_v56  ;;  %v1801_v27 = vor.u32 %v1800_v5, %v1796_v18  ;;  %v615_v50 = vshll.u32 %v10414_v57, 16  ;;  %v10437_v59 = vpop.permute.xlu1 %2184  ;;  %v10452_v9 = vld [vmem:[%s9171_s9 + $0xb4] sm:$0xf] }
 0x12b   : > { %v10430_v22 = vpop.permute.xlu0 %2772  ;;  %v621_v51 = vshll.u32 %v10421_v26, 16  ;;  %2624 = vrot.lane.b32.xlu0 %v8158_v29, %s9082_s15  ;;  %v1826_v45 = vrot.slane %v1825_v36, 4  ;;  %v1797_v62 = vsel %vm9239_vm5, %v1792_v47, %v1796_v18  ;;  %v614_v4 = vrot.slane %v612_v2, 4  ;;  %v10455_v29 = vld [vmem:[%s9171_s9 + $0xb8] sm:$0xf] }
 0x12c   : > { %v625_v61 = vshrl.u32 %v10421_v26, 16  ;;  %v1802_v52 = vrot.slane %v1801_v27, 4  ;;  %v617_v7 = vrot.slane %v615_v50, 5  ;;  %v631_v3 = vshll.u32 %v10427_v37, 16  ;;  %v8031_v18 = vld [vmem:[%s9171_s9 + $0xb4] sm:$0xe] }
 0x12d   : > { %v623_v12 = vrot.slane %v621_v51, 5  ;;  %v1831_v16 = vsel %vm9239_vm5, %v1826_v45, %v1830_v53  ;;  %v8046_v23 = vrot.slane %v8030_v10, 9  ;;  %v2030_v11 = vrot.slane %v10380_v6, 5  ;;  %v674_v2 = vld [vmem:[%s9171_s9 + $0xb4] sm:$0xe] }
 0x12e   : > { %v627_v14 = vrot.slane %v625_v61, 4  ;;  %v8175_v63 = vcombine.low %v1821_v49, %v1831_v16  ;;  %v1807_v8 = vsel %vm9239_vm5, %v1802_v52, %v1806_v55  ;;  %v2888_v20 = vsel %vm2874_vm8, %v2855_v43, %v10283_v60  ;;  %v673_v52 = vld [vmem:[%s9171_s9 + $0xa8] sm:$0xe] }
 0x12f   : > { %v618_v32 = vor.u32 %v617_v7, %v614_v4  ;;  %v8174_v33 = vcombine.low %v1797_v62, %v1807_v8  ;;  %v633_v38 = vrot.slane %v631_v3, 5  ;;  %v2032_v13 = vrot.slane %v2030_v11, 4 }
 0x130   : > { %v628_v0 = vor.u32 %v627_v14, %v623_v12  ;;  %v10460_v44 = vpop.permute.xlu0 %2774  ;;  %2706 = vrot.lane.b32.xlu1 %v8175_v63, %s9083_s16  ;;  %v2031_v60 = vsel %vm9195_vm2, %v8046_v23, %v2030_v11  ;;  %v2033_v42 = vrot.slane %v10405_v35, 5  ;;  %v2923_v1 = vsel %vm2907_vm9, %v2890_v48, %v10311_v31 }
 0x131   : > { %v619_v6 = vrot.slane %v618_v32, 4  ;;  %2704 = vrot.lane.b32.xlu0 %v8174_v33, %s9083_s16  ;;  %v636_v56 = vshrl.u32 %v10452_v9, 16  ;;  %v639_v58 = vshll.u32 %v10452_v9, 16  ;;  %v645_v34 = vshll.u32 %v10455_v29, 16 }
 0x132   : > { %v629_v43 = vrot.slane %v628_v0, 4  ;;  %v2034_v35 = vsel %vm9195_vm2, %v2032_v13, %v2033_v42  ;;  %v649_v31 = vshrl.u32 %v10455_v29, 16  ;;  %v655_v53 = vshll.u32 %v10458_v28, 16  ;;  %v10516_v42 = vld [vmem:[%s9171_s9 + $0xc4] sm:$0xf] }
 0x133   : > { %v10468_v5 = vpop.permute.xlu1 %2186  ;;  %v624_v30 = vsel %vm9239_vm5, %v619_v6, %v623_v12  ;;  %v8190_v36 = vcombine.low %v2031_v60, %v2034_v35  ;;  %v638_v47 = vrot.slane %v636_v56, 4  ;;  %v641_v55 = vrot.slane %v639_v58, 5 }
 0x134   : > { %v634_v48 = vsel %vm9239_vm5, %v629_v43, %v633_v38  ;;  %v2921_v27 = vsel %vm2907_vm9, %v2888_v20, %v10323_v41  ;;  %v647_v50 = vrot.slane %v645_v34, 5  ;;  %v651_v51 = vrot.slane %v649_v31, 4  ;;  %v10509_v38 = vld [vmem:[%s9171_s9 + $0xc0] sm:$0xf] }
 0x135   : > { %v8080_v49 = vcombine.low %v624_v30, %v634_v48  ;;  %2784 = vrot.lane.b32.xlu0 %v8190_v36, %s9084_s25  ;;  %v642_v45 = vor.u32 %v641_v55, %v638_v47  ;;  %v8047_v62 = vrot.slane %v8031_v18, 9  ;;  %v2037_v4 = vrot.slane %v10369_v15, 5  ;;  %v10492_v7 = vpop.permute.xlu0 %2264  ;;  %v10534_v48 = vld [vmem:[%s9171_s9 + $0xb8] sm:$0xf] }
 0x136   : > { %v2040_v61 = vrot.slane %v10395_v54, 5  ;;  %v652_v12 = vor.u32 %v651_v51, %v647_v50  ;;  %v657_v41 = vrot.slane %v655_v53, 5  ;;  %v2956_v3 = vsel %vm2940_vm10, %v2923_v1, %v10331_v25  ;;  %v7918_v1 = vld [vmem:[%s9171_s9 + $0xb4] sm:$0xf] }
 0x137   : > { %v10486_v10 = vpop.permute.xlu1 %2266  ;;  %2196 = vrot.lane.b32.xlu1 %v8080_v49, %s9080_s13  ;;  %v7889_v16 = vrot.slane %v674_v2, 9  ;;  %v643_v14 = vrot.slane %v642_v45, 4  ;;  %v2038_v23 = vsel %vm9195_vm2, %v8047_v62, %v2037_v4  ;;  %v2039_v15 = vrot.slane %v2037_v4, 4 }
 0x138   : > { %v833_v54 = vrot.slane %v10455_v29, 5  ;;  %v653_v11 = vrot.slane %v652_v12, 4  ;;  %v836_v63 = vrot.slane %v10458_v28, 5  ;;  %v7888_v8 = vrot.slane %v673_v52, 9 }
 0x139   : > { %v826_v20 = vrot.slane %v10421_v26, 5  ;;  %v648_v32 = vsel %vm9239_vm5, %v643_v14, %v647_v50  ;;  %v2041_v25 = vsel %vm9195_vm2, %v2039_v15, %v2040_v61  ;;  %v2954_v28 = vsel %vm2940_vm10, %v2921_v27, %v10340_v39  ;;  %v10526_v35 = vpop.permute.xlu0 %2360  ;;  %v10543_v50 = vld [vmem:[%s9171_s9 + $0xc8] sm:$0x1]  ;;  %v10550_v61 = vld [vmem:[%s9171_s9 + $0xbc] sm:$0x1] }
 0x13a   : > { %v834_v33 = vsel %vm9195_vm2, %v7889_v16, %v833_v54  ;;  %v835_v0 = vrot.slane %v833_v54, 4  ;;  %v658_v13 = vsel %vm9239_vm5, %v653_v11, %v657_v41  ;;  %v8191_v6 = vcombine.low %v2038_v23, %v2041_v25 }
 0x13b   : > { %v828_v60 = vrot.slane %v826_v20, 4  ;;  %v10519_v43 = vpop.permute.xlu1 %2362  ;;  %v8081_v56 = vcombine.low %v648_v32, %v658_v13  ;;  %v827_v34 = vsel %vm9195_vm2, %v7888_v8, %v826_v20  ;;  %v829_v30 = vrot.slane %v10427_v37, 5  ;;  %v7953_v20 = vld [vmem:[%s9171_s9 + $0xc0] sm:$0xe] }
 0x13c   : > { %v837_v58 = vsel %vm9195_vm2, %v835_v0, %v836_v63  ;;  %2786 = vrot.lane.b32.xlu0 %v8191_v6, %s9084_s25  ;;  %v2989_v31 = vsel %vm13036_vm11, %v2956_v3, %v10360_v40  ;;  %v1248_v53 = vshrl.u32 %v10509_v38, 16  ;;  %v1251_v18 = vshll.u32 %v10509_v38, 16 }
 0x13d   : > { %v8097_v39 = vcombine.low %v834_v33, %v837_v58  ;;  %2198 = vrot.lane.b32.xlu1 %v8081_v56, %s9080_s13  ;;  %v830_v37 = vsel %vm9195_vm2, %v828_v60, %v829_v30  ;;  %v2987_v36 = vsel %vm13036_vm11, %v2954_v28, %v10362_v46  ;;  %v1261_v47 = vshrl.u32 %v10516_v42, 16  ;;  %v8975_v60 = vld [vmem:[%s9171_s9 + $0x60] sm:$0xf] }
 0x13e   : > { %v1224_v55 = vshrl.u32 %v7918_v1, 16  ;;  %v8096_v2 = vcombine.low %v827_v34, %v830_v37  ;;  %v1250_v40 = vrot.slane %v1248_v53, 4  ;;  %v1253_v49 = vrot.slane %v1251_v18, 5 }
 0x13f   : > { %v1227_v27 = vshll.u32 %v7918_v1, 16  ;;  %v8113_v51 = vcombine.low %v10509_v38, %v10516_v42  ;;  %v1237_v62 = vshrl.u32 %v10534_v48, 16  ;;  %v8112_v4 = vcombine.low %v7918_v1, %v10534_v48  ;;  %v7952_v38 = vld [vmem:[%s9171_s9 + $0xb4] sm:$0xe]  ;;  %v8976_v1 = vld [vmem:[%s9171_s9 + $0x64] sm:$0xf] }
 0x140   : > { %v1226_v45 = vrot.slane %v1224_v55, 4  ;;  %2276 = vrot.lane.b32.xlu0 %v8096_v2, %s9079_s12  ;;  %v3020_v52 = vsel %vm13037_vm12, %v2987_v36, %v10397_v24  ;;  %v1254_v12 = vor.u32 %v1253_v49, %v1250_v40  ;;  %v1257_v41 = vshll.u32 %v10516_v42, 16  ;;  %v8977_v49 = vld [vmem:[%s9171_s9 + $0x6c] sm:$0xf] }
 0x141   : > { %v1229_v46 = vrot.slane %v1227_v27, 5  ;;  %v10556_v3 = vpop.permute.xlu1 %2442  ;;  %2278 = vrot.lane.b32.xlu1 %v8097_v39, %s9079_s12  ;;  %v1263_v16 = vrot.slane %v1261_v47, 4  ;;  %v1267_v14 = vshll.u32 %v10543_v50, 16  ;;  %v1233_v23 = vshll.u32 %v10534_v48, 16  ;;  %v8978_v27 = vld [vmem:[%s9171_s9 + $0x70] sm:$0xf] }
 0x142   : > { %v1239_v15 = vrot.slane %v1237_v62, 4  ;;  %v10561_v54 = vpop.permute.xlu0 %2440  ;;  %v1255_v11 = vrot.slane %v1254_v12, 4  ;;  %v1259_v24 = vrot.slane %v1257_v41, 5  ;;  %v1243_v8 = vshll.u32 %v10550_v61, 16  ;;  %v10597_v62 = vld [vmem:[%s9171_s9 + $0xd0] sm:$0xf] }
 0x143   : > { %v1230_v63 = vor.u32 %v1229_v46, %v1226_v45  ;;  %v3022_v32 = vsel %vm13037_vm12, %v2989_v31, %v10407_v21  ;;  %v1269_v25 = vrot.slane %v1267_v14, 5  ;;  %v1235_v33 = vrot.slane %v1233_v23, 5  ;;  %v8000_v45 = vld [vmem:[%s9171_s9 + $0xcc] sm:$0xf]  ;;  %v10607_v12 = vld [vmem:[%s9171_s9 + $0xc4] sm:$0xf] }
 0x144   : > { %v3053_v0 = vsel %vm3039_vm14, %v3020_v52, %v10430_v22  ;;  %2372 = vrot.lane.b32.xlu0 %v8112_v4, %s9077_s10  ;;  %v1260_v13 = vsel %vm9239_vm5, %v1255_v11, %v1259_v24  ;;  %v1264_v6 = vor.u32 %v1263_v16, %v1259_v24  ;;  %v8058_v56 = vcombine.low %v8975_v60, %v8976_v1 }
 0x145   : > { %v1231_v28 = vrot.slane %v1230_v63, 4  ;;  %8759 = vmatprep.mubr.msk.bf16.mxu0 %vm3099_vm15, %v3053_v0  ;;  %v10576_v58 = vpop.permute.xlu1 %2522  ;;  %2374 = vrot.lane.b32.xlu1 %v8113_v51, %s9077_s10  ;;  %v1240_v21 = vor.u32 %v1239_v15, %v1235_v33  ;;  %v1245_v22 = vrot.slane %v1243_v8, 5  ;;  %v7969_v34 = vrot.slane %v7953_v20, 9 }
 0x146   : > { %v1442_v30 = vrot.slane %v10516_v42, 5  ;;  %v10580_v39 = vpop.permute.xlu0 %2520  ;;  %v1265_v31 = vrot.slane %v1264_v6, 4  ;;  %v1445_v18 = vrot.slane %v10543_v50, 5  ;;  %v7968_v37 = vrot.slane %v7952_v38, 9 }
 0x147   : > { %v1236_v53 = vsel %vm9239_vm5, %v1231_v28, %v1235_v33  ;;  %v1241_v36 = vrot.slane %v1240_v21, 4  ;;  %v1435_v42 = vrot.slane %v10534_v48, 5  ;;  %v1438_v40 = vrot.slane %v10550_v61, 5  ;;  %v7998_v61 = vld [vmem:[%s9171_s9 + $0xc0] sm:$0xf] }
 0x148   : > { %v1443_v47 = vsel %vm9195_vm2, %v7969_v34, %v1442_v30  ;;  %v1444_v55 = vrot.slane %v1442_v30, 4  ;;  %v1270_v2 = vsel %vm9239_vm5, %v1265_v31, %v1269_v25  ;;  %v8059_v51 = vcombine.low %v8977_v49, %v8978_v27  ;;  %v8017_v33 = vld [vmem:[%s9171_s9 + $0xd4] sm:$0x1] }
 0x149   : > { %v3055_v50 = vsel %vm3039_vm14, %v3022_v32, %v10460_v44  ;;  %v8129_v4 = vcombine.low %v1260_v13, %v1270_v2  ;;  %v1246_v46 = vsel %vm9239_vm5, %v1241_v36, %v1245_v22  ;;  %v2819_v48 = vsel %vm2792_vm6, %v8058_v56, %v10437_v59  ;;  %v10612_v23 = vpop.permute.xlu1 %2618  ;;  %v8033_v36 = vld [vmem:[%s9171_s9 + $0xcc] sm:$0xe] }
 0x14a   : > { %v1446_v52 = vsel %vm9195_vm2, %v1444_v55, %v1445_v18  ;;  %8760 = vmatmul.mubr.msk.bf16.gmra.mrb[12].mxu0 %vm3099_vm15, %v3055_v50  ;;  %v8128_v41 = vcombine.low %v1236_v53, %v1246_v46  ;;  %v1436_v16 = vsel %vm9195_vm2, %v7968_v37, %v1435_v42  ;;  %v1437_v14 = vrot.slane %v1435_v42, 4  ;;  %v10614_v15 = vpop.permute.xlu0 %2616 }
 0x14b   : > { %v8145_v44 = vcombine.low %v1443_v47, %v1446_v52  ;;  %2454 = vrot.lane.b32.xlu1 %v8129_v4, %s9081_s14  ;;  %v2822_v59 = vsel %vm2792_vm6, %v8059_v51, %v10468_v5  ;;  %v1857_v11 = vshrl.u32 %v8000_v45, 16  ;;  %v1860_v24 = vshll.u32 %v8000_v45, 16  ;;  %v8016_v5 = vld [vmem:[%s9171_s9 + $0xc8] sm:$0x1] }
 0x14c   : > { %v1870_v63 = vshrl.u32 %v10597_v62, 16  ;;  %2452 = vrot.lane.b32.xlu0 %v8128_v41, %s9081_s14  ;;  %v1439_v8 = vsel %vm9195_vm2, %v1437_v14, %v1438_v40  ;;  %v1833_v20 = vshrl.u32 %v7998_v61, 16  ;;  %v1836_v32 = vshll.u32 %v7998_v61, 16  ;;  %v8032_v40 = vld [vmem:[%s9171_s9 + $0xc0] sm:$0xe] }
 0x14d   : > { %v1846_v25 = vshrl.u32 %v10607_v12, 16  ;;  %v8144_v0 = vcombine.low %v1436_v16, %v1439_v8  ;;  %v1859_v38 = vrot.slane %v1857_v11, 4  ;;  %v1862_v13 = vrot.slane %v1860_v24, 5 }
 0x14e   : > { %v8161_v6 = vcombine.low %v8000_v45, %v10597_v62  ;;  %v1835_v28 = vrot.slane %v1833_v20, 4  ;;  %v1838_v60 = vrot.slane %v1836_v32, 5  ;;  %v8160_v1 = vcombine.low %v7998_v61, %v10607_v12 }
 0x14f   : > { %v2861_v56 = vsel %vm2841_vm7, %v2822_v59, %v10486_v10  ;;  %2534 = vrot.lane.b32.xlu1 %v8145_v44, %s9078_s11  ;;  %v1863_v21 = vor.u32 %v1862_v13, %v1859_v38  ;;  %v1866_v22 = vshll.u32 %v10597_v62, 16  ;;  %v1872_v34 = vrot.slane %v1870_v63, 4  ;;  %v2699_v47 = vpop.permute.xlu1 %2698 }
 0x150   : > { %v1876_v30 = vshll.u32 %v8017_v33, 16  ;;  %2532 = vrot.lane.b32.xlu0 %v8144_v0, %s9078_s11  ;;  %v1839_v31 = vor.u32 %v1838_v60, %v1835_v28  ;;  %v1842_v53 = vshll.u32 %v10607_v12, 16  ;;  %v1848_v18 = vrot.slane %v1846_v25, 4  ;;  %v2697_v55 = vpop.permute.xlu0 %2696 }
 0x151   : > { %v1852_v37 = vshll.u32 %v8016_v5, 16  ;;  %v2859_v10 = vsel %vm2841_vm7, %v2819_v48, %v10492_v7  ;;  %v1864_v42 = vrot.slane %v1863_v21, 4  ;;  %v1868_v2 = vrot.slane %v1866_v22, 5 }
 0x152   : > { %v1878_v49 = vrot.slane %v1876_v30, 5  ;;  %v1840_v27 = vrot.slane %v1839_v31, 4  ;;  %v1844_v51 = vrot.slane %v1842_v53, 5  ;;  %v2894_v50 = vsel %vm2874_vm8, %v2861_v56, %v10519_v43  ;;  %v3347_v30 = vld [vmem:[#allocation2 + $0x18] sm:$0x1] }
 0x153   : > { %2630 = vrot.lane.b32.xlu1 %v8161_v6, %s9082_s15  ;;  %v1873_v45 = vor.u32 %v1872_v34, %v1868_v2  ;;  %v1854_v4 = vrot.slane %v1852_v37, 5  ;;  %v8049_v46 = vrot.slane %v8033_v36, 9  ;;  %v2051_v52 = vrot.slane %v10597_v62, 5  ;;  %v3344_v31 = vld [vmem:[#allocation2 + $0xc] sm:$0x1] }
 0x154   : > { %2628 = vrot.lane.b32.xlu0 %v8160_v1, %s9082_s15  ;;  %v1849_v61 = vor.u32 %v1848_v18, %v1844_v51  ;;  %v2892_v7 = vsel %vm2874_vm8, %v2859_v10, %v10526_v35  ;;  %v2054_v48 = vrot.slane %v8017_v33, 5  ;;  %v8048_v41 = vrot.slane %v8032_v40, 9  ;;  %v2777_v59 = vpop.permute.xlu0 %2776  ;;  %v3403_v53 = vld [vmem:[#allocation2 + $0x20] sm:$0x1]  ;;  %v3400_v18 = vld [vmem:[#allocation2 + $0x14] sm:$0x1] }
 0x155   : > { %v1869_v44 = vsel %vm9239_vm5, %v1864_v42, %v1868_v2  ;;  %v1874_v16 = vrot.slane %v1873_v45, 4  ;;  %v2053_v43 = vrot.slane %v2051_v52, 4  ;;  %v2044_v14 = vrot.slane %v10607_v12, 5  ;;  %v3353_v37 = vld [vmem:[#allocation2 + $0x30] sm:$0x1] }
 0x156   : > { %v1845_v11 = vsel %vm9239_vm5, %v1840_v27, %v1844_v51  ;;  %v1850_v62 = vrot.slane %v1849_v61, 4  ;;  %v2052_v24 = vsel %vm9195_vm2, %v8049_v46, %v2051_v52  ;;  %v2047_v63 = vrot.slane %v8016_v5, 5  ;;  %v10652_v8 = vpop.permute.xlu1 %2188  ;;  %v3350_v36 = vld [vmem:[#allocation2 + $0x24] sm:$0x1]  ;;  %v3409_v10 = vld [vmem:[#allocation2 + $0x38] sm:$0x1] }
 0x157   : > { %v1879_v35 = vsel %vm9239_vm5, %v1874_v16, %v1878_v49  ;;  %v2055_v20 = vsel %vm9195_vm2, %v2053_v43, %v2054_v48  ;;  %v2046_v32 = vrot.slane %v2044_v14, 4  ;;  %v2927_v12 = vsel %vm2907_vm9, %v2894_v50, %v10556_v3  ;;  %v3406_v42 = vld [vmem:[#allocation2 + $0x2c] sm:$0x1] }
 0x158   : > { %v8177_v25 = vcombine.low %v1869_v44, %v1879_v35  ;;  %v1855_v33 = vsel %vm9239_vm5, %v1850_v62, %v1854_v4  ;;  %v2045_v0 = vsel %vm9195_vm2, %v8048_v41, %v2044_v14  ;;  %v2925_v38 = vsel %vm2907_vm9, %v2892_v7, %v10561_v54 }
 0x159   : > { %v8176_v13 = vcombine.low %v1845_v11, %v1855_v33  ;;  %v2048_v6 = vsel %vm9195_vm2, %v2046_v32, %v2047_v63  ;;  %v2960_v5 = vsel %vm2940_vm10, %v2927_v12, %v10576_v58  ;;  %v2958_v3 = vsel %vm2940_vm10, %v2925_v38, %v10580_v39  ;;  %v8980_v33 = vld [vmem:[%s9171_s9 + $0x7c] sm:$0xf] }
 0x15a   : > { %2710 = vrot.lane.b32.xlu1 %v8177_v25, %s9083_s16  ;;  %v8193_v28 = vcombine.low %v2052_v24, %v2055_v20  ;;  %v2993_v60 = vsel %vm13036_vm11, %v2960_v5, %v10612_v23  ;;  %v2991_v1 = vsel %vm13036_vm11, %v2958_v3, %v10614_v15  ;;  %v8192_v54 = vcombine.low %v2045_v0, %v2048_v6  ;;  %v8979_v25 = vld [vmem:[%s9171_s9 + $0x78] sm:$0xf] }
 0x15b   : > { %2708 = vrot.lane.b32.xlu0 %v8176_v13, %s9083_s16  ;;  %v3026_v56 = vsel %vm13037_vm12, %v2993_v60, %v2699_v47  ;;  %v3024_v21 = vsel %vm13037_vm12, %v2991_v1, %v2697_v55  ;;  %v2779_v58 = vpop.permute.xlu0 %2778  ;;  %v8064_v23 = vcombine.low %v10414_v57, %v10421_v26  ;;  %v8065_v15 = vcombine.low %v10452_v9, %v10455_v29 }
 0x15c   : > { %v3057_v22 = vsel %vm3039_vm14, %v3024_v21, %v2777_v59  ;;  %v10681_v39 = vpop.permute.xlu1 %2190  ;;  %v3059_v34 = vsel %vm3039_vm14, %v3026_v56, %v2779_v58  ;;  %v3348_v40 = vsel %vm10696_vm13, 0, %v3347_v30  ;;  %v3345_v49 = vsel %vm10696_vm13, 0, %v3344_v31 }
 0x15d   : > { %8763 = vmatprep.mubr.msk.bf16.mxu0 %vm3099_vm15, %v3057_v22  ;;  %v9085_v27 = vmov 0   ;;  %v3354_v51 = vsel %vm10696_vm13, 0, %v3353_v37  ;;  %3349 = vst [vmem:[#allocation2 + $0x18] sm:$0x1] %v3348_v40  ;;  %3346 = vst [vmem:[#allocation2 + $0xc] sm:$0x1] %v3345_v49  ;;  %v8060_v0 = vcombine.low %v8979_v25, %v8980_v33 }
 0x15e   : > { %2790 = vrot.lane.b32.xlu1 %v8193_v28, %s9084_s25  ;;  %8764 = vmatmul.mubr.msk.bf16.gmra.mrb[16].mxu0 %vm3099_vm15, %v3059_v34  ;;  %3330 = vst.msk [vmem:[#allocation2] sm:$0xf] %vm3329_vm0, %v9085_v27  ;;  %3331 = vst.msk [vmem:[#allocation2 + $0x4] sm:$0xf] %vm3329_vm0, %v9085_v27  ;;  %v3351_v45 = vsel %vm10696_vm13, 0, %v3350_v36  ;;  %v3404_v4 = vsel %vm10716_vm3, 0, %v3403_v53 }
 0x15f   : > { %2788 = vrot.lane.b32.xlu0 %v8192_v54, %s9084_s25  ;;  %v10692_v47 = vpop.permute.xlu0 %2268  ;;  %3333 = vst.msk [vmem:[#allocation2 + $0x8] sm:$0x1] %vm3332_vm1, %v9085_v27  ;;  %3337 = vst.msk [vmem:[#allocation2 + $0xd4] sm:$0x1] %vm3332_vm1, %v9085_v27  ;;  %v3401_v46 = vsel %vm10716_vm3, 0, %v3400_v18  ;;  %v3410_v52 = vsel %vm10716_vm3, 0, %v3409_v10  ;;  %v2825_v58 = vsel %vm2792_vm6, %v8060_v0, %v10652_v8 }
 0x160   : > { %v10700_v2 = vpop.permute.xlu1 %2270  ;;  %3335 = vst.msk [vmem:[#allocation2 + $0xcc] sm:$0xf] %vm3329_vm0, %v9085_v27  ;;  %3336 = vst.msk [vmem:[#allocation2 + $0xd0] sm:$0xf] %vm3329_vm0, %v9085_v27  ;;  %v3407_v61 = vsel %vm10716_vm3, 0, %v3406_v42  ;;  %v2863_v49 = vsel %vm2841_vm7, %v2825_v58, %v10692_v47 }
 0x161   : > { %3355 = vst [vmem:[#allocation2 + $0x30] sm:$0x1] %v3354_v51  ;;  %3352 = vst [vmem:[#allocation2 + $0x24] sm:$0x1] %v3351_v45  ;;  %v8981_v37 = vld [vmem:[%s9171_s9 + $0x84] sm:$0xf] }
 0x162   : > { %3405 = vst [vmem:[#allocation2 + $0x20] sm:$0x1] %v3404_v4  ;;  %3402 = vst [vmem:[#allocation2 + $0x14] sm:$0x1] %v3401_v46  ;;  %v8982_v36 = vld [vmem:[%s9171_s9 + $0x88] sm:$0xf] }
 0x163   : > { %3411 = vst [vmem:[#allocation2 + $0x38] sm:$0x1] %v3410_v52  ;;  %3408 = vst [vmem:[#allocation2 + $0x2c] sm:$0x1] %v3407_v61  ;;  %v2365_v48 = vpop.permute.xlu0 %2364  ;;  %v8061_v10 = vcombine.low %v8981_v37, %v8982_v36  ;;  %v3359_v27 = vld [vmem:[#allocation2 + $0x48] sm:$0x1] }
 0x164   : > { %v10730_v7 = vpop.permute.xlu1 %2366  ;;  %v3360_v4 = vsel %vm10696_vm13, 0, %v3359_v27  ;;  %v2896_v46 = vsel %vm2874_vm8, %v2863_v49, %v2365_v48  ;;  %v3356_v25 = vld [vmem:[#allocation2 + $0x3c] sm:$0x1]  ;;  %v3415_v0 = vld [vmem:[#allocation2 + $0x50] sm:$0x1] }
 0x165   : > { %v3341_v41 = vld [vmem:[#allocation2] sm:$0x1]  ;;  %v10732_v16 = vld [vmem:[#allocation2 + $0x4] sm:$0xf]  ;;  %v4416_v60 = vld [vmem:[#allocation2] sm:$0xe]  ;;  %v2828_v47 = vsel %vm2792_vm6, %v8061_v10, %v10681_v39 }
 0x166   : > { %v3397_v44 = vld [vmem:[#allocation2 + $0x8] sm:$0x1]  ;;  %v3342_v43 = vsel %vm10696_vm13, 0, %v3341_v41  ;;  %v4042_v59 = vshll.u32 %v10732_v16, 16  ;;  %v4046_v11 = vshrl.u32 %v10732_v16, 16  ;;  %v4482_v28 = vrot.slane %v10732_v16, 5 }
 0x167   : > { %v3398_v14 = vsel %vm10716_vm3, 0, %v3397_v44  ;;  %3343 = vst [vmem:[#allocation2] sm:$0x1] %v3342_v43  ;;  %v8246_v31 = vrot.slane %v4416_v60, 9  ;;  %3361 = vst [vmem:[#allocation2 + $0x48] sm:$0x1] %v3360_v4 }
 0x168   : > { %3399 = vst [vmem:[#allocation2 + $0x8] sm:$0x1] %v3398_v14  ;;  %v4044_v63 = vrot.slane %v4042_v59, 5  ;;  %v4048_v35 = vrot.slane %v4046_v11, 4  ;;  %v4484_v53 = vrot.slane %v4482_v28, 4  ;;  %v2865_v11 = vsel %vm2841_vm7, %v2828_v47, %v10700_v2 }
 0x169   : > { %v4483_v51 = vsel %vm9195_vm2, %v8246_v31, %v4482_v28  ;;  %v2898_v39 = vsel %vm2874_vm8, %v2865_v11, %v10730_v7  ;;  %v3357_v33 = vsel %vm10696_vm13, 0, %v3356_v25  ;;  %v3412_v7 = vld [vmem:[#allocation2 + $0x44] sm:$0x1]  ;;  %v8986_v37 = vld [vmem:[%s9171_s9 + $0xa0] sm:$0xf] }
 0x16a   : > { %v2447_v62 = vpop.permute.xlu1 %2446  ;;  %v4049_v12 = vor.u32 %v4048_v35, %v4044_v63  ;;  %3358 = vst [vmem:[#allocation2 + $0x3c] sm:$0x1] %v3357_v33  ;;  %vm3547_vm1 = vsmask.f32 4368 }
 0x16b   : > { %v2445_v24 = vpop.permute.xlu0 %2444 }
 0x16c   : > { %v4050_v56 = vrot.slane %v4049_v12, 4  ;;  %v2929_v44 = vsel %vm2907_vm9, %v2896_v46, %v2445_v24  ;;  %v2931_v24 = vsel %vm2907_vm9, %v2898_v39, %v2447_v62 }
 0x16e   : > { %v2527_v20 = vpop.permute.xlu1 %2526  ;;  %v10742_v38 = vld [vmem:[#allocation2] sm:$0xf] }
 0x16f   : > { %v2525_v32 = vpop.permute.xlu0 %2524  ;;  %v4016_v13 = vld [vmem:[#allocation2 + $0x8] sm:$0x1]  ;;  %v4033_v6 = vshrl.u32 %v10742_v38, 16  ;;  %v4036_v5 = vshll.u32 %v10742_v38, 16 }
 0x170   : > { %v4052_v3 = vshll.u32 %v4016_v13, 16  ;;  %v4485_v18 = vrot.slane %v4016_v13, 5  ;;  %v2962_v43 = vsel %vm2940_vm10, %v2929_v44, %v2525_v32  ;;  %v2964_v32 = vsel %vm2940_vm10, %v2931_v24, %v2527_v20 }
 0x171   : > { %v4035_v1 = vrot.slane %v4033_v6, 4  ;;  %v4038_v54 = vrot.slane %v4036_v5, 5  ;;  %v3416_v5 = vsel %vm10716_vm3, 0, %v3415_v0 }
 0x172   : > { %v4054_v21 = vrot.slane %v4052_v3, 5  ;;  %v2623_v22 = vpop.permute.xlu1 %2622  ;;  %v4486_v45 = vsel %vm9195_vm2, %v4484_v53, %v4485_v18  ;;  %3417 = vst [vmem:[#allocation2 + $0x50] sm:$0x1] %v3416_v5  ;;  %v3413_v3 = vsel %vm10716_vm3, 0, %v3412_v7  ;;  %v8985_v18 = vld [vmem:[%s9171_s9 + $0x9c] sm:$0xf] }
 0x173   : > { %v2621_v34 = vpop.permute.xlu0 %2620  ;;  %v4039_v30 = vor.u32 %v4038_v54, %v4035_v1  ;;  %v8326_v14 = vcombine.low %v4483_v51, %v4486_v45  ;;  %v2997_v2 = vsel %vm13036_vm11, %v2964_v32, %v2623_v22  ;;  %3414 = vst [vmem:[#allocation2 + $0x44] sm:$0x1] %v3413_v3  ;;  %v8983_v22 = vld [vmem:[%s9171_s9 + $0x90] sm:$0xf]  ;;  %v8063_v36 = vcombine.low %v8985_v18, %v8986_v37  ;;  %v10802_v51 = vld [vmem:[%s13030_s2] ss:$0 sm:$0xff] }
 0x174   : > { %v4055_v40 = vsel %vm9239_vm5, %v4050_v56, %v4054_v21  ;;  %v2995_v59 = vsel %vm13036_vm11, %v2962_v43, %v2621_v34  ;;  %v8984_v34 = vld [vmem:[%s9171_s9 + $0x94] sm:$0xf] }
 0x175   : > { %v4040_v42 = vrot.slane %v4039_v30, 4  ;;  %v8062_v30 = vcombine.low %v8983_v22, %v8984_v34  ;;  %v3418_v34 = vld [vmem:[#allocation2 + $0x5c] sm:$0x1] }
 0x177   : > { %v4045_v8 = vsel %vm9239_vm5, %v4040_v42, %v4044_v63 }
 0x178   : > { %v8310_v41 = vcombine.low %v4045_v8, %v4055_v40  ;;  %v3365_v40 = vld [vmem:[#allocation2 + $0x60] sm:$0x1] }
 0x179   : > { %v2703_v52 = vpop.permute.xlu1 %2702  ;;  %v3366_v27 = vsel %vm10696_vm13, 0, %v3365_v40 }
 0x17a   : > { %v2701_v61 = vpop.permute.xlu0 %2700  ;;  %5921 = vrot.lane.b32.xlu0 %v8310_v41, %s9080_s13  ;;  %v3030_v13 = vsel %vm13037_vm12, %v2997_v2, %v2703_v52  ;;  %3367 = vst [vmem:[#allocation2 + $0x60] sm:$0x1] %v3366_v27 }
 0x17b   : > { %v3028_v48 = vsel %vm13037_vm12, %v2995_v59, %v2701_v61 }
 0x17e   : > { %v2781_v63 = vpop.permute.xlu0 %2780  ;;  %6001 = vrot.lane.b32.xlu0 %v8326_v14, %s9079_s12 }
 0x17f   : > { %v3061_v35 = vsel %vm3039_vm14, %v3028_v48, %v2781_v63  ;;  %v2193_v12 = vpop.permute.xlu1 %2192 }
 0x180   : > { %8767 = vmatprep.mubr.msk.bf16.mxu0 %vm3099_vm15, %v3061_v35  ;;  %v2831_v53 = vsel %vm2792_vm6, %v8062_v30, %v2193_v12 }
 0x185   : > { %v2783_v6 = vpop.permute.xlu0 %2782 }
 0x186   : > { %v2195_v62 = vpop.permute.xlu1 %2194  ;;  %v3063_v20 = vsel %vm3039_vm14, %v3030_v13, %v2783_v6 }
 0x187   : > { %8768 = vmatmul.mubr.msk.bf16.gmra.mrb[20].mxu0 %vm3099_vm15, %v3063_v20  ;;  %v2834_v8 = vsel %vm2792_vm6, %v8063_v36, %v2195_v62  ;;  %v3362_v62 = vld [vmem:[#allocation2 + $0x54] sm:$0x1] }
 0x189   : > { %v2273_v28 = vpop.permute.xlu0 %2272 }
 0x18a   : > { %v2275_v60 = vpop.permute.xlu1 %2274  ;;  %v2867_v49 = vsel %vm2841_vm7, %v2831_v53, %v2273_v28 }
 0x18b   : > { %v2869_v52 = vsel %vm2841_vm7, %v2834_v8, %v2275_v60  ;;  %v3363_v60 = vsel %vm10696_vm13, 0, %v3362_v62 }
 0x18c   : > { %3364 = vst [vmem:[#allocation2 + $0x54] sm:$0x1] %v3363_v60 }
 0x18d   : > { %v2369_v54 = vpop.permute.xlu0 %2368 }
 0x18e   : > { %v2371_v1 = vpop.permute.xlu1 %2370  ;;  %v2900_v45 = vsel %vm2874_vm8, %v2867_v49, %v2369_v54 }
 0x18f   : > { %v2902_v48 = vsel %vm2874_vm8, %v2869_v52, %v2371_v1  ;;  %v3421_v1 = vld [vmem:[#allocation2 + $0x68] sm:$0x1] }
 0x194   : > { %v2451_v56 = vpop.permute.xlu1 %2450 }
 0x195   : > { %v2449_v21 = vpop.permute.xlu0 %2448  ;;  %v2935_v6 = vsel %vm2907_vm9, %v2902_v48, %v2451_v56  ;;  %v3422_v56 = vsel %vm10716_vm3, 0, %v3421_v1 }
 0x196   : > { %v2933_v61 = vsel %vm2907_vm9, %v2900_v45, %v2449_v21  ;;  %3423 = vst [vmem:[#allocation2 + $0x68] sm:$0x1] %v3422_v56 }
 0x198   : > { %v2531_v58 = vpop.permute.xlu1 %2530 }
 0x199   : > { %v2529_v31 = vpop.permute.xlu0 %2528  ;;  %v2968_v20 = vsel %vm2940_vm10, %v2935_v6, %v2531_v58  ;;  %v3419_v58 = vsel %vm10716_vm3, 0, %v3418_v34 }
 0x19a   : > { %v2966_v47 = vsel %vm2940_vm10, %v2933_v61, %v2529_v31  ;;  %3420 = vst [vmem:[#allocation2 + $0x5c] sm:$0x1] %v3419_v58 }
 0x19c   : > { %v2627_v10 = vpop.permute.xlu1 %2626 }
 0x19d   : > { %v2625_v42 = vpop.permute.xlu0 %2624  ;;  %v3001_v54 = vsel %vm13036_vm11, %v2968_v20, %v2627_v10  ;;  %v3879_v10 = vld [vmem:[#allocation2 + $0x18] sm:$0xf] }
 0x19e   : > { %v2999_v14 = vsel %vm13036_vm11, %v2966_v47, %v2625_v42  ;;  %vm10831_vm11 = vmand %vm3329_vm0, %vm3395_vm4  ;;  %vm13055_vm4 = vsmask.f32 256  ;;  %v3883_v47 = vld [vmem:[#allocation2 + $0x20] sm:$0x1] }
 0x1a2   : > { %v2707_v4 = vpop.permute.xlu1 %2706 }
 0x1a3   : > { %v2705_v46 = vpop.permute.xlu0 %2704  ;;  %v8749_v41 = vpop.f32.mrb[0].mxu0  ;;  %v3034_v18 = vsel %vm13037_vm12, %v3001_v54, %v2707_v4 }
 0x1a4   : > { %v3179_v44 = vadd.f32 %v8749_v41, %v10802_v51  ;;  %v3170_v43 = vpop.f32.mrb[1].mxu0  ;;  %v3032_v63 = vsel %vm13037_vm12, %v2999_v14, %v2705_v46  ;;  %v3872_v46 = vld [vmem:[#allocation2 + $0xc] sm:$0xf]  ;;  %vm10839_vm12 = vmor %vm13055_vm4, %vm3547_vm1  ;;  %vm13058_vm1 = vcmask 195584  }
 0x1a5   : > { %v3171_v59 = vadd.f32 %v10802_v51, %v3170_v43  ;;  %v8750_v11 = vpop.f32.mrb[2].mxu0  ;;  %vm13059_vm4 = vmmov %vm13058_vm1 }
 0x1a6   : > { %v3299_v12 = vmax.f32 %v3179_v44, 0.0  ;;  %v3182_v39 = vadd.f32 %v8750_v11, %v10802_v51  ;;  %v3173_v24 = vpop.f32.mrb[3].mxu0 }
 0x1a7   : > { %v2785_v35 = vpop.permute.xlu0 %2784  ;;  %v3297_v25 = vmax.f32 %v3171_v59, 0.0  ;;  %v3174_v2 = vadd.f32 %v10802_v51, %v3173_v24 }
 0x1a8   : > { %v3065_v32 = vsel %vm3039_vm14, %v3032_v63, %v2785_v35  ;;  %v8545_v0 = vpack.c.bf16 %v3299_v12, %v3299_v12  ;;  %v3300_v13 = vmax.f32 %v3182_v39, 0.0  ;;  %v3876_v63 = vld [vmem:[#allocation2 + $0x14] sm:$0x1] }
 0x1a9   : > { %v10816_v33 = vpop.permute.xlu1 %2196  ;;  %8771 = vmatprep.mubr.msk.bf16.mxu0 %vm3099_vm15, %v3065_v32  ;;  %v8543_v5 = vpack.c.bf16 %v3297_v25, %v3297_v25  ;;  %v3298_v7 = vmax.f32 %v3174_v2, 0.0 }
 0x1aa   : > { %v3567_v3 = vshrl.u32 %v8545_v0, 16  ;;  %v8546_v28 = vpack.c.bf16 %v3300_v13, %v3300_v13  ;;  %v3570_v31 = vshll.u32 %v8545_v0, 16 }
 0x1ab   : > { %v3550_v21 = vshrl.u32 %v8543_v5, 16  ;;  %v8544_v22 = vpack.c.bf16 %v3298_v7, %v3298_v7  ;;  %v3553_v40 = vshll.u32 %v8543_v5, 16  ;;  %v2837_v5 = vsel %vm2792_vm6, %v8064_v23, %v10816_v33 }
 0x1ac   : > { %v3569_v30 = vrot.slane %v3567_v3, 7  ;;  %v3575_v53 = vshrl.u32 %v8546_v28, 16  ;;  %v3578_v61 = vshll.u32 %v8546_v28, 16 }
 0x1ad   : > { %v3552_v42 = vrot.slane %v3550_v21, 7  ;;  %v3558_v49 = vshrl.u32 %v8544_v22, 16  ;;  %v3561_v43 = vshll.u32 %v8544_v22, 16 }
 0x1ae   : > { %v2787_v37 = vpop.permute.xlu0 %2786  ;;  %v3572_v45 = vor.u32 %v3570_v31, %v3569_v30  ;;  %v3577_v52 = vrot.slane %v3575_v53, 7  ;;  %v3573_v14 = vrot.slane %v3569_v30, 4 }
 0x1af   : > { %v2199_v27 = vpop.permute.xlu1 %2198  ;;  %v3067_v8 = vsel %vm3039_vm14, %v3034_v18, %v2787_v37  ;;  %v3555_v4 = vor.u32 %v3553_v40, %v3552_v42  ;;  %v3560_v44 = vrot.slane %v3558_v49, 7  ;;  %v3556_v12 = vrot.slane %v3552_v42, 4 }
 0x1b0   : > { %8772 = vmatmul.mubr.msk.bf16.gmra.mrb[24].mxu0 %vm3099_vm15, %v3067_v8  ;;  %v3880_v59 = vsel %vm10831_vm11, %v3572_v45, %v3879_v10  ;;  %v3580_v11 = vor.u32 %v3578_v61, %v3577_v52  ;;  %v3582_v48 = vrot.slane %v3577_v52, 4  ;;  %v2840_v7 = vsel %vm2792_vm6, %v8065_v15, %v2199_v27 }
 0x1b1   : > { %3881 = vst [vmem:[#allocation2 + $0x18] sm:$0xf] %v3880_v59  ;;  %v3873_v39 = vsel %vm10831_vm11, %v3555_v4, %v3872_v46  ;;  %v3563_v24 = vor.u32 %v3561_v43, %v3560_v44  ;;  %v3565_v32 = vrot.slane %v3560_v44, 4 }
 0x1b2   : > { %v2277_v35 = vpop.permute.xlu0 %2276  ;;  %3874 = vst [vmem:[#allocation2 + $0xc] sm:$0xf] %v3873_v39  ;;  %v3581_v2 = vsel %vm10839_vm12, %v3573_v14, %v3580_v11  ;;  %v3884_v0 = vsel %vm10696_vm13, %v3582_v48, %v3883_v47 }
 0x1b3   : > { %v2279_v25 = vpop.permute.xlu1 %2278  ;;  %3882 = vst.msk [vmem:[#allocation2 + $0x1c] sm:$0xf] %vm3329_vm0, %v3581_v2  ;;  %3885 = vst [vmem:[#allocation2 + $0x20] sm:$0x1] %v3884_v0  ;;  %v3564_v13 = vsel %vm10839_vm12, %v3556_v12, %v3563_v24  ;;  %v3877_v6 = vsel %vm10696_vm13, %v3565_v32, %v3876_v63  ;;  %v2871_v3 = vsel %vm2841_vm7, %v2837_v5, %v2277_v35 }
 0x1b4   : > { %3875 = vst.msk [vmem:[#allocation2 + $0x10] sm:$0xf] %vm3329_vm0, %v3564_v13  ;;  %3878 = vst [vmem:[#allocation2 + $0x14] sm:$0x1] %v3877_v6  ;;  %v2873_v20 = vsel %vm2841_vm7, %v2840_v7, %v2279_v25 }
 0x1b6   : > { %v2373_v28 = vpop.permute.xlu0 %2372 }
 0x1b7   : > { %v2375_v62 = vpop.permute.xlu1 %2374  ;;  %v2904_v29 = vsel %vm2874_vm8, %v2871_v3, %v2373_v28 }
 0x1b8   : > { %v4594_v60 = vld [vmem:[#allocation2 + $0x18] sm:$0xf]  ;;  %v2906_v9 = vsel %vm2874_vm8, %v2873_v20, %v2375_v62 }
 0x1b9   : > { %v5201_v1 = vld [vmem:[#allocation2 + $0x18] sm:$0xf]  ;;  %v4665_v54 = vshrl.u32 %v4594_v60, 16  ;;  %v4668_v57 = vshll.u32 %v4594_v60, 16  ;;  %v4592_v33 = vld [vmem:[#allocation2 + $0xc] sm:$0xf] }
 0x1ba   : > { %v5250_v26 = vshrl.u32 %v5201_v1, 16  ;;  %v5253_v23 = vshll.u32 %v5201_v1, 16  ;;  %v5025_v21 = vld [vmem:[#allocation2 + $0x18] sm:$0xe]  ;;  %v10870_v15 = vld [vmem:[#allocation2 + $0x1c] sm:$0xf] }
 0x1bb   : > { %v10872_v22 = vld [vmem:[#allocation2 + $0x1c] sm:$0xf]  ;;  %v4641_v56 = vshrl.u32 %v4592_v33, 16  ;;  %v4644_v34 = vshll.u32 %v4592_v33, 16  ;;  %v10874_v30 = vrot.slane %v4665_v54, 4  ;;  %v10876_v31 = vrot.slane %v4668_v57, 5 }
 0x1bc   : > { %v8343_v53 = vcombine.low %v4594_v60, %v10870_v15  ;;  %v4678_v58 = vshrl.u32 %v10870_v15, 16  ;;  %v10880_v18 = vld [vmem:[#allocation2 + $0x10] sm:$0xf]  ;;  %v10882_v10 = vrot.slane %v5250_v26, 4  ;;  %v10884_v42 = vrot.slane %v5253_v23, 5 }
 0x1bd   : > { %v2455_v37 = vpop.permute.xlu1 %2454  ;;  %v5263_v40 = vshrl.u32 %v10872_v22, 16  ;;  %v8390_v49 = vcombine.low %v5201_v1, %v10872_v22  ;;  %v10888_v27 = vld [vmem:[#allocation2 + $0x20] sm:$0x1]  ;;  %v10892_v46 = vrot.slane %v4641_v56, 4  ;;  %v10894_v52 = vrot.slane %v4644_v34, 5 }
 0x1be   : > { %v2939_v8 = vsel %vm2907_vm9, %v2906_v9, %v2455_v37  ;;  %v2453_v45 = vpop.permute.xlu0 %2452  ;;  %6099 = vrot.lane.b32.xlu1 %v8343_v53, %s9077_s10  ;;  %v4654_v61 = vshrl.u32 %v10880_v18, 16  ;;  %v10897_v4 = vld [vmem:[#allocation2 + $0x20] sm:$0x1]  ;;  %v8342_v44 = vcombine.low %v4592_v33, %v10880_v18  ;;  %v8263_v43 = vrot.slane %v5025_v21, 9  ;;  %v5633_v59 = vld [vmem:[#allocation2 + $0x18] sm:$0xe] }
 0x1bf   : > { %v2937_v47 = vsel %vm2907_vm9, %v2904_v29, %v2453_v45  ;;  %6353 = vrot.lane.b32.xlu0 %v8390_v49, %s9082_s15  ;;  %v5097_v14 = vrot.slane %v10870_v15, 5  ;;  %v10903_v11 = vld [vmem:[#allocation2 + $0x10] sm:$0xf]  ;;  %v5100_v48 = vrot.slane %v10888_v27, 5  ;;  %v8278_v63 = vrot.slane %v5633_v59, 9 }
 0x1c0   : > { %v5699_v35 = vrot.slane %v10872_v22, 5  ;;  %v5702_v12 = vrot.slane %v10897_v4, 5  ;;  %v10908_v39 = vld [vmem:[#allocation2 + $0x14] sm:$0x1]  ;;  %v4417_v2 = vld [vmem:[#allocation2 + $0xc] sm:$0xe] }
 0x1c1   : > { %v2535_v24 = vpop.permute.xlu1 %2534  ;;  %v5098_v32 = vsel %vm9195_vm2, %v8263_v43, %v5097_v14  ;;  %v5099_v25 = vrot.slane %v5097_v14, 4  ;;  %v4489_v0 = vrot.slane %v10903_v11, 5  ;;  %v4492_v13 = vrot.slane %v10908_v39, 5  ;;  %v10917_v3 = vld [vmem:[#allocation2 + $0x1c] sm:$0xf] }
 0x1c2   : > { %v2972_v6 = vsel %vm2940_vm10, %v2939_v8, %v2535_v24  ;;  %v2533_v5 = vpop.permute.xlu0 %2532  ;;  %v5700_v7 = vsel %vm9195_vm2, %v8278_v63, %v5699_v35  ;;  %v5701_v62 = vrot.slane %v5699_v35, 4  ;;  %v8247_v20 = vrot.slane %v4417_v2, 9  ;;  %v10919_v28 = vld [vmem:[#allocation2 + $0x20] sm:$0x1]  ;;  %v4418_v57 = vld [vmem:[#allocation2 + $0x18] sm:$0xe] }
 0x1c3   : > { %v2970_v60 = vsel %vm2940_vm10, %v2937_v47, %v2533_v5  ;;  %6097 = vrot.lane.b32.xlu0 %v8342_v44, %s9077_s10  ;;  %v5101_v1 = vsel %vm9195_vm2, %v5099_v25, %v5100_v48  ;;  %v4491_v54 = vrot.slane %v4489_v0, 4  ;;  %v4496_v26 = vrot.slane %v10917_v3, 5  ;;  %v10930_v29 = vld [vmem:[#allocation2 + $0x14] sm:$0x1]  ;;  %v5024_v56 = vld [vmem:[#allocation2 + $0xc] sm:$0xe] }
 0x1c4   : > { %v8375_v23 = vcombine.low %v5098_v32, %v5101_v1  ;;  %v5703_v33 = vsel %vm9195_vm2, %v5701_v62, %v5702_v12  ;;  %v4490_v21 = vsel %vm9195_vm2, %v8247_v20, %v4489_v0  ;;  %v8248_v9 = vrot.slane %v4418_v57, 9 }
 0x1c5   : > { %v2631_v34 = vpop.permute.xlu1 %2630  ;;  %v8422_v53 = vcombine.low %v5700_v7, %v5703_v33  ;;  %v4493_v37 = vsel %vm9195_vm2, %v4491_v54, %v4492_v13  ;;  %v4498_v49 = vrot.slane %v4496_v26, 4  ;;  %v4499_v8 = vrot.slane %v10919_v28, 5 }
 0x1c6   : > { %v3005_v45 = vsel %vm13058_vm1, %v2972_v6, %v2631_v34  ;;  %v2629_v47 = vpop.permute.xlu0 %2628  ;;  %6259 = vrot.lane.b32.xlu1 %v8375_v23, %s9078_s11  ;;  %v8327_v44 = vcombine.low %v4490_v21, %v4493_v37  ;;  %v4497_v43 = vsel %vm9195_vm2, %v8248_v9, %v4496_v26  ;;  %v8262_v14 = vrot.slane %v5024_v56, 9 }
 0x1c7   : > { %v3003_v59 = vsel %vm13059_vm4, %v2970_v60, %v2629_v47  ;;  %6513 = vrot.lane.b32.xlu0 %v8422_v53, %s9084_s25  ;;  %v4500_v48 = vsel %vm9195_vm2, %v4498_v49, %v4499_v8  ;;  %v5090_v63 = vrot.slane %v10880_v18, 5  ;;  %v5093_v35 = vrot.slane %v10930_v29, 5 }
 0x1c8   : > { %v8328_v12 = vcombine.low %v4497_v43, %v4500_v48  ;;  %v4671_v24 = vor.u32 %v10876_v31, %v10874_v30  ;;  %v4674_v32 = vshll.u32 %v10870_v15, 16  ;;  %v4680_v25 = vrot.slane %v4678_v58, 4 }
 0x1c9   : > { %v5091_v0 = vsel %vm9195_vm2, %v8262_v14, %v5090_v63  ;;  %v5092_v13 = vrot.slane %v5090_v63, 4  ;;  %v4684_v6 = vshll.u32 %v10888_v27, 16  ;;  %v5256_v5 = vor.u32 %v10884_v42, %v10882_v10 }
 0x1ca   : > { %v8753_v2 = vpop.f32.mrb[4].mxu0  ;;  %6003 = vrot.lane.b32.xlu1 %v8327_v44, %s9079_s12  ;;  %v4672_v30 = vrot.slane %v4671_v24, 4  ;;  %v4676_v31 = vrot.slane %v4674_v32, 5  ;;  %v5259_v15 = vshll.u32 %v10872_v22, 16  ;;  %vm13060_vm1 = vcmask 228352  }
 0x1cb   : > { %v3195_v7 = vadd.f32 %v8753_v2, %v10802_v51  ;;  %v3186_v62 = vpop.f32.mrb[5].mxu0  ;;  %6005 = vrot.lane.b32.xlu0 %v8328_v12, %s9079_s12  ;;  %v5094_v27 = vsel %vm9195_vm2, %v5092_v13, %v5093_v35  ;;  %v4686_v60 = vrot.slane %v4684_v6, 5  ;;  %v10962_v1 = vrot.slane %v5256_v5, 4  ;;  %vm13061_vm4 = vmmov %vm13060_vm1  ;;  %v3893_v6 = vld [vmem:[#allocation2 + $0x30] sm:$0xf] }
 0x1cc   : > { %v3187_v58 = vadd.f32 %v10802_v51, %v3186_v62  ;;  %v8754_v20 = vpop.f32.mrb[6].mxu0  ;;  %v2711_v10 = vpop.permute.xlu1 %2710  ;;  %v8374_v26 = vcombine.low %v5091_v0, %v5094_v27  ;;  %v4677_v23 = vsel %vm9239_vm5, %v4672_v30, %v4676_v31  ;;  %v4681_v34 = vor.u32 %v4680_v25, %v4676_v31 }
 0x1cd   : > { %v3303_v42 = vmax.f32 %v3195_v7, 0.0  ;;  %v3198_v54 = vadd.f32 %v8754_v20, %v10802_v51  ;;  %v3189_v57 = vpop.f32.mrb[7].mxu0  ;;  %v3038_v33 = vsel %vm13060_vm1, %v3005_v45, %v2711_v10  ;;  %v2709_v21 = vpop.permute.xlu0 %2708  ;;  %v10970_v8 = vrot.slane %v5259_v15, 5 }
 0x1ce   : > { %v3301_v9 = vmax.f32 %v3187_v58, 0.0  ;;  %v3190_v56 = vadd.f32 %v10802_v51, %v3189_v57  ;;  %v3036_v53 = vsel %vm13061_vm4, %v3003_v59, %v2709_v21  ;;  %v4682_v43 = vrot.slane %v4681_v34, 4  ;;  %v3886_v58 = vld [vmem:[#allocation2 + $0x24] sm:$0xf] }
 0x1cf   : > { %v8549_v37 = vpack.c.bf16 %v3303_v42, %v3303_v42  ;;  %v3304_v49 = vmax.f32 %v3198_v54, 0.0  ;;  %6257 = vrot.lane.b32.xlu0 %v8374_v26, %s9078_s11  ;;  %v5265_v14 = vrot.slane %v5263_v40, 4  ;;  %v5262_v59 = vsel %vm9239_vm5, %v10962_v1, %v10970_v8  ;;  %v3897_v42 = vld [vmem:[#allocation2 + $0x38] sm:$0x1] }
 0x1d0   : > { %v8547_v47 = vpack.c.bf16 %v3301_v9, %v3301_v9  ;;  %v3302_v44 = vmax.f32 %v3190_v56, 0.0  ;;  %v2791_v45 = vpop.permute.xlu1 %2790  ;;  %v4687_v30 = vsel %vm9239_vm5, %v4682_v43, %v4686_v60  ;;  %v3988_v26 = vld [vmem:[#allocation2 + $0x18] sm:$0xf]  ;;  %v3890_v9 = vld [vmem:[#allocation2 + $0x2c] sm:$0x1]  ;;  %v5269_v56 = vshll.u32 %v10897_v4, 16 }
 0x1d1   : > { %v3601_v48 = vshrl.u32 %v8549_v37, 16  ;;  %v3604_v63 = vshll.u32 %v8549_v37, 16  ;;  %v8550_v35 = vpack.c.bf16 %v3304_v49, %v3304_v49  ;;  %v3071_v12 = vsel %vm3039_vm14, %v3038_v33, %v2791_v45  ;;  %v2789_v24 = vpop.permute.xlu0 %2788 }
 0x1d2   : > { %v3584_v32 = vshrl.u32 %v8547_v47, 16  ;;  %v3587_v25 = vshll.u32 %v8547_v47, 16  ;;  %v8548_v2 = vpack.c.bf16 %v3302_v44, %v3302_v44  ;;  %v3069_v0 = vsel %vm3039_vm14, %v3036_v53, %v2789_v24  ;;  %v3986_v24 = vld [vmem:[#allocation2 + $0xc] sm:$0xf] }
 0x1d3   : > { %v3603_v13 = vrot.slane %v3601_v48, 7  ;;  %v3609_v22 = vshrl.u32 %v8550_v35, 16  ;;  %v3612_v40 = vshll.u32 %v8550_v35, 16  ;;  %8775 = vmatprep.mubr.msk.bf16.mxu0 %vm3099_vm15, %v3069_v0  ;;  %v10985_v27 = vcombine.low %v4677_v23, %v4687_v30 }
 0x1d4   : > { %v3586_v5 = vrot.slane %v3584_v32, 7  ;;  %v3592_v7 = vshrl.u32 %v8548_v2, 16  ;;  %v3595_v62 = vshll.u32 %v8548_v2, 16  ;;  %8776 = vmatmul.mubr.msk.bf16.gmra.mrb[28].mxu0 %vm3099_vm15, %v3071_v12  ;;  %v5266_v57 = vor.u32 %v5265_v14, %v10970_v8 }
 0x1d5   : > { %v3606_v31 = vor.u32 %v3604_v63, %v3603_v13  ;;  %v3607_v15 = vrot.slane %v3603_v13, 4  ;;  %v3611_v20 = vrot.slane %v3609_v22, 7  ;;  %v5271_v47 = vrot.slane %v5269_v56, 5 }
 0x1d6   : > { %v3589_v1 = vor.u32 %v3587_v25, %v3586_v5  ;;  %v3590_v10 = vrot.slane %v3586_v5, 4  ;;  %v3594_v54 = vrot.slane %v3592_v7, 7  ;;  %v5267_v37 = vrot.slane %v5266_v57, 4 }
 0x1d7   : > { %v3894_v33 = vsel %vm10831_vm11, %v3606_v31, %v3893_v6  ;;  %v3614_v21 = vor.u32 %v3612_v40, %v3611_v20  ;;  %v3616_v60 = vrot.slane %v3611_v20, 4  ;;  %v4081_v44 = vshrl.u32 %v3988_v26, 16 }
 0x1d8   : > { %3895 = vst [vmem:[#allocation2 + $0x30] sm:$0xf] %v3894_v33  ;;  %v3887_v23 = vsel %vm10831_vm11, %v3589_v1, %v3886_v58  ;;  %v3597_v34 = vor.u32 %v3595_v62, %v3594_v54  ;;  %v3599_v53 = vrot.slane %v3594_v54, 4  ;;  %v4084_v14 = vshll.u32 %v3988_v26, 16 }
 0x1d9   : > { %3888 = vst [vmem:[#allocation2 + $0x24] sm:$0xf] %v3887_v23  ;;  %v3615_v49 = vsel %vm10839_vm12, %v3607_v15, %v3614_v21  ;;  %v3898_v8 = vsel %vm10696_vm13, %v3616_v60, %v3897_v42  ;;  %v4090_v45 = vshll.u32 %v10917_v3, 16  ;;  %v5272_v48 = vsel %vm9239_vm5, %v5267_v37, %v5271_v47 }
 0x1da   : > { %3896 = vst.msk [vmem:[#allocation2 + $0x34] sm:$0xf] %vm3329_vm0, %v3615_v49  ;;  %3899 = vst [vmem:[#allocation2 + $0x38] sm:$0x1] %v3898_v8  ;;  %v3598_v4 = vsel %vm10839_vm12, %v3590_v10, %v3597_v34  ;;  %v3891_v43 = vsel %vm10696_vm13, %v3599_v53, %v3890_v9  ;;  %v4083_v63 = vrot.slane %v4081_v44, 4  ;;  %v4094_v35 = vshrl.u32 %v10917_v3, 16 }
 0x1db   : > { %3889 = vst.msk [vmem:[#allocation2 + $0x28] sm:$0xf] %vm3329_vm0, %v3598_v4  ;;  %3892 = vst [vmem:[#allocation2 + $0x2c] sm:$0x1] %v3891_v43  ;;  %v4100_v12 = vshll.u32 %v10919_v28, 16  ;;  %v11008_v32 = vcombine.low %v5262_v59, %v5272_v48  ;;  %v4086_v25 = vrot.slane %v4084_v14, 5  ;;  %v4647_v0 = vor.u32 %v10894_v52, %v10892_v46 }
 0x1dc   : > { %v11010_v2 = vrot.slane %v4090_v45, 5  ;;  %v4096_v13 = vrot.slane %v4094_v35, 4  ;;  %v4650_v40 = vshll.u32 %v10880_v18, 16  ;;  %v4656_v6 = vrot.slane %v4654_v61, 4 }
 0x1dd   : > { %v11014_v22 = vrot.slane %v4100_v12, 5  ;;  %v4087_v3 = vor.u32 %v4086_v25, %v4083_v63  ;;  %v4648_v5 = vrot.slane %v4647_v0, 4  ;;  %v4660_v28 = vshll.u32 %v10930_v29, 16 }
 0x1de   : > { %v4057_v59 = vshrl.u32 %v3986_v24, 16  ;;  %v4097_v30 = vor.u32 %v4096_v13, %v11010_v2  ;;  %v4652_v31 = vrot.slane %v4650_v40, 5  ;;  %v4060_v15 = vshll.u32 %v3986_v24, 16 }
 0x1df   : > { %v4598_v7 = vld [vmem:[#allocation2 + $0x30] sm:$0xf]  ;;  %v8294_v46 = vcombine.low %v10742_v38, %v10732_v16  ;;  %v4088_v63 = vrot.slane %v4087_v3, 4  ;;  %v4662_v24 = vrot.slane %v4660_v28, 5  ;;  %vm13065_vm1 = vcmask 1041408  }
 0x1e0   : > { %v5205_v62 = vld [vmem:[#allocation2 + $0x30] sm:$0xf]  ;;  %v4713_v52 = vshrl.u32 %v4598_v7, 16  ;;  %v4716_v58 = vshll.u32 %v4598_v7, 16  ;;  %v5203_v18 = vld [vmem:[#allocation2 + $0x24] sm:$0xf]  ;;  %v4653_v54 = vsel %vm9239_vm5, %v4648_v5, %v4652_v31  ;;  %v4657_v57 = vor.u32 %v4656_v6, %v4652_v31 }
 0x1e1   : > { %v5298_v20 = vshrl.u32 %v5205_v62, 16  ;;  %v5301_v1 = vshll.u32 %v5205_v62, 16  ;;  %v11023_v61 = vld [vmem:[#allocation2 + $0x34] sm:$0xf]  ;;  %v5274_v29 = vshrl.u32 %v5203_v18, 16  ;;  %v5277_v42 = vshll.u32 %v5203_v18, 16 }
 0x1e2   : > { %v11025_v10 = vld [vmem:[#allocation2 + $0x34] sm:$0xf]  ;;  %v11029_v26 = vrot.slane %v4713_v52, 4  ;;  %v11031_v33 = vrot.slane %v4716_v58, 5  ;;  %v8345_v21 = vcombine.low %v4598_v7, %v11023_v61  ;;  %v4726_v60 = vshrl.u32 %v11023_v61, 16 }
 0x1e3   : > { %v11035_v9 = vld [vmem:[#allocation2 + $0x28] sm:$0xf]  ;;  %v11037_v56 = vrot.slane %v5298_v20, 4  ;;  %v11039_v23 = vrot.slane %v5301_v1, 5  ;;  %v5311_v34 = vshrl.u32 %v11025_v10, 16  ;;  %v8392_v53 = vcombine.low %v5205_v62, %v11025_v10 }
 0x1e4   : > { %v4596_v37 = vld [vmem:[#allocation2 + $0x24] sm:$0xf]  ;;  %6103 = vrot.lane.b32.xlu1 %v8345_v21, %s9077_s10  ;;  %v5287_v49 = vshrl.u32 %v11035_v9, 16  ;;  %v8391_v8 = vcombine.low %v5203_v18, %v11035_v9  ;;  %v11046_v47 = vrot.slane %v5274_v29, 4  ;;  %v11048_v44 = vrot.slane %v5277_v42, 5 }
 0x1e5   : > { %v11050_v4 = vld [vmem:[#allocation2 + $0x28] sm:$0xf]  ;;  %6357 = vrot.lane.b32.xlu0 %v8392_v53, %s9082_s15  ;;  %v4689_v43 = vshrl.u32 %v4596_v37, 16  ;;  %v4692_v14 = vshll.u32 %v4596_v37, 16  ;;  %v4098_v35 = vrot.slane %v4097_v30, 4  ;;  %v4658_v12 = vrot.slane %v4657_v57, 4 }
 0x1e6   : > { %v4702_v45 = vshrl.u32 %v11050_v4, 16  ;;  %v8344_v48 = vcombine.low %v4596_v37, %v11050_v4  ;;  %v4059_v13 = vrot.slane %v4057_v59, 4  ;;  %v4062_v40 = vrot.slane %v4060_v15, 5  ;;  %v5635_v6 = vld [vmem:[#allocation2 + $0x30] sm:$0xe] }
 0x1e7   : > { %v11055_v25 = vrot.slane %v4689_v43, 4  ;;  %v11057_v0 = vrot.slane %v4692_v14, 5  ;;  %v4093_v5 = vsel %vm9239_vm5, %v4088_v63, %v11010_v2  ;;  %v4103_v3 = vsel %vm9239_vm5, %v4098_v35, %v11014_v22  ;;  %v11070_v62 = vld [vmem:[#allocation2 + $0x38] sm:$0x1]  ;;  %v5027_v59 = vld [vmem:[#allocation2 + $0x30] sm:$0xe] }
 0x1e8   : > { %6179 = vrot.lane.b32.xlu1 %v10985_v27, %s9081_s14  ;;  %v4663_v28 = vsel %vm9239_vm5, %v4658_v12, %v4662_v24  ;;  %v4066_v7 = vshll.u32 %v10903_v11, 16  ;;  %v8312_v27 = vcombine.low %v4093_v5, %v4103_v3  ;;  %v4063_v31 = vor.u32 %v4062_v40, %v4059_v13  ;;  %v11075_v15 = vld [vmem:[#allocation2 + $0x38] sm:$0x1]  ;;  %v11077_v52 = vld [vmem:[#allocation2 + $0x34] sm:$0xf] }
 0x1e9   : > { %6433 = vrot.lane.b32.xlu0 %v11008_v32, %s9083_s16  ;;  %v8358_v30 = vcombine.low %v4653_v54, %v4663_v28  ;;  %v4070_v2 = vshrl.u32 %v10903_v11, 16  ;;  %v4076_v58 = vshll.u32 %v10908_v39, 16  ;;  %v8280_v20 = vrot.slane %v5635_v6, 9  ;;  %v4420_v18 = vld [vmem:[#allocation2 + $0x30] sm:$0xe] }
 0x1ea   : > { %v4068_v22 = vrot.slane %v4066_v7, 5  ;;  %v5713_v1 = vrot.slane %v11025_v10, 5  ;;  %v4064_v29 = vrot.slane %v4063_v31, 4  ;;  %v5716_v32 = vrot.slane %v11070_v62, 5  ;;  %v11082_v54 = vld [vmem:[#allocation2 + $0x38] sm:$0x1] }
 0x1eb   : > { %v4072_v42 = vrot.slane %v4070_v2, 4  ;;  %v8265_v57 = vrot.slane %v5027_v59, 9  ;;  %v4078_v11 = vrot.slane %v4076_v58, 5  ;;  %v5111_v39 = vrot.slane %v11023_v61, 5  ;;  %v4419_v37 = vld [vmem:[#allocation2 + $0x24] sm:$0xe] }
 0x1ec   : > { %6355 = vrot.lane.b32.xlu1 %v8391_v8, %s9082_s15  ;;  %v5714_v21 = vsel %vm9195_vm2, %v8280_v20, %v5713_v1  ;;  %v5715_v53 = vrot.slane %v5713_v1, 4  ;;  %v4069_v43 = vsel %vm9239_vm5, %v4064_v29, %v4068_v22  ;;  %v5114_v63 = vrot.slane %v11075_v15, 5  ;;  %v11092_v12 = vld [vmem:[#allocation2 + $0x28] sm:$0xf]  ;;  %v11099_v6 = vld [vmem:[#allocation2 + $0x2c] sm:$0x1] }
 0x1ed   : > { %6101 = vrot.lane.b32.xlu0 %v8344_v48, %s9077_s10  ;;  %v4073_v14 = vor.u32 %v4072_v42, %v4068_v22  ;;  %v8250_v35 = vrot.slane %v4420_v18, 9  ;;  %v5112_v24 = vsel %vm9195_vm2, %v8265_v57, %v5111_v39  ;;  %v5113_v13 = vrot.slane %v5111_v39, 4  ;;  %v5634_v48 = vld [vmem:[#allocation2 + $0x24] sm:$0xe]  ;;  %v11108_v58 = vld [vmem:[#allocation2 + $0x2c] sm:$0x1] }
 0x1ee   : > { %v5717_v8 = vsel %vm9195_vm2, %v5715_v53, %v5716_v32  ;;  %v4510_v40 = vrot.slane %v11077_v52, 5  ;;  %v4513_v28 = vrot.slane %v11082_v54, 5  ;;  %v8249_v7 = vrot.slane %v4419_v37, 9  ;;  %v5026_v20 = vld [vmem:[#allocation2 + $0x24] sm:$0xe] }
 0x1ef   : > { %v4074_v5 = vrot.slane %v4073_v14, 4  ;;  %v8424_v3 = vcombine.low %v5714_v21, %v5717_v8  ;;  %v5115_v59 = vsel %vm9195_vm2, %v5113_v13, %v5114_v63  ;;  %v4503_v22 = vrot.slane %v11092_v12, 5  ;;  %v11114_v42 = vld [vmem:[#allocation2 + $0x2c] sm:$0x1] }
 0x1f0   : > { %5925 = vrot.lane.b32.xlu1 %v8312_v27, %s9080_s13  ;;  %v4511_v31 = vsel %vm9195_vm2, %v8250_v35, %v4510_v40  ;;  %v4512_v2 = vrot.slane %v4510_v40, 4  ;;  %v8377_v18 = vcombine.low %v5112_v24, %v5115_v59  ;;  %v4506_v27 = vrot.slane %v11099_v6, 5 }
 0x1f1   : > { %6177 = vrot.lane.b32.xlu0 %v8358_v30, %s9081_s14  ;;  %v4079_v1 = vsel %vm9239_vm5, %v4074_v5, %v4078_v11  ;;  %v8279_v29 = vrot.slane %v5634_v48, 9  ;;  %v4504_v21 = vsel %vm9195_vm2, %v8249_v7, %v4503_v22  ;;  %v4505_v53 = vrot.slane %v4503_v22, 4 }
 0x1f2   : > { %v8311_v32 = vcombine.low %v4069_v43, %v4079_v1  ;;  %v4514_v57 = vsel %vm9195_vm2, %v4512_v2, %v4513_v28  ;;  %v5706_v30 = vrot.slane %v11035_v9, 5  ;;  %v5709_v37 = vrot.slane %v11108_v58, 5 }
 0x1f3   : > { %v8330_v39 = vcombine.low %v4511_v31, %v4514_v57  ;;  %v8264_v11 = vrot.slane %v5026_v20, 9  ;;  %v4507_v14 = vsel %vm9195_vm2, %v4505_v53, %v4506_v27  ;;  %v5104_v43 = vrot.slane %v11050_v4, 5 }
 0x1f4   : > { %5923 = vrot.lane.b32.xlu1 %v8311_v32, %s9080_s13  ;;  %v5107_v63 = vrot.slane %v11114_v42, 5  ;;  %v4719_v35 = vor.u32 %v11031_v33, %v11029_v26  ;;  %v8329_v8 = vcombine.low %v4504_v21, %v4507_v14  ;;  %v5707_v24 = vsel %vm9195_vm2, %v8279_v29, %v5706_v30  ;;  %v8757_v48 = vpop.f32.mrb[8].mxu0 }
 0x1f5   : > { %6517 = vrot.lane.b32.xlu0 %v8424_v3, %s9084_s25  ;;  %v5708_v13 = vrot.slane %v5706_v30, 4  ;;  %v4722_v40 = vshll.u32 %v11023_v61, 16  ;;  %v5105_v5 = vsel %vm9195_vm2, %v8264_v11, %v5104_v43  ;;  %v5106_v28 = vrot.slane %v5104_v43, 4  ;;  %v3202_v33 = vpop.f32.mrb[9].mxu0 }
 0x1f6   : > { %v4720_v7 = vrot.slane %v4719_v35, 4  ;;  %v4728_v59 = vrot.slane %v4726_v60, 4  ;;  %v3211_v26 = vadd.f32 %v8757_v48, %v10802_v51  ;;  %v4732_v2 = vshll.u32 %v11075_v15, 16  ;;  %v8758_v20 = vpop.f32.mrb[10].mxu0 }
 0x1f7   : > { %v5710_v3 = vsel %vm9195_vm2, %v5708_v13, %v5709_v37  ;;  %v4724_v31 = vrot.slane %v4722_v40, 5  ;;  %v3203_v22 = vadd.f32 %v10802_v51, %v3202_v33  ;;  %v5108_v27 = vsel %vm9195_vm2, %v5106_v28, %v5107_v63  ;;  %v3205_v32 = vpop.f32.mrb[11].mxu0  ;;  %v3907_v33 = vld [vmem:[#allocation2 + $0x48] sm:$0xf] }
 0x1f8   : > { %6263 = vrot.lane.b32.xlu1 %v8377_v18, %s9078_s11  ;;  %v8423_v1 = vcombine.low %v5707_v24, %v5710_v3  ;;  %v5304_v61 = vor.u32 %v11039_v23, %v11037_v56  ;;  %v3307_v60 = vmax.f32 %v3211_v26, 0.0  ;;  %v3214_v29 = vadd.f32 %v8758_v20, %v10802_v51  ;;  %v3900_v20 = vld [vmem:[#allocation2 + $0x3c] sm:$0xf] }
 0x1f9   : > { %6009 = vrot.lane.b32.xlu0 %v8330_v39, %s9079_s12  ;;  %v8376_v57 = vcombine.low %v5105_v5, %v5108_v27  ;;  %v4725_v15 = vsel %vm9239_vm5, %v4720_v7, %v4724_v31  ;;  %v3305_v21 = vmax.f32 %v3203_v22, 0.0  ;;  %v3206_v18 = vadd.f32 %v10802_v51, %v3205_v32  ;;  %v3911_v27 = vld [vmem:[#allocation2 + $0x50] sm:$0x1] }
 0x1fa   : > { %v4729_v53 = vor.u32 %v4728_v59, %v4724_v31  ;;  %v4734_v30 = vrot.slane %v4732_v2, 5  ;;  %v8553_v37 = vpack.c.bf16 %v3307_v60, %v3307_v60  ;;  %v3308_v11 = vmax.f32 %v3214_v29, 0.0 }
 0x1fb   : > { %v5305_v14 = vrot.slane %v5304_v61, 4  ;;  %v5307_v56 = vshll.u32 %v11025_v10, 16  ;;  %v8551_v23 = vpack.c.bf16 %v3305_v21, %v3305_v21  ;;  %v3306_v43 = vmax.f32 %v3206_v18, 0.0  ;;  %v3992_v21 = vld [vmem:[#allocation2 + $0x30] sm:$0xf] }
 0x1fc   : > { %6007 = vrot.lane.b32.xlu1 %v8329_v8, %s9079_s12  ;;  %v4730_v63 = vrot.slane %v4729_v53, 4  ;;  %v5313_v39 = vrot.slane %v5311_v34, 4  ;;  %v3635_v35 = vshrl.u32 %v8553_v37, 16  ;;  %v3638_v24 = vshll.u32 %v8553_v37, 16  ;;  %v3904_v37 = vld [vmem:[#allocation2 + $0x44] sm:$0x1] }
 0x1fd   : > { %v8554_v13 = vpack.c.bf16 %v3308_v11, %v3308_v11  ;;  %6515 = vrot.lane.b32.xlu0 %v8423_v1, %s9084_s25  ;;  %v5309_v51 = vrot.slane %v5307_v56, 5  ;;  %v3618_v40 = vshrl.u32 %v8551_v23, 16  ;;  %v3621_v48 = vshll.u32 %v8551_v23, 16 }
 0x1fe   : > { %v8552_v5 = vpack.c.bf16 %v3306_v43, %v3306_v43  ;;  %v4735_v28 = vsel %vm9239_vm5, %v4730_v63, %v4734_v30  ;;  %v3637_v7 = vrot.slane %v3635_v35, 7  ;;  %v4129_v63 = vshrl.u32 %v3992_v21, 16 }
 0x1ff   : > { %v3643_v59 = vshrl.u32 %v8554_v13, 16  ;;  %v3646_v26 = vshll.u32 %v8554_v13, 16  ;;  %v11159_v8 = vcombine.low %v4725_v15, %v4735_v28  ;;  %v3620_v10 = vrot.slane %v3618_v40, 7 }
 0x200   : > { %v3626_v34 = vshrl.u32 %v8552_v5, 16  ;;  %v3629_v3 = vshll.u32 %v8552_v5, 16  ;;  %v5310_v31 = vsel %vm9239_vm5, %v5305_v14, %v5309_v51  ;;  %v3640_v2 = vor.u32 %v3638_v24, %v3637_v7 }
 0x201   : > { %v3641_v22 = vrot.slane %v3637_v7, 4  ;;  %v3645_v1 = vrot.slane %v3643_v59, 7  ;;  %6261 = vrot.lane.b32.xlu0 %v8376_v57, %s9078_s11  ;;  %v5314_v61 = vor.u32 %v5313_v39, %v5309_v51  ;;  %v3623_v60 = vor.u32 %v3621_v48, %v3620_v10 }
 0x202   : > { %v3624_v29 = vrot.slane %v3620_v10, 4  ;;  %v3628_v32 = vrot.slane %v3626_v34, 7  ;;  %v5317_v15 = vshll.u32 %v11070_v62, 16  ;;  %v3908_v18 = vsel %vm10831_vm11, %v3640_v2, %v3907_v33 }
 0x203   : > { %v3648_v53 = vor.u32 %v3646_v26, %v3645_v1  ;;  %v3650_v30 = vrot.slane %v3645_v1, 4  ;;  %v5315_v11 = vrot.slane %v5314_v61, 4  ;;  %3909 = vst [vmem:[#allocation2 + $0x48] sm:$0xf] %v3908_v18  ;;  %v3901_v14 = vsel %vm10831_vm11, %v3623_v60, %v3900_v20  ;;  %v5922_v20 = vpop.permute.xlu0 %5921 }
 0x204   : > { %v3631_v56 = vor.u32 %v3629_v3, %v3628_v32  ;;  %v3633_v57 = vrot.slane %v3628_v32, 4  ;;  %v5319_v23 = vrot.slane %v5317_v15, 5  ;;  %3902 = vst [vmem:[#allocation2 + $0x3c] sm:$0xf] %v3901_v14  ;;  %v4132_v39 = vshll.u32 %v3992_v21, 16 }
 0x205   : > { %v3649_v43 = vsel %vm10839_vm12, %v3641_v22, %v3648_v53  ;;  %v3912_v62 = vsel %vm10696_vm13, %v3650_v30, %v3911_v27  ;;  %v4138_v51 = vshll.u32 %v11077_v52, 16  ;;  %v4131_v48 = vrot.slane %v4129_v63, 4 }
 0x206   : > { %3910 = vst.msk [vmem:[#allocation2 + $0x4c] sm:$0xf] %vm3329_vm0, %v3649_v43  ;;  %3913 = vst [vmem:[#allocation2 + $0x50] sm:$0x1] %v3912_v62  ;;  %v3632_v35 = vsel %vm10839_vm12, %v3624_v29, %v3631_v56  ;;  %v3905_v24 = vsel %vm10696_vm13, %v3633_v57, %v3904_v37  ;;  %v5320_v13 = vsel %vm9239_vm5, %v5315_v11, %v5319_v23  ;;  %v4134_v5 = vrot.slane %v4132_v39, 5 }
 0x207   : > { %3903 = vst.msk [vmem:[#allocation2 + $0x40] sm:$0xf] %vm3329_vm0, %v3632_v35  ;;  %3906 = vst [vmem:[#allocation2 + $0x44] sm:$0x1] %v3905_v24  ;;  %v11182_v40 = vcombine.low %v5310_v31, %v5320_v13  ;;  %v4142_v28 = vshrl.u32 %v11077_v52, 16  ;;  %v11185_v7 = vrot.slane %v4138_v51, 5  ;;  %v4695_v26 = vor.u32 %v11057_v0, %v11055_v25 }
 0x208   : > { %v4148_v59 = vshll.u32 %v11082_v54, 16  ;;  %v4698_v33 = vshll.u32 %v11050_v4, 16  ;;  %v4135_v10 = vor.u32 %v4134_v5, %v4131_v48  ;;  %v4704_v3 = vrot.slane %v4702_v45, 4 }
 0x209   : > { %v4144_v34 = vrot.slane %v4142_v28, 4  ;;  %v4708_v31 = vshll.u32 %v11114_v42, 16  ;;  %v11194_v22 = vrot.slane %v4695_v26, 4  ;;  %v5280_v54 = vor.u32 %v11048_v44, %v11046_v47 }
 0x20a   : > { %v4150_v2 = vrot.slane %v4148_v59, 5  ;;  %v11196_v52 = vrot.slane %v4698_v33, 5  ;;  %v4602_v1 = vld [vmem:[#allocation2 + $0x48] sm:$0xf]  ;;  %v4136_v0 = vrot.slane %v4135_v10, 4  ;;  %v11205_v4 = vsel %vm2792_vm6, %v8294_v46, %v5922_v20 }
 0x20b   : > { %v5209_v25 = vld [vmem:[#allocation2 + $0x48] sm:$0xf]  ;;  %v4145_v27 = vor.u32 %v4144_v34, %v11185_v7  ;;  %v4710_v61 = vrot.slane %v4708_v31, 5  ;;  %v4761_v45 = vshrl.u32 %v4602_v1, 16  ;;  %v4764_v42 = vshll.u32 %v4602_v1, 16 }
 0x20c   : > { %v5346_v60 = vshrl.u32 %v5209_v25, 16  ;;  %v5349_v29 = vshll.u32 %v5209_v25, 16  ;;  %v5207_v32 = vld [vmem:[#allocation2 + $0x3c] sm:$0xf]  ;;  %v4141_v18 = vsel %vm9239_vm5, %v4136_v0, %v11185_v7  ;;  %v4701_v16 = vsel %vm9239_vm5, %v11194_v22, %v11196_v52  ;;  %v5637_v33 = vld [vmem:[#allocation2 + $0x48] sm:$0xe] }
 0x20d   : > { %v11207_v15 = vld [vmem:[#allocation2 + $0x4c] sm:$0xf]  ;;  %v5322_v44 = vshrl.u32 %v5207_v32, 16  ;;  %v5325_v21 = vshll.u32 %v5207_v32, 16  ;;  %v11218_v38 = vrot.slane %v4761_v45, 4  ;;  %v11220_v46 = vrot.slane %v4764_v42, 5 }
 0x20e   : > { %v11209_v47 = vld [vmem:[#allocation2 + $0x4c] sm:$0xf]  ;;  %v8347_v53 = vcombine.low %v4602_v1, %v11207_v15  ;;  %v4774_v30 = vshrl.u32 %v11207_v15, 16  ;;  %v11224_v37 = vld [vmem:[#allocation2 + $0x40] sm:$0xf]  ;;  %v11226_v11 = vrot.slane %v5346_v60, 4  ;;  %v4705_v7 = vor.u32 %v4704_v3, %v11196_v52 }
 0x20f   : > { %v11228_v14 = vrot.slane %v5349_v29, 5  ;;  %v5359_v56 = vshrl.u32 %v11209_v47, 16  ;;  %v8394_v57 = vcombine.low %v5209_v25, %v11209_v47  ;;  %v4600_v23 = vld [vmem:[#allocation2 + $0x3c] sm:$0xf]  ;;  %v5335_v43 = vshrl.u32 %v11224_v37, 16 }
 0x210   : > { %6107 = vrot.lane.b32.xlu1 %v8347_v53, %s9077_s10  ;;  %v8393_v62 = vcombine.low %v5207_v32, %v11224_v37  ;;  %v11235_v63 = vrot.slane %v5322_v44, 4  ;;  %v11237_v39 = vrot.slane %v5325_v21, 5  ;;  %v11239_v35 = vld [vmem:[#allocation2 + $0x40] sm:$0xf]  ;;  %v4737_v24 = vshrl.u32 %v4600_v23, 16 }
 0x211   : > { %6361 = vrot.lane.b32.xlu0 %v8394_v57, %s9082_s15  ;;  %v4740_v13 = vshll.u32 %v4600_v23, 16  ;;  %v4750_v51 = vshrl.u32 %v11239_v35, 16  ;;  %v8346_v48 = vcombine.low %v4600_v23, %v11239_v35  ;;  %v11244_v5 = vld [vmem:[#allocation2 + $0x50] sm:$0x1]  ;;  %v4146_v28 = vrot.slane %v4145_v27, 4 }
 0x212   : > { %v5281_v59 = vrot.slane %v5280_v54, 4  ;;  %v5283_v26 = vshll.u32 %v11035_v9, 16  ;;  %v11248_v10 = vrot.slane %v4737_v24, 4  ;;  %v5289_v31 = vrot.slane %v5287_v49, 4  ;;  %v3990_v20 = vld [vmem:[#allocation2 + $0x24] sm:$0xf] }
 0x213   : > { %v11250_v34 = vrot.slane %v4740_v13, 5  ;;  %v5293_v22 = vshll.u32 %v11108_v58, 16  ;;  %v4151_v3 = vsel %vm9239_vm5, %v4146_v28, %v4150_v2  ;;  %v4706_v52 = vrot.slane %v4705_v7, 4  ;;  %v4422_v45 = vld [vmem:[#allocation2 + $0x48] sm:$0xe] }
 0x214   : > { %6183 = vrot.lane.b32.xlu1 %v11159_v8, %s9081_s14  ;;  %v5285_v54 = vrot.slane %v5283_v26, 5  ;;  %v8282_v1 = vrot.slane %v5637_v33, 9  ;;  %v8314_v25 = vcombine.low %v4141_v18, %v4151_v3  ;;  %v5727_v9 = vrot.slane %v11209_v47, 5  ;;  %v11269_v32 = vld [vmem:[#allocation2 + $0x4c] sm:$0xf] }
 0x215   : > { %6437 = vrot.lane.b32.xlu0 %v11182_v40, %s9083_s16  ;;  %v5295_v0 = vrot.slane %v5293_v22, 5  ;;  %v5730_v49 = vrot.slane %v11244_v5, 5  ;;  %v4711_v58 = vsel %vm9239_vm5, %v4706_v52, %v4710_v61  ;;  %v4105_v2 = vshrl.u32 %v3990_v20, 16  ;;  %v11274_v53 = vld [vmem:[#allocation2 + $0x50] sm:$0x1] }
 0x216   : > { %v5286_v8 = vsel %vm9239_vm5, %v5281_v59, %v5285_v54  ;;  %v5290_v27 = vor.u32 %v5289_v31, %v5285_v54  ;;  %v8360_v42 = vcombine.low %v4701_v16, %v4711_v58  ;;  %v5728_v60 = vsel %vm9195_vm2, %v8282_v1, %v5727_v9  ;;  %v5029_v13 = vld [vmem:[#allocation2 + $0x48] sm:$0xe]  ;;  %v11282_v26 = vld [vmem:[#allocation2 + $0x50] sm:$0x1]  ;;  %v5636_v52 = vld [vmem:[#allocation2 + $0x3c] sm:$0xe] }
 0x217   : > { %v5729_v40 = vrot.slane %v5727_v9, 4  ;;  %v4108_v29 = vshll.u32 %v3990_v20, 16  ;;  %v4107_v21 = vrot.slane %v4105_v2, 4  ;;  %v4114_v61 = vshll.u32 %v11092_v12, 16 }
 0x218   : > { %6359 = vrot.lane.b32.xlu1 %v8393_v62, %s9082_s15  ;;  %v5291_v44 = vrot.slane %v5290_v27, 4  ;;  %v4118_v18 = vshrl.u32 %v11092_v12, 16  ;;  %v4124_v23 = vshll.u32 %v11099_v6, 16  ;;  %v8252_v24 = vrot.slane %v4422_v45, 9 }
 0x219   : > { %6105 = vrot.lane.b32.xlu0 %v8346_v48, %s9077_s10  ;;  %v5731_v16 = vsel %vm9195_vm2, %v5729_v40, %v5730_v49  ;;  %v4110_v57 = vrot.slane %v4108_v29, 5  ;;  %v4116_v7 = vrot.slane %v4114_v61, 5  ;;  %v4524_v48 = vrot.slane %v11269_v32, 5 }
 0x21a   : > { %v5296_v62 = vsel %vm9239_vm5, %v5291_v44, %v5295_v0  ;;  %v8426_v28 = vcombine.low %v5728_v60, %v5731_v16  ;;  %v4120_v59 = vrot.slane %v4118_v18, 4  ;;  %v4126_v31 = vrot.slane %v4124_v23, 5  ;;  %v11309_v23 = vld [vmem:[#allocation2 + $0x44] sm:$0x1] }
 0x21b   : > { %v8407_v12 = vcombine.low %v5286_v8, %v5296_v62  ;;  %v4111_v33 = vor.u32 %v4110_v57, %v4107_v21  ;;  %v4527_v6 = vrot.slane %v11274_v53, 5  ;;  %v8267_v20 = vrot.slane %v5029_v13, 9 }
 0x21c   : > { %5929 = vrot.lane.b32.xlu1 %v8314_v25, %s9080_s13  ;;  %v4121_v22 = vor.u32 %v4120_v59, %v4116_v7  ;;  %v5125_v3 = vrot.slane %v11207_v15, 5  ;;  %v4525_v0 = vsel %vm9195_vm2, %v8252_v24, %v4524_v48  ;;  %v4526_v9 = vrot.slane %v4524_v48, 4  ;;  %v11295_v25 = vld [vmem:[%s13030_s2] ss:$0 sm:$0xff]  ;;  %v4421_v24 = vld [vmem:[#allocation2 + $0x3c] sm:$0xe] }
 0x21d   : > { %v8761_v54 = vpop.f32.mrb[12].mxu0  ;;  %6181 = vrot.lane.b32.xlu0 %v8360_v42, %s9081_s14  ;;  %v4112_v1 = vrot.slane %v4111_v33, 4  ;;  %v5128_v49 = vrot.slane %v11282_v26, 5  ;;  %v8281_v44 = vrot.slane %v5636_v52, 9  ;;  %v8251_v52 = vrot.slane %v4421_v24, 9 }
 0x21e   : > { %v3227_v58 = vadd.f32 %v11295_v25, %v8761_v54  ;;  %v3218_v8 = vpop.f32.mrb[13].mxu0  ;;  %v4122_v27 = vrot.slane %v4121_v22, 4  ;;  %v5126_v2 = vsel %vm9195_vm2, %v8267_v20, %v5125_v3  ;;  %v5127_v45 = vrot.slane %v5125_v3, 4  ;;  %v11317_v3 = vld [vmem:[#allocation2 + $0x40] sm:$0xf] }
 0x21f   : > { %v3219_v42 = vadd.f32 %v11295_v25, %v3218_v8  ;;  %v8762_v60 = vpop.f32.mrb[14].mxu0  ;;  %v4117_v40 = vsel %vm9239_vm5, %v4112_v1, %v4116_v7  ;;  %v4528_v29 = vsel %vm9195_vm2, %v4526_v9, %v4527_v6  ;;  %v5723_v20 = vrot.slane %v11309_v23, 5 }
 0x220   : > { %v3311_v21 = vmax.f32 %v3227_v58, 0.0  ;;  %v3230_v61 = vadd.f32 %v11295_v25, %v8762_v60  ;;  %v3221_v18 = vpop.f32.mrb[15].mxu0  ;;  %6435 = vrot.lane.b32.xlu1 %v8407_v12, %s9083_s16  ;;  %v4127_v16 = vsel %vm9239_vm5, %v4122_v27, %v4126_v31  ;;  %v8332_v57 = vcombine.low %v4525_v0, %v4528_v29  ;;  %v3921_v60 = vld [vmem:[#allocation2 + $0x60] sm:$0xf] }
 0x221   : > { %v3309_v13 = vmax.f32 %v3219_v42, 0.0  ;;  %v3222_v62 = vadd.f32 %v11295_v25, %v3221_v18  ;;  %6521 = vrot.lane.b32.xlu0 %v8426_v28, %s9084_s25  ;;  %v8313_v7 = vcombine.low %v4117_v40, %v4127_v16  ;;  %v5129_v59 = vsel %vm9195_vm2, %v5127_v45, %v5128_v49  ;;  %v3914_v16 = vld [vmem:[#allocation2 + $0x54] sm:$0xf] }
 0x222   : > { %v8557_v33 = vpack.c.bf16 %v3311_v21, %v3311_v21  ;;  %v3312_v48 = vmax.f32 %v3230_v61, 0.0  ;;  %v8379_v22 = vcombine.low %v5126_v2, %v5129_v59  ;;  %v5720_v12 = vrot.slane %v11224_v37, 5  ;;  %v3925_v59 = vld [vmem:[#allocation2 + $0x68] sm:$0x1] }
 0x223   : > { %v8555_v6 = vpack.c.bf16 %v3309_v13, %v3309_v13  ;;  %v3310_v31 = vmax.f32 %v3222_v62, 0.0  ;;  %v4517_v42 = vrot.slane %v11317_v3, 5  ;;  %v11327_v13 = vld [vmem:[#allocation2 + $0x44] sm:$0x1]  ;;  %vm13085_vm4 = vcmask 195584  }
 0x224   : > { %v3669_v54 = vshrl.u32 %v8557_v33, 16  ;;  %v3672_v1 = vshll.u32 %v8557_v33, 16  ;;  %v8558_v0 = vpack.c.bf16 %v3312_v48, %v3312_v48  ;;  %5927 = vrot.lane.b32.xlu1 %v8313_v7, %s9080_s13  ;;  %v5721_v28 = vsel %vm9195_vm2, %v8281_v44, %v5720_v12 }
 0x225   : > { %v3652_v9 = vshrl.u32 %v8555_v6, 16  ;;  %v3655_v49 = vshll.u32 %v8555_v6, 16  ;;  %v8556_v58 = vpack.c.bf16 %v3310_v31, %v3310_v31  ;;  %6013 = vrot.lane.b32.xlu0 %v8332_v57, %s9079_s12  ;;  %v5722_v8 = vrot.slane %v5720_v12, 4  ;;  %v5028_v12 = vld [vmem:[#allocation2 + $0x3c] sm:$0xe] }
 0x226   : > { %v3671_v27 = vrot.slane %v3669_v54, 7  ;;  %v3677_v2 = vshrl.u32 %v8558_v0, 16  ;;  %v3680_v45 = vshll.u32 %v8558_v0, 16  ;;  %v4518_v48 = vsel %vm9195_vm2, %v8251_v52, %v4517_v42  ;;  %v3918_v54 = vld [vmem:[#allocation2 + $0x5c] sm:$0x1] }
 0x227   : > { %v3654_v40 = vrot.slane %v3652_v9, 7  ;;  %v3660_v29 = vshrl.u32 %v8556_v58, 16  ;;  %v3663_v21 = vshll.u32 %v8556_v58, 16  ;;  %v5724_v61 = vsel %vm9195_vm2, %v5722_v8, %v5723_v20 }
 0x228   : > { %v3674_v18 = vor.u32 %v3672_v1, %v3671_v27  ;;  %v3675_v44 = vrot.slane %v3671_v27, 4  ;;  %v3679_v24 = vrot.slane %v3677_v2, 7  ;;  %6267 = vrot.lane.b32.xlu1 %v8379_v22, %s9078_s11  ;;  %v8425_v57 = vcombine.low %v5721_v28, %v5724_v61  ;;  %v11334_v1 = vld [vmem:[#allocation2 + $0x44] sm:$0x1] }
 0x229   : > { %v3657_v62 = vor.u32 %v3655_v49, %v3654_v40  ;;  %v3658_v7 = vrot.slane %v3654_v40, 4  ;;  %v3662_v33 = vrot.slane %v3660_v29, 7  ;;  %v4519_v22 = vrot.slane %v4517_v42, 4 }
 0x22a   : > { %v3922_v6 = vsel %vm10831_vm11, %v3674_v18, %v3921_v60  ;;  %v3682_v31 = vor.u32 %v3680_v45, %v3679_v24  ;;  %v3684_v20 = vrot.slane %v3679_v24, 4  ;;  %6519 = vrot.lane.b32.xlu0 %v8425_v57, %s9084_s25  ;;  %v4520_v52 = vrot.slane %v11327_v13, 5 }
 0x22b   : > { %3923 = vst [vmem:[#allocation2 + $0x60] sm:$0xf] %v3922_v6  ;;  %v3915_v0 = vsel %vm10831_vm11, %v3657_v62, %v3914_v16  ;;  %v3665_v28 = vor.u32 %v3663_v21, %v3662_v33  ;;  %v3667_v9 = vrot.slane %v3662_v33, 4  ;;  %v8266_v8 = vrot.slane %v5028_v12, 9 }
 0x22c   : > { %3916 = vst [vmem:[#allocation2 + $0x54] sm:$0xf] %v3915_v0  ;;  %v3683_v49 = vsel %vm10839_vm12, %v3675_v44, %v3682_v31  ;;  %v3926_v58 = vsel %vm10696_vm13, %v3684_v20, %v3925_v59  ;;  %v5118_v27 = vrot.slane %v11239_v35, 5  ;;  %v4521_v42 = vsel %vm9195_vm2, %v4519_v22, %v4520_v52 }
 0x22d   : > { %3924 = vst.msk [vmem:[#allocation2 + $0x64] sm:$0xf] %vm3329_vm0, %v3683_v49  ;;  %3927 = vst [vmem:[#allocation2 + $0x68] sm:$0x1] %v3926_v58  ;;  %v3666_v2 = vsel %vm10839_vm12, %v3658_v7, %v3665_v28  ;;  %v3919_v45 = vsel %vm10696_vm13, %v3667_v9, %v3918_v54  ;;  %v5121_v60 = vrot.slane %v11334_v1, 5  ;;  %v8331_v40 = vcombine.low %v4518_v48, %v4521_v42 }
 0x22e   : > { %3917 = vst.msk [vmem:[#allocation2 + $0x58] sm:$0xf] %vm3329_vm0, %v3666_v2  ;;  %3920 = vst [vmem:[#allocation2 + $0x5c] sm:$0x1] %v3919_v45  ;;  %v5119_v29 = vsel %vm9195_vm2, %v8266_v8, %v5118_v27  ;;  %v5120_v21 = vrot.slane %v5118_v27, 4  ;;  %v4767_v61 = vor.u32 %v11220_v46, %v11218_v38  ;;  %v4770_v18 = vshll.u32 %v11207_v15, 16 }
 0x22f   : > { %v4776_v44 = vrot.slane %v4774_v30, 4  ;;  %v4780_v16 = vshll.u32 %v11282_v26, 16  ;;  %v5352_v24 = vor.u32 %v11228_v14, %v11226_v11  ;;  %6011 = vrot.lane.b32.xlu1 %v8331_v40, %s9079_s12  ;;  %v5355_v7 = vshll.u32 %v11209_v47, 16  ;;  %v6002_v47 = vpop.permute.xlu0 %6001  ;;  %v3371_v27 = vld [vmem:[#allocation2 + $0x78] sm:$0x1] }
 0x230   : > { %v5122_v57 = vsel %vm9195_vm2, %v5120_v21, %v5121_v60  ;;  %v4768_v62 = vrot.slane %v4767_v61, 4  ;;  %v5361_v38 = vrot.slane %v5359_v56, 4  ;;  %v4772_v59 = vrot.slane %v4770_v18, 5  ;;  %v3368_v2 = vld [vmem:[#allocation2 + $0x6c] sm:$0x1] }
 0x231   : > { %v8378_v46 = vcombine.low %v5119_v29, %v5122_v57  ;;  %v4782_v15 = vrot.slane %v4780_v16, 5  ;;  %v5353_v30 = vrot.slane %v5352_v24, 4  ;;  %v5357_v48 = vrot.slane %v5355_v7, 5  ;;  %v8765_v31 = vpop.f32.mrb[16].mxu0 }
 0x232   : > { %v4606_v33 = vld [vmem:[#allocation2 + $0x60] sm:$0xf]  ;;  %v5365_v11 = vshll.u32 %v11244_v5, 16  ;;  %v4743_v20 = vor.u32 %v11250_v34, %v11248_v10  ;;  %v4777_v0 = vor.u32 %v4776_v44, %v4772_v59  ;;  %v3234_v9 = vpop.f32.mrb[17].mxu0  ;;  %v11379_v5 = vsel %vm2841_vm7, %v11205_v4, %v6002_v47 }
 0x233   : > { %v5213_v26 = vld [vmem:[#allocation2 + $0x60] sm:$0xf]  ;;  %6265 = vrot.lane.b32.xlu0 %v8378_v46, %s9078_s11  ;;  %v4809_v14 = vshrl.u32 %v4606_v33, 16  ;;  %v4812_v12 = vshll.u32 %v4606_v33, 16  ;;  %v5362_v28 = vor.u32 %v5361_v38, %v5357_v48  ;;  %v4773_v58 = vsel %vm9239_vm5, %v4768_v62, %v4772_v59  ;;  %v8766_v45 = vpop.f32.mrb[18].mxu0 }
 0x234   : > { %v5394_v6 = vshrl.u32 %v5213_v26, 16  ;;  %v11373_v56 = vld [vmem:[#allocation2 + $0x64] sm:$0xf]  ;;  %v5397_v22 = vshll.u32 %v5213_v26, 16  ;;  %v5358_v8 = vsel %vm9239_vm5, %v5353_v30, %v5357_v48  ;;  %v3237_v29 = vpop.f32.mrb[19].mxu0  ;;  %v4778_v21 = vrot.slane %v4777_v0, 4  ;;  %v11414_v0 = vpop.permute.xlu0 %6353 }
 0x235   : > { %v11375_v54 = vld [vmem:[#allocation2 + $0x64] sm:$0xf]  ;;  %v11381_v52 = vrot.slane %v4809_v14, 4  ;;  %v8349_v49 = vcombine.low %v4606_v33, %v11373_v56  ;;  %v11388_v42 = vrot.slane %v4812_v12, 5  ;;  %v5363_v61 = vrot.slane %v5362_v28, 4 }
 0x236   : > { %v11391_v40 = vrot.slane %v5394_v6, 4  ;;  %v8396_v4 = vcombine.low %v5213_v26, %v11375_v54  ;;  %v5367_v18 = vrot.slane %v5365_v11, 5  ;;  %v3243_v44 = vadd.f32 %v11295_v25, %v8765_v31  ;;  %v5211_v16 = vld [vmem:[#allocation2 + $0x54] sm:$0xf]  ;;  %v3427_v38 = vld [vmem:[#allocation2 + $0x80] sm:$0x1] }
 0x237   : > { %6111 = vrot.lane.b32.xlu1 %v8349_v49, %s9077_s10  ;;  %v11396_v24 = vrot.slane %v5397_v22, 5  ;;  %v3372_v57 = vsel %vm10696_vm13, 0, %v3371_v27  ;;  %v3235_v62 = vadd.f32 %v11295_v25, %v3234_v9  ;;  %v3369_v7 = vsel %vm10696_vm13, 0, %v3368_v2  ;;  %v11409_v26 = vld [vmem:[#allocation2 + $0x58] sm:$0xf] }
 0x238   : > { %6365 = vrot.lane.b32.xlu0 %v8396_v4, %s9082_s15  ;;  %v4783_v59 = vsel %vm9239_vm5, %v4778_v21, %v4782_v15  ;;  %v5368_v30 = vsel %vm9239_vm5, %v5363_v61, %v5367_v18  ;;  %v3315_v33 = vmax.f32 %v3243_v44, 0.0  ;;  %3373 = vst [vmem:[#allocation2 + $0x78] sm:$0x1] %v3372_v57  ;;  %3370 = vst [vmem:[#allocation2 + $0x6c] sm:$0x1] %v3369_v7  ;;  %v5370_v6 = vshrl.u32 %v5211_v16, 16 }
 0x239   : > { %v4604_v48 = vld [vmem:[#allocation2 + $0x54] sm:$0xf]  ;;  %v8363_v11 = vcombine.low %v4773_v58, %v4783_v59  ;;  %v8410_v14 = vcombine.low %v5358_v8, %v5368_v30  ;;  %v3313_v12 = vmax.f32 %v3235_v62, 0.0  ;;  %v5373_v47 = vshll.u32 %v5211_v16, 16  ;;  %v11419_v49 = vld [vmem:[#allocation2 + $0x58] sm:$0xf] }
 0x23a   : > { %v8561_v31 = vpack.c.bf16 %v3315_v33, %v3315_v33  ;;  %v3246_v22 = vadd.f32 %v11295_v25, %v8766_v45  ;;  %v3428_v15 = vsel %vm10716_vm3, 0, %v3427_v38  ;;  %v4785_v58 = vshrl.u32 %v4604_v48, 16  ;;  %v3424_v21 = vld [vmem:[#allocation2 + $0x74] sm:$0x1]  ;;  %v3996_v30 = vld [vmem:[#allocation2 + $0x48] sm:$0xf] }
 0x23b   : > { %6187 = vrot.lane.b32.xlu1 %v8363_v11, %s9081_s14  ;;  %v8559_v28 = vpack.c.bf16 %v3313_v12, %v3313_v12  ;;  %3429 = vst [vmem:[#allocation2 + $0x80] sm:$0x1] %v3428_v15  ;;  %v4788_v8 = vshll.u32 %v4604_v48, 16  ;;  %v8395_v2 = vcombine.low %v5211_v16, %v11409_v26  ;;  %v11422_v45 = vrot.slane %v5370_v6, 4  ;;  %v11440_v15 = vpop.permute.xlu0 %6097 }
 0x23c   : > { %6441 = vrot.lane.b32.xlu0 %v8410_v14, %s9083_s16  ;;  %v3703_v27 = vshrl.u32 %v8561_v31, 16  ;;  %v3316_v4 = vmax.f32 %v3246_v22, 0.0  ;;  %v3706_v61 = vshll.u32 %v8561_v31, 16  ;;  %v11424_v57 = vrot.slane %v5373_v47, 5 }
 0x23d   : > { %v3686_v18 = vshrl.u32 %v8559_v28, 16  ;;  %v3689_v44 = vshll.u32 %v8559_v28, 16  ;;  %v11426_v38 = vrot.slane %v4785_v58, 4  ;;  %v8348_v59 = vcombine.low %v4604_v48, %v11419_v49 }
 0x23e   : > { %v3705_v62 = vrot.slane %v3703_v27, 7  ;;  %v8562_v7 = vpack.c.bf16 %v3316_v4, %v3316_v4  ;;  %v11432_v16 = vrot.slane %v4788_v8, 5  ;;  %v3238_v14 = vadd.f32 %v11295_v25, %v3237_v29 }
 0x23f   : > { %v3935_v33 = vld [vmem:[#allocation2 + $0x78] sm:$0xf]  ;;  %v11429_v11 = vrot.slane %v3686_v18, 7  ;;  %6363 = vrot.lane.b32.xlu1 %v8395_v2, %s9082_s15  ;;  %v3425_v12 = vsel %vm10716_vm3, 0, %v3424_v21  ;;  %v3928_v47 = vld [vmem:[#allocation2 + $0x6c] sm:$0xf]  ;;  %v5328_v48 = vor.u32 %v11237_v39, %v11235_v63 }
 0x240   : > { %v3708_v6 = vor.u32 %v3706_v61, %v3705_v62  ;;  %v3709_v31 = vrot.slane %v3705_v62, 4  ;;  %v3711_v22 = vshrl.u32 %v8562_v7, 16  ;;  %6109 = vrot.lane.b32.xlu0 %v8348_v59, %s9077_s10  ;;  %3426 = vst [vmem:[#allocation2 + $0x74] sm:$0x1] %v3425_v12  ;;  %v3714_v58 = vshll.u32 %v8562_v7, 16 }
 0x241   : > { %v3691_v28 = vor.u32 %v3689_v44, %v11429_v11  ;;  %v3314_v8 = vmax.f32 %v3238_v14, 0.0  ;;  %v4177_v29 = vshrl.u32 %v3996_v30, 16  ;;  %v4180_v4 = vshll.u32 %v3996_v30, 16  ;;  %v8943_v30 = vld [vmem:[%s13031_s3] sm:$0xff]  }
 0x242   : > { %v3936_v27 = vsel %vm10831_vm11, %v3708_v6, %v3935_v33  ;;  %v3713_v2 = vrot.slane %v3711_v22, 7  ;;  %v4186_v21 = vshll.u32 %v11269_v32, 16  ;;  %v3939_v18 = vld [vmem:[#allocation2 + $0x80] sm:$0x1]  ;;  %v4190_v62 = vshrl.u32 %v11269_v32, 16  ;;  %8779 = vmatprep.subr.bf16.mxu1 %v8943_v30 }
 0x243   : > { %3937 = vst [vmem:[#allocation2 + $0x78] sm:$0xf] %v3936_v27  ;;  %v3929_v61 = vsel %vm10831_vm11, %v3691_v28, %v3928_v47  ;;  %v8560_v63 = vpack.c.bf16 %v3314_v8, %v3314_v8  ;;  %v4179_v39 = vrot.slane %v4177_v29, 4  ;;  %v4182_v59 = vrot.slane %v4180_v4, 5  ;;  %v11458_v8 = vpop.permute.xlu0 %6513  ;;  %8780 = vmatpush3.bf16.msra.mxu1 %v8943_v30  ;;  %v11482_v30 = vld [vmem:[#allocation2 + $0x68] sm:$0x1] }
 0x244   : > { %3930 = vst [vmem:[#allocation2 + $0x6c] sm:$0xf] %v3929_v61  ;;  %v3716_v44 = vor.u32 %v3714_v58, %v3713_v2  ;;  %v3718_v7 = vrot.slane %v3713_v2, 4  ;;  %v4188_v14 = vrot.slane %v4186_v21, 5  ;;  %v3692_v33 = vrot.slane %v11429_v11, 4 }
 0x245   : > { %v3694_v12 = vshrl.u32 %v8560_v63, 16  ;;  %v4192_v6 = vrot.slane %v4190_v62, 4  ;;  %v4196_v47 = vshll.u32 %v11274_v53, 16  ;;  %v3697_v28 = vshll.u32 %v8560_v63, 16 }
 0x246   : > { %v3717_v22 = vsel %vm10839_vm12, %v3709_v31, %v3716_v44  ;;  %v3940_v32 = vsel %vm10696_vm13, %v3718_v7, %v3939_v18  ;;  %v4183_v58 = vor.u32 %v4182_v59, %v4179_v39  ;;  %v4744_v53 = vrot.slane %v4743_v20, 4  ;;  %v3994_v44 = vld [vmem:[#allocation2 + $0x3c] sm:$0xf]  ;;  %v5639_v59 = vld [vmem:[#allocation2 + $0x60] sm:$0xe] }
 0x247   : > { %3938 = vst.msk [vmem:[#allocation2 + $0x7c] sm:$0xf] %vm3329_vm0, %v3717_v22  ;;  %3941 = vst [vmem:[#allocation2 + $0x80] sm:$0x1] %v3940_v32  ;;  %v3696_v29 = vrot.slane %v3694_v12, 7  ;;  %v4193_v11 = vor.u32 %v4192_v6, %v4188_v14  ;;  %v4746_v27 = vshll.u32 %v11239_v35, 16 }
 0x248   : > { %v3932_v31 = vld [vmem:[#allocation2 + $0x74] sm:$0x1]  ;;  %v4184_v2 = vrot.slane %v4183_v58, 4  ;;  %v4198_v4 = vrot.slane %v4196_v47, 5  ;;  %v4752_v21 = vrot.slane %v4750_v51, 4  ;;  %v4756_v61 = vshll.u32 %v11334_v1, 16  ;;  %v11486_v47 = vpop.permute.xlu1 %6099 }
 0x249   : > { %v3699_v18 = vor.u32 %v3697_v28, %v3696_v29  ;;  %v3701_v63 = vrot.slane %v3696_v29, 4  ;;  %v4194_v39 = vrot.slane %v4193_v11, 4  ;;  %v4748_v62 = vrot.slane %v4746_v27, 5  ;;  %v8944_v35 = vld [vmem:[%s13031_s3 + $0x8] sm:$0xff]  }
 0x24a   : > { %v4189_v10 = vsel %vm9239_vm5, %v4184_v2, %v4188_v14  ;;  %v5329_v34 = vrot.slane %v5328_v48, 4  ;;  %v5331_v20 = vshll.u32 %v11224_v37, 16  ;;  %v5337_v7 = vrot.slane %v5335_v43, 4  ;;  %8781 = vmatprep.subr.bf16.mxu1 %v8944_v35 }
 0x24b   : > { %v3700_v51 = vsel %vm10839_vm12, %v3692_v33, %v3699_v18  ;;  %v3933_v1 = vsel %vm10696_vm13, %v3701_v63, %v3932_v31  ;;  %v4199_v14 = vsel %vm9239_vm5, %v4194_v39, %v4198_v4  ;;  %v4758_v48 = vrot.slane %v4756_v61, 5  ;;  %v11488_v33 = vpop.permute.xlu0 %6005  ;;  %8782 = vmatpush3.bf16.msra.mxu1 %v8944_v35 }
 0x24c   : > { %3931 = vst.msk [vmem:[#allocation2 + $0x70] sm:$0xf] %vm3329_vm0, %v3700_v51  ;;  %3934 = vst [vmem:[#allocation2 + $0x74] sm:$0x1] %v3933_v1  ;;  %v8316_v37 = vcombine.low %v4189_v10, %v4199_v14  ;;  %v4753_v43 = vor.u32 %v4752_v21, %v4748_v62  ;;  %v5333_v12 = vrot.slane %v5331_v20, 5  ;;  %v5341_v6 = vshll.u32 %v11309_v23, 16 }
 0x24d   : > { %v4749_v22 = vsel %vm9239_vm5, %v4744_v53, %v4748_v62  ;;  %v8284_v32 = vrot.slane %v5639_v59, 9  ;;  %v5741_v28 = vrot.slane %v11375_v54, 5  ;;  %v4153_v58 = vshrl.u32 %v3994_v44, 16  ;;  %v11504_v20 = vld [vmem:[#allocation2 + $0x64] sm:$0xf] }
 0x24e   : > { %5933 = vrot.lane.b32.xlu1 %v8316_v37, %s9080_s13  ;;  %v4754_v29 = vrot.slane %v4753_v43, 4  ;;  %v5334_v11 = vsel %vm9239_vm5, %v5329_v34, %v5333_v12  ;;  %v5338_v23 = vor.u32 %v5337_v7, %v5333_v12  ;;  %v5744_v27 = vrot.slane %v11482_v30, 5  ;;  %v4424_v7 = vld [vmem:[#allocation2 + $0x60] sm:$0xe]  ;;  %v11510_v1 = vld [vmem:[#allocation2 + $0x68] sm:$0x1] }
 0x24f   : > { %v5343_v31 = vrot.slane %v5341_v6, 5  ;;  %v5743_v2 = vrot.slane %v5741_v28, 4  ;;  %v4155_v4 = vrot.slane %v4153_v58, 4  ;;  %v4156_v21 = vshll.u32 %v3994_v44, 16  ;;  %v11514_v14 = vpop.permute.xlu0 %6257  ;;  %v11518_v12 = vld [vmem:[#allocation2 + $0x68] sm:$0x1] }
 0x250   : > { %v4759_v53 = vsel %vm9239_vm5, %v4754_v29, %v4758_v48  ;;  %v5339_v61 = vrot.slane %v5338_v23, 4  ;;  %v4162_v18 = vshll.u32 %v11317_v3, 16  ;;  %v4166_v63 = vshrl.u32 %v11317_v3, 16  ;;  %v11512_v3 = vpop.permute.xlu1 %6259  ;;  %v5031_v6 = vld [vmem:[#allocation2 + $0x60] sm:$0xe] }
 0x251   : > { %v8362_v39 = vcombine.low %v4749_v22, %v4759_v53  ;;  %v5745_v62 = vsel %vm9195_vm2, %v5743_v2, %v5744_v27  ;;  %v4158_v10 = vrot.slane %v4156_v21, 5  ;;  %v4172_v34 = vshll.u32 %v11327_v13, 16  ;;  %13062 = vst [vmem:[#allocation6_spill] sm:$0xff] %v11512_v3  ;;  %v5638_v29 = vld [vmem:[#allocation2 + $0x54] sm:$0xe] }
 0x252   : > { %v5344_v44 = vsel %vm9239_vm5, %v5339_v61, %v5343_v31  ;;  %v5742_v59 = vsel %vm9195_vm2, %v8284_v32, %v5741_v28  ;;  %v4164_v35 = vrot.slane %v4162_v18, 5  ;;  %v4168_v51 = vrot.slane %v4166_v63, 4  ;;  %v11529_v2 = vld [vmem:[#allocation2 + $0x5c] sm:$0x1]  ;;  %v11532_v18 = vld [vmem:[#allocation2 + $0x58] sm:$0xf] }
 0x253   : > { %6185 = vrot.lane.b32.xlu0 %v8362_v39, %s9081_s14  ;;  %v8409_v13 = vcombine.low %v5334_v11, %v5344_v44  ;;  %v8428_v37 = vcombine.low %v5742_v59, %v5745_v62  ;;  %v4159_v43 = vor.u32 %v4158_v10, %v4155_v4  ;;  %v4174_v32 = vrot.slane %v4172_v34, 5  ;;  %v4423_v10 = vld [vmem:[#allocation2 + $0x54] sm:$0xe] }
 0x254   : > { %v4169_v22 = vor.u32 %v4168_v51, %v4164_v35  ;;  %v8254_v28 = vrot.slane %v4424_v7, 9  ;;  %v4538_v58 = vrot.slane %v11504_v20, 5  ;;  %v4541_v27 = vrot.slane %v11510_v1, 5  ;;  %v11548_v51 = vpop.permute.xlu1 %6003 }
 0x255   : > { %6439 = vrot.lane.b32.xlu1 %v8409_v13, %s9083_s16  ;;  %v4160_v23 = vrot.slane %v4159_v43, 4  ;;  %v11526_v11 = vsel %vm2874_vm8, %v11379_v5, %v11440_v15  ;;  %v5139_v31 = vrot.slane %v11373_v56, 5  ;;  %v8269_v53 = vrot.slane %v5031_v6, 9  ;;  %v11550_v13 = vld [vmem:[#allocation2 + $0x5c] sm:$0x1] }
 0x256   : > { %v4170_v4 = vrot.slane %v4169_v22, 4  ;;  %v4540_v21 = vrot.slane %v4538_v58, 4  ;;  %v5142_v61 = vrot.slane %v11518_v12, 5  ;;  %v4539_v39 = vsel %vm9195_vm2, %v8254_v28, %v4538_v58  ;;  %v8945_v28 = vld [vmem:[%s13031_s3 + $0x10] ss:$0 sps:$4 sm:$0x33]  }
 0x257   : > { %v11534_v63 = vpop.permute.xlu0 %6357  ;;  %6525 = vrot.lane.b32.xlu0 %v8428_v37, %s9084_s25  ;;  %v5141_v5 = vrot.slane %v5139_v31, 4  ;;  %v8283_v15 = vrot.slane %v5638_v29, 9  ;;  %v5734_v62 = vrot.slane %v11409_v26, 5  ;;  %v4165_v34 = vsel %vm9239_vm5, %v4160_v23, %v4164_v35  ;;  %v11552_v37 = vld [vmem:[#allocation2 + $0x78] sm:$0xf]  ;;  %8818 = vmatprep.subr.msk.bf16.mxu1 %vm13065_vm1, %v8945_v28 }
 0x258   : > { %13063 = vst [vmem:[#allocation7_spill] sm:$0xff] %v11534_v63  ;;  %v4175_v7 = vsel %vm9239_vm5, %v4170_v4, %v4174_v32  ;;  %v4542_v44 = vsel %vm9195_vm2, %v4540_v21, %v4541_v27  ;;  %v5140_v59 = vsel %vm9195_vm2, %v8269_v53, %v5139_v31  ;;  %v5737_v22 = vrot.slane %v11529_v2, 5  ;;  %v5030_v32 = vld [vmem:[#allocation2 + $0x54] sm:$0xe]  ;;  %v11563_v31 = vld [vmem:[#allocation2 + $0x5c] sm:$0x1] }
 0x259   : > { %v8315_v43 = vcombine.low %v4165_v34, %v4175_v7  ;;  %v8334_v6 = vcombine.low %v4539_v39, %v4542_v44  ;;  %v5143_v35 = vsel %vm9195_vm2, %v5141_v5, %v5142_v61  ;;  %v5735_v58 = vsel %vm9195_vm2, %v8283_v15, %v5734_v62  ;;  %v11574_v7 = vld [vmem:[#allocation2 + $0x7c] sm:$0xf]  ;;  %v11629_v63 = vld [vmem:[#allocation2 + $0x6c] sm:$0xf] }
 0x25a   : > { %v5736_v29 = vrot.slane %v5734_v62, 4  ;;  %v8253_v23 = vrot.slane %v4423_v10, 9  ;;  %v4531_v27 = vrot.slane %v11532_v18, 5  ;;  %v8769_v4 = vpop.f32.mrb[20].mxu0  ;;  %v8381_v21 = vcombine.low %v5140_v59, %v5143_v35  ;;  %v11579_v59 = vpop.permute.xlu1 %6103  ;;  %v11595_v28 = vld [vmem:[#allocation2 + $0x7c] sm:$0xf] }
 0x25b   : > { %5931 = vrot.lane.b32.xlu1 %v8315_v43, %s9080_s13  ;;  %6017 = vrot.lane.b32.xlu0 %v8334_v6, %s9079_s12  ;;  %v4534_v53 = vrot.slane %v11550_v13, 5  ;;  %v5132_v61 = vrot.slane %v11419_v49, 5  ;;  %v4857_v39 = vshrl.u32 %v11552_v37, 16  ;;  %v3250_v5 = vpop.f32.mrb[21].mxu0  ;;  %v11570_v15 = vpop.permute.xlu0 %6433  ;;  %v8268_v34 = vrot.slane %v5030_v32, 9  ;;  %13064 = vst [vmem:[#allocation8_spill] sm:$0xff] %v11579_v59 }
 0x25c   : > { %v5738_v62 = vsel %vm9195_vm2, %v5736_v29, %v5737_v22  ;;  %v4533_v10 = vrot.slane %v4531_v27, 4  ;;  %v4860_v44 = vshll.u32 %v11552_v37, 16  ;;  %v11577_v43 = vpop.f32.mrb[22].mxu0  ;;  %v4532_v35 = vsel %vm9195_vm2, %v8253_v23, %v4531_v27  ;;  %v5217_v22 = vld [vmem:[#allocation2 + $0x78] sm:$0xf] }
 0x25d   : > { %v8427_v6 = vcombine.low %v5735_v58, %v5738_v62  ;;  %v5134_v9 = vrot.slane %v5132_v61, 4  ;;  %v5135_v48 = vrot.slane %v11563_v31, 5  ;;  %v11585_v29 = vpop.f32.mrb[23].mxu0  ;;  %v5133_v46 = vsel %vm9195_vm2, %v8268_v34, %v5132_v61 }
 0x25e   : > { %v4535_v32 = vsel %vm9195_vm2, %v4533_v10, %v4534_v53  ;;  %v11591_v60 = vrot.slane %v4857_v39, 4  ;;  %v11593_v59 = vrot.slane %v4860_v44, 5  ;;  %v8351_v27 = vcombine.low %v11552_v37, %v11574_v7 }
 0x25f   : > { %6271 = vrot.lane.b32.xlu1 %v8381_v21, %s9078_s11  ;;  %6523 = vrot.lane.b32.xlu0 %v8427_v6, %s9084_s25  ;;  %v8333_v58 = vcombine.low %v4532_v35, %v4535_v32  ;;  %v5136_v23 = vsel %vm9195_vm2, %v5134_v9, %v5135_v48  ;;  %v5442_v39 = vshrl.u32 %v5217_v22, 16  ;;  %v5445_v62 = vshll.u32 %v5217_v22, 16  ;;  %v3377_v48 = vld [vmem:[#allocation2 + $0x90] sm:$0x1]  ;;  %v11611_v35 = vpop.permute.xlu0 %6101 }
 0x260   : > { %v8380_v61 = vcombine.low %v5133_v46, %v5136_v23  ;;  %v4815_v10 = vor.u32 %v11388_v42, %v11381_v52  ;;  %v8398_v21 = vcombine.low %v5217_v22, %v11595_v28  ;;  %v4818_v44 = vshll.u32 %v11373_v56, 16  ;;  %13067 = vst [vmem:[#allocation9_spill] sm:$0xff] %v11611_v35  ;;  %v11617_v42 = vpop.permute.xlu1 %6179 }
 0x261   : > { %v13066_v6 = vshrl.u32 %v11373_v56, 16  ;;  %v4828_v46 = vshll.u32 %v11518_v12, 16  ;;  %v5400_v32 = vor.u32 %v11396_v24, %v11391_v40  ;;  %v5403_v52 = vshll.u32 %v11375_v54, 16  ;;  %13068 = vst [vmem:[#allocation10_spill] sm:$0xff] %v11617_v42  ;;  %v3374_v12 = vld [vmem:[#allocation2 + $0x84] sm:$0x1] }
 0x262   : > { %v4816_v37 = vrot.slane %v4815_v10, 4  ;;  %v4820_v22 = vrot.slane %v4818_v44, 5  ;;  %v13069_v56 = vshrl.u32 %v11375_v54, 16  ;;  %v3259_v10 = vadd.f32 %v11295_v25, %v8769_v4 }
 0x263   : > { %v4824_v9 = vrot.slane %v13066_v6, 4  ;;  %6015 = vrot.lane.b32.xlu1 %v8333_v58, %s9079_s12  ;;  %6269 = vrot.lane.b32.xlu0 %v8380_v61, %s9078_s11  ;;  %v5413_v6 = vshll.u32 %v11482_v30, 16  ;;  %v11625_v53 = vrot.slane %v5442_v39, 4  ;;  %v5401_v40 = vrot.slane %v5400_v32, 4 }
 0x264   : > { %v5409_v23 = vrot.slane %v13069_v56, 4  ;;  %v5405_v24 = vrot.slane %v5403_v52, 5  ;;  %v3378_v34 = vsel %vm10696_vm13, 0, %v3377_v48  ;;  %v11631_v58 = vrot.slane %v5445_v62, 5  ;;  %v11633_v56 = vld [vmem:[#allocation2 + $0x70] sm:$0xf] }
 0x265   : > { %v4825_v61 = vor.u32 %v4824_v9, %v4820_v22  ;;  %v4830_v44 = vrot.slane %v4828_v46, 5  ;;  %v3319_v54 = vmax.f32 %v3259_v10, 0.0  ;;  %3379 = vst [vmem:[#allocation2 + $0x90] sm:$0x1] %v3378_v34  ;;  %v4821_v30 = vsel %vm9239_vm5, %v4816_v37, %v4820_v22  ;;  %v11644_v46 = vpop.permute.xlu0 %6177 }
 0x266   : > { %v5410_v4 = vor.u32 %v5409_v23, %v5405_v24  ;;  %v3251_v39 = vadd.f32 %v11295_v25, %v3250_v5  ;;  %v3375_v32 = vsel %vm10696_vm13, 0, %v3374_v12  ;;  %v5406_v9 = vsel %vm9239_vm5, %v5401_v40, %v5405_v24  ;;  %v11648_v23 = vpop.permute.xlu1 %6355  ;;  %v3433_v12 = vld [vmem:[#allocation2 + $0x98] sm:$0x1]  ;;  %v11655_v40 = vld [vmem:[#allocation2 + $0x6c] sm:$0xf] }
 0x267   : > { %6115 = vrot.lane.b32.xlu1 %v8351_v27, %s9077_s10  ;;  %6369 = vrot.lane.b32.xlu0 %v8398_v21, %s9082_s15  ;;  %v4826_v62 = vrot.slane %v4825_v61, 4  ;;  %v5415_v34 = vrot.slane %v5413_v6, 5  ;;  %v8565_v48 = vpack.c.bf16 %v3319_v54, %v3319_v54  ;;  %3376 = vst [vmem:[#allocation2 + $0x84] sm:$0x1] %v3375_v32  ;;  %v5418_v22 = vshrl.u32 %v11629_v63, 16  ;;  %13070 = vst [vmem:[#allocation11_spill] sm:$0xff] %v11648_v23 }
 0x268   : > { %v5411_v37 = vrot.slane %v5410_v4, 4  ;;  %v3317_v52 = vmax.f32 %v3251_v39, 0.0  ;;  %v5421_v10 = vshll.u32 %v11629_v63, 16  ;;  %v3262_v6 = vadd.f32 %v11295_v25, %v11577_v43  ;;  %v11661_v5 = vld [vmem:[#allocation2 + $0x70] sm:$0xf] }
 0x269   : > { %v4831_v27 = vsel %vm9239_vm5, %v4826_v62, %v4830_v44  ;;  %v3737_v21 = vshrl.u32 %v8565_v48, 16  ;;  %v8397_v4 = vcombine.low %v11629_v63, %v11633_v56  ;;  %v3740_v44 = vshll.u32 %v8565_v48, 16 }
 0x26a   : > { %v8365_v24 = vcombine.low %v4821_v30, %v4831_v27  ;;  %v5416_v61 = vsel %vm9239_vm5, %v5411_v37, %v5415_v34  ;;  %v8563_v54 = vpack.c.bf16 %v3317_v52, %v3317_v52  ;;  %v3320_v62 = vmax.f32 %v3262_v6, 0.0  ;;  %v3430_v52 = vld [vmem:[#allocation2 + $0x8c] sm:$0x1]  ;;  %v11672_v27 = vpop.permute.xlu0 %6517 }
 0x26b   : > { %v8412_v39 = vcombine.low %v5406_v9, %v5416_v61  ;;  %v3739_v32 = vrot.slane %v3737_v21, 7  ;;  %v11664_v3 = vrot.slane %v5418_v22, 4  ;;  %v3434_v30 = vsel %vm10716_vm3, 0, %v3433_v12  ;;  %13072 = vst [vmem:[#allocation13_spill] sm:$0xff] %v11672_v27  ;;  %v11679_v61 = vpop.permute.xlu1 %5925 }
 0x26c   : > { %6191 = vrot.lane.b32.xlu1 %v8365_v24, %s9081_s14  ;;  %v3949_v43 = vld [vmem:[#allocation2 + $0x90] sm:$0xf]  ;;  %v3720_v23 = vshrl.u32 %v8563_v54, 16  ;;  %v4833_v34 = vshrl.u32 %v11655_v40, 16  ;;  %v3723_v9 = vshll.u32 %v8563_v54, 16  ;;  %v11670_v37 = vrot.slane %v5421_v10, 5 }
 0x26d   : > { %6445 = vrot.lane.b32.xlu0 %v8412_v39, %s9083_s16  ;;  %v3742_v63 = vor.u32 %v3740_v44, %v3739_v32  ;;  %3435 = vst [vmem:[#allocation2 + $0x98] sm:$0x1] %v3434_v30  ;;  %v8566_v48 = vpack.c.bf16 %v3320_v62, %v3320_v62  ;;  %v3743_v21 = vrot.slane %v3739_v32, 4  ;;  %v4000_v24 = vld [vmem:[#allocation2 + $0x60] sm:$0xf]  ;;  %v8350_v62 = vcombine.low %v11655_v40, %v11661_v5 }
 0x26e   : > { %13071 = vst [vmem:[#allocation12_spill] sm:$0xff] %v11670_v37  ;;  %v11674_v6 = vrot.slane %v3720_v23, 7  ;;  %v11676_v22 = vrot.slane %v4833_v34, 4  ;;  %v3942_v10 = vld [vmem:[#allocation2 + $0x84] sm:$0xf]  ;;  %v3254_v30 = vadd.f32 %v11295_v25, %v11585_v29  ;;  %v3431_v34 = vsel %vm10716_vm3, 0, %v3430_v52  ;;  %v11698_v27 = vpop.permute.xlu0 %6009 }
 0x26f   : > { %v3950_v54 = vsel %vm10831_vm11, %v3742_v63, %v3949_v43  ;;  %v3745_v39 = vshrl.u32 %v8566_v48, 16  ;;  %v3748_v32 = vshll.u32 %v8566_v48, 16  ;;  %3432 = vst [vmem:[#allocation2 + $0x8c] sm:$0x1] %v3431_v34  ;;  %v4225_v63 = vshrl.u32 %v4000_v24, 16  ;;  %v11700_v37 = vpop.permute.xlu1 %5923 }
 0x270   : > { %3951 = vst [vmem:[#allocation2 + $0x90] sm:$0xf] %v3950_v54  ;;  %v3725_v23 = vor.u32 %v3723_v9, %v11674_v6  ;;  %6367 = vrot.lane.b32.xlu1 %v8397_v4, %s9082_s15  ;;  %v4228_v44 = vshll.u32 %v4000_v24, 16  ;;  %v4234_v12 = vshll.u32 %v11504_v20, 16  ;;  %v3318_v54 = vmax.f32 %v3254_v30, 0.0 }
 0x271   : > { %v3747_v43 = vrot.slane %v3745_v39, 7  ;;  %6113 = vrot.lane.b32.xlu0 %v8350_v62, %s9077_s10  ;;  %v4238_v4 = vshrl.u32 %v11504_v20, 16  ;;  %v4244_v48 = vshll.u32 %v11510_v1, 16  ;;  %v4227_v52 = vrot.slane %v4225_v63, 4 }
 0x272   : > { %v3943_v9 = vsel %vm10831_vm11, %v3725_v23, %v3942_v10  ;;  %v4230_v39 = vrot.slane %v4228_v44, 5  ;;  %v8564_v34 = vpack.c.bf16 %v3318_v54, %v3318_v54  ;;  %v4236_v24 = vrot.slane %v4234_v12, 5 }
 0x273   : > { %3944 = vst [vmem:[#allocation2 + $0x84] sm:$0xf] %v3943_v9  ;;  %v3750_v25 = vor.u32 %v3748_v32, %v3747_v43  ;;  %v3752_v29 = vrot.slane %v3747_v43, 4  ;;  %v4240_v42 = vrot.slane %v4238_v4, 4  ;;  %v4246_v35 = vrot.slane %v4244_v48, 5 }
 0x274   : > { %v3953_v62 = vld [vmem:[#allocation2 + $0x98] sm:$0x1]  ;;  %v4231_v1 = vor.u32 %v4230_v39, %v4227_v52  ;;  %v4791_v23 = vor.u32 %v11432_v16, %v11426_v38  ;;  %v3728_v44 = vshrl.u32 %v8564_v34, 16  ;;  %v3731_v32 = vshll.u32 %v8564_v34, 16 }
 0x275   : > { %v3751_v10 = vsel %vm10839_vm12, %v3743_v21, %v3750_v25  ;;  %v3954_v20 = vsel %vm10696_vm13, %v3752_v29, %v3953_v62  ;;  %v4241_v12 = vor.u32 %v4240_v42, %v4236_v24  ;;  %v4794_v30 = vshll.u32 %v11419_v49, 16  ;;  %v11721_v62 = vpop.permute.xlu0 %6515 }
 0x276   : > { %3952 = vst.msk [vmem:[#allocation2 + $0x94] sm:$0xf] %vm3329_vm0, %v3751_v10  ;;  %3955 = vst [vmem:[#allocation2 + $0x98] sm:$0x1] %v3954_v20  ;;  %v4232_v43 = vrot.slane %v4231_v1, 4  ;;  %v4792_v63 = vrot.slane %v4791_v23, 4  ;;  %v5376_v38 = vor.u32 %v11424_v57, %v11422_v45  ;;  %v11725_v57 = vpop.permute.xlu1 %6263 }
 0x277   : > { %v13073_v9 = vshrl.u32 %v11419_v49, 16  ;;  %v4804_v54 = vshll.u32 %v11563_v31, 16  ;;  %v3730_v4 = vrot.slane %v3728_v44, 7  ;;  %v4242_v48 = vrot.slane %v4241_v12, 4  ;;  %v3946_v29 = vld [vmem:[#allocation2 + $0x8c] sm:$0x1] }
 0x278   : > { %v4796_v25 = vrot.slane %v4794_v30, 5  ;;  %v3726_v16 = vrot.slane %v11674_v6, 4  ;;  %v4237_v42 = vsel %vm9239_vm5, %v4232_v43, %v4236_v24  ;;  %v5379_v52 = vshll.u32 %v11409_v26, 16  ;;  %13075 = vst [vmem:[#allocation14_spill] sm:$0xff] %v11721_v62  ;;  %v5641_v45 = vld [vmem:[#allocation2 + $0x78] sm:$0xe] }
 0x279   : > { %v4800_v21 = vrot.slane %v13073_v9, 4  ;;  %v13074_v39 = vshrl.u32 %v11409_v26, 16  ;;  %v3733_v31 = vor.u32 %v3731_v32, %v3730_v4  ;;  %v3735_v34 = vrot.slane %v3730_v4, 4  ;;  %13076 = vst [vmem:[#allocation15_spill] sm:$0xff] %v11725_v57  ;;  %v3998_v44 = vld [vmem:[#allocation2 + $0x54] sm:$0xf] }
 0x27a   : > { %v4247_v10 = vsel %vm9239_vm5, %v4242_v48, %v4246_v35  ;;  %v4806_v20 = vrot.slane %v4804_v54, 5  ;;  %v5377_v23 = vrot.slane %v5376_v38, 4  ;;  %v5381_v24 = vrot.slane %v5379_v52, 5  ;;  %v11734_v30 = vld [vmem:[#allocation2 + $0x80] sm:$0x1] }
 0x27b   : > { %v5385_v49 = vrot.slane %v13074_v39, 4  ;;  %v8318_v6 = vcombine.low %v4237_v42, %v4247_v10  ;;  %v4801_v1 = vor.u32 %v4800_v21, %v4796_v25  ;;  %v3734_v26 = vsel %vm10839_vm12, %v3726_v16, %v3733_v31  ;;  %v11744_v42 = vpop.permute.xlu0 %6261  ;;  %v11749_v10 = vpop.permute.xlu1 %6007 }
 0x27c   : > { %v3947_v12 = vsel %vm10696_vm13, %v3735_v34, %v3946_v29  ;;  %v4797_v32 = vsel %vm9239_vm5, %v4792_v63, %v4796_v25  ;;  %v5389_v35 = vshll.u32 %v11529_v2, 16  ;;  %3945 = vst.msk [vmem:[#allocation2 + $0x88] sm:$0xf] %vm3329_vm0, %v3734_v26  ;;  %v8286_v21 = vrot.slane %v5641_v45, 9  ;;  %v11747_v34 = vld [vmem:[#allocation2 + $0x7c] sm:$0xf] }
 0x27d   : > { %3948 = vst [vmem:[#allocation2 + $0x8c] sm:$0x1] %v3947_v12  ;;  %5937 = vrot.lane.b32.xlu1 %v8318_v6, %s9080_s13  ;;  %v4802_v43 = vrot.slane %v4801_v1, 4  ;;  %v5386_v9 = vor.u32 %v5385_v49, %v5381_v24  ;;  %v5755_v54 = vrot.slane %v11595_v28, 5  ;;  %v5382_v4 = vsel %vm9239_vm5, %v5377_v23, %v5381_v24  ;;  %13077 = vst [vmem:[#allocation16_spill] sm:$0xff] %v11749_v10 }
 0x27e   : > { %v5391_v48 = vrot.slane %v5389_v35, 5  ;;  %v4201_v38 = vshrl.u32 %v3998_v44, 16  ;;  %v4204_v63 = vshll.u32 %v3998_v44, 16  ;;  %v5758_v29 = vrot.slane %v11734_v30, 5  ;;  %v4426_v23 = vld [vmem:[#allocation2 + $0x78] sm:$0xe] }
 0x27f   : > { %v4807_v2 = vsel %vm9239_vm5, %v4802_v43, %v4806_v20  ;;  %v5387_v25 = vrot.slane %v5386_v9, 4  ;;  %v5757_v16 = vrot.slane %v5755_v54, 4  ;;  %v4210_v31 = vshll.u32 %v11532_v18, 16  ;;  %v5033_v24 = vld [vmem:[#allocation2 + $0x78] sm:$0xe] }
 0x280   : > { %v8364_v52 = vcombine.low %v4797_v32, %v4807_v2  ;;  %v4203_v39 = vrot.slane %v4201_v38, 4  ;;  %v4206_v49 = vrot.slane %v4204_v63, 5  ;;  %v4214_v6 = vshrl.u32 %v11532_v18, 16  ;;  %v11760_v35 = vld [vmem:[#allocation2 + $0x80] sm:$0x1] }
 0x281   : > { %v5392_v45 = vsel %vm9239_vm5, %v5387_v25, %v5391_v48  ;;  %v5759_v20 = vsel %vm9195_vm2, %v5757_v16, %v5758_v29  ;;  %v4220_v1 = vshll.u32 %v11550_v13, 16  ;;  %v5756_v26 = vsel %vm9195_vm2, %v8286_v21, %v5755_v54  ;;  %v11762_v43 = vld [vmem:[#allocation2 + $0x80] sm:$0x1]  ;;  %v5640_v63 = vld [vmem:[#allocation2 + $0x6c] sm:$0xe] }
 0x282   : > { %6189 = vrot.lane.b32.xlu0 %v8364_v52, %s9081_s14  ;;  %v8411_v44 = vcombine.low %v5382_v4, %v5392_v45  ;;  %v4207_v12 = vor.u32 %v4206_v49, %v4203_v39  ;;  %v4212_v32 = vrot.slane %v4210_v31, 5  ;;  %v13078_v9 = vshll.u32 %v11655_v40, 16  ;;  %v11773_v16 = vld [vmem:[#allocation2 + $0x74] sm:$0x1]  ;;  %v11775_v29 = vpop.permute.xlu1 %6107  ;;  %v11778_v31 = vld [vmem:[#allocation2 + $0x70] sm:$0xf] }
 0x283   : > { %v8430_v18 = vcombine.low %v5756_v26, %v5759_v20  ;;  %v4216_v13 = vrot.slane %v4214_v6, 4  ;;  %v4552_v38 = vrot.slane %v11747_v34, 5  ;;  %v11769_v2 = vpop.f32.mrb[24].mxu0  ;;  %v4222_v54 = vrot.slane %v4220_v1, 5  ;;  %13079 = vst [vmem:[#allocation17_spill] sm:$0xff] %v11775_v29  ;;  %v11782_v20 = vpop.permute.xlu0 %6361 }
 0x284   : > { %v11766_v48 = vrot.slane %v13078_v9, 5  ;;  %6443 = vrot.lane.b32.xlu1 %v8411_v44, %s9083_s16  ;;  %v4208_v21 = vrot.slane %v4207_v12, 4  ;;  %v8256_v4 = vrot.slane %v4426_v23, 9  ;;  %v5153_v25 = vrot.slane %v11574_v7, 5  ;;  %v11780_v45 = vpop.f32.mrb[25].mxu0  ;;  %13080 = vst [vmem:[#allocation18_spill] sm:$0xff] %v11782_v20 }
 0x285   : > { %v4217_v40 = vor.u32 %v4216_v13, %v4212_v32  ;;  %v4554_v52 = vrot.slane %v4552_v38, 4  ;;  %v4555_v39 = vrot.slane %v11760_v35, 5  ;;  %v8271_v49 = vrot.slane %v5033_v24, 9  ;;  %v4425_v26 = vld [vmem:[#allocation2 + $0x6c] sm:$0xe]  ;;  %v11790_v12 = vpop.f32.mrb[26].mxu0 }
 0x286   : > { %6529 = vrot.lane.b32.xlu0 %v8430_v18, %s9084_s25  ;;  %v4213_v6 = vsel %vm9239_vm5, %v4208_v21, %v4212_v32  ;;  %v4553_v1 = vsel %vm9195_vm2, %v8256_v4, %v4552_v38  ;;  %v5155_v23 = vrot.slane %v5153_v25, 4  ;;  %v5156_v44 = vrot.slane %v11762_v43, 5  ;;  %v11797_v29 = vld [vmem:[#allocation2 + $0x74] sm:$0x1]  ;;  %v11799_v32 = vpop.f32.mrb[27].mxu0  ;;  %v11813_v62 = vpop.permute.xlu1 %6183 }
 0x287   : > { %v4218_v24 = vrot.slane %v4217_v40, 4  ;;  %v4556_v9 = vsel %vm9195_vm2, %v4554_v52, %v4555_v39  ;;  %v5154_v13 = vsel %vm9195_vm2, %v8271_v49, %v5153_v25  ;;  %v5748_v18 = vrot.slane %v11633_v56, 5  ;;  %v5032_v20 = vld [vmem:[#allocation2 + $0x6c] sm:$0xe]  ;;  %v11811_v10 = vld [vmem:[#allocation2 + $0x74] sm:$0x1] }
 0x288   : > { %v8336_v38 = vcombine.low %v4553_v1, %v4556_v9  ;;  %v8285_v21 = vrot.slane %v5640_v63, 9  ;;  %v5751_v4 = vrot.slane %v11773_v16, 5  ;;  %v4545_v57 = vrot.slane %v11778_v31, 5  ;;  %13081 = vst [vmem:[#allocation19_spill] sm:$0xff] %v11813_v62 }
 0x289   : > { %v4223_v40 = vsel %vm9239_vm5, %v4218_v24, %v4222_v54  ;;  %v5157_v52 = vsel %vm9195_vm2, %v5155_v23, %v5156_v44  ;;  %v5750_v25 = vrot.slane %v5748_v18, 4  ;;  %v8255_v39 = vrot.slane %v4425_v26, 9  ;;  %v11820_v26 = vld [vmem:[#allocation2 + $0x90] sm:$0xf]  ;;  %v11822_v24 = vpop.permute.xlu0 %6437 }
 0x28a   : > { %v8317_v49 = vcombine.low %v4213_v6, %v4223_v40  ;;  %6021 = vrot.lane.b32.xlu0 %v8336_v38, %s9079_s12  ;;  %v5749_v1 = vsel %vm9195_vm2, %v8285_v21, %v5748_v18  ;;  %v4547_v63 = vrot.slane %v4545_v57, 4  ;;  %v4548_v9 = vrot.slane %v11797_v29, 5  ;;  %13082 = vst [vmem:[#allocation20_spill] sm:$0xff] %v11822_v24  ;;  %v8988_v21 = vld [vmem:[#allocation2 + $0x1c] sm:$0xf] }
 0x28b   : > { %v5752_v54 = vsel %vm9195_vm2, %v5750_v25, %v5751_v4  ;;  %v4546_v23 = vsel %vm9195_vm2, %v8255_v39, %v4545_v57  ;;  %v8270_v44 = vrot.slane %v5032_v20, 9  ;;  %v5146_v6 = vrot.slane %v11661_v5, 5  ;;  %v8989_v40 = vld [vmem:[#allocation2 + $0x18] sm:$0xf]  ;;  %v11830_v20 = vld [vmem:[#allocation2 + $0x94] sm:$0xf] }
 0x28c   : > { %5935 = vrot.lane.b32.xlu1 %v8317_v49, %s9080_s13  ;;  %v8429_v18 = vcombine.low %v5749_v1, %v5752_v54  ;;  %v4549_v38 = vsel %vm9195_vm2, %v4547_v63, %v4548_v9  ;;  %v8296_v62 = vcombine.low %v8989_v40, %v8988_v21  ;;  %v6658_v57 = vsel %vm2907_vm9, %v11526_v11, %v11644_v46 }
 0x28d   : > { %v8383_v4 = vcombine.low %v5154_v13, %v5157_v52  ;;  %v8335_v25 = vcombine.low %v4546_v23, %v4549_v38  ;;  %v5148_v39 = vrot.slane %v5146_v6, 4  ;;  %v5149_v24 = vrot.slane %v11811_v10, 5  ;;  %v11855_v23 = vld [vmem:[#allocation2 + $0x84] sm:$0xf]  ;;  %v11862_v21 = vpop.permute.xlu0 %6105 }
 0x28e   : > { %6527 = vrot.lane.b32.xlu0 %v8429_v18, %s9084_s25  ;;  %v5147_v49 = vsel %vm9195_vm2, %v8270_v44, %v5146_v6  ;;  %v6553_v1 = vsel %vm2792_vm6, %v8296_v62, %v11679_v61  ;;  %v6690_v63 = vsel %vm2940_vm10, %v6658_v57, %v11514_v14  ;;  %v4905_v11 = vshrl.u32 %v11820_v26, 16  ;;  %v11857_v44 = vpop.permute.xlu1 %6359  ;;  %v8991_v18 = vld [vmem:[#allocation2 + $0xc] sm:$0xf] }
 0x28f   : > { %v5150_v46 = vsel %vm9195_vm2, %v5148_v39, %v5149_v24  ;;  %v4908_v13 = vshll.u32 %v11820_v26, 16  ;;  %v8353_v52 = vcombine.low %v11820_v26, %v11830_v20  ;;  %v5448_v9 = vor.u32 %v11631_v58, %v11625_v53  ;;  %v8990_v58 = vld [vmem:[#allocation2 + $0x10] sm:$0xf] }
 0x290   : > { %6275 = vrot.lane.b32.xlu1 %v8383_v4, %s9078_s11  ;;  %v8382_v54 = vcombine.low %v5147_v49, %v5150_v46  ;;  %v11851_v61 = vsel %vm2841_vm7, %v6553_v1, %v11488_v33  ;;  %v5451_v62 = vshll.u32 %v11595_v28, 16  ;;  %v13083_v26 = vshrl.u32 %v11595_v28, 16 }
 0x291   : > { %v5449_v6 = vrot.slane %v5448_v9, 4  ;;  %v5461_v53 = vshll.u32 %v11734_v30, 16  ;;  %v8295_v38 = vcombine.low %v8991_v18, %v8990_v58  ;;  %v11865_v33 = vrot.slane %v4905_v11, 4 }
 0x292   : > { %v5457_v24 = vrot.slane %v13083_v26, 4  ;;  %6273 = vrot.lane.b32.xlu0 %v8382_v54, %s9078_s11  ;;  %v5453_v40 = vrot.slane %v5451_v62, 5  ;;  %v4863_v57 = vor.u32 %v11593_v59, %v11591_v60  ;;  %v4866_v4 = vshll.u32 %v11574_v7, 16  ;;  %v11881_v59 = vld [vmem:[#allocation2 + $0x88] sm:$0xf] }
 0x293   : > { %v6550_v28 = vsel %vm2792_vm6, %v8295_v38, %v11700_v37  ;;  %v13084_v30 = vshrl.u32 %v11574_v7, 16  ;;  %v4876_v49 = vshll.u32 %v11762_v43, 16  ;;  %v4881_v1 = vshrl.u32 %v11855_v23, 16  ;;  %v3383_v62 = vld [vmem:[#allocation2 + $0xa8] sm:$0x1] }
 0x294   : > { %6019 = vrot.lane.b32.xlu1 %v8335_v25, %s9079_s12  ;;  %v11877_v11 = vrot.slane %v4908_v13, 5  ;;  %v5458_v46 = vor.u32 %v5457_v24, %v5453_v40  ;;  %v5463_v9 = vrot.slane %v5461_v53, 5  ;;  %v6596_v60 = vsel %vm2841_vm7, %v6550_v28, %v11548_v51  ;;  %v11892_v53 = vpop.permute.xlu1 %5929  ;;  %v3380_v38 = vld [vmem:[#allocation2 + $0x9c] sm:$0x1]  ;;  %v11915_v28 = vld [vmem:[#allocation2 + $0x84] sm:$0xf] }
 0x295   : > { %v4872_v39 = vrot.slane %v13084_v30, 4  ;;  %v5454_v37 = vsel %vm9239_vm5, %v5449_v6, %v5453_v40  ;;  %v11887_v7 = vsel %vm2874_vm8, %v6596_v60, %v11486_v47  ;;  %v4864_v43 = vrot.slane %v4863_v57, 4  ;;  %v11900_v47 = vld [vmem:[%s13030_s2] ss:$0 sm:$0xff]  ;;  %v11904_v40 = vpop.permute.xlu0 %6181 }
 0x296   : > { %v4868_v54 = vrot.slane %v4866_v4, 5  ;;  %v5459_v25 = vrot.slane %v5458_v46, 4  ;;  %v4878_v13 = vrot.slane %v4876_v49, 5  ;;  %v11889_v26 = vrot.slane %v4881_v1, 4  ;;  %v3439_v1 = vld [vmem:[#allocation2 + $0xb0] sm:$0x1] }
 0x297   : > { %v4884_v24 = vshll.u32 %v11855_v23, 16  ;;  %v4894_v58 = vshrl.u32 %v11881_v59, 16  ;;  %v6722_v6 = vsel %vm13085_vm4, %v6690_v63, %v11414_v0  ;;  %v3275_v18 = vadd.f32 %v11900_v47, %v11769_v2  ;;  %v11917_v2 = vld [vmem:[#allocation2 + $0x88] sm:$0xf] }
 0x298   : > { %v4873_v51 = vor.u32 %v4872_v39, %v4868_v54  ;;  %6119 = vrot.lane.b32.xlu1 %v8353_v52, %s9077_s10  ;;  %v5464_v57 = vsel %vm9239_vm5, %v5459_v25, %v5463_v9  ;;  %v8352_v4 = vcombine.low %v11855_v23, %v11881_v59  ;;  %vm13086_vm1 = vcmask 228352  }
 0x299   : > { %v6754_v0 = vsel %vm13086_vm1, %v6722_v6, %v11570_v15  ;;  %v3384_v63 = vsel %vm10696_vm13, 0, %v3383_v62  ;;  %v8414_v30 = vcombine.low %v5454_v37, %v5464_v57  ;;  %v3323_v49 = vmax.f32 %v3275_v18, 0.0 }
 0x29a   : > { %v4874_v39 = vrot.slane %v4873_v51, 4  ;;  %v6786_v52 = vsel %vm3039_vm14, %v6754_v0, %v11458_v8  ;;  %3385 = vst [vmem:[#allocation2 + $0xa8] sm:$0x1] %v3384_v63  ;;  %v4869_v23 = vsel %vm9239_vm5, %v4864_v43, %v4868_v54  ;;  %v11923_v46 = vrot.slane %v4884_v24, 5  ;;  %v11939_v24 = vpop.permute.xlu1 %6435 }
 0x29b   : > { %8785 = vmatprep.mubr.msk.bf16.mxu1 %vm3099_vm15, %v6786_v52  ;;  %v3267_v15 = vadd.f32 %v11900_v47, %v11780_v45  ;;  %v3381_v9 = vsel %vm10696_vm13, 0, %v3380_v38  ;;  %6449 = vrot.lane.b32.xlu0 %v8414_v30, %s9083_s16  ;;  %v8569_v60 = vpack.c.bf16 %v3323_v49, %v3323_v49  ;;  %v5466_v43 = vshrl.u32 %v11915_v28, 16  ;;  %v11944_v38 = vpop.permute.xlu0 %6521 }
 0x29c   : > { %v4879_v8 = vsel %vm9239_vm5, %v4874_v39, %v4878_v13  ;;  %3382 = vst [vmem:[#allocation2 + $0x9c] sm:$0x1] %v3381_v9  ;;  %v3278_v25 = vadd.f32 %v11900_v47, %v11790_v12  ;;  %v3440_v45 = vsel %vm10716_vm3, 0, %v3439_v1  ;;  %v8399_v13 = vcombine.low %v11915_v28, %v11917_v2 }
 0x29d   : > { %v8367_v54 = vcombine.low %v4869_v23, %v4879_v8  ;;  %v3321_v62 = vmax.f32 %v3267_v15, 0.0  ;;  %v3771_v51 = vshrl.u32 %v8569_v60, 16  ;;  %v3774_v6 = vshll.u32 %v8569_v60, 16  ;;  %3441 = vst [vmem:[#allocation2 + $0xb0] sm:$0x1] %v3440_v45 }
 0x29e   : > { %v5469_v18 = vshll.u32 %v11915_v28, 16  ;;  %v3324_v0 = vmax.f32 %v3278_v25, 0.0  ;;  %v4839_v12 = vor.u32 %v11766_v48, %v11676_v22  ;;  %v4842_v63 = vshll.u32 %v11661_v5, 16  ;;  %v3436_v23 = vld [vmem:[#allocation2 + $0xa4] sm:$0x1] }
 0x29f   : > { %6195 = vrot.lane.b32.xlu1 %v8367_v54, %s9081_s14  ;;  %v8567_v57 = vpack.c.bf16 %v3321_v62, %v3321_v62  ;;  %6117 = vrot.lane.b32.xlu0 %v8352_v4, %s9077_s10  ;;  %v3773_v30 = vrot.slane %v3771_v51, 7  ;;  %v13087_v39 = vshrl.u32 %v11661_v5, 16  ;;  %v4852_v49 = vshll.u32 %v11811_v10, 16  ;;  %v4004_v51 = vld [vmem:[#allocation2 + $0x78] sm:$0xf] }
 0x2a0   : > { %v3270_v1 = vadd.f32 %v11900_v47, %v11799_v32  ;;  %v11956_v8 = vrot.slane %v5466_v43, 4  ;;  %v8570_v60 = vpack.c.bf16 %v3324_v0, %v3324_v0  ;;  %v4840_v22 = vrot.slane %v4839_v12, 4  ;;  %v11961_v32 = vpop.permute.xlu1 %5927 }
 0x2a1   : > { %v4848_v52 = vrot.slane %v13087_v39, 4  ;;  %v3963_v15 = vld [vmem:[#allocation2 + $0xa8] sm:$0xf]  ;;  %v3754_v9 = vshrl.u32 %v8567_v57, 16  ;;  %v3776_v48 = vor.u32 %v3774_v6, %v3773_v30  ;;  %v3777_v54 = vrot.slane %v3773_v30, 4 }
 0x2a2   : > { %v3757_v62 = vshll.u32 %v8567_v57, 16  ;;  %v4844_v4 = vrot.slane %v4842_v63, 5  ;;  %v3779_v5 = vshrl.u32 %v8570_v60, 16  ;;  %v4854_v10 = vrot.slane %v4852_v49, 5  ;;  %v11967_v57 = vpop.permute.xlu0 %6013 }
 0x2a3   : > { %v11958_v25 = vrot.slane %v3754_v9, 7  ;;  %6371 = vrot.lane.b32.xlu1 %v8399_v13, %s9082_s15  ;;  %v3322_v45 = vmax.f32 %v3270_v1, 0.0  ;;  %v3964_v43 = vsel %vm10831_vm11, %v3776_v48, %v3963_v15  ;;  %v3956_v39 = vld [vmem:[#allocation2 + $0x9c] sm:$0xf]  ;;  %v3782_v0 = vshll.u32 %v8570_v60, 16 }
 0x2a4   : > { %v4849_v12 = vor.u32 %v4848_v52, %v4844_v4  ;;  %v3437_v6 = vsel %vm10716_vm3, 0, %v3436_v23  ;;  %3965 = vst [vmem:[#allocation2 + $0xa8] sm:$0xf] %v3964_v43  ;;  %v3781_v63 = vrot.slane %v3779_v5, 7  ;;  %v4845_v30 = vsel %vm9239_vm5, %v4840_v22, %v4844_v4  ;;  %v3967_v1 = vld [vmem:[#allocation2 + $0xb0] sm:$0x1] }
 0x2a5   : > { %v3759_v13 = vor.u32 %v3757_v62, %v11958_v25  ;;  %3438 = vst [vmem:[#allocation2 + $0xa4] sm:$0x1] %v3437_v6  ;;  %v8568_v49 = vpack.c.bf16 %v3322_v45, %v3322_v45  ;;  %v4273_v15 = vshrl.u32 %v4004_v51, 16  ;;  %v4276_v48 = vshll.u32 %v4004_v51, 16 }
 0x2a6   : > { %v4850_v9 = vrot.slane %v4849_v12, 4  ;;  %v4282_v52 = vshll.u32 %v11747_v34, 16  ;;  %v3784_v60 = vor.u32 %v3782_v0, %v3781_v63  ;;  %v3786_v37 = vrot.slane %v3781_v63, 4  ;;  %v5642_v0 = vld [vmem:[#allocation2 + $0x84] sm:$0xe]  ;;  %v11985_v63 = vpop.permute.xlu1 %6267 }
 0x2a7   : > { %v3957_v23 = vsel %vm10831_vm11, %v3759_v13, %v3956_v39  ;;  %v3762_v43 = vshrl.u32 %v8568_v49, 16  ;;  %v3765_v5 = vshll.u32 %v8568_v49, 16  ;;  %v4275_v22 = vrot.slane %v4273_v15, 4  ;;  %v11977_v45 = vpop.f32.mrb[28].mxu0  ;;  %13088 = vst [vmem:[#allocation21_spill] sm:$0xff] %v11985_v63 }
 0x2a8   : > { %3958 = vst [vmem:[#allocation2 + $0x9c] sm:$0xf] %v3957_v23  ;;  %v4855_v62 = vsel %vm9239_vm5, %v4850_v9, %v4854_v10  ;;  %v4278_v4 = vrot.slane %v4276_v48, 5  ;;  %v3785_v51 = vsel %vm10839_vm12, %v3777_v54, %v3784_v60  ;;  %v3968_v12 = vsel %vm10696_vm13, %v3786_v37, %v3967_v1  ;;  %v11983_v13 = vpop.f32.mrb[29].mxu0  ;;  %v11990_v54 = vld [vmem:[#allocation2 + $0x8c] sm:$0x1]  ;;  %v11994_v37 = vpop.permute.xlu0 %6519 }
 0x2a9   : > { %v8366_v6 = vcombine.low %v4845_v30, %v4855_v62  ;;  %v3764_v39 = vrot.slane %v3762_v43, 7  ;;  %3966 = vst.msk [vmem:[#allocation2 + $0xac] sm:$0xf] %vm3329_vm0, %v3785_v51  ;;  %3969 = vst [vmem:[#allocation2 + $0xb0] sm:$0x1] %v3968_v12  ;;  %v4284_v49 = vrot.slane %v4282_v52, 5 }
 0x2aa   : > { %v4279_v10 = vor.u32 %v4278_v4, %v4275_v22  ;;  %v4286_v9 = vshrl.u32 %v11747_v34, 16  ;;  %v4292_v15 = vshll.u32 %v11760_v35, 16  ;;  %v11992_v48 = vpop.f32.mrb[30].mxu0  ;;  %v3760_v30 = vrot.slane %v11958_v25, 4 }
 0x2ab   : > { %6193 = vrot.lane.b32.xlu0 %v8366_v6, %s9081_s14  ;;  %v3767_v1 = vor.u32 %v3765_v5, %v3764_v39  ;;  %v3769_v23 = vrot.slane %v3764_v39, 4  ;;  %v5762_v60 = vrot.slane %v11917_v2, 5  ;;  %v11999_v43 = vpop.f32.mrb[31].mxu0  ;;  %v12003_v34 = vrot.slane %v5469_v18, 5  ;;  %v13089_v18 = vld [vmem:[#allocation12_spill] sm:$0xff] }
 0x2ac   : > { %v3960_v35 = vld [vmem:[#allocation2 + $0xa4] sm:$0x1]  ;;  %v4280_v52 = vrot.slane %v4279_v10, 4  ;;  %v4288_v62 = vrot.slane %v4286_v9, 4  ;;  %v8287_v22 = vrot.slane %v5642_v0, 9  ;;  %v5765_v51 = vrot.slane %v11990_v54, 5 }
 0x2ad   : > { %v3768_v4 = vsel %vm10839_vm12, %v3760_v30, %v3767_v1  ;;  %v3961_v25 = vsel %vm10696_vm13, %v3769_v23, %v3960_v35  ;;  %v5764_v5 = vrot.slane %v5762_v60, 4  ;;  %v4294_v28 = vrot.slane %v4292_v15, 5  ;;  %v12021_v23 = vld [vmem:[#allocation2 + $0x8c] sm:$0x1]  ;;  %v12023_v35 = vpop.permute.xlu1 %6011 }
 0x2ae   : > { %3959 = vst.msk [vmem:[#allocation2 + $0xa0] sm:$0xf] %vm3329_vm0, %v3768_v4  ;;  %3962 = vst [vmem:[#allocation2 + $0xa4] sm:$0x1] %v3961_v25  ;;  %v4289_v12 = vor.u32 %v4288_v62, %v4284_v49  ;;  %v5424_v6 = vor.u32 %v13089_v18, %v11664_v3  ;;  %v5427_v39 = vshll.u32 %v11633_v56, 16  ;;  %v5763_v0 = vsel %vm9195_vm2, %v8287_v22, %v5762_v60  ;;  %v12027_v60 = vpop.permute.xlu0 %6265 }
 0x2af   : > { %v5766_v10 = vsel %vm9195_vm2, %v5764_v5, %v5765_v51  ;;  %v13090_v9 = vshrl.u32 %v11633_v56, 16  ;;  %v5437_v1 = vshll.u32 %v11773_v16, 16  ;;  %v4887_v4 = vor.u32 %v11923_v46, %v11889_v26  ;;  %v4002_v25 = vld [vmem:[#allocation2 + $0x6c] sm:$0xf] }
 0x2b0   : > { %v4290_v15 = vrot.slane %v4289_v12, 4  ;;  %v8431_v62 = vcombine.low %v5763_v0, %v5766_v10  ;;  %v5429_v3 = vrot.slane %v5427_v39, 5  ;;  %v4285_v22 = vsel %vm9239_vm5, %v4280_v52, %v4284_v49 }
 0x2b1   : > { %v5433_v30 = vrot.slane %v13090_v9, 4  ;;  %v5425_v56 = vrot.slane %v5424_v6, 4  ;;  %v4890_v5 = vshll.u32 %v11881_v59, 16  ;;  %v4896_v16 = vrot.slane %v4894_v58, 4 }
 0x2b2   : > { %v4295_v51 = vsel %vm9239_vm5, %v4290_v15, %v4294_v28  ;;  %6531 = vrot.lane.b32.xlu0 %v8431_v62, %s9084_s25  ;;  %v5439_v18 = vrot.slane %v5437_v1, 5  ;;  %v4900_v26 = vshll.u32 %v12021_v23, 16  ;;  %v4249_v0 = vshrl.u32 %v4002_v25, 16  ;;  %v5034_v15 = vld [vmem:[#allocation2 + $0x84] sm:$0xe]  ;;  %v12043_v62 = vpop.permute.xlu1 %6111 }
 0x2b3   : > { %v5434_v12 = vor.u32 %v5433_v30, %v5429_v3  ;;  %v8320_v46 = vcombine.low %v4285_v22, %v4295_v51  ;;  %v4892_v39 = vrot.slane %v4890_v5, 5  ;;  %v4252_v10 = vshll.u32 %v4002_v25, 16  ;;  %13091 = vst [vmem:[#allocation12_spill] sm:$0xff] %v12043_v62  ;;  %v12048_v51 = vld [vmem:[#allocation2 + $0x88] sm:$0xf] }
 0x2b4   : > { %v4888_v52 = vrot.slane %v4887_v4, 4  ;;  %v4258_v6 = vshll.u32 %v11778_v31, 16  ;;  %v4262_v9 = vshrl.u32 %v11778_v31, 16  ;;  %v5430_v58 = vsel %vm9239_vm5, %v5425_v56, %v5429_v3  ;;  %v12050_v31 = vpop.permute.xlu0 %6365 }
 0x2b5   : > { %v5435_v49 = vrot.slane %v5434_v12, 4  ;;  %5941 = vrot.lane.b32.xlu1 %v8320_v46, %s9080_s13  ;;  %v4897_v28 = vor.u32 %v4896_v16, %v4892_v39  ;;  %v4251_v30 = vrot.slane %v4249_v0, 4  ;;  %v4254_v1 = vrot.slane %v4252_v10, 5 }
 0x2b6   : > { %v4260_v22 = vrot.slane %v4258_v6, 5  ;;  %v4264_v4 = vrot.slane %v4262_v9, 4  ;;  %v4268_v5 = vshll.u32 %v11797_v29, 16  ;;  %v4902_v3 = vrot.slane %v4900_v26, 5 }
 0x2b7   : > { %v5440_v25 = vsel %vm9239_vm5, %v5435_v49, %v5439_v18  ;;  %v4898_v46 = vrot.slane %v4897_v28, 4  ;;  %v4255_v56 = vor.u32 %v4254_v1, %v4251_v30  ;;  %v4893_v16 = vsel %vm9239_vm5, %v4888_v52, %v4892_v39  ;;  %v12055_v18 = vld [vmem:[#allocation2 + $0x8c] sm:$0x1]  ;;  %v4427_v49 = vld [vmem:[#allocation2 + $0x84] sm:$0xe] }
 0x2b8   : > { %v8413_v12 = vcombine.low %v5430_v58, %v5440_v25  ;;  %v4265_v0 = vor.u32 %v4264_v4, %v4260_v22  ;;  %v8272_v10 = vrot.slane %v5034_v15, 9  ;;  %v5160_v14 = vrot.slane %v11881_v59, 5  ;;  %v5221_v58 = vld [vmem:[#allocation2 + $0x90] sm:$0xf]  ;;  %v12062_v1 = vld [vmem:[#allocation2 + $0x94] sm:$0xf] }
 0x2b9   : > { %v4903_v29 = vsel %vm9239_vm5, %v4898_v46, %v4902_v3  ;;  %v4256_v6 = vrot.slane %v4255_v56, 4  ;;  %v4270_v9 = vrot.slane %v4268_v5, 5  ;;  %v4559_v26 = vrot.slane %v12048_v51, 5  ;;  %v12074_v56 = vld [vmem:[#allocation2 + $0x98] sm:$0x1] }
 0x2ba   : > { %6447 = vrot.lane.b32.xlu1 %v8413_v12, %s9083_s16  ;;  %v8368_v28 = vcombine.low %v4893_v16, %v4903_v29  ;;  %v4266_v30 = vrot.slane %v4265_v0, 4  ;;  %v5162_v39 = vrot.slane %v5160_v14, 4  ;;  %v5163_v52 = vrot.slane %v12021_v23, 5  ;;  %v12067_v12 = vpop.permute.xlu1 %6187  ;;  %v12076_v16 = vpop.permute.xlu0 %6441 }
 0x2bb   : > { %v4261_v59 = vsel %vm9239_vm5, %v4256_v6, %v4260_v22  ;;  %v8257_v15 = vrot.slane %v4427_v49, 9  ;;  %v4561_v25 = vrot.slane %v4559_v26, 4  ;;  %v4562_v4 = vrot.slane %v12055_v18, 5  ;;  %13092 = vst [vmem:[#allocation22_spill] sm:$0xff] %v12067_v12  ;;  %v12083_v6 = vld [vmem:[#allocation2 + $0x98] sm:$0x1] }
 0x2bc   : > { %6197 = vrot.lane.b32.xlu0 %v8368_v28, %s9081_s14  ;;  %v4271_v5 = vsel %vm9239_vm5, %v4266_v30, %v4270_v9  ;;  %v5164_v46 = vsel %vm9195_vm2, %v5162_v39, %v5163_v52  ;;  %v5490_v23 = vshrl.u32 %v5221_v58, 16  ;;  %v5493_v3 = vshll.u32 %v5221_v58, 16  ;;  %v13094_v12 = vld [vmem:[#allocation9_spill] sm:$0xff] }
 0x2bd   : > { %v8319_v22 = vcombine.low %v4261_v59, %v4271_v5  ;;  %v5161_v0 = vsel %vm9195_vm2, %v8272_v10, %v5160_v14  ;;  %v4560_v49 = vsel %vm9195_vm2, %v8257_v15, %v4559_v26  ;;  %v5503_v29 = vshrl.u32 %v12062_v1, 16 }
 0x2be   : > { %v8384_v9 = vcombine.low %v5161_v0, %v5164_v46  ;;  %v4563_v28 = vsel %vm9195_vm2, %v4561_v25, %v4562_v4  ;;  %v5492_v30 = vrot.slane %v5490_v23, 4  ;;  %v5495_v39 = vrot.slane %v5493_v3, 5  ;;  %v12097_v0 = vpop.permute.xlu1 %6363 }
 0x2bf   : > { %5939 = vrot.lane.b32.xlu1 %v8319_v22, %s9080_s13  ;;  %v4911_v52 = vor.u32 %v11877_v11, %v11865_v33  ;;  %v4914_v14 = vshll.u32 %v11830_v20, 16  ;;  %v13093_v10 = vshrl.u32 %v11830_v20, 16  ;;  %v4924_v59 = vshll.u32 %v12074_v56, 16  ;;  %v8993_v22 = vld [vmem:[#allocation2 + $0x34] sm:$0xf] }
 0x2c0   : > { %6277 = vrot.lane.b32.xlu0 %v8384_v9, %s9078_s11  ;;  %v5496_v15 = vor.u32 %v5495_v39, %v5492_v30  ;;  %v5499_v5 = vshll.u32 %v12062_v1, 16  ;;  %v5505_v25 = vrot.slane %v5503_v29, 4  ;;  %v5509_v4 = vshll.u32 %v12083_v6, 16  ;;  %v8994_v33 = vld [vmem:[#allocation2 + $0x30] sm:$0xf]  ;;  %v12103_v30 = vpop.permute.xlu0 %6109 }
 0x2c1   : > { %v4920_v26 = vrot.slane %v13093_v10, 4  ;;  %v8337_v46 = vcombine.low %v4560_v49, %v4563_v28  ;;  %v4912_v23 = vrot.slane %v4911_v52, 4  ;;  %v4916_v3 = vrot.slane %v4914_v14, 5 }
 0x2c2   : > { %v8298_v11 = vcombine.low %v8994_v33, %v8993_v22  ;;  %v8400_v10 = vcombine.low %v5221_v58, %v12062_v1  ;;  %v5497_v62 = vrot.slane %v5496_v15, 4  ;;  %v5501_v63 = vrot.slane %v5499_v5, 5  ;;  %v3389_v33 = vld [vmem:[#allocation2 + $0xc0] sm:$0x1] }
 0x2c3   : > { %v6630_v9 = vsel %vm2874_vm8, %v11851_v61, %v13094_v12  ;;  %6023 = vrot.lane.b32.xlu1 %v8337_v46, %s9079_s12  ;;  %v4921_v49 = vor.u32 %v4920_v26, %v4916_v3  ;;  %v4926_v29 = vrot.slane %v4924_v59, 5  ;;  %v4917_v58 = vsel %vm9239_vm5, %v4912_v23, %v4916_v3  ;;  %v5643_v59 = vld [vmem:[#allocation2 + $0x90] sm:$0xe] }
 0x2c4   : > { %v6559_v28 = vsel %vm2792_vm6, %v8298_v11, %v11892_v53  ;;  %v6662_v39 = vsel %vm2907_vm9, %v6630_v9, %v11904_v40  ;;  %6373 = vrot.lane.b32.xlu0 %v8400_v10, %s9082_s15  ;;  %v5502_v61 = vsel %vm9239_vm5, %v5497_v62, %v5501_v63  ;;  %v5506_v12 = vor.u32 %v5505_v25, %v5501_v63 }
 0x2c5   : > { %v5511_v52 = vrot.slane %v5509_v4, 5  ;;  %v4922_v14 = vrot.slane %v4921_v49, 4  ;;  %v12117_v26 = vsel %vm2841_vm7, %v6559_v28, %v11698_v27  ;;  %v5472_v53 = vor.u32 %v12003_v34, %v11956_v8  ;;  %v12132_v34 = vpop.permute.xlu1 %5933  ;;  %v12136_v11 = vpop.permute.xlu0 %6185 }
 0x2c6   : > { %v5475_v40 = vshll.u32 %v11917_v2, 16  ;;  %v5507_v15 = vrot.slane %v5506_v12, 4  ;;  %v12124_v5 = vsel %vm2940_vm10, %v6662_v39, %v11744_v42  ;;  %v13095_v62 = vshrl.u32 %v11917_v2, 16  ;;  %v4006_v2 = vld [vmem:[#allocation2 + $0x84] sm:$0xf]  ;;  %v13097_v39 = vld [vmem:[#allocation10_spill] sm:$0xff] }
 0x2c7   : > { %v5485_v25 = vshll.u32 %v11990_v54, 16  ;;  %v4927_v27 = vsel %vm9239_vm5, %v4922_v14, %v4926_v29  ;;  %v5473_v4 = vrot.slane %v5472_v53, 4  ;;  %v5769_v8 = vrot.slane %v12062_v1, 5  ;;  %v8995_v29 = vld [vmem:[%s13031_s3 + $0x10] ss:$0 sps:$4 sm:$0x33]  }
 0x2c8   : > { %v5481_v63 = vrot.slane %v13095_v62, 4  ;;  %v5477_v46 = vrot.slane %v5475_v40, 5  ;;  %v8369_v23 = vcombine.low %v4917_v58, %v4927_v27  ;;  %v5512_v3 = vsel %vm9239_vm5, %v5507_v15, %v5511_v52  ;;  %v3386_v15 = vld [vmem:[#allocation2 + $0xb4] sm:$0x1] }
 0x2c9   : > { %v5487_v42 = vrot.slane %v5485_v25, 5  ;;  %v8288_v22 = vrot.slane %v5643_v59, 9  ;;  %v8416_v54 = vcombine.low %v5502_v61, %v5512_v3  ;;  %v5772_v49 = vrot.slane %v12083_v6, 5  ;;  %v13098_v6 = vld [vmem:[#allocation6_spill] sm:$0xff]  ;;  %v13099_v25 = vld [vmem:[#allocation11_spill] sm:$0xff] }
 0x2ca   : > { %v5478_v10 = vsel %vm9239_vm5, %v5473_v4, %v5477_v46  ;;  %v5482_v9 = vor.u32 %v5481_v63, %v5477_v46  ;;  %6199 = vrot.lane.b32.xlu1 %v8369_v23, %s9081_s14  ;;  %v5771_v1 = vrot.slane %v5769_v8, 4  ;;  %vm13096_vm4 = vcmask 1041408   ;;  %v12164_v46 = vpop.permute.xlu1 %6439 }
 0x2cb   : > { %v7398_v28 = vsel %vm13096_vm4, %v8995_v29, 0  ;;  %v6660_v58 = vsel %vm2907_vm9, %v11887_v7, %v13097_v39  ;;  %v3291_v61 = vadd.f32 %v11900_v47, %v11977_v45  ;;  %6453 = vrot.lane.b32.xlu0 %v8416_v54, %s9083_s16  ;;  %v3390_v14 = vsel %vm10696_vm13, 0, %v3389_v33  ;;  %v12167_v33 = vpop.permute.xlu0 %6525 }
 0x2cc   : > { %v5483_v12 = vrot.slane %v5482_v9, 4  ;;  %8784 = vmatpush3.bf16.msra.mxu1 %v7398_v28  ;;  %v6692_v52 = vsel %vm2940_vm10, %v6660_v58, %v13098_v6  ;;  %v4297_v53 = vshrl.u32 %v4006_v2, 16  ;;  %v5770_v40 = vsel %vm9195_vm2, %v8288_v22, %v5769_v8  ;;  %3391 = vst [vmem:[#allocation2 + $0xc0] sm:$0x1] %v3390_v14  ;;  %v13102_v6 = vld [vmem:[#allocation14_spill] sm:$0xff]  ;;  %v13103_v14 = vld [vmem:[#allocation7_spill] sm:$0xff] }
 0x2cd   : > { %v5773_v7 = vsel %vm9195_vm2, %v5771_v1, %v5772_v49  ;;  %v3327_v59 = vmax.f32 %v3291_v61, 0.0  ;;  %v4300_v45 = vshll.u32 %v4006_v2, 16  ;;  %vm13100_vm1 = vcmask 195584  }
 0x2ce   : > { %v5488_v62 = vsel %vm9239_vm5, %v5483_v12, %v5487_v42  ;;  %v8432_v63 = vcombine.low %v5770_v40, %v5773_v7  ;;  %v6724_v27 = vsel %vm13100_vm1, %v6692_v52, %v13099_v25  ;;  %v4299_v4 = vrot.slane %v4297_v53, 4  ;;  %v8997_v25 = vld [vmem:[#allocation2 + $0x24] sm:$0xf] }
 0x2cf   : > { %v8415_v23 = vcombine.low %v5478_v10, %v5488_v62  ;;  %v8573_v3 = vpack.c.bf16 %v3327_v59, %v3327_v59  ;;  %v4302_v8 = vrot.slane %v4300_v45, 5  ;;  %v4306_v22 = vshll.u32 %v12048_v51, 16  ;;  %v3445_v10 = vld [vmem:[#allocation2 + $0xc8] sm:$0x1]  ;;  %v12191_v45 = vpop.permute.xlu1 %5931 }
 0x2d0   : > { %6533 = vrot.lane.b32.xlu0 %v8432_v63, %s9084_s25  ;;  %vm13101_vm4 = vcmask 228352   ;;  %v4310_v42 = vshrl.u32 %v12048_v51, 16  ;;  %v3283_v54 = vadd.f32 %v11900_v47, %v11983_v13  ;;  %v3387_v9 = vsel %vm10696_vm13, 0, %v3386_v15  ;;  %v8996_v63 = vld [vmem:[#allocation2 + $0x28] sm:$0xf] }
 0x2d1   : > { %v6756_v2 = vsel %vm13101_vm4, %v6724_v27, %v11939_v24  ;;  %6451 = vrot.lane.b32.xlu1 %v8415_v23, %s9083_s16  ;;  %v3805_v49 = vshrl.u32 %v8573_v3, 16  ;;  %v4303_v1 = vor.u32 %v4302_v8, %v4299_v4  ;;  %v4308_v29 = vrot.slane %v4306_v22, 5  ;;  %3388 = vst [vmem:[#allocation2 + $0xb4] sm:$0x1] %v3387_v9 }
 0x2d2   : > { %v4316_v28 = vshll.u32 %v12055_v18, 16  ;;  %v3808_v39 = vshll.u32 %v8573_v3, 16  ;;  %v4312_v58 = vrot.slane %v4310_v42, 4  ;;  %v3325_v24 = vmax.f32 %v3283_v54, 0.0 }
 0x2d3   : > { %v3294_v51 = vadd.f32 %v11900_v47, %v11992_v48  ;;  %v12181_v61 = vrot.slane %v3805_v49, 7  ;;  %v4304_v13 = vrot.slane %v4303_v1, 4  ;;  %v3446_v12 = vsel %vm10716_vm3, 0, %v3445_v10  ;;  %v3977_v53 = vld [vmem:[#allocation2 + $0xc0] sm:$0xf] }
 0x2d4   : > { %v6788_v52 = vsel %vm3039_vm14, %v6756_v2, %v13102_v6  ;;  %v6726_v18 = vsel %vm13100_vm1, %v12124_v5, %v13103_v14  ;;  %v4313_v40 = vor.u32 %v4312_v58, %v4308_v29  ;;  %v8571_v7 = vpack.c.bf16 %v3325_v24, %v3325_v24  ;;  %3447 = vst [vmem:[#allocation2 + $0xc8] sm:$0x1] %v3446_v12  ;;  %v3442_v48 = vld [vmem:[#allocation2 + $0xbc] sm:$0x1]  ;;  %v12196_v5 = vpop.permute.xlu0 %6017  ;;  %v5644_v10 = vld [vmem:[#allocation2 + $0x9c] sm:$0xe] }
 0x2d5   : > { %v3328_v59 = vmax.f32 %v3294_v51, 0.0  ;;  %8786 = vmatmul.mubr.msk.bf16.vlgmr.msra.gmra.mrb[0].mxu1 %vm3099_vm15, %v6788_v52  ;;  %v3810_v15 = vor.u32 %v3808_v39, %v12181_v61  ;;  %v4318_v62 = vrot.slane %v4316_v28, 5  ;;  %v8297_v27 = vcombine.low %v8997_v25, %v8996_v63  ;;  %v13104_v12 = vld [vmem:[#allocation16_spill] sm:$0xff]  ;;  %v12215_v52 = vld [vmem:[#allocation2 + $0xa4] sm:$0x1] }
 0x2d6   : > { %v3286_v4 = vadd.f32 %v11900_v47, %v11999_v43  ;;  %v4309_v23 = vsel %vm9239_vm5, %v4304_v13, %v4308_v29  ;;  %v4314_v3 = vrot.slane %v4313_v40, 4  ;;  %v3788_v8 = vshrl.u32 %v8571_v7, 16  ;;  %v12208_v29 = vld [vmem:[#allocation2 + $0xa0] sm:$0xf]  ;;  %v12217_v40 = vpop.permute.xlu1 %6271 }
 0x2d7   : > { %v8574_v22 = vpack.c.bf16 %v3328_v59, %v3328_v59  ;;  %v3978_v2 = vsel %vm10831_vm11, %v3810_v15, %v3977_v53  ;;  %v6556_v42 = vsel %vm2792_vm6, %v8297_v27, %v11961_v32  ;;  %v3443_v9 = vsel %vm10716_vm3, 0, %v3442_v48  ;;  %v5035_v53 = vld [vmem:[#allocation2 + $0x90] sm:$0xe] }
 0x2d8   : > { %v3326_v54 = vmax.f32 %v3286_v4, 0.0  ;;  %3979 = vst [vmem:[#allocation2 + $0xc0] sm:$0xf] %v3978_v2  ;;  %v4319_v47 = vsel %vm9239_vm5, %v4314_v3, %v4318_v62  ;;  %v3790_v43 = vrot.slane %v3788_v8, 7  ;;  %v3791_v49 = vshll.u32 %v8571_v7, 16  ;;  %v12221_v62 = vpop.permute.xlu0 %6523  ;;  %v13105_v4 = vld [vmem:[#allocation20_spill] sm:$0xff] }
 0x2d9   : > { %v3813_v1 = vshrl.u32 %v8574_v22, 16  ;;  %3444 = vst [vmem:[#allocation2 + $0xbc] sm:$0x1] %v3443_v9  ;;  %v3811_v28 = vrot.slane %v12181_v61, 4  ;;  %v8321_v39 = vcombine.low %v4309_v23, %v4319_v47  ;;  %v3970_v58 = vld [vmem:[#allocation2 + $0xb4] sm:$0xf]  ;;  %v12213_v6 = vsel %vm2841_vm7, %v6556_v42, %v13104_v12 }
 0x2da   : > { %v3816_v32 = vshll.u32 %v8574_v22, 16  ;;  %v8572_v24 = vpack.c.bf16 %v3326_v54, %v3326_v54  ;;  %v3793_v51 = vor.u32 %v3791_v49, %v3790_v43  ;;  %v8289_v14 = vrot.slane %v5644_v10, 9  ;;  %v13106_v2 = vld [vmem:[#allocation13_spill] sm:$0xff]  ;;  %v12238_v47 = vld [vmem:[#allocation2 + $0x98] sm:$0x1] }
 0x2db   : > { %v3815_v13 = vrot.slane %v3813_v1, 7  ;;  %5943 = vrot.lane.b32.xlu1 %v8321_v39, %s9080_s13  ;;  %v3794_v7 = vrot.slane %v3790_v43, 4  ;;  %v3981_v61 = vld [vmem:[#allocation2 + $0xc8] sm:$0x1]  ;;  %v5776_v15 = vrot.slane %v12208_v29, 5  ;;  %v6758_v23 = vsel %vm13101_vm4, %v6726_v18, %v13105_v4 }
 0x2dc   : > { %v3796_v59 = vshrl.u32 %v8572_v24, 16  ;;  %v3799_v48 = vshll.u32 %v8572_v24, 16  ;;  %v3971_v63 = vsel %vm10831_vm11, %v3793_v51, %v3970_v58  ;;  %v5779_v22 = vrot.slane %v12215_v52, 5  ;;  %v12230_v54 = vld [vmem:[#allocation2 + $0x94] sm:$0xf]  ;;  %vm13113_vm11 = vmmov %vm13100_vm1 }
 0x2dd   : > { %v3818_v25 = vor.u32 %v3816_v32, %v3815_v13  ;;  %v3820_v27 = vrot.slane %v3815_v13, 4  ;;  %3972 = vst [vmem:[#allocation2 + $0xb4] sm:$0xf] %v3971_v63  ;;  %v5778_v8 = vrot.slane %v5776_v15, 4  ;;  %v6790_v42 = vsel %vm3039_vm14, %v6758_v23, %v13106_v2  ;;  %v4428_v43 = vld [vmem:[#allocation2 + $0x90] sm:$0xe]  ;;  %v12257_v63 = vpop.permute.xlu0 %6269 }
 0x2de   : > { %v3798_v3 = vrot.slane %v3796_v59, 7  ;;  %8789 = vmatprep.mubr.msk.bf16.mxu1 %vm3099_vm15, %v6790_v42  ;;  %v8273_v10 = vrot.slane %v5035_v53, 9  ;;  %v5167_v18 = vrot.slane %v11830_v20, 5  ;;  %v5223_v32 = vld [vmem:[#allocation2 + $0x9c] sm:$0xf]  ;;  %v5170_v13 = vrot.slane %v12074_v56, 5  ;;  %v12248_v53 = vpop.permute.xlu1 %6015 }
 0x2df   : > { %v3819_v9 = vsel %vm10839_vm12, %v3811_v28, %v3818_v25  ;;  %v3982_v36 = vsel %vm10696_vm13, %v3820_v27, %v3981_v61  ;;  %v5777_v28 = vsel %vm9195_vm2, %v8289_v14, %v5776_v15  ;;  %v5780_v58 = vsel %vm9195_vm2, %v5778_v8, %v5779_v22  ;;  %v4616_v12 = vld [vmem:[#allocation2 + $0x9c] sm:$0xf]  ;;  %v12255_v15 = vld [vmem:[#allocation2 + $0xa0] sm:$0xf] }
 0x2e0   : > { %3980 = vst.msk [vmem:[#allocation2 + $0xc4] sm:$0xf] %vm3329_vm0, %v3819_v9  ;;  %3983 = vst [vmem:[#allocation2 + $0xc8] sm:$0x1] %v3982_v36  ;;  %v3801_v49 = vor.u32 %v3799_v48, %v3798_v3  ;;  %v3803_v1 = vrot.slane %v3798_v3, 4  ;;  %v8433_v24 = vcombine.low %v5777_v28, %v5780_v58  ;;  %v5168_v20 = vsel %vm9195_vm2, %v8273_v10, %v5167_v18 }
 0x2e1   : > { %v3974_v39 = vld [vmem:[#allocation2 + $0xbc] sm:$0x1]  ;;  %v5169_v51 = vrot.slane %v5167_v18, 4  ;;  %v8258_v59 = vrot.slane %v4428_v43, 9  ;;  %v4566_v48 = vrot.slane %v12230_v54, 5  ;;  %v4569_v41 = vrot.slane %v12238_v47, 5 }
 0x2e2   : > { %v3802_v61 = vsel %vm10839_vm12, %v3794_v7, %v3801_v49  ;;  %v3975_v14 = vsel %vm10696_vm13, %v3803_v1, %v3974_v39  ;;  %6535 = vrot.lane.b32.xlu0 %v8433_v24, %s9084_s25  ;;  %v5514_v7 = vshrl.u32 %v5223_v32, 16  ;;  %v5517_v25 = vshll.u32 %v5223_v32, 16  ;;  %v12272_v43 = vld [vmem:[#allocation2 + $0xa4] sm:$0x1]  ;;  %v12275_v58 = vld [vmem:[#allocation2 + $0x90] sm:$0xf]  ;;  %vm13115_vm12 = vmmov %vm13100_vm1 }
 0x2e3   : > { %3973 = vst.msk [vmem:[#allocation2 + $0xb8] sm:$0xf] %vm3329_vm0, %v3802_v61  ;;  %3976 = vst [vmem:[#allocation2 + $0xbc] sm:$0x1] %v3975_v14  ;;  %v5171_v56 = vsel %vm9195_vm2, %v5169_v51, %v5170_v13  ;;  %v4568_v4 = vrot.slane %v4566_v48, 4  ;;  %v8401_v23 = vcombine.low %v5223_v32, %v12208_v29  ;;  %v4929_v3 = vshrl.u32 %v4616_v12, 16  ;;  %v12277_v32 = vpop.permute.xlu1 %6115  ;;  %v12281_v61 = vpop.permute.xlu0 %6369 }
 0x2e4   : > { %v8385_v27 = vcombine.low %v5168_v20, %v5171_v56  ;;  %v5516_v8 = vrot.slane %v5514_v7, 4  ;;  %v5519_v22 = vrot.slane %v5517_v25, 5  ;;  %v4932_v2 = vshll.u32 %v4616_v12, 16  ;;  %13107 = vst [vmem:[#allocation9_spill] sm:$0xff] %v12275_v58  ;;  %vm13116_vm0 = vmmov %vm13101_vm4 }
 0x2e5   : > { %v4942_v42 = vshrl.u32 %v12255_v15, 16  ;;  %v4567_v9 = vsel %vm9195_vm2, %v8258_v59, %v4566_v48  ;;  %v4570_v36 = vsel %vm9195_vm2, %v4568_v4, %v4569_v41  ;;  %v4931_v10 = vrot.slane %v4929_v3, 4  ;;  %vm13117_vm1 = vmmov %vm13116_vm0 }
 0x2e6   : > { %6279 = vrot.lane.b32.xlu1 %v8385_v27, %s9078_s11  ;;  %v5523_v18 = vshll.u32 %v12208_v29, 16  ;;  %v8338_v49 = vcombine.low %v4567_v9, %v4570_v36  ;;  %v4934_v1 = vrot.slane %v4932_v2, 5  ;;  %v5520_v39 = vor.u32 %v5519_v22, %v5516_v8  ;;  %v5036_v9 = vld [vmem:[#allocation2 + $0x9c] sm:$0xe]  ;;  %vm13122_vm4 = vmmov %vm13113_vm11 }
 0x2e7   : > { %v5527_v28 = vshrl.u32 %v12208_v29, 16  ;;  %v5533_v20 = vshll.u32 %v12215_v52, 16  ;;  %v4938_v51 = vshll.u32 %v12255_v15, 16  ;;  %v4944_v13 = vrot.slane %v4942_v42, 4 }
 0x2e8   : > { %v5525_v24 = vrot.slane %v5523_v18, 5  ;;  %6025 = vrot.lane.b32.xlu0 %v8338_v49, %s9079_s12  ;;  %v5521_v14 = vrot.slane %v5520_v39, 4  ;;  %v4935_v48 = vor.u32 %v4934_v1, %v4931_v10  ;;  %v4948_v56 = vshll.u32 %v12272_v43, 16  ;;  %v12295_v18 = vpop.permute.xlu1 %6191 }
 0x2e9   : > { %v5529_v59 = vrot.slane %v5527_v28, 4  ;;  %v8354_v29 = vcombine.low %v4616_v12, %v12255_v15  ;;  %v4940_v41 = vrot.slane %v4938_v51, 5  ;;  %v4321_v7 = vshrl.u32 %v12275_v58, 16 }
 0x2ea   : > { %6375 = vrot.lane.b32.xlu1 %v8401_v23, %s9082_s15  ;;  %v4324_v52 = vshll.u32 %v12275_v58, 16  ;;  %v5526_v25 = vsel %vm9239_vm5, %v5521_v14, %v5525_v24  ;;  %v5535_v4 = vrot.slane %v5533_v20, 5  ;;  %v4936_v3 = vrot.slane %v4935_v48, 4  ;;  %v12301_v20 = vpop.permute.xlu0 %6445 }
 0x2eb   : > { %v5530_v27 = vor.u32 %v5529_v59, %v5525_v24  ;;  %v4945_v8 = vor.u32 %v4944_v13, %v4940_v41  ;;  %v4323_v22 = vrot.slane %v4321_v7, 4  ;;  %v4330_v42 = vshll.u32 %v12230_v54, 16  ;;  %v12299_v24 = vld [vmem:[#allocation2 + $0x9c] sm:$0xf] }
 0x2ec   : > { %v4326_v2 = vrot.slane %v4324_v52, 5  ;;  %6121 = vrot.lane.b32.xlu0 %v8354_v29, %s9077_s10  ;;  %v4950_v23 = vrot.slane %v4948_v56, 5  ;;  %v4334_v36 = vshrl.u32 %v12230_v54, 16  ;;  %v4340_v10 = vshll.u32 %v12238_v47, 16  ;;  %13108 = vst [vmem:[#allocation10_spill] sm:$0xff] %v12299_v24 }
 0x2ed   : > { %v5531_v12 = vrot.slane %v5530_v27, 4  ;;  %v4941_v49 = vsel %vm9239_vm5, %v4936_v3, %v4940_v41  ;;  %v4946_v1 = vrot.slane %v4945_v8, 4  ;;  %v4332_v28 = vrot.slane %v4330_v42, 5  ;;  %v12306_v47 = vld [vmem:[#allocation2 + $0xa0] sm:$0xf] }
 0x2ee   : > { %v4327_v39 = vor.u32 %v4326_v2, %v4323_v22  ;;  %v4336_v13 = vrot.slane %v4334_v36, 4  ;;  %v8274_v14 = vrot.slane %v5036_v9, 9  ;;  %v5174_v54 = vrot.slane %v12255_v15, 5  ;;  %13109 = vst [vmem:[#allocation6_spill] sm:$0xff] %v12306_v47  ;;  %v12310_v41 = vld [vmem:[#allocation2 + $0xa4] sm:$0x1] }
 0x2ef   : > { %v5536_v51 = vsel %vm9239_vm5, %v5531_v12, %v5535_v4  ;;  %v4951_v48 = vsel %vm9239_vm5, %v4946_v1, %v4950_v23  ;;  %v4342_v29 = vrot.slane %v4340_v10, 5  ;;  %v5177_v3 = vrot.slane %v12272_v43, 5  ;;  %v5225_v22 = vld [vmem:[#allocation2 + $0xa8] sm:$0xf]  ;;  %v12324_v12 = vld [vmem:[#allocation2 + $0xac] sm:$0xf]  ;;  %v12326_v23 = vpop.permute.xlu1 %6367 }
 0x2f0   : > { %v8417_v59 = vcombine.low %v5526_v25, %v5536_v51  ;;  %v4328_v56 = vrot.slane %v4327_v39, 4  ;;  %v8370_v7 = vcombine.low %v4941_v49, %v4951_v48  ;;  %v4337_v52 = vor.u32 %v4336_v13, %v4332_v28  ;;  %v12330_v39 = vpop.permute.xlu0 %6113 }
 0x2f1   : > { %v5176_v27 = vrot.slane %v5174_v54, 4  ;;  %v5175_v15 = vsel %vm9195_vm2, %v8274_v14, %v5174_v54  ;;  %v4345_v4 = vshrl.u32 %v12299_v24, 16  ;;  %v4348_v25 = vshll.u32 %v12299_v24, 16 }
 0x2f2   : > { %6455 = vrot.lane.b32.xlu1 %v8417_v59, %s9083_s16  ;;  %v4354_v8 = vshll.u32 %v12306_v47, 16  ;;  %6201 = vrot.lane.b32.xlu0 %v8370_v7, %s9081_s14  ;;  %v4338_v2 = vrot.slane %v4337_v52, 4  ;;  %v4358_v43 = vshrl.u32 %v12306_v47, 16  ;;  %v4364_v9 = vshll.u32 %v12310_v41, 16 }
 0x2f3   : > { %v5178_v42 = vsel %vm9195_vm2, %v5176_v27, %v5177_v3  ;;  %v4333_v36 = vsel %vm9239_vm5, %v4328_v56, %v4332_v28  ;;  %v4347_v10 = vrot.slane %v4345_v4, 4  ;;  %v4350_v49 = vrot.slane %v4348_v25, 5  ;;  %v4429_v27 = vld [vmem:[#allocation2 + $0x9c] sm:$0xe]  ;;  %v13110_v3 = vld [vmem:[#allocation8_spill] sm:$0xff] }
 0x2f4   : > { %v4356_v1 = vrot.slane %v4354_v8, 5  ;;  %v4343_v51 = vsel %vm9239_vm5, %v4338_v2, %v4342_v29  ;;  %v8386_v13 = vcombine.low %v5175_v15, %v5178_v42  ;;  %v4360_v14 = vrot.slane %v4358_v43, 4  ;;  %v12342_v42 = vld [vmem:[#allocation2 + $0xb0] sm:$0x1] }
 0x2f5   : > { %v5538_v54 = vshrl.u32 %v5225_v22, 16  ;;  %v8322_v59 = vcombine.low %v4333_v36, %v4343_v51  ;;  %v4351_v48 = vor.u32 %v4350_v49, %v4347_v10  ;;  %v5541_v7 = vshll.u32 %v5225_v22, 16  ;;  %v12345_v49 = vpop.permute.xlu1 %5937 }
 0x2f6   : > { %v5551_v52 = vshrl.u32 %v12324_v12, 16  ;;  %v6632_v28 = vsel %vm2874_vm8, %v12213_v6, %v13110_v3  ;;  %6281 = vrot.lane.b32.xlu0 %v8386_v13, %s9078_s11  ;;  %v4361_v56 = vor.u32 %v4360_v14, %v4356_v1  ;;  %v4366_v4 = vrot.slane %v4364_v9, 5  ;;  %v8998_v13 = vld [vmem:[#allocation2 + $0x4c] sm:$0xf]  ;;  %v8999_v14 = vld [vmem:[#allocation2 + $0x48] sm:$0xf] }
 0x2f7   : > { %v5540_v25 = vrot.slane %v5538_v54, 4  ;;  %5945 = vrot.lane.b32.xlu1 %v8322_v59, %s9080_s13  ;;  %v4352_v29 = vrot.slane %v4351_v48, 4  ;;  %v5543_v15 = vrot.slane %v5541_v7, 5  ;;  %v8402_v8 = vcombine.low %v5225_v22, %v12324_v12  ;;  %v12348_v48 = vpop.permute.xlu0 %6189  ;;  %v4618_v3 = vld [vmem:[#allocation2 + $0xa8] sm:$0xf] }
 0x2f8   : > { %v4573_v2 = vrot.slane %v12306_v47, 5  ;;  %v4362_v43 = vrot.slane %v4361_v56, 4  ;;  %v8259_v36 = vrot.slane %v4429_v27, 9  ;;  %v5547_v10 = vshll.u32 %v12324_v12, 16 }
 0x2f9   : > { %v5553_v6 = vrot.slane %v5551_v52, 4  ;;  %v4576_v9 = vrot.slane %v12310_v41, 5  ;;  %v8300_v54 = vcombine.low %v8999_v14, %v8998_v13  ;;  %v5544_v59 = vor.u32 %v5543_v15, %v5540_v25  ;;  %v12360_v13 = vld [vmem:[#allocation2 + $0xac] sm:$0xf]  ;;  %v5645_v14 = vld [vmem:[#allocation2 + $0xa8] sm:$0xe] }
 0x2fa   : > { %v4575_v51 = vrot.slane %v4573_v2, 4  ;;  %v4357_v22 = vsel %vm9239_vm5, %v4352_v29, %v4356_v1  ;;  %v4367_v7 = vsel %vm9239_vm5, %v4362_v43, %v4366_v4  ;;  %6377 = vrot.lane.b32.xlu0 %v8402_v8, %s9082_s15  ;;  %v5549_v52 = vrot.slane %v5547_v10, 5 }
 0x2fb   : > { %v5557_v27 = vshll.u32 %v12342_v42, 16  ;;  %v8323_v56 = vcombine.low %v4357_v22, %v4367_v7  ;;  %v4574_v41 = vsel %vm9195_vm2, %v8259_v36, %v4573_v2  ;;  %v5545_v15 = vrot.slane %v5544_v59, 4  ;;  %v13111_v22 = vld [vmem:[#allocation19_spill] sm:$0xff]  ;;  %v12382_v7 = vpop.permute.xlu0 %6529 }
 0x2fc   : > { %v4577_v25 = vsel %vm9195_vm2, %v4575_v51, %v4576_v9  ;;  %v12364_v4 = vsel %vm2792_vm6, %v8300_v54, %v12132_v34  ;;  %v5554_v29 = vor.u32 %v5553_v6, %v5549_v52  ;;  %v6634_v8 = vsel %vm2874_vm8, %v12117_v26, %v11862_v21  ;;  %v12377_v54 = vpop.permute.xlu1 %6443 }
 0x2fd   : > { %v8339_v1 = vcombine.low %v4574_v41, %v4577_v25  ;;  %5947 = vrot.lane.b32.xlu1 %v8323_v56, %s9080_s13  ;;  %v5559_v43 = vrot.slane %v5557_v27, 5  ;;  %v6666_v2 = vsel %vm2907_vm9, %v6634_v8, %v12136_v11  ;;  %v4953_v36 = vshrl.u32 %v4618_v3, 16  ;;  %v13112_v27 = vld [vmem:[#allocation18_spill] sm:$0xff]  ;;  %v13114_v56 = vld [vmem:[#allocation15_spill] sm:$0xff] }
 0x2fe   : > { %v4956_v10 = vshll.u32 %v4618_v3, 16  ;;  %v5550_v51 = vsel %vm9239_vm5, %v5545_v15, %v5549_v52  ;;  %v5555_v9 = vrot.slane %v5554_v29, 4  ;;  %v6698_v34 = vsel %vm2940_vm10, %v6666_v2, %v12027_v60  ;;  %v12391_v15 = vld [vmem:[#allocation2 + $0xb0] sm:$0x1]  ;;  %v5646_v2 = vld [vmem:[#allocation2 + $0xb4] sm:$0xe] }
 0x2ff   : > { %v4966_v6 = vshrl.u32 %v12360_v13, 16  ;;  %v4955_v21 = vrot.slane %v4953_v36, 4  ;;  %v8355_v59 = vcombine.low %v4618_v3, %v12360_v13  ;;  %v6664_v11 = vsel %vm2907_vm9, %v6632_v28, %v13111_v22  ;;  %v9001_v22 = vld [vmem:[#allocation2 + $0x3c] sm:$0xf] }
 0x300   : > { %v4958_v26 = vrot.slane %v4956_v10, 5  ;;  %v5560_v52 = vsel %vm9239_vm5, %v5555_v9, %v5559_v43  ;;  %v6730_v60 = vsel %vm13113_vm11, %v6698_v34, %v13112_v27  ;;  %v6696_v41 = vsel %vm2940_vm10, %v6664_v11, %v13114_v56  ;;  %vm13125_vm11 = vmmov %vm13122_vm4 }
 0x301   : > { %v5783_v25 = vrot.slane %v12324_v12, 5  ;;  %6027 = vrot.lane.b32.xlu1 %v8339_v1, %s9079_s12  ;;  %v8418_v3 = vcombine.low %v5550_v51, %v5560_v52  ;;  %v6728_v28 = vsel %vm13115_vm12, %v6696_v41, %v11857_v44  ;;  %v8290_v29 = vrot.slane %v5645_v14, 9  ;;  %v12400_v12 = vld [vmem:[#allocation2 + $0xb8] sm:$0xf]  ;;  %v12406_v14 = vld [vmem:[#allocation2 + $0xbc] sm:$0x1]  ;;  %vm13126_vm12 = vmmov %vm13116_vm0 }
 0x302   : > { %v4959_v8 = vor.u32 %v4958_v26, %v4955_v21  ;;  %v6760_v43 = vsel %vm13116_vm0, %v6728_v28, %v12164_v46  ;;  %v5786_v10 = vrot.slane %v12342_v42, 5  ;;  %v4962_v9 = vshll.u32 %v12360_v13, 16  ;;  %v9000_v26 = vld [vmem:[#allocation2 + $0x40] sm:$0xf]  ;;  %v5037_v41 = vld [vmem:[#allocation2 + $0xa8] sm:$0xe] }
 0x303   : > { %v5785_v36 = vrot.slane %v5783_v25, 4  ;;  %6457 = vrot.lane.b32.xlu0 %v8418_v3, %s9083_s16  ;;  %v4968_v51 = vrot.slane %v4966_v6, 4  ;;  %v4972_v34 = vshll.u32 %v12391_v15, 16  ;;  %v6792_v44 = vsel %vm3039_vm14, %v6760_v43, %v11994_v37  ;;  %v12413_v6 = vpop.permute.xlu1 %5935  ;;  %v12424_v43 = vld [vmem:[#allocation2 + $0xac] sm:$0xf] }
 0x304   : > { %v4960_v1 = vrot.slane %v4959_v8, 4  ;;  %v5784_v46 = vsel %vm9195_vm2, %v8290_v29, %v5783_v25  ;;  %v4964_v21 = vrot.slane %v4962_v9, 5  ;;  %8790 = vmatmul.mubr.msk.bf16.gmra.mrb[4].mxu1 %vm3099_vm15, %v6792_v44  ;;  %v8299_v11 = vcombine.low %v9001_v22, %v9000_v26  ;;  %v12417_v25 = vpop.permute.xlu0 %6021 }
 0x305   : > { %v5787_v42 = vsel %vm9195_vm2, %v5785_v36, %v5786_v10  ;;  %6123 = vrot.lane.b32.xlu1 %v8355_v59, %s9077_s10  ;;  %v4974_v37 = vrot.slane %v4972_v34, 5  ;;  %v8291_v27 = vrot.slane %v5646_v2, 9  ;;  %v5790_v56 = vrot.slane %v12400_v12, 5  ;;  %v4430_v59 = vld [vmem:[#allocation2 + $0xa8] sm:$0xe] }
 0x306   : > { %v8434_v52 = vcombine.low %v5784_v46, %v5787_v42  ;;  %v4969_v3 = vor.u32 %v4968_v51, %v4964_v21  ;;  %v6562_v28 = vsel %vm2792_vm6, %v8299_v11, %v12191_v45  ;;  %v5793_v29 = vrot.slane %v12406_v14, 5  ;;  %v12439_v34 = vld [vmem:[#allocation2 + $0xb0] sm:$0x1] }
 0x307   : > { %v6762_v8 = vsel %vm13117_vm1, %v6730_v60, %v12076_v16  ;;  %v4965_v2 = vsel %vm9239_vm5, %v4960_v1, %v4964_v21  ;;  %v12431_v36 = vsel %vm2841_vm7, %v6562_v28, %v12023_v35  ;;  %v5792_v10 = vrot.slane %v5790_v56, 4  ;;  %v12449_v11 = vpop.permute.xlu1 %6275  ;;  %vm13130_vm1 = vmmov %vm13116_vm0 }
 0x308   : > { %6537 = vrot.lane.b32.xlu0 %v8434_v52, %s9084_s25  ;;  %v6794_v45 = vsel %vm3039_vm14, %v6762_v8, %v11944_v38  ;;  %v4970_v9 = vrot.slane %v4969_v3, 4  ;;  %v5791_v16 = vsel %vm9195_vm2, %v8291_v27, %v5790_v56  ;;  %v8275_v60 = vrot.slane %v5037_v41, 9  ;;  %v5227_v38 = vld [vmem:[#allocation2 + $0xb4] sm:$0xf]  ;;  %v12454_v41 = vld [vmem:[#allocation2 + $0xb8] sm:$0xf]  ;;  %v12456_v3 = vpop.permute.xlu0 %6527 }
 0x309   : > { %8793 = vmatprep.mubr.msk.bf16.mxu1 %vm3099_vm15, %v6794_v45  ;;  %v5181_v51 = vrot.slane %v12360_v13, 5  ;;  %v5794_v1 = vsel %vm9195_vm2, %v5792_v10, %v5793_v29  ;;  %v5184_v35 = vrot.slane %v12391_v15, 5  ;;  %v8260_v44 = vrot.slane %v4430_v59, 9  ;;  %v4620_v13 = vld [vmem:[#allocation2 + $0xb4] sm:$0xf] }
 0x30a   : > { %v4580_v46 = vrot.slane %v12424_v43, 5  ;;  %v4975_v42 = vsel %vm9239_vm5, %v4970_v9, %v4974_v37  ;;  %v8435_v21 = vcombine.low %v5791_v16, %v5794_v1  ;;  %v4583_v56 = vrot.slane %v12439_v34, 5  ;;  %v12466_v1 = vld [vmem:[#allocation2 + $0xbc] sm:$0x1] }
 0x30b   : > { %v5182_v26 = vsel %vm9195_vm2, %v8275_v60, %v5181_v51  ;;  %v5183_v22 = vrot.slane %v5181_v51, 4  ;;  %v8371_v52 = vcombine.low %v4965_v2, %v4975_v42  ;;  %v8403_v28 = vcombine.low %v5227_v38, %v12400_v12 }
 0x30c   : > { %v4581_v27 = vsel %vm9195_vm2, %v8260_v44, %v4580_v46  ;;  %v4582_v15 = vrot.slane %v4580_v46, 4  ;;  %6539 = vrot.lane.b32.xlu0 %v8435_v21, %s9084_s25  ;;  %v5562_v29 = vshrl.u32 %v5227_v38, 16  ;;  %v5565_v8 = vshll.u32 %v5227_v38, 16 }
 0x30d   : > { %v5185_v37 = vsel %vm9195_vm2, %v5183_v22, %v5184_v35  ;;  %6203 = vrot.lane.b32.xlu1 %v8371_v52, %s9081_s14  ;;  %v4977_v10 = vshrl.u32 %v4620_v13, 16  ;;  %v4980_v45 = vshll.u32 %v4620_v13, 16  ;;  %v4990_v51 = vshrl.u32 %v12454_v41, 16  ;;  %v12474_v52 = vld [vmem:[#allocation2 + $0xa8] sm:$0xf] }
 0x30e   : > { %v8387_v59 = vcombine.low %v5182_v26, %v5185_v37  ;;  %v4584_v2 = vsel %vm9195_vm2, %v4582_v15, %v4583_v56  ;;  %v5564_v16 = vrot.slane %v5562_v29, 4  ;;  %v5567_v60 = vrot.slane %v5565_v8, 5  ;;  %v12480_v29 = vpop.permute.xlu0 %6273 }
 0x30f   : > { %v8340_v9 = vcombine.low %v4581_v27, %v4584_v2  ;;  %v4979_v35 = vrot.slane %v4977_v10, 4  ;;  %v4982_v44 = vrot.slane %v4980_v45, 5  ;;  %v8356_v46 = vcombine.low %v4620_v13, %v12454_v41  ;;  %v12476_v27 = vpop.permute.xlu1 %6019 }
 0x310   : > { %v5571_v38 = vshll.u32 %v12400_v12, 16  ;;  %v5568_v42 = vor.u32 %v5567_v60, %v5564_v16  ;;  %v5575_v21 = vshrl.u32 %v12400_v12, 16  ;;  %v5581_v26 = vshll.u32 %v12406_v14, 16 }
 0x311   : > { %6029 = vrot.lane.b32.xlu0 %v8340_v9, %s9079_s12  ;;  %v4986_v22 = vshll.u32 %v12454_v41, 16  ;;  %6283 = vrot.lane.b32.xlu1 %v8387_v59, %s9078_s11  ;;  %v4983_v56 = vor.u32 %v4982_v44, %v4979_v35  ;;  %v4992_v13 = vrot.slane %v4990_v51, 4  ;;  %v4996_v37 = vshll.u32 %v12466_v1, 16  ;;  %v5038_v44 = vld [vmem:[#allocation2 + $0xb4] sm:$0xe] }
 0x312   : > { %v5573_v15 = vrot.slane %v5571_v38, 5  ;;  %v5569_v8 = vrot.slane %v5568_v42, 4  ;;  %v5577_v2 = vrot.slane %v5575_v21, 4  ;;  %v5583_v12 = vrot.slane %v5581_v26, 5  ;;  %v12498_v47 = vpop.permute.xlu0 %6449 }
 0x313   : > { %v4988_v10 = vrot.slane %v4986_v22, 5  ;;  %v4984_v14 = vrot.slane %v4983_v56, 4  ;;  %v4998_v45 = vrot.slane %v4996_v37, 5  ;;  %v4369_v9 = vshrl.u32 %v12474_v52, 16 }
 0x314   : > { %v4372_v16 = vshll.u32 %v12474_v52, 16  ;;  %v5574_v59 = vsel %vm9239_vm5, %v5569_v8, %v5573_v15  ;;  %v5578_v60 = vor.u32 %v5577_v2, %v5573_v15  ;;  %v4378_v35 = vshll.u32 %v12424_v43, 16  ;;  %v12493_v8 = vpop.permute.xlu1 %6119 }
 0x315   : > { %6125 = vrot.lane.b32.xlu0 %v8356_v46, %s9077_s10  ;;  %v4993_v51 = vor.u32 %v4992_v13, %v4988_v10  ;;  %6379 = vrot.lane.b32.xlu1 %v8403_v28, %s9082_s15  ;;  %v4989_v38 = vsel %vm9239_vm5, %v4984_v14, %v4988_v10  ;;  %v4371_v42 = vrot.slane %v4369_v9, 4  ;;  %v4382_v26 = vshrl.u32 %v12424_v43, 16  ;;  %13118 = vst [vmem:[#allocation11_spill] sm:$0xff] %v12493_v8  ;;  %v12496_v28 = vld [vmem:[#allocation2 + $0xb4] sm:$0xf] }
 0x316   : > { %v4374_v21 = vrot.slane %v4372_v16, 5  ;;  %v5579_v22 = vrot.slane %v5578_v60, 4  ;;  %v4380_v46 = vrot.slane %v4378_v35, 5  ;;  %v4388_v37 = vshll.u32 %v12439_v34, 16  ;;  %13119 = vst [vmem:[#allocation14_spill] sm:$0xff] %v12496_v28 }
 0x317   : > { %v4994_v56 = vrot.slane %v4993_v51, 4  ;;  %v4384_v13 = vrot.slane %v4382_v26, 4  ;;  %v8276_v2 = vrot.slane %v5038_v44, 9  ;;  %v5188_v24 = vrot.slane %v12454_v41, 5  ;;  %v12505_v16 = vld [vmem:[#allocation2 + $0xb8] sm:$0xf] }
 0x318   : > { %v4375_v15 = vor.u32 %v4374_v21, %v4371_v42  ;;  %v5584_v10 = vsel %vm9239_vm5, %v5579_v22, %v5583_v12  ;;  %v4390_v9 = vrot.slane %v4388_v37, 5  ;;  %v5191_v34 = vrot.slane %v12466_v1, 5  ;;  %v4031_v41 = vld [vmem:[#allocation2 + $0xbc] sm:$0x1]  ;;  %v5229_v22 = vld [vmem:[#allocation2 + $0xc0] sm:$0xf] }
 0x319   : > { %v4999_v14 = vsel %vm9239_vm5, %v4994_v56, %v4998_v45  ;;  %v8419_v60 = vcombine.low %v5574_v59, %v5584_v10  ;;  %v4385_v44 = vor.u32 %v4384_v13, %v4380_v46  ;;  %v5189_v42 = vsel %vm9195_vm2, %v8276_v2, %v5188_v24  ;;  %v12519_v13 = vld [vmem:[#allocation2 + $0xc4] sm:$0xf]  ;;  %v12521_v2 = vpop.permute.xlu1 %6195  ;;  %v4431_v8 = vld [vmem:[#allocation2 + $0xb4] sm:$0xe] }
 0x31a   : > { %v8372_v51 = vcombine.low %v4989_v38, %v4999_v14  ;;  %v4376_v35 = vrot.slane %v4375_v15, 4  ;;  %v5190_v21 = vrot.slane %v5188_v24, 4  ;;  %v4393_v26 = vshrl.u32 %v12496_v28, 16 }
 0x31b   : > { %v4396_v12 = vshll.u32 %v12496_v28, 16  ;;  %6459 = vrot.lane.b32.xlu1 %v8419_v60, %s9083_s16  ;;  %v4386_v45 = vrot.slane %v4385_v44, 4  ;;  %v4402_v59 = vshll.u32 %v12505_v16, 16  ;;  %v4406_v38 = vshrl.u32 %v12505_v16, 16 }
 0x31c   : > { %6205 = vrot.lane.b32.xlu0 %v8372_v51, %s9081_s14  ;;  %v4381_v1 = vsel %vm9239_vm5, %v4376_v35, %v4380_v46  ;;  %v5192_v24 = vsel %vm9195_vm2, %v5190_v21, %v5191_v34  ;;  %v4395_v56 = vrot.slane %v4393_v26, 4  ;;  %v4412_v15 = vshll.u32 %v4031_v41, 16  ;;  %v12525_v51 = vpop.permute.xlu0 %6117 }
 0x31d   : > { %v4398_v37 = vrot.slane %v4396_v12, 5  ;;  %v4391_v10 = vsel %vm9239_vm5, %v4386_v45, %v4390_v9  ;;  %v8388_v46 = vcombine.low %v5189_v42, %v5192_v24  ;;  %v4404_v14 = vrot.slane %v4402_v59, 5  ;;  %v13120_v9 = vld [vmem:[#allocation17_spill] sm:$0xff]  ;;  %v12539_v28 = vpop.permute.xlu1 %6371 }
 0x31e   : > { %v4408_v60 = vrot.slane %v4406_v38, 4  ;;  %v8324_v35 = vcombine.low %v4381_v1, %v4391_v10  ;;  %v5586_v58 = vshrl.u32 %v5229_v22, 16  ;;  %v6606_v34 = vsel %vm2841_vm7, %v12364_v4, %v11967_v57  ;;  %13121 = vst [vmem:[#allocation7_spill] sm:$0xff] %v12539_v28 }
 0x31f   : > { %v4399_v44 = vor.u32 %v4398_v37, %v4395_v56  ;;  %v5589_v26 = vshll.u32 %v5229_v22, 16  ;;  %v5599_v12 = vshrl.u32 %v12519_v13, 16  ;;  %v6636_v42 = vsel %vm2874_vm8, %v12431_v36, %v13120_v9 }
 0x320   : > { %6285 = vrot.lane.b32.xlu0 %v8388_v46, %s9078_s11  ;;  %v4409_v21 = vor.u32 %v4408_v60, %v4404_v14  ;;  %5949 = vrot.lane.b32.xlu1 %v8324_v35, %s9080_s13  ;;  %v5588_v45 = vrot.slane %v5586_v58, 4  ;;  %v4587_v59 = vrot.slane %v12505_v16, 5  ;;  %v4414_v24 = vrot.slane %v4412_v15, 5  ;;  %v5247_v46 = vld [vmem:[#allocation2 + $0xc8] sm:$0x1] }
 0x321   : > { %v4400_v1 = vrot.slane %v4399_v44, 4  ;;  %v5591_v57 = vrot.slane %v5589_v26, 5  ;;  %v8404_v4 = vcombine.low %v5229_v22, %v12519_v13  ;;  %v8261_v56 = vrot.slane %v4431_v8, 9  ;;  %v4622_v44 = vld [vmem:[#allocation2 + $0xc0] sm:$0xf]  ;;  %v12546_v22 = vpop.permute.xlu0 %6193 }
 0x322   : > { %v4410_v38 = vrot.slane %v4409_v21, 4  ;;  %v4589_v37 = vrot.slane %v4587_v59, 4  ;;  %v4590_v10 = vrot.slane %v4031_v41, 5  ;;  %v5595_v60 = vshll.u32 %v12519_v13, 16  ;;  %v9002_v21 = vld [vmem:[#allocation2 + $0x64] sm:$0xf] }
 0x323   : > { %v4405_v36 = vsel %vm9239_vm5, %v4400_v1, %v4404_v14  ;;  %v5592_v15 = vor.u32 %v5591_v57, %v5588_v45  ;;  %v5601_v35 = vrot.slane %v5599_v12, 4  ;;  %v9003_v26 = vld [vmem:[#allocation2 + $0x60] sm:$0xf]  ;;  %v4588_v14 = vsel %vm9195_vm2, %v8261_v56, %v4587_v59  ;;  %v12554_v12 = vld [vmem:[#allocation2 + $0xc4] sm:$0xf] }
 0x324   : > { %v4415_v58 = vsel %vm9239_vm5, %v4410_v38, %v4414_v24  ;;  %6381 = vrot.lane.b32.xlu0 %v8404_v4, %s9082_s15  ;;  %v4591_v41 = vsel %vm9195_vm2, %v4589_v37, %v4590_v10  ;;  %v8302_v9 = vcombine.low %v9003_v26, %v9002_v21  ;;  %v5597_v28 = vrot.slane %v5595_v60, 5 }
 0x325   : > { %v8325_v8 = vcombine.low %v4405_v36, %v4415_v58  ;;  %v5593_v1 = vrot.slane %v5592_v15, 4  ;;  %v5605_v38 = vshll.u32 %v5247_v46, 16  ;;  %v6638_v45 = vsel %vm2874_vm8, %v6606_v34, %v12103_v30 }
 0x326   : > { %v5602_v24 = vor.u32 %v5601_v35, %v5597_v28  ;;  %v6670_v57 = vsel %vm2907_vm9, %v6638_v45, %v12348_v48  ;;  %v5001_v4 = vshrl.u32 %v4622_v44, 16  ;;  %v5004_v37 = vshll.u32 %v4622_v44, 16 }
 0x327   : > { %5951 = vrot.lane.b32.xlu1 %v8325_v8, %s9080_s13  ;;  %v8341_v10 = vcombine.low %v4588_v14, %v4591_v41  ;;  %v6571_v60 = vsel %vm2792_vm6, %v8302_v9, %v12345_v49  ;;  %v5607_v59 = vrot.slane %v5605_v38, 5  ;;  %v6702_v56 = vsel %vm2940_vm10, %v6670_v57, %v12257_v63  ;;  %v12564_v15 = vpop.permute.xlu1 %5941  ;;  %v13123_v8 = vld [vmem:[#allocation22_spill] sm:$0xff]  ;;  %v5647_v41 = vld [vmem:[#allocation2 + $0xc0] sm:$0xe]  ;;  %v12573_v63 = vpop.permute.xlu0 %6531  ;;  %v13124_v14 = vld [vmem:[#allocation21_spill] sm:$0xff] }
 0x328   : > { %v5603_v36 = vrot.slane %v5602_v24, 4  ;;  %v5003_v30 = vrot.slane %v5001_v4, 4  ;;  %v5006_v34 = vrot.slane %v5004_v37, 5  ;;  %v5014_v58 = vshrl.u32 %v12554_v12, 16 }
 0x329   : > { %v5598_v48 = vsel %vm9239_vm5, %v5593_v1, %v5597_v28  ;;  %v6734_v35 = vsel %vm13122_vm4, %v6702_v56, %v12050_v31  ;;  %v6668_v49 = vsel %vm2907_vm9, %v6636_v42, %v13123_v8  ;;  %v5797_v21 = vrot.slane %v12519_v13, 5  ;;  %v4639_v1 = vld [vmem:[#allocation2 + $0xc8] sm:$0x1]  ;;  %v9004_v56 = vld [vmem:[#allocation2 + $0x58] sm:$0xf] }
 0x32a   : > { %v5608_v26 = vsel %vm9239_vm5, %v5603_v36, %v5607_v59  ;;  %v8357_v9 = vcombine.low %v4622_v44, %v12554_v12  ;;  %v6700_v28 = vsel %vm2940_vm10, %v6668_v49, %v13124_v14  ;;  %v5007_v31 = vor.u32 %v5006_v34, %v5003_v30 }
 0x32b   : > { %6031 = vrot.lane.b32.xlu1 %v8341_v10, %s9079_s12  ;;  %v8420_v38 = vcombine.low %v5598_v48, %v5608_v26  ;;  %v6732_v42 = vsel %vm13125_vm11, %v6700_v28, %v12097_v0  ;;  %v5799_v45 = vrot.slane %v5797_v21, 4  ;;  %v5800_v13 = vrot.slane %v5247_v46, 5  ;;  %v9005_v46 = vld [vmem:[#allocation2 + $0x54] sm:$0xf]  ;;  %v3392_v48 = vld [vmem:[#allocation2 + $0xcc] sm:$0x1] }
 0x32c   : > { %v6764_v24 = vsel %vm13126_vm12, %v6732_v42, %v12377_v54  ;;  %v8292_v57 = vrot.slane %v5647_v41, 9  ;;  %v5010_v4 = vshll.u32 %v12554_v12, 16  ;;  %v5016_v37 = vrot.slane %v5014_v58, 4  ;;  %v12586_v10 = vpop.permute.xlu1 %6447  ;;  %v12604_v26 = vld [vmem:[#allocation2 + $0xd0] sm:$0xf]  ;;  %s215_s12 = sand.u32 1, %s9067_s19  }
 0x32d   : > { %6461 = vrot.lane.b32.xlu0 %v8420_v38, %s9083_s16  ;;  %v5801_v44 = vsel %vm9195_vm2, %v5799_v45, %v5800_v13  ;;  %v5020_v59 = vshll.u32 %v4639_v1, 16  ;;  %v6796_v0 = vsel %vm3039_vm14, %v6764_v24, %v12221_v62  ;;  %v8301_v36 = vcombine.low %v9005_v46, %v9004_v56 }
 0x32e   : > { %v5798_v54 = vsel %vm9195_vm2, %v8292_v57, %v5797_v21  ;;  %v5008_v30 = vrot.slane %v5007_v31, 4  ;;  %v5012_v34 = vrot.slane %v5010_v4, 5  ;;  %8794 = vmatmul.mubr.msk.bf16.gmra.mrb[8].mxu1 %vm3099_vm15, %v6796_v0  ;;  %v6766_v58 = vsel %vm13116_vm0, %v6734_v35, %v12301_v20  ;;  %v3448_v21 = vld [vmem:[#allocation2 + $0xd4] sm:$0x1]  ;;  %v5039_v31 = vld [vmem:[#allocation2 + $0xc0] sm:$0xe] }
 0x32f   : > { %6127 = vrot.lane.b32.xlu1 %v8357_v9, %s9077_s10  ;;  %v8436_v8 = vcombine.low %v5798_v54, %v5801_v44  ;;  %v6568_v62 = vsel %vm2792_vm6, %v8301_v36, %v12413_v6  ;;  %v6798_v49 = vsel %vm3039_vm14, %v6766_v58, %v12167_v33  ;;  %v5195_v41 = vrot.slane %v12554_v12, 5  ;;  %v12606_v9 = vpop.permute.xlu0 %6197  ;;  %v9006_v36 = vld [vmem:[#allocation2 + $0x7c] sm:$0xf]  ;;  %v9007_v54 = vld [vmem:[#allocation2 + $0x78] sm:$0xf] }
 0x330   : > { %v5017_v14 = vor.u32 %v5016_v37, %v5012_v34  ;;  %v6608_v28 = vsel %vm2841_vm7, %v6568_v62, %v12248_v53  ;;  %8797 = vmatprep.mubr.msk.bf16.mxu1 %vm3099_vm15, %v6798_v49  ;;  %v6610_v20 = vsel %vm2841_vm7, %v6571_v60, %v12196_v5  ;;  %v5022_v6 = vrot.slane %v5020_v59, 5  ;;  %v13127_v60 = vld [vmem:[#allocation12_spill] sm:$0xff] }
 0x331   : > { %6541 = vrot.lane.b32.xlu0 %v8436_v8, %s9084_s25  ;;  %v5197_v33 = vrot.slane %v5195_v41, 4  ;;  %v3393_v12 = vsel %vm10696_vm13, 0, %v3392_v48  ;;  %v5623_v38 = vshrl.u32 %v12604_v26, 16  ;;  %v3449_v53 = vsel %vm10716_vm3, 0, %v3448_v21  ;;  %v5940_v45 = vpop.permute.xlu1 %5939  ;;  %vm13128_vm13 = vmmov %vm13122_vm4  ;;  %v9009_v48 = vld [vmem:[#allocation2 + $0x6c] sm:$0xf] }
 0x332   : > { %v5018_v35 = vrot.slane %v5017_v14, 4  ;;  %3394 = vst [vmem:[#allocation2 + $0xcc] sm:$0x1] %v3393_v12  ;;  %v5619_v42 = vshll.u32 %v12604_v26, 16  ;;  %v5013_v5 = vsel %vm9239_vm5, %v5008_v30, %v5012_v34  ;;  %v6640_v13 = vsel %vm2874_vm8, %v6608_v28, %v13127_v60  ;;  %3450 = vst [vmem:[#allocation2 + $0xd4] sm:$0x1] %v3449_v53 }
 0x333   : > { %v5198_v24 = vrot.slane %v4639_v1, 5  ;;  %v12624_v55 = vpop.permute.xlu0 %6277  ;;  %v5625_v50 = vrot.slane %v5623_v38, 4  ;;  %v6642_v37 = vsel %vm2874_vm8, %v6610_v20, %v12330_v39  ;;  %v8277_v59 = vrot.slane %v5039_v31, 9  ;;  %vm13129_vm3 = vmmov %vm13122_vm4  ;;  %v5648_v28 = vld [vmem:[#allocation2 + $0xcc] sm:$0xe] }
 0x334   : > { %v5023_v57 = vsel %vm9239_vm5, %v5018_v35, %v5022_v6  ;;  %v12628_v4 = vrot.slane %v5619_v42, 5  ;;  %v6674_v1 = vsel %vm2907_vm9, %v6642_v37, %v12546_v22  ;;  %v8304_v30 = vcombine.low %v9007_v54, %v9006_v36  ;;  %v9008_v22 = vld [vmem:[#allocation2 + $0x70] sm:$0xf]  ;;  %vm13131_vm4 = vmmov %vm13116_vm0  ;;  %v13133_v36 = vld [vmem:[#allocation7_spill] sm:$0xff] }
 0x335   : > { %v8373_v44 = vcombine.low %v5013_v5, %v5023_v57  ;;  %v5199_v0 = vsel %vm9195_vm2, %v5197_v33, %v5198_v24  ;;  %v6706_v46 = vsel %vm2940_vm10, %v6674_v1, %v12480_v29  ;;  %v6672_v34 = vsel %vm2907_vm9, %v6640_v13, %v12295_v18  ;;  %v12646_v62 = vpop.permute.xlu1 %6023  ;;  %vm13134_vm11 = vmmov %vm13129_vm3 }
 0x336   : > { %v5626_v56 = vor.u32 %v5625_v50, %v12628_v4  ;;  %v6738_v39 = vsel %vm13128_vm13, %v6706_v46, %v12281_v61  ;;  %v6704_v58 = vsel %vm2940_vm10, %v6672_v34, %v12217_v40  ;;  %v8303_v8 = vcombine.low %v9009_v48, %v9008_v22  ;;  %vm13135_vm12 = vmmov %vm13129_vm3  ;;  %v9010_v48 = vld [vmem:[#allocation2 + $0x88] sm:$0xf] }
 0x337   : > { %6207 = vrot.lane.b32.xlu1 %v8373_v44, %s9081_s14  ;;  %v5196_v29 = vsel %vm9195_vm2, %v8277_v59, %v5195_v41  ;;  %v6577_v49 = vsel %vm2792_vm6, %v8304_v30, %v12564_v15  ;;  %v6736_v18 = vsel %vm13129_vm3, %v6704_v58, %v12326_v23  ;;  %v6374_v21 = vpop.permute.xlu0 %6373  ;;  %v6770_v6 = vsel %vm13131_vm4, %v6738_v39, %v12498_v47  ;;  %v13132_v59 = vld [vmem:[#allocation14_spill] sm:$0xff]  ;;  %vm13138_vm13 = vmmov %vm13129_vm3  ;;  %s7872_s14 = sshll.u32 %s215_s12, 7 }
 0x338   : > { %v8389_v14 = vcombine.low %v5196_v29, %v5199_v0  ;;  %v6768_v40 = vsel %vm13130_vm1, %v6736_v18, %v12586_v10  ;;  %v6574_v20 = vsel %vm2792_vm6, %v8303_v8, %v5940_v45  ;;  %v5627_v35 = vrot.slane %v5626_v56, 4  ;;  %v9011_v8 = vld [vmem:[#allocation2 + $0x84] sm:$0xf]  ;;  %vm13139_vm3 = vmmov %vm13116_vm0 }
 0x339   : > { %v5231_v61 = vld [vmem:[#allocation2 + $0xcc] sm:$0xf]  ;;  %v5248_v12 = vld [vmem:[#allocation2 + $0xd4] sm:$0x1]  ;;  %v5804_v15 = vrot.slane %v12604_v26, 5  ;;  %v6614_v38 = vsel %vm2841_vm7, %v6577_v49, %v12417_v25  ;;  %v6800_v10 = vsel %vm3039_vm14, %v6768_v40, %v12456_v3  ;;  %v6612_v47 = vsel %vm2841_vm7, %v6574_v20, %v12476_v27  ;;  %vm13141_vm1 = vmmov %vm13134_vm11 }
 0x33a   : > { %v5610_v33 = vshrl.u32 %v5231_v61, 16  ;;  %v5613_v41 = vshll.u32 %v5231_v61, 16  ;;  %v8405_v23 = vcombine.low %v5231_v61, %v12604_v26  ;;  %v5629_v31 = vshll.u32 %v5248_v12, 16  ;;  %8798 = vmatmul.mubr.msk.bf16.gmra.mrb[12].mxu1 %vm3099_vm15, %v6800_v10  ;;  %v13137_v61 = vld [vmem:[#allocation11_spill] sm:$0xff]  ;;  %vm13142_vm4 = vmmov %vm13116_vm0 }
 0x33b   : > { %6287 = vrot.lane.b32.xlu1 %v8389_v14, %s9078_s11  ;;  %v6802_v45 = vsel %vm3039_vm14, %v6770_v6, %v12382_v7  ;;  %v8293_v60 = vrot.slane %v5648_v28, 9  ;;  %v6644_v26 = vsel %vm2874_vm8, %v6612_v47, %v12277_v32  ;;  %v5806_v3 = vrot.slane %v5804_v15, 4 }
 0x33c   : > { %v5612_v53 = vrot.slane %v5610_v33, 4  ;;  %v5615_v42 = vrot.slane %v5613_v41, 5  ;;  %v5631_v5 = vrot.slane %v5629_v31, 5  ;;  %8801 = vmatprep.mubr.msk.bf16.mxu1 %vm3099_vm15, %v6802_v45  ;;  %v6200_v25 = vpop.permute.xlu1 %6199  ;;  %v5807_v24 = vrot.slane %v5248_v12, 5  ;;  %v13140_v31 = vld [vmem:[#allocation9_spill] sm:$0xff] }
 0x33d   : > { %v6454_v57 = vpop.permute.xlu0 %6453  ;;  %v6676_v50 = vsel %vm2907_vm9, %v6644_v26, %v12521_v2  ;;  %v6646_v27 = vsel %vm2874_vm8, %v6614_v38, %v12525_v51  ;;  %v8308_v44 = vcombine.low %v12474_v52, %v12424_v43  ;;  %v8309_v0 = vcombine.low %v13132_v59, %v12505_v16  ;;  %v8444_v59 = vld [vmem:[%s9171_s9 + $0x24] sm:$0xf] }
 0x33e   : > { %v5616_v13 = vor.u32 %v5615_v42, %v5612_v53  ;;  %v5632_v7 = vsel %vm9239_vm5, %v5627_v35, %v5631_v5  ;;  %v6708_v32 = vsel %vm2940_vm10, %v6676_v50, %v12449_v11  ;;  %v5805_v1 = vsel %vm9195_vm2, %v8293_v60, %v5804_v15 }
 0x33f   : > { %6383 = vrot.lane.b32.xlu1 %v8405_v23, %s9082_s15  ;;  %v5808_v51 = vsel %vm9195_vm2, %v5806_v3, %v5807_v24  ;;  %v6678_v56 = vsel %vm2907_vm9, %v6646_v27, %v12606_v9  ;;  %v6740_v54 = vsel %vm13134_vm11, %v6708_v32, %v13133_v36  ;;  %vm13136_vm2 = vmmov %vm13116_vm0  ;;  %v8305_v29 = vcombine.low %v9011_v8, %v9010_v48  ;;  %v8442_v48 = vld [vmem:[%s9171_s9 + $0x1c] sm:$0xf]  ;;  %s12786_s15 = scalar_lea.vmem [#allocation3], %s7872_s14 }
 0x340   : > { %v5617_v37 = vrot.slane %v5616_v13, 4  ;;  %v6710_v46 = vsel %vm2940_vm10, %v6678_v56, %v12624_v55  ;;  %v8437_v17 = vcombine.low %v5805_v1, %v5808_v51  ;;  %v13143_v51 = vld [vmem:[#allocation6_spill] sm:$0xff]  ;;  %vm13145_vm11 = vmmov %vm13141_vm1 }
 0x341   : > { %v13144_v56 = vld [vmem:[#allocation10_spill] sm:$0xff] }
 0x342   : > { %v5622_v2 = vsel %vm9239_vm5, %v5617_v37, %v12628_v4  ;;  %v6534_v34 = vpop.permute.xlu0 %6533  ;;  %v6742_v4 = vsel %vm13135_vm12, %v6710_v46, %v6374_v21  ;;  %vm13146_vm12 = vmmov %vm13116_vm0 }
 0x343   : > { %v8421_v11 = vcombine.low %v5622_v2, %v5632_v7  ;;  %v6452_v30 = vpop.permute.xlu1 %6451  ;;  %v6774_v58 = vsel %vm13136_vm2, %v6742_v4, %v6454_v57 }
 0x344   : > { %v6772_v39 = vsel %vm13116_vm0, %v6740_v54, %v6452_v30  ;;  %v6806_v22 = vsel %vm3039_vm14, %v6774_v58, %v6534_v34  ;;  %v8438_v58 = vld [vmem:[%s9171_s9 + $0xc] sm:$0xf]  ;;  %vm13147_vm0 = vmmov %vm13141_vm1 }
 0x345   : > { %6463 = vrot.lane.b32.xlu1 %v8421_v11, %s9083_s16  ;;  %v6804_v9 = vsel %vm3039_vm14, %v6772_v39, %v12573_v63  ;;  %v8307_v11 = vcombine.low %v13144_v56, %v13143_v51  ;;  %v8441_v39 = vld [vmem:[%s9171_s9 + $0x18] sm:$0xf]  ;;  %s7806_s16 = sshll.u32 %s12786_s15, 4  ;;  %s12980_s16 = int_to_ptr.vmem [resolvable:$true] %s7806_s16 }
 0x346   : > { %8802 = vmatmul.mubr.msk.bf16.gmra.mrb[16].mxu1 %vm3099_vm15, %v6804_v9  ;;  %s9013_s23 = scalar_lea.vmem %s12980_s16, 2048  ;;  %p9020_p0 = scmp.lt.s32.totalorder %s12980_s16, %s9018_s30 }
 0x347   : > { %8805 = vmatprep.mubr.msk.bf16.mxu1 %vm3099_vm15, %v6806_v22  ;;  %p9014_p11 = scmp.ne.s32.totalorder %s12980_s16, %s9013_s23  ;;  %p9021_p1 = scmp.lt.s32.totalorder %s9019_s6, %s9013_s23 }
 0x349   : > { %6543 = vrot.lane.b32.xlu1 %v8437_v17, %s9084_s25  ;;  %p9015_p12 = pnand %p9014_p11, %p9156_p5  ;;  %p9022_p2 = por %p9021_p1, %p9020_p0 }
 0x34b   : > { %p9016_p13 = pneg %p9015_p12 }
 0x34d   : > { %v5944_v55 = vpop.permute.xlu1 %5943  ;;  %p9023_p3 = pnand %p9022_p2, %p9016_p13 }
 0x34e   : > { %v6580_v18 = vsel %vm2792_vm6, %v8305_v29, %v5944_v55  ;;  %v6895_v29 = vshrl.u32 %v8441_v39, 16 }
 0x34f   : > { %v6616_v14 = vsel %vm2841_vm7, %v6580_v18, %v12646_v62  ;;  %v9012_v62 = vld [vmem:[#allocation2 + $0x94] sm:$0xf]  ;;  %v8439_v18 = vld [vmem:[%s9171_s9 + $0x10] sm:$0xf] }
 0x350   : > { %v6648_v28 = vsel %vm2874_vm8, %v6616_v14, %v13137_v61  ;;  %v8306_v38 = vcombine.low %v13140_v31, %v9012_v62  ;;  %v6871_v14 = vshrl.u32 %v8438_v58, 16  ;;  %v6904_v61 = vshll.u32 %v8442_v48, 16 }
 0x351   : > { %v6680_v6 = vsel %vm2907_vm9, %v6648_v28, %v6200_v25  ;;  %v6908_v28 = vshrl.u32 %v8442_v48, 16 }
 0x352   : > { %v6906_v62 = vrot.slane %v6904_v61, 5 }
 0x353   : > { %v6910_v31 = vrot.slane %v6908_v28, 4 }
 0x354   : > { %v6536_v49 = vpop.permute.xlu0 %6535 }
 0x358   : > { %v6280_v21 = vpop.permute.xlu1 %6279 }
 0x359   : > { %v6712_v33 = vsel %vm2940_vm10, %v6680_v6, %v6280_v21 }
 0x35a   : > { %v6026_v63 = vpop.permute.xlu0 %6025 }
 0x35c   : > { %v6376_v40 = vpop.permute.xlu1 %6375 }
 0x35d   : > { %v6744_v41 = vsel %vm13138_vm13, %v6712_v33, %v6376_v40  ;;  %v6880_v40 = vshll.u32 %v8439_v18, 16  ;;  %v6897_v33 = vrot.slane %v6895_v29, 4  ;;  %vm13148_vm13 = vmmov %vm13147_vm0 }
 0x35e   : > { %v6122_v20 = vpop.permute.xlu0 %6121 }
 0x364   : > { %v6456_v12 = vpop.permute.xlu1 %6455  ;;  %v6202_v15 = vpop.permute.xlu0 %6201 }
 0x365   : > { %v6776_v35 = vsel %vm13139_vm3, %v6744_v41, %v6456_v12  ;;  %vm13149_vm3 = vmmov %vm13136_vm2 }
 0x366   : > { %v6808_v23 = vsel %vm3039_vm14, %v6776_v35, %v6536_v49  ;;  %v6898_v49 = vshll.u32 %v8441_v39, 16 }
 0x367   : > { %8806 = vmatmul.mubr.msk.bf16.gmra.mrb[20].mxu1 %vm3099_vm15, %v6808_v23 }
 0x368   : > { %v6282_v53 = vpop.permute.xlu0 %6281  ;;  %v6900_v41 = vrot.slane %v6898_v49, 5 }
 0x369   : > { %v5946_v10 = vpop.permute.xlu1 %5945 }
 0x36a   : > { %v6583_v42 = vsel %vm2792_vm6, %v8306_v38, %v5946_v10  ;;  %v6882_v38 = vrot.slane %v6880_v40, 5  ;;  %v8443_v10 = vld [vmem:[%s9171_s9 + $0x20] sm:$0x1] }
 0x36b   : > { %v6618_v47 = vsel %vm2841_vm7, %v6583_v42, %v6026_v63  ;;  %v6874_v63 = vshll.u32 %v8438_v58, 16 }
 0x36c   : > { %v6650_v45 = vsel %vm2874_vm8, %v6618_v47, %v6122_v20  ;;  %v6378_v60 = vpop.permute.xlu0 %6377  ;;  %v6884_v20 = vshrl.u32 %v8439_v18, 16  ;;  %v6901_v47 = vor.u32 %v6900_v41, %v6897_v33 }
 0x36d   : > { %v6682_v26 = vsel %vm2907_vm9, %v6650_v45, %v6202_v15  ;;  %v6873_v15 = vrot.slane %v6871_v14, 4  ;;  %v6876_v23 = vrot.slane %v6874_v63, 5  ;;  %v8440_v45 = vld [vmem:[%s9171_s9 + $0x14] sm:$0x1] }
 0x36e   : > { %v6714_v13 = vsel %vm2940_vm10, %v6682_v26, %v6282_v53  ;;  %v6886_v53 = vrot.slane %v6884_v20, 4  ;;  %v6911_v26 = vor.u32 %v6910_v31, %v6906_v62 }
 0x36f   : > { %v5948_v5 = vpop.permute.xlu1 %5947  ;;  %v6746_v24 = vsel %vm13141_vm1, %v6714_v13, %v6378_v60  ;;  %v6890_v13 = vshll.u32 %v8440_v45, 16 }
 0x370   : > { %v6586_v54 = vsel %vm2792_vm6, %v8307_v11, %v5948_v5  ;;  %v6877_v5 = vor.u32 %v6876_v23, %v6873_v15 }
 0x373   : > { %v6028_v25 = vpop.permute.xlu1 %6027 }
 0x374   : > { %v6620_v30 = vsel %vm2841_vm7, %v6586_v54, %v6028_v25  ;;  %v6914_v25 = vshll.u32 %v8443_v10, 16 }
 0x375   : > { %v6458_v3 = vpop.permute.xlu0 %6457 }
 0x376   : > { %v6778_v57 = vsel %vm13142_vm4, %v6746_v24, %v6458_v3  ;;  %v6902_v3 = vrot.slane %v6901_v47, 4  ;;  %v6878_v24 = vrot.slane %v6877_v5, 4 }
 0x377   : > { %v6124_v50 = vpop.permute.xlu1 %6123 }
 0x378   : > { %v6652_v34 = vsel %vm2874_vm8, %v6620_v30, %v6124_v50  ;;  %v6912_v50 = vrot.slane %v6911_v26, 4  ;;  %v6883_v56 = vsel %vm9239_vm5, %v6878_v24, %v6882_v38  ;;  %v8445_v24 = vld [vmem:[%s9171_s9 + $0x28] sm:$0xf] }
 0x379   : > { %v7286_v30 = vunpack.c.l.bf16 %v6883_v56 }
 0x37a   : > { %v6538_v7 = vpop.permute.xlu0 %6537 }
 0x37b   : > { %v6810_v27 = vsel %vm3039_vm14, %v6778_v57, %v6538_v7  ;;  %v6916_v7 = vrot.slane %v6914_v25, 5 }
 0x37c   : > { %8809 = vmatprep.mubr.msk.bf16.mxu1 %vm3099_vm15, %v6810_v27 }
 0x37d   : > { %v6917_v11 = vsel %vm9239_vm5, %v6912_v50, %v6916_v7  ;;  %v6922_v50 = vshll.u32 %v8444_v59, 16 }
 0x37e   : > { %v6540_v37 = vpop.permute.xlu0 %6539 }
 0x37f   : > { %v6204_v32 = vpop.permute.xlu1 %6203  ;;  %v6924_v56 = vrot.slane %v6922_v50, 5 }
 0x380   : > { %v6684_v4 = vsel %vm2907_vm9, %v6652_v34, %v6204_v32  ;;  %v6892_v32 = vrot.slane %v6890_v13, 5  ;;  %v8447_v13 = vld [vmem:[%s9171_s9 + $0x30] sm:$0xf] }
 0x383   : > { %v6030_v2 = vpop.permute.xlu0 %6029  ;;  %v6284_v1 = vpop.permute.xlu1 %6283 }
 0x384   : > { %v6716_v17 = vsel %vm2940_vm10, %v6684_v4, %v6284_v1 }
 0x387   : > { %v6380_v46 = vpop.permute.xlu1 %6379  ;;  %v6126_v36 = vpop.permute.xlu0 %6125 }
 0x388   : > { %v6748_v9 = vsel %vm13145_vm11, %v6716_v17, %v6380_v46  ;;  %v7289_v17 = vunpack.c.l.bf16 %v6917_v11 }
 0x38a   : > { %v7321_v29 = vsel %vm2792_vm6, %v7289_v17, 0.0 }
 0x38d   : > { %v6460_v22 = vpop.permute.xlu1 %6459 }
 0x38e   : > { %v6206_v55 = vpop.permute.xlu0 %6205  ;;  %v6780_v8 = vsel %vm13146_vm12, %v6748_v9, %v6460_v22 }
 0x38f   : > { %v6812_v21 = vsel %vm3039_vm14, %v6780_v8, %v6540_v37  ;;  %v12775_v8 = vld [vmem:[%s13032_s4] ss:$0 sm:$0xff] }
 0x390   : > { %8810 = vmatmul.mubr.msk.bf16.gmra.mrb[24].mxu1 %vm3099_vm15, %v6812_v21 }
 0x392   : > { %v5950_v6 = vpop.permute.xlu1 %5949  ;;  %v6286_v35 = vpop.permute.xlu0 %6285 }
 0x393   : > { %v6589_v12 = vsel %vm2792_vm6, %v8308_v44, %v5950_v6  ;;  %v6887_v44 = vor.u32 %v6886_v53, %v6882_v38 }
 0x394   : > { %v6622_v42 = vsel %vm2841_vm7, %v6589_v12, %v6030_v2  ;;  %v6907_v2 = vsel %vm9239_vm5, %v6902_v3, %v6906_v62  ;;  %v6946_v3 = vshll.u32 %v8447_v13, 16 }
 0x395   : > { %v6654_v43 = vsel %vm2874_vm8, %v6622_v42, %v6126_v36  ;;  %v6888_v37 = vrot.slane %v6887_v44, 4  ;;  %v7288_v46 = vunpack.c.l.bf16 %v6907_v2 }
 0x396   : > { %v6382_v52 = vpop.permute.xlu0 %6381  ;;  %v6686_v57 = vsel %vm2907_vm9, %v6654_v43, %v6206_v55  ;;  %v7318_v55 = vsel %vm2792_vm6, %v7286_v30, 0.0 }
 0x397   : > { %v6718_v1 = vsel %vm2940_vm10, %v6686_v57, %v6286_v35  ;;  %v6893_v36 = vsel %vm9239_vm5, %v6888_v37, %v6892_v32  ;;  %v7320_v22 = vsel %vm2792_vm6, %v7288_v46, 0.0  ;;  %v6919_v57 = vshrl.u32 %v8444_v59, 16 }
 0x398   : > { %v6750_v54 = vsel %vm13147_vm0, %v6718_v1, %v6382_v52  ;;  %v7287_v9 = vunpack.c.l.bf16 %v6893_v36  ;;  %v6928_v37 = vshll.u32 %v8445_v24, 16  ;;  %v6932_v32 = vshrl.u32 %v8445_v24, 16  ;;  %v8451_v24 = vld [vmem:[%s9171_s9 + $0x40] sm:$0xf] }
 0x399   : > { %v12753_v60 = vpop.permute.xlu1 %5951  ;;  %v6948_v1 = vrot.slane %v6946_v3, 5  ;;  %v8450_v3 = vld [vmem:[%s9171_s9 + $0x3c] sm:$0xf] }
 0x39a   : > { %v7319_v21 = vsel %vm2792_vm6, %v7287_v9, 0.0  ;;  %v6592_v42 = vsel %vm2792_vm6, %v8309_v0, %v12753_v60  ;;  %v8448_v0 = vld [vmem:[%s9171_s9 + $0x34] sm:$0xf]  ;;  %v6943_v60 = vshrl.u32 %v8447_v13, 16  ;;  %v6930_v36 = vrot.slane %v6928_v37, 5 }
 0x39b   : > { %v6952_v7 = vshll.u32 %v8448_v0, 16  ;;  %v6934_v30 = vrot.slane %v6932_v32, 4  ;;  %v6967_v37 = vshrl.u32 %v8450_v3, 16  ;;  %v6970_v32 = vshll.u32 %v8450_v3, 16 }
 0x39c   : > { %v6945_v2 = vrot.slane %v6943_v60, 4  ;;  %v8454_v60 = vld [vmem:[%s9171_s9 + $0x4c] sm:$0xf] }
 0x39d   : > { %v6032_v27 = vpop.permute.xlu1 %6031  ;;  %v6954_v11 = vrot.slane %v6952_v7, 5  ;;  %v6935_v9 = vor.u32 %v6934_v30, %v6930_v36  ;;  %v7000_v7 = vshll.u32 %v8454_v60, 16 }
 0x39e   : > { %v6624_v47 = vsel %vm2841_vm7, %v6592_v42, %v6032_v27  ;;  %v6956_v27 = vshrl.u32 %v8448_v0, 16  ;;  %v8453_v0 = vld [vmem:[%s9171_s9 + $0x48] sm:$0xf] }
 0x39f   : > { %v6462_v51 = vpop.permute.xlu0 %6461  ;;  %v6994_v50 = vshll.u32 %v8453_v0, 16 }
 0x3a0   : > { %v6782_v34 = vsel %vm13136_vm2, %v6750_v54, %v6462_v51  ;;  %v6921_v51 = vrot.slane %v6919_v57, 4  ;;  %v6958_v46 = vrot.slane %v6956_v27, 4  ;;  %v8449_v54 = vld [vmem:[%s9171_s9 + $0x38] sm:$0x1]  ;;  %v6991_v57 = vshrl.u32 %v8453_v0, 16 }
 0x3a1   : > { %v6128_v4 = vpop.permute.xlu1 %6127  ;;  %v7004_v27 = vshrl.u32 %v8454_v60, 16  ;;  %v8458_v60 = vld [vmem:[%s9171_s9 + $0x5c] sm:$0x1] }
 0x3a2   : > { %v6656_v45 = vsel %vm2874_vm8, %v6624_v47, %v6128_v4  ;;  %v8446_v4 = vld [vmem:[%s9171_s9 + $0x2c] sm:$0x1]  ;;  %v6959_v17 = vor.u32 %v6958_v46, %v6954_v11  ;;  %v6969_v46 = vrot.slane %v6967_v37, 4 }
 0x3a3   : > { %v6542_v39 = vpop.permute.xlu0 %6541 }
 0x3a4   : > { %v6814_v58 = vsel %vm3039_vm14, %v6782_v34, %v6542_v39  ;;  %v6949_v34 = vor.u32 %v6948_v1, %v6945_v2  ;;  %v6925_v39 = vor.u32 %v6924_v56, %v6921_v51  ;;  %v6976_v2 = vshll.u32 %v8451_v24, 16 }
 0x3a5   : > { %8813 = vmatprep.mubr.msk.bf16.mxu1 %vm3099_vm15, %v6814_v58  ;;  %v6962_v58 = vshll.u32 %v8449_v54, 16  ;;  %v6980_v1 = vshrl.u32 %v8451_v24, 16  ;;  %v6993_v51 = vrot.slane %v6991_v57, 4  ;;  %v6996_v56 = vrot.slane %v6994_v50, 5 }
 0x3a6   : > { %v7006_v54 = vrot.slane %v7004_v27, 4  ;;  %v6978_v30 = vrot.slane %v6976_v2, 5  ;;  %v8465_v27 = vld [vmem:[%s9171_s9 + $0x78] sm:$0xf]  ;;  %v8462_v2 = vld [vmem:[%s9171_s9 + $0x6c] sm:$0xf] }
 0x3a8   : > { %v8787_v48 = vpop.f32.mrb[0].mxu1 }
 0x3a9   : > { %v7443_v49 = vadd.f32 %v8787_v48, %v7320_v22  ;;  %v7434_v18 = vpop.f32.mrb[1].mxu1  ;;  %v6208_v14 = vpop.permute.xlu1 %6207  ;;  %v6938_v22 = vshll.u32 %v8446_v4, 16  ;;  %v6926_v48 = vrot.slane %v6925_v39, 4  ;;  %v6982_v4 = vrot.slane %v6980_v1, 4  ;;  %v8452_v39 = vld [vmem:[%s9171_s9 + $0x44] sm:$0x1] }
 0x3aa   : > { %v7435_v63 = vadd.f32 %v7434_v18, %v7318_v55  ;;  %v8788_v61 = vpop.f32.mrb[2].mxu1  ;;  %v6688_v26 = vsel %vm2907_vm9, %v6656_v45, %v6208_v14  ;;  %v6950_v55 = vrot.slane %v6949_v34, 4  ;;  %v6936_v18 = vrot.slane %v6935_v9, 4  ;;  %v8455_v34 = vld [vmem:[%s9171_s9 + $0x50] sm:$0x1] }
 0x3ab   : > { %v7570_v28 = vadd.f32 %v12775_v8, %v7443_v49  ;;  %v7446_v40 = vadd.f32 %v8788_v61, %v7321_v29  ;;  %v7437_v20 = vpop.f32.mrb[3].mxu1  ;;  %v6960_v29 = vrot.slane %v6959_v17, 4  ;;  %v6964_v49 = vrot.slane %v6962_v58, 5  ;;  %v8459_v17 = vld [vmem:[%s9171_s9 + $0x60] sm:$0xf] }
 0x3ac   : > { %v7568_v6 = vadd.f32 %v12775_v8, %v7435_v63  ;;  %v7438_v33 = vadd.f32 %v7437_v20, %v7319_v21  ;;  %v6940_v21 = vrot.slane %v6938_v22, 5  ;;  %v6955_v14 = vsel %vm9239_vm5, %v6950_v55, %v6954_v11 }
 0x3ad   : > { %v7571_v41 = vadd.f32 %v12775_v8, %v7446_v40  ;;  %v6288_v12 = vpop.permute.xlu1 %6287  ;;  %v7602_v15 = vmax.f32 %v7570_v28, 0.0  ;;  %v6931_v63 = vsel %vm9239_vm5, %v6926_v48, %v6930_v36  ;;  %v6965_v61 = vsel %vm9239_vm5, %v6960_v29, %v6964_v49 }
 0x3ae   : > { %v7569_v35 = vadd.f32 %v12775_v8, %v7438_v33  ;;  %v7600_v62 = vmax.f32 %v7568_v6, 0.0  ;;  %v6720_v25 = vsel %vm2940_vm10, %v6688_v26, %v6288_v12  ;;  %v7292_v28 = vunpack.c.l.bf16 %v6955_v14  ;;  %v8456_v14 = vld [vmem:[%s9171_s9 + $0x54] sm:$0xf] }
 0x3af   : > { %v7603_v23 = vmax.f32 %v7571_v41, 0.0  ;;  %v6941_v40 = vsel %vm9239_vm5, %v6936_v18, %v6940_v21  ;;  %v7290_v20 = vunpack.c.l.bf16 %v6931_v63  ;;  %v7293_v6 = vunpack.c.l.bf16 %v6965_v61  ;;  %v8460_v21 = vld [vmem:[%s9171_s9 + $0x64] sm:$0xf] }
 0x3b0   : > { %v7601_v31 = vmax.f32 %v7569_v35, 0.0  ;;  %v7291_v33 = vunpack.c.l.bf16 %v6941_v40  ;;  %v7324_v41 = vsel %vm2792_vm6, %v7292_v28, 0.0  ;;  %v7002_v11 = vrot.slane %v7000_v7, 5 }
 0x3b1   : > { %v8616_v38 = vpack.c.bf16 %v7603_v23, %v7602_v15  ;;  %v6384_v10 = vpop.permute.xlu1 %6383  ;;  %v7322_v12 = vsel %vm2792_vm6, %v7290_v20, 0.0  ;;  %v7325_v15 = vsel %vm2792_vm6, %v7293_v6, 0.0  ;;  %v6972_v36 = vrot.slane %v6970_v32, 5 }
 0x3b2   : > { %v8611_v53 = vpack.c.bf16 %v7601_v31, %v7600_v62  ;;  %v6752_v43 = vsel %vm13148_vm13, %v6720_v25, %v6384_v10  ;;  %v7323_v31 = vsel %vm2792_vm6, %v7291_v33, 0.0  ;;  %v6997_v58 = vor.u32 %v6996_v56, %v6993_v51 }
 0x3b3   : > { %8688 = vst [vmem:[%s12786_s15 + $0x8] sm:$0xff] %v8616_v38   ;;  %v6973_v9 = vor.u32 %v6972_v36, %v6969_v46  ;;  %v7007_v22 = vor.u32 %v7006_v54, %v7002_v11  ;;  %v7010_v55 = vshll.u32 %v8455_v34, 16  ;;  %v6983_v48 = vor.u32 %v6982_v4, %v6978_v30  ;;  %v8466_v46 = vld [vmem:[%s9171_s9 + $0x7c] sm:$0xf]  ;;  %v8463_v4 = vld [vmem:[%s9171_s9 + $0x70] sm:$0xf] }
 0x3b4   : > { %8612 = vst [vmem:[%s12786_s15] sm:$0xff] %v8611_v53   ;;  %v6986_v29 = vshll.u32 %v8452_v39, 16  ;;  %v7039_v49 = vshrl.u32 %v8459_v17, 16  ;;  %v7042_v18 = vshll.u32 %v8459_v17, 16  ;;  %v6998_v63 = vrot.slane %v6997_v58, 4 }
 0x3b5   : > { %v6974_v61 = vrot.slane %v6973_v9, 4  ;;  %v7008_v28 = vrot.slane %v7007_v22, 4  ;;  %v7012_v40 = vrot.slane %v7010_v55, 5  ;;  %v6984_v20 = vrot.slane %v6983_v48, 4 }
 0x3b6   : > { %v6988_v6 = vrot.slane %v6986_v29, 5  ;;  %v7041_v33 = vrot.slane %v7039_v49, 4  ;;  %v7034_v32 = vshll.u32 %v8458_v60, 16  ;;  %v7090_v34 = vshll.u32 %v8465_v27, 16 }
 0x3b7   : > { %v6464_v5 = vpop.permute.xlu1 %6463  ;;  %v7063_v9 = vshrl.u32 %v8462_v2, 16  ;;  %v7066_v22 = vshll.u32 %v8462_v2, 16  ;;  %v7096_v49 = vshll.u32 %v8466_v46, 16 }
 0x3b8   : > { %v6784_v52 = vsel %vm13149_vm3, %v6752_v43, %v6464_v5  ;;  %v7036_v29 = vrot.slane %v7034_v32, 5 }
 0x3bb   : > { %v6544_v44 = vpop.permute.xlu1 %6543 }
 0x3bc   : > { %v6816_v16 = vsel %vm3039_vm14, %v6784_v52, %v6544_v44 }
 0x3bd   : > { %8814 = vmatmul.mubr.msk.bf16.gmra.mrb[28].mxu1 %vm3099_vm15, %v6816_v16 }
 0x3d7   : > { %v8791_v35 = vpop.f32.mrb[4].mxu1 }
 0x3d8   : > { %v7459_v23 = vadd.f32 %v8791_v35, %v7324_v41  ;;  %v7450_v62 = vpop.f32.mrb[5].mxu1  ;;  %v7044_v41 = vrot.slane %v7042_v18, 5  ;;  %v7048_v35 = vshll.u32 %v8460_v21, 16  ;;  %v7100_v18 = vshrl.u32 %v8466_v46, 16 }
 0x3d9   : > { %v7451_v38 = vadd.f32 %v7450_v62, %v7322_v12  ;;  %v8792_v10 = vpop.f32.mrb[6].mxu1  ;;  %v8457_v12 = vld [vmem:[%s9171_s9 + $0x58] sm:$0xf]  ;;  %v7018_v62 = vshll.u32 %v8456_v14, 16 }
 0x3da   : > { %v7574_v53 = vadd.f32 %v12775_v8, %v7459_v23  ;;  %v7462_v42 = vadd.f32 %v8792_v10, %v7325_v15  ;;  %v7453_v47 = vpop.f32.mrb[7].mxu1  ;;  %v7052_v15 = vshrl.u32 %v8460_v21, 16  ;;  %v7015_v23 = vshrl.u32 %v8456_v14, 16 }
 0x3db   : > { %v7572_v45 = vadd.f32 %v12775_v8, %v7451_v38  ;;  %v7454_v5 = vadd.f32 %v7453_v47, %v7323_v31  ;;  %v7003_v31 = vsel %vm9239_vm5, %v6998_v63, %v7002_v11  ;;  %v7013_v38 = vsel %vm9239_vm5, %v7008_v28, %v7012_v40 }
 0x3dc   : > { %v7575_v26 = vadd.f32 %v12775_v8, %v7462_v42  ;;  %v7606_v43 = vmax.f32 %v7574_v53, 0.0  ;;  %v7024_v10 = vshll.u32 %v8457_v12, 16  ;;  %v7028_v53 = vshrl.u32 %v8457_v12, 16 }
 0x3dd   : > { %v7573_v25 = vadd.f32 %v12775_v8, %v7454_v5  ;;  %v7604_v44 = vmax.f32 %v7572_v45, 0.0  ;;  %v6979_v42 = vsel %vm9239_vm5, %v6974_v61, %v6978_v30  ;;  %v6989_v47 = vsel %vm9239_vm5, %v6984_v20, %v6988_v6 }
 0x3de   : > { %v7607_v52 = vmax.f32 %v7575_v26, 0.0  ;;  %v7045_v45 = vor.u32 %v7044_v41, %v7041_v33  ;;  %v7050_v5 = vrot.slane %v7048_v35, 5  ;;  %v7017_v26 = vrot.slane %v7015_v23, 4 }
 0x3df   : > { %v7605_v13 = vmax.f32 %v7573_v25, 0.0  ;;  %v7020_v25 = vrot.slane %v7018_v62, 5  ;;  %v12846_v0 = vrot.slane %v7024_v10, 5  ;;  %v7030_v3 = vrot.slane %v7028_v53, 4 }
 0x3e0   : > { %v8626_v16 = vpack.c.bf16 %v7607_v52, %v7606_v43  ;;  %v8461_v43 = vld [vmem:[%s9171_s9 + $0x68] sm:$0x1]  ;;  %v7054_v52 = vrot.slane %v7052_v15, 4  ;;  %v7046_v24 = vrot.slane %v7045_v45, 4  ;;  %v7087_v30 = vshrl.u32 %v8465_v27, 16 }
 0x3e1   : > { %v8621_v59 = vpack.c.bf16 %v7605_v13, %v7604_v44  ;;  %v7296_v44 = vunpack.c.l.bf16 %v7003_v31  ;;  %v7297_v13 = vunpack.c.l.bf16 %v7013_v38  ;;  %v7058_v57 = vshll.u32 %v8461_v43, 16  ;;  %v8467_v45 = vld [vmem:[%s9171_s9 + $0x80] sm:$0x1] }
 0x3e2   : > { %8690 = vst [vmem:[%s12786_s15 + $0x18] sm:$0xff] %v8626_v16   ;;  %v7294_v16 = vunpack.c.l.bf16 %v6979_v42  ;;  %v7021_v50 = vor.u32 %v7020_v25, %v7017_v26  ;;  %v7055_v7 = vor.u32 %v7054_v52, %v7050_v5  ;;  %v7031_v11 = vor.u32 %v7030_v3, %v12846_v0 }
 0x3e3   : > { %8689 = vst [vmem:[%s12786_s15 + $0x10] sm:$0xff] %v8621_v59   ;;  %v7295_v59 = vunpack.c.l.bf16 %v6989_v47  ;;  %v7328_v37 = vsel %vm2792_vm6, %v7296_v44, 0.0  ;;  %v7329_v51 = vsel %vm2792_vm6, %v7297_v13, 0.0  ;;  %v7051_v36 = vsel %vm9239_vm5, %v7046_v24, %v7050_v5  ;;  %v8464_v44 = vld [vmem:[%s9171_s9 + $0x74] sm:$0x1] }
 0x3e4   : > { %v7326_v1 = vsel %vm2792_vm6, %v7294_v16, 0.0  ;;  %v7060_v54 = vrot.slane %v7058_v57, 5  ;;  %v7022_v17 = vrot.slane %v7021_v50, 4  ;;  %v7056_v58 = vrot.slane %v7055_v7, 4 }
 0x3e5   : > { %v7327_v56 = vsel %vm2792_vm6, %v7295_v59, 0.0  ;;  %v7032_v63 = vrot.slane %v7031_v11, 4  ;;  %v7072_v61 = vshll.u32 %v8463_v4, 16  ;;  %v7076_v28 = vshrl.u32 %v8463_v4, 16 }
 0x3e6   : > { %v7089_v33 = vrot.slane %v7087_v30, 4  ;;  %v7092_v41 = vrot.slane %v7090_v34, 5  ;;  %v7065_v15 = vrot.slane %v7063_v9, 4  ;;  %v7068_v23 = vrot.slane %v7066_v22, 5 }
 0x3e7   : > { %v7300_v31 = vunpack.c.l.bf16 %v7051_v36  ;;  %v7098_v38 = vrot.slane %v7096_v49, 5  ;;  %v7102_v10 = vrot.slane %v7100_v18, 4  ;;  %v7027_v42 = vsel %vm9239_vm5, %v7022_v17, %v12846_v0 }
 0x3e8   : > { %v7074_v47 = vrot.slane %v7072_v61, 5  ;;  %v7078_v5 = vrot.slane %v7076_v28, 4  ;;  %v7061_v43 = vsel %vm9239_vm5, %v7056_v58, %v7060_v54  ;;  %v7093_v52 = vor.u32 %v7092_v41, %v7089_v33 }
 0x3e9   : > { %v7037_v59 = vsel %vm9239_vm5, %v7032_v63, %v7036_v29  ;;  %v7069_v60 = vor.u32 %v7068_v23, %v7065_v15  ;;  %v7298_v0 = vunpack.c.l.bf16 %v7027_v42  ;;  %v7103_v24 = vor.u32 %v7102_v10, %v7098_v38 }
 0x3ea   : > { %v7106_v57 = vshll.u32 %v8467_v45, 16  ;;  %v7301_v7 = vunpack.c.l.bf16 %v7061_v43  ;;  %v7079_v27 = vor.u32 %v7078_v5, %v7074_v47  ;;  %v7299_v32 = vunpack.c.l.bf16 %v7037_v59 }
 0x3eb   : > { %v7094_v2 = vrot.slane %v7093_v52, 4  ;;  %v7104_v11 = vrot.slane %v7103_v24, 4 }
 0x3ec   : > { %v7108_v46 = vrot.slane %v7106_v57, 5  ;;  %v7333_v54 = vsel %vm2792_vm6, %v7301_v7, 0.0  ;;  %v7080_v30 = vrot.slane %v7079_v27, 4  ;;  %v7331_v17 = vsel %vm2792_vm6, %v7299_v32, 0.0  ;;  %v8469_v27 = vld [vmem:[%s9171_s9 + $0x88] sm:$0xf] }
 0x3ed   : > { %v7099_v58 = vsel %vm9239_vm5, %v7094_v2, %v7098_v38 }
 0x3ee   : > { %v7109_v18 = vsel %vm9239_vm5, %v7104_v11, %v7108_v46  ;;  %v7304_v63 = vunpack.c.l.bf16 %v7099_v58 }
 0x3f0   : > { %v7336_v23 = vsel %vm2792_vm6, %v7304_v63, 0.0 }
 0x401   : > { %v8795_v39 = vpop.f32.mrb[8].mxu1 }
 0x402   : > { %v7475_v55 = vadd.f32 %v8795_v39, %v7328_v37  ;;  %v7466_v48 = vpop.f32.mrb[9].mxu1  ;;  %v7082_v37 = vshll.u32 %v8464_v44, 16 }
 0x403   : > { %v7467_v21 = vadd.f32 %v7466_v48, %v7326_v1  ;;  %v8796_v14 = vpop.f32.mrb[10].mxu1  ;;  %v7332_v1 = vsel %vm2792_vm6, %v7300_v31, 0.0 }
 0x404   : > { %v7578_v40 = vadd.f32 %v12775_v8, %v7475_v55  ;;  %v7478_v20 = vadd.f32 %v8796_v14, %v7329_v51  ;;  %v7469_v6 = vpop.f32.mrb[11].mxu1  ;;  %v7070_v51 = vrot.slane %v7069_v60, 4  ;;  %v7084_v34 = vrot.slane %v7082_v37, 5  ;;  %v8468_v60 = vld [vmem:[%s9171_s9 + $0x84] sm:$0xf] }
 0x405   : > { %v7576_v12 = vadd.f32 %v12775_v8, %v7467_v21  ;;  %v7470_v35 = vadd.f32 %v7469_v6, %v7327_v56  ;;  %v7330_v56 = vsel %vm2792_vm6, %v7298_v0, 0.0  ;;  %v7305_v6 = vunpack.c.l.bf16 %v7109_v18  ;;  %v8472_v0 = vld [vmem:[%s9171_s9 + $0x94] sm:$0xf] }
 0x406   : > { %v7579_v62 = vadd.f32 %v12775_v8, %v7478_v20  ;;  %v7610_v26 = vmax.f32 %v7578_v40, 0.0  ;;  %v7075_v55 = vsel %vm9239_vm5, %v7070_v51, %v7074_v47  ;;  %v7085_v61 = vsel %vm9239_vm5, %v7080_v30, %v7084_v34 }
 0x407   : > { %v7577_v53 = vadd.f32 %v12775_v8, %v7470_v35  ;;  %v7608_v13 = vmax.f32 %v7576_v12, 0.0  ;;  %v7302_v40 = vunpack.c.l.bf16 %v7075_v55  ;;  %v7303_v12 = vunpack.c.l.bf16 %v7085_v61 }
 0x408   : > { %v7611_v25 = vmax.f32 %v7579_v62, 0.0  ;;  %v7111_v2 = vshrl.u32 %v8468_v60, 16  ;;  %v7148_v11 = vshrl.u32 %v8472_v0, 16 }
 0x409   : > { %v7609_v16 = vmax.f32 %v7577_v53, 0.0  ;;  %v7334_v31 = vsel %vm2792_vm6, %v7302_v40, 0.0  ;;  %v7337_v53 = vsel %vm2792_vm6, %v7305_v6, 0.0  ;;  %v7335_v45 = vsel %vm2792_vm6, %v7303_v12, 0.0 }
 0x40a   : > { %v8636_v3 = vpack.c.bf16 %v7611_v25, %v7610_v26  ;;  %v7150_v58 = vrot.slane %v7148_v11, 4 }
 0x40b   : > { %v8631_v50 = vpack.c.bf16 %v7609_v16, %v7608_v13  ;;  %v8471_v16 = vld [vmem:[%s9171_s9 + $0x90] sm:$0xf] }
 0x40c   : > { %8692 = vst [vmem:[%s12786_s15 + $0x28] sm:$0xff] %v8636_v3   ;;  %v7138_v7 = vshll.u32 %v8471_v16, 16 }
 0x40d   : > { %8691 = vst [vmem:[%s12786_s15 + $0x20] sm:$0xff] %v8631_v50   ;;  %v8799_v36 = vpop.f32.mrb[12].mxu1  ;;  %v7135_v50 = vshrl.u32 %v8471_v16, 16 }
 0x40e   : > { %v7491_v4 = vadd.f32 %v8799_v36, %v7332_v1  ;;  %v7482_v39 = vpop.f32.mrb[13].mxu1  ;;  %v7114_v1 = vshll.u32 %v8468_v60, 16  ;;  %v7120_v36 = vshll.u32 %v8469_v27, 16  ;;  %v7140_v34 = vrot.slane %v7138_v7, 5 }
 0x40f   : > { %v7483_v9 = vadd.f32 %v7482_v39, %v7330_v56  ;;  %v8800_v22 = vpop.f32.mrb[14].mxu1  ;;  %v7144_v56 = vshll.u32 %v8472_v0, 16  ;;  %v7137_v30 = vrot.slane %v7135_v50, 4 }
 0x410   : > { %v7582_v48 = vadd.f32 %v12775_v8, %v7491_v4  ;;  %v7494_v29 = vadd.f32 %v8800_v22, %v7333_v54  ;;  %v7485_v49 = vpop.f32.mrb[15].mxu1  ;;  %v7124_v54 = vshrl.u32 %v8469_v27, 16  ;;  %v7113_v4 = vrot.slane %v7111_v2, 4  ;;  %v8473_v22 = vld [vmem:[%s9171_s9 + $0x98] sm:$0x1] }
 0x411   : > { %v7580_v21 = vadd.f32 %v12775_v8, %v7483_v9  ;;  %v7486_v14 = vadd.f32 %v7485_v49, %v7331_v17  ;;  %v7116_v39 = vrot.slane %v7114_v1, 5  ;;  %v7146_v17 = vrot.slane %v7144_v56, 5  ;;  %v8478_v2 = vld [vmem:[%s9171_s9 + $0xac] sm:$0xf]  ;;  %v8475_v56 = vld [vmem:[%s9171_s9 + $0xa0] sm:$0xf] }
 0x412   : > { %v7583_v28 = vadd.f32 %v12775_v8, %v7494_v29  ;;  %v7614_v33 = vmax.f32 %v7582_v48, 0.0  ;;  %v7122_v9 = vrot.slane %v7120_v36, 5  ;;  %v7126_v55 = vrot.slane %v7124_v54, 4  ;;  %v8470_v29 = vld [vmem:[%s9171_s9 + $0x8c] sm:$0x1] }
 0x413   : > { %v7581_v20 = vadd.f32 %v12775_v8, %v7486_v14  ;;  %v7612_v35 = vmax.f32 %v7580_v21, 0.0  ;;  %v7141_v48 = vor.u32 %v7140_v34, %v7137_v30  ;;  %v7117_v49 = vor.u32 %v7116_v39, %v7113_v4 }
 0x414   : > { %v7615_v41 = vmax.f32 %v7583_v28, 0.0  ;;  %v7151_v18 = vor.u32 %v7150_v58, %v7146_v17  ;;  %v7154_v21 = vshll.u32 %v8473_v22, 16  ;;  %v7127_v14 = vor.u32 %v7126_v55, %v7122_v9 }
 0x415   : > { %v7613_v15 = vmax.f32 %v7581_v20, 0.0  ;;  %v7130_v63 = vshll.u32 %v8470_v29, 16  ;;  %v7142_v61 = vrot.slane %v7141_v48, 4  ;;  %v7118_v28 = vrot.slane %v7117_v49, 4  ;;  %v8479_v48 = vld [vmem:[%s9171_s9 + $0xb0] sm:$0x1] }
 0x416   : > { %v8646_v62 = vpack.c.bf16 %v7615_v41, %v7614_v33  ;;  %v7152_v40 = vrot.slane %v7151_v18, 4  ;;  %v7156_v20 = vrot.slane %v7154_v21, 5  ;;  %v7128_v6 = vrot.slane %v7127_v14, 4  ;;  %v8476_v18 = vld [vmem:[%s9171_s9 + $0xa4] sm:$0x1] }
 0x417   : > { %v8641_v38 = vpack.c.bf16 %v7613_v15, %v7612_v35  ;;  %v7132_v33 = vrot.slane %v7130_v63, 5  ;;  %v7147_v41 = vsel %vm9239_vm5, %v7142_v61, %v7146_v17  ;;  %v7123_v12 = vsel %vm9239_vm5, %v7118_v28, %v7122_v9 }
 0x418   : > { %8694 = vst [vmem:[%s12786_s15 + $0x38] sm:$0xff] %v8646_v62   ;;  %v7157_v35 = vsel %vm9239_vm5, %v7152_v40, %v7156_v20  ;;  %v7308_v15 = vunpack.c.l.bf16 %v7147_v41  ;;  %v7306_v62 = vunpack.c.l.bf16 %v7123_v12  ;;  %v7192_v36 = vshll.u32 %v8478_v2, 16 }
 0x419   : > { %v8803_v10 = vpop.f32.mrb[16].mxu1  ;;  %8693 = vst [vmem:[%s12786_s15 + $0x30] sm:$0xff] %v8641_v38   ;;  %v7196_v54 = vshrl.u32 %v8478_v2, 16  ;;  %v7168_v30 = vshll.u32 %v8475_v56, 16  ;;  %v7172_v34 = vshrl.u32 %v8475_v56, 16  ;;  %v7202_v63 = vshll.u32 %v8479_v48, 16 }
 0x41a   : > { %v7507_v42 = vadd.f32 %v8803_v10, %v7336_v23  ;;  %v7498_v47 = vpop.f32.mrb[17].mxu1  ;;  %v7133_v23 = vsel %vm9239_vm5, %v7128_v6, %v7132_v33  ;;  %v7340_v10 = vsel %vm2792_vm6, %v7308_v15, 0.0  ;;  %v7194_v9 = vrot.slane %v7192_v36, 5  ;;  %v8483_v2 = vld [vmem:[%s9171_s9 + $0xc0] sm:$0xf] }
 0x41b   : > { %v7499_v5 = vadd.f32 %v7498_v47, %v7334_v31  ;;  %v8804_v26 = vpop.f32.mrb[18].mxu1  ;;  %v7309_v31 = vunpack.c.l.bf16 %v7157_v35  ;;  %v7307_v38 = vunpack.c.l.bf16 %v7133_v23  ;;  %v7198_v22 = vrot.slane %v7196_v54, 4 }
 0x41c   : > { %v7586_v25 = vadd.f32 %v12775_v8, %v7507_v42  ;;  %v7510_v43 = vadd.f32 %v8804_v26, %v7337_v53  ;;  %v7501_v52 = vpop.f32.mrb[19].mxu1  ;;  %v7338_v53 = vsel %vm2792_vm6, %v7306_v62, 0.0  ;;  %v7170_v55 = vrot.slane %v7168_v30, 5 }
 0x41d   : > { %v7584_v44 = vadd.f32 %v12775_v8, %v7499_v5  ;;  %v7502_v13 = vadd.f32 %v7501_v52, %v7335_v45  ;;  %v7341_v47 = vsel %vm2792_vm6, %v7309_v31, 0.0  ;;  %v7339_v26 = vsel %vm2792_vm6, %v7307_v38, 0.0 }
 0x41e   : > { %v7587_v59 = vadd.f32 %v12775_v8, %v7510_v43  ;;  %v7618_v24 = vmax.f32 %v7586_v25, 0.0  ;;  %v7174_v29 = vrot.slane %v7172_v34, 4  ;;  %v7199_v14 = vor.u32 %v7198_v22, %v7194_v9 }
 0x41f   : > { %v7585_v3 = vadd.f32 %v12775_v8, %v7502_v13  ;;  %v7616_v37 = vmax.f32 %v7584_v44, 0.0  ;;  %v7178_v28 = vshll.u32 %v8476_v18, 16  ;;  %v7204_v33 = vrot.slane %v7202_v63, 5 }
 0x420   : > { %v7619_v57 = vmax.f32 %v7587_v59, 0.0  ;;  %v7175_v61 = vor.u32 %v7174_v29, %v7170_v55  ;;  %v7200_v6 = vrot.slane %v7199_v14, 4  ;;  %v7231_v56 = vshrl.u32 %v8483_v2, 16  ;;  %v8482_v14 = vld [vmem:[%s9171_s9 + $0xbc] sm:$0x1] }
 0x421   : > { %v7617_v32 = vmax.f32 %v7585_v3, 0.0  ;;  %v7180_v12 = vrot.slane %v7178_v28, 5 }
 0x422   : > { %v8656_v51 = vpack.c.bf16 %v7619_v57, %v7618_v24  ;;  %v7176_v41 = vrot.slane %v7175_v61, 4  ;;  %v7205_v23 = vsel %vm9239_vm5, %v7200_v6, %v7204_v33 }
 0x423   : > { %v8651_v46 = vpack.c.bf16 %v7617_v32, %v7616_v37  ;;  %v8477_v37 = vld [vmem:[%s9171_s9 + $0xa8] sm:$0xf]  ;;  %v8474_v32 = vld [vmem:[%s9171_s9 + $0x9c] sm:$0xf] }
 0x424   : > { %8696 = vst [vmem:[%s12786_s15 + $0x48] sm:$0xff] %v8656_v51   ;;  %v7183_v1 = vshrl.u32 %v8477_v37, 16  ;;  %v7186_v51 = vshll.u32 %v8477_v37, 16  ;;  %v7159_v11 = vshrl.u32 %v8474_v32, 16  ;;  %v7181_v31 = vsel %vm9239_vm5, %v7176_v41, %v7180_v12 }
 0x425   : > { %8695 = vst [vmem:[%s12786_s15 + $0x40] sm:$0xff] %v8651_v46   ;;  %v7162_v46 = vshll.u32 %v8474_v32, 16 }
 0x426   : > { %v7185_v4 = vrot.slane %v7183_v1, 4  ;;  %v7188_v39 = vrot.slane %v7186_v51, 5  ;;  %v7161_v17 = vrot.slane %v7159_v11, 4  ;;  %v8480_v1 = vld [vmem:[%s9171_s9 + $0xb4] sm:$0xf]  ;;  %v7234_v11 = vshll.u32 %v8483_v2, 16 }
 0x427   : > { %v7164_v58 = vrot.slane %v7162_v46, 5  ;;  %v8484_v51 = vld [vmem:[%s9171_s9 + $0xc4] sm:$0xf]  ;;  %v8481_v46 = vld [vmem:[%s9171_s9 + $0xb8] sm:$0xf]  ;;  %v7207_v36 = vshrl.u32 %v8480_v1, 16 }
 0x428   : > { %v7189_v49 = vor.u32 %v7188_v39, %v7185_v4  ;;  %v7210_v54 = vshll.u32 %v8480_v1, 16  ;;  %v7240_v30 = vshll.u32 %v8484_v51, 16  ;;  %v7244_v34 = vshrl.u32 %v8484_v51, 16 }
 0x429   : > { %v7165_v21 = vor.u32 %v7164_v58, %v7161_v17  ;;  %v7216_v4 = vshll.u32 %v8481_v46, 16  ;;  %v7220_v39 = vshrl.u32 %v8481_v46, 16  ;;  %v7233_v17 = vrot.slane %v7231_v56, 4 }
 0x42a   : > { %v7190_v40 = vrot.slane %v7189_v49, 4  ;;  %v7236_v58 = vrot.slane %v7234_v11, 5  ;;  %v7212_v22 = vrot.slane %v7210_v54, 5  ;;  %v7246_v48 = vrot.slane %v7244_v34, 4  ;;  %v8485_v49 = vld [vmem:[%s9171_s9 + $0xc8] sm:$0x1] }
 0x42b   : > { %v7166_v20 = vrot.slane %v7165_v21, 4  ;;  %v7218_v29 = vrot.slane %v7216_v4, 5  ;;  %v7222_v18 = vrot.slane %v7220_v39, 4  ;;  %v7250_v28 = vshll.u32 %v8485_v49, 16  ;;  %s8607_s9 = sshll.u32 %s9139_s22, 11  ;;  %s12986_s22 = scalar_lea.sflag [#allocation4], %s215_s12 }
 0x42c   : > { %v7195_v35 = vsel %vm9239_vm5, %v7190_v40, %v7194_v9  ;;  %v7209_v9 = vrot.slane %v7207_v36, 4  ;;  %v7237_v21 = vor.u32 %v7236_v58, %v7233_v17  ;;  %s12978_s17 = scalar_lea.hbm %s13033_s5, %s8607_s9 }
 0x42d   : > { %v7171_v15 = vsel %vm9239_vm5, %v7166_v20, %v7170_v55  ;;  %v7312_v62 = vunpack.c.l.bf16 %v7195_v35  ;;  %v7242_v55 = vrot.slane %v7240_v30, 5  ;;  %v7223_v40 = vor.u32 %v7222_v18, %v7218_v29 }
 0x42e   : > { %v7310_v38 = vunpack.c.l.bf16 %v7171_v15  ;;  %v7213_v63 = vor.u32 %v7212_v22, %v7209_v9  ;;  %v7226_v20 = vshll.u32 %v8482_v14, 16  ;;  %v7238_v6 = vrot.slane %v7237_v21, 4 }
 0x42f   : > { %v7247_v61 = vor.u32 %v7246_v48, %v7242_v55  ;;  %v7252_v12 = vrot.slane %v7250_v28, 5  ;;  %v7224_v35 = vrot.slane %v7223_v40, 4 }
 0x430   : > { %v7214_v33 = vrot.slane %v7213_v63, 4  ;;  %v7228_v15 = vrot.slane %v7226_v20, 5 }
 0x431   : > { %v7248_v41 = vrot.slane %v7247_v61, 4 }
 0x43a   : > { %v8807_v42 = vpop.f32.mrb[20].mxu1 }
 0x43b   : > { %v7523_v45 = vadd.f32 %v8807_v42, %v7340_v10  ;;  %v7514_v5 = vpop.f32.mrb[21].mxu1  ;;  %v7313_v10 = vunpack.c.l.bf16 %v7205_v23  ;;  %v7344_v42 = vsel %vm2792_vm6, %v7312_v62, 0.0  ;;  %v7243_v23 = vsel %vm9239_vm5, %v7238_v6, %v7242_v55 }
 0x43c   : > { %v7515_v25 = vadd.f32 %v7514_v5, %v7338_v53  ;;  %v8808_v43 = vpop.f32.mrb[22].mxu1  ;;  %v7311_v53 = vunpack.c.l.bf16 %v7181_v31  ;;  %v7219_v62 = vsel %vm9239_vm5, %v7214_v33, %v7218_v29  ;;  %v7253_v31 = vsel %vm9239_vm5, %v7248_v41, %v7252_v12 }
 0x43d   : > { %v7590_v52 = vadd.f32 %v12775_v8, %v7523_v45  ;;  %v7526_v44 = vadd.f32 %v8808_v43, %v7341_v47  ;;  %v7517_v13 = vpop.f32.mrb[23].mxu1  ;;  %v7342_v47 = vsel %vm2792_vm6, %v7310_v38, 0.0  ;;  %v7345_v5 = vsel %vm2792_vm6, %v7313_v10, 0.0 }
 0x43e   : > { %v7588_v16 = vadd.f32 %v12775_v8, %v7515_v25  ;;  %v7518_v59 = vadd.f32 %v7517_v13, %v7339_v26  ;;  %v7343_v43 = vsel %vm2792_vm6, %v7311_v53, 0.0  ;;  %v7316_v38 = vunpack.c.l.bf16 %v7243_v23 }
 0x43f   : > { %v7591_v60 = vadd.f32 %v12775_v8, %v7526_v44  ;;  %v7622_v0 = vmax.f32 %v7590_v52, 0.0  ;;  %v7229_v10 = vsel %vm9239_vm5, %v7224_v35, %v7228_v15  ;;  %v7314_v53 = vunpack.c.l.bf16 %v7219_v62 }
 0x440   : > { %v7589_v3 = vadd.f32 %v12775_v8, %v7518_v59  ;;  %v7620_v57 = vmax.f32 %v7588_v16, 0.0 }
 0x441   : > { %v7623_v24 = vmax.f32 %v7591_v60, 0.0 }
 0x442   : > { %v7621_v50 = vmax.f32 %v7589_v3, 0.0 }
 0x443   : > { %v8666_v7 = vpack.c.bf16 %v7623_v24, %v7622_v0 }
 0x444   : > { %v8661_v27 = vpack.c.bf16 %v7621_v50, %v7620_v57 }
 0x445   : > { %8698 = vst [vmem:[%s12786_s15 + $0x58] sm:$0xff] %v8666_v7  }
 0x446   : > { %8697 = vst [vmem:[%s12786_s15 + $0x50] sm:$0xff] %v8661_v27  }
 0x463   : > { %v8811_v45 = vpop.f32.mrb[24].mxu1 }
 0x464   : > { %v7539_v26 = vadd.f32 %v8811_v45, %v7344_v42  ;;  %v7530_v25 = vpop.f32.mrb[25].mxu1  ;;  %v7317_v42 = vunpack.c.l.bf16 %v7253_v31  ;;  %v7348_v45 = vsel %vm2792_vm6, %v7316_v38, 0.0 }
 0x465   : > { %v7531_v52 = vadd.f32 %v7530_v25, %v7342_v47  ;;  %v8812_v44 = vpop.f32.mrb[26].mxu1  ;;  %v7315_v47 = vunpack.c.l.bf16 %v7229_v10 }
 0x466   : > { %v7594_v13 = vadd.f32 %v12775_v8, %v7539_v26  ;;  %v7542_v16 = vadd.f32 %v8812_v44, %v7345_v5  ;;  %v7533_v59 = vpop.f32.mrb[27].mxu1  ;;  %v7346_v5 = vsel %vm2792_vm6, %v7314_v53, 0.0  ;;  %v7349_v25 = vsel %vm2792_vm6, %v7317_v42, 0.0 }
 0x467   : > { %v7592_v60 = vadd.f32 %v12775_v8, %v7531_v52  ;;  %v7534_v3 = vadd.f32 %v7533_v59, %v7343_v43  ;;  %v7347_v44 = vsel %vm2792_vm6, %v7315_v47, 0.0 }
 0x468   : > { %v7595_v0 = vadd.f32 %v12775_v8, %v7542_v16  ;;  %v7626_v57 = vmax.f32 %v7594_v13, 0.0 }
 0x469   : > { %v7593_v24 = vadd.f32 %v12775_v8, %v7534_v3  ;;  %v7624_v7 = vmax.f32 %v7592_v60, 0.0 }
 0x46a   : > { %v7627_v50 = vmax.f32 %v7595_v0, 0.0 }
 0x46b   : > { %v7625_v27 = vmax.f32 %v7593_v24, 0.0 }
 0x46c   : > { %v8676_v37 = vpack.c.bf16 %v7627_v50, %v7626_v57 }
 0x46d   : > { %v8671_v32 = vpack.c.bf16 %v7625_v27, %v7624_v7 }
 0x46e   : > { %8700 = vst [vmem:[%s12786_s15 + $0x68] sm:$0xff] %v8676_v37  }
 0x46f   : > { %8699 = vst [vmem:[%s12786_s15 + $0x60] sm:$0xff] %v8671_v32  }
 0x490   : > { %v8815_v26 = vpop.f32.mrb[28].mxu1 }
 0x491   : > { %v7555_v43 = vadd.f32 %v8815_v26, %v7348_v45  ;;  %v7546_v52 = vpop.f32.mrb[29].mxu1 }
 0x492   : > { %v7547_v13 = vadd.f32 %v7546_v52, %v7346_v5  ;;  %v8816_v16 = vpop.f32.mrb[30].mxu1 }
 0x493   : > { %v7598_v19 = vadd.f32 %v12775_v8, %v7555_v43  ;;  %v7558_v59 = vadd.f32 %v8816_v16, %v7349_v25  ;;  %v7549_v60 = vpop.f32.mrb[31].mxu1 }
 0x494   : > { %v7596_v3 = vadd.f32 %v12775_v8, %v7547_v13  ;;  %v7550_v0 = vadd.f32 %v7549_v60, %v7347_v44 }
 0x495   : > { %v7599_v24 = vadd.f32 %v12775_v8, %v7558_v59  ;;  %v7630_v50 = vmax.f32 %v7598_v19, 0.0 }
 0x496   : > { %v7597_v57 = vadd.f32 %v12775_v8, %v7550_v0  ;;  %v7628_v27 = vmax.f32 %v7596_v3, 0.0 }
 0x497   : > { %v7631_v7 = vmax.f32 %v7599_v24, 0.0 }
 0x498   : > { %v7629_v37 = vmax.f32 %v7597_v57, 0.0 }
 0x499   : > { %v8686_v32 = vpack.c.bf16 %v7631_v7, %v7630_v50 }
 0x49a   : > { %v8681_v2 = vpack.c.bf16 %v7629_v37, %v7628_v27 }
 0x49b   : > { %8702 = vst [vmem:[%s12786_s15 + $0x78] sm:$0xff] %v8686_v32  }
 0x49c   : > { %8701 = vst [vmem:[%s12786_s15 + $0x70] sm:$0xff] %v8681_v2  }
 0x49d   : > { %9026 = shalt.err (!%p9023_p3)
}
 0x49e   : > { %s9027_s7 = scalar_lea.hbm %s12978_s17, 2048  ;;  %s9031_s12 = scalar_lea.hbm %s13033_s5, 4096 }
 0x49f   : > { %p9028_p4 = scmp.ne.s32.totalorder %s12978_s17, %s9027_s7  ;;  %p9032_p9 = scmp.lt.u32.totalorder %s12978_s17, %s13033_s5 }
 0x4a0   : > { %p9033_p10 = scmp.lt.u32.totalorder %s9031_s12, %s9027_s7  ;;  %p9035_p12 = scmp.lt.u32.totalorder %s9027_s7, %s12978_s17 }
 0x4a1   : > { %p9029_p7 = pnand %p9028_p4, %p9156_p5 }
 0x4a2   : > { %p9034_p11 = por %p9033_p10, %p9032_p9 }
 0x4a3   : > { %p9030_p8 = pneg %p9029_p7 }
 0x4a4   : > { %p9036_p13 = por %p9035_p12, %p9034_p11 }
 0x4a6   : > { %p9037_p0 = pnand %p9036_p13, %p9030_p8 }
 0x4a8   : > { %9040 = shalt.err (!%p9037_p0)
}
 0x4a9   : > { %s9087_s9 = smov 64  }
 0x4aa   : > { %8820 = dma.vmem_to_hbm [thread:$0]  (%p9156_p5), %s12980_s16, 2048, %s12978_s17, %s12986_s22, %s9087_s9, %s9087_s9, %s9080_s13  }
 0x4ab PF: > { %p8826_p1 = scmp.ge.s32.totalorder %s9075_s21, 2  ;;  %s7821_s25 = sand.u32 1, %s9063_s18  }
 0x4ac   : > { %s7822_s8 = scalar_lea.sflag [#allocation4], %s7821_s25 }
 0x4ad   : > { %p8823_p2 = pnand %p8826_p1, %p9160_p6 }
 0x4af   : > { %9058 = dma.done.wait (!%p8823_p2), %s7822_s8, 2048  }
 0x4b0   : > { %9060 = vsyncadd (!%p8823_p2), %s7822_s8, 4294965248  ;;  %p15_p3 = scmp.ge.s32.totalorder %s9143_s24, 4   ;;  %s13150_s18 = smov %s9067_s19 }
 0x4b1   : > { %s13151_s19 = smov %s9071_s20  ;;  %s13152_s20 = smov %s9154_s27 }
 0x4b2   : > { %s13153_s21 = smov %s9143_s24  ;;  %17 = sbr.rel (!%p15_p3) target bundleno = 3 (0x3), region = 80 }
 0x4b9   :  { %7827 = vsyncpa [#allocation4], 1 }
 0x4ba   :  { %7829 = vsyncpa [#allocation4 + $0x1], 1 }

</bundles_post_ra>
